<compile_context>
chip_gen: v7x
topology: tpu7x:2x2x1
jax: 0.10.0
libtpu: 0.0.40
codegen_flags: <defaults>
</compile_context>

<pallas_src>
import jax
import jax.numpy as jnp
from jax.experimental import pallas as pl
from jax.experimental.pallas import tpu as pltpu


def _round_up(x, m):
    return ((x + m - 1) // m) * m


# ----------------------------------------------------------------------------
# Backbone conv (3x3 / stride 4 / pad 1, 3 -> 2048) as a single-K-block matmul.
# K = 27 padded only to 32; grid is (N/tn,) = (2,) "parallel" tiles.
# ----------------------------------------------------------------------------
def _backbone_matmul_kernel(a_ref, w_ref, b_ref, o_ref):
    out = jnp.dot(a_ref[...], w_ref[...], preferred_element_type=jnp.float32)
    out = jnp.maximum(out + b_ref[...], 0.0)
    o_ref[...] = out.astype(o_ref.dtype)


def backbone_matmul(a, w, b, *, tn=1024):
    """a:(M,Kp) bf16, w:(Kp,N) bf16, b:(1,N) f32 -> (M,N) bf16 (ReLU applied)."""
    M, Kp = a.shape
    N = w.shape[1]
    grid = (N // tn,)
    return pl.pallas_call(
        _backbone_matmul_kernel,
        out_shape=jax.ShapeDtypeStruct((M, N), jnp.bfloat16),
        grid_spec=pltpu.PrefetchScalarGridSpec(
            num_scalar_prefetch=0,
            grid=grid,
            in_specs=[
                pl.BlockSpec((M, Kp), lambda j: (0, 0)),   # whole A, resident
                pl.BlockSpec((Kp, tn), lambda j: (0, j)),
                pl.BlockSpec((1, tn), lambda j: (0, j)),
            ],
            out_specs=pl.BlockSpec((M, tn), lambda j: (0, j)),
        ),
        compiler_params=pltpu.CompilerParams(
            dimension_semantics=("parallel",)),
    )(a, w, b)


# ----------------------------------------------------------------------------
# Fused RPN kernel: implicit-im2col 3x3 conv (2048 -> 256, pad 1, stride 1)
# with the 1x1 cls/bbox heads (256 -> 6, padded to 128) fused as an epilogue.
#
# Grid = (nj=2 output-channel halves [parallel], nk cin chunks [arbitrary]).
# The padded feature map is VMEM-resident per cin chunk; the 9 taps are a
# static Python loop (static slices only -> no dynamic sublane indexing).
# The kernel emits per-half partial head activations; they are summed outside.
# ----------------------------------------------------------------------------
def _rpn_fused_kernel(xp_ref, w_ref, b_ref, wh_ref, hp_ref, acc_ref):
    k = pl.program_id(1)

    @pl.when(k == 0)
    def _init():
        acc_ref[...] = jnp.zeros_like(acc_ref)

    nb, hpad, wpad, _ = xp_ref.shape
    ho, wo = hpad - 2, wpad - 2
    rows = nb * ho * wo

    acc = acc_ref[...]
    for t in range(9):                      # static unroll: 3x3 taps
        ih, iw = divmod(t, 3)
        a = xp_ref[:, ih:ih + ho, iw:iw + wo, :]        # (nb, ho, wo, tkc) bf16
        a = a.reshape(rows, a.shape[-1])                # (rows, tkc)
        acc = acc + jnp.dot(a, w_ref[t], preferred_element_type=jnp.float32)
    acc_ref[...] = acc

    # Fused 1x1 heads epilogue.  Computed every k step (few MFLOP, negligible);
    # only the last step's value — using the fully-accumulated conv output —
    # survives to the HBM writeback.  No ReLU between conv and heads (matches
    # the reference RPN module).
    rpn_half = acc + b_ref[...]
    hp_ref[0] = jnp.dot(rpn_half.astype(jnp.bfloat16), wh_ref[0],
                        preferred_element_type=jnp.float32)


def rpn_fused(xp, w9, b_conv, wh_split, *, tkc=512):
    """xp:(N,H+2,W+2,Cin) bf16, w9:(9,Cin,Cout) bf16, b_conv:(1,Cout) f32,
    wh_split:(2,Cout//2,128) bf16 -> (2, N*H*W, 128) f32 partial head acts."""
    N, Hp, Wp, Cin = xp.shape
    Cout = w9.shape[2]
    nj = 2
    tn = Cout // nj                 # 128
    nk = Cin // tkc                 # 4  (effective K per step = 9*512 = 4608)
    M = N * (Hp - 2) * (Wp - 2)     # 128

    return pl.pallas_call(
        _rpn_fused_kernel,
        out_shape=jax.ShapeDtypeStruct((nj, M, 128), jnp.float32),
        grid_spec=pltpu.PrefetchScalarGridSpec(
            num_scalar_prefetch=0,
            grid=(nj, nk),
            in_specs=[
                pl.BlockSpec((N, Hp, Wp, tkc), lambda j, k: (0, 0, 0, k)),
                pl.BlockSpec((9, tkc, tn), lambda j, k: (0, k, j)),
                pl.BlockSpec((1, tn), lambda j, k: (0, j)),
                pl.BlockSpec((1, tn, 128), lambda j, k: (j, 0, 0)),
            ],
            out_specs=pl.BlockSpec((1, M, 128), lambda j, k: (j, 0, 0)),
            scratch_shapes=[pltpu.VMEM((M, tn), jnp.float32)],
        ),
        compiler_params=pltpu.CompilerParams(
            dimension_semantics=("parallel", "arbitrary")),
    )(xp, w9, b_conv, wh_split)


# ----------------------------------------------------------------------------
# Fused detection head: Linear(256,256) -> ReLU -> Linear(256,C). One launch,
# whole-array VMEM refs (problem is tiny: M <= 8).
# ----------------------------------------------------------------------------
def _head_kernel(x_ref, w1_ref, b1_ref, w2_ref, b2_ref, o_ref):
    h = jnp.dot(x_ref[...], w1_ref[...], preferred_element_type=jnp.float32)
    h = jnp.maximum(h + b1_ref[...], 0.0)
    out = jnp.dot(h.astype(w2_ref.dtype), w2_ref[...],
                  preferred_element_type=jnp.float32)
    o_ref[...] = out + b2_ref[...]


def pallas_detection_head(x, w1, b1, w2p, b2p, num_classes):
    """x:(M,256) bf16, w1:(256,256) bf16, b1:(1,256) f32,
    w2p:(256,Cp) bf16 (padded), b2p:(1,Cp) f32 -> (M,num_classes) f32."""
    M = x.shape[0]
    Mp = _round_up(M, 8)
    x_p = jnp.pad(x, ((0, Mp - M), (0, 0)))
    out = pl.pallas_call(
        _head_kernel,
        out_shape=jax.ShapeDtypeStruct((Mp, w2p.shape[1]), jnp.float32),
    )(x_p, w1, b1, w2p, b2p)
    return out[:M, :num_classes]


# ----------------------------------------------------------------------------
# Tiny im2col (XLA glue) — only used for the backbone conv where the patch
# matrix is (128, 27) ~ 7 KiB, i.e. negligible.
# ----------------------------------------------------------------------------
def _im2col(x, kh, kw, stride, pad):
    N, H, W, C = x.shape
    xpad = jnp.pad(x, ((0, 0), (pad, pad), (pad, pad), (0, 0)))
    Ho = (H + 2 * pad - kh) // stride + 1
    Wo = (W + 2 * pad - kw) // stride + 1
    cols = []
    for i in range(kh):
        for j in range(kw):
            cols.append(
                xpad[:, i:i + stride * Ho:stride, j:j + stride * Wo:stride, :])
    patches = jnp.concatenate(cols, axis=-1)            # (N, Ho, Wo, kh*kw*C)
    return patches.reshape(N * Ho * Wo, kh * kw * C), Ho, Wo


# ----------------------------------------------------------------------------
# Parameter init (deterministic, synthetic) + one-time matmul-ready prep.
# ----------------------------------------------------------------------------
def init_params(key, num_classes=21):
    ks = jax.random.split(key, 12)

    def w(k, shape, scale):
        return jax.random.normal(k, shape, jnp.float32) * scale

    return {
        # backbone stand-in conv: 3 -> 2048, 3x3 stride 4  (OIHW, PyTorch)
        "backbone_w": w(ks[0], (2048, 3, 3, 3), 0.1),
        "backbone_b": w(ks[1], (2048,), 0.01),
        # RPN
        "rpn_conv_w": w(ks[2], (256, 2048, 3, 3), 0.01),
        "rpn_conv_b": w(ks[3], (256,), 0.01),
        "rpn_cls_w": w(ks[4], (2, 256, 1, 1), 0.05),
        "rpn_cls_b": w(ks[5], (2,), 0.01),
        "rpn_bbox_w": w(ks[6], (4, 256, 1, 1), 0.05),
        "rpn_bbox_b": w(ks[7], (4,), 0.01),
        # Head: Linear(256,256) -> ReLU -> Linear(256,num_classes)
        "fc1_w": w(ks[8], (256, 256), 0.05),
        "fc1_b": w(ks[9], (256,), 0.01),
        "fc2_w": w(ks[10], (num_classes, 256), 0.05),
        "fc2_b": w(ks[11], (num_classes,), 0.01),
    }


def prepare_params(raw, num_classes=21):
    """Cache weights in matmul-ready bf16 layouts (done once, outside jit)."""
    p = {}
    # Backbone: OIHW (2048,3,3,3) -> (kh*kw*Cin, Cout) = (27, 2048), K pad -> 32.
    bw = jnp.transpose(raw["backbone_w"], (2, 3, 1, 0)).reshape(27, 2048)
    p["backbone_w"] = jnp.pad(bw, ((0, 32 - 27), (0, 0))).astype(jnp.bfloat16)
    p["backbone_b"] = raw["backbone_b"].reshape(1, 2048).astype(jnp.float32)

    # RPN conv: OIHW (256,2048,3,3) -> (tap, Cin, Cout) = (9, 2048, 256).
    rw = jnp.transpose(raw["rpn_conv_w"], (2, 3, 1, 0)).reshape(9, 2048, 256)
    p["rpn_conv_w"] = rw.astype(jnp.bfloat16)
    p["rpn_conv_b"] = raw["rpn_conv_b"].reshape(1, 256).astype(jnp.float32)

    # Fused 1x1 heads [cls(2) | bbox(4)]: (256, 6) padded to (256, 128), then
    # split into the two 128-row halves matching the conv's output-channel tiles.
    wh = jnp.concatenate([raw["rpn_cls_w"], raw["rpn_bbox_w"]], axis=0)  # (6,256,1,1)
    wh = jnp.transpose(wh.reshape(6, 256), (1, 0))                       # (256, 6)
    wh = jnp.pad(wh, ((0, 0), (0, 128 - 6)))
    p["rpn_heads_w"] = wh.reshape(2, 128, 128).astype(jnp.bfloat16)
    p["rpn_heads_b"] = jnp.concatenate(
        [raw["rpn_cls_b"], raw["rpn_bbox_b"]]).astype(jnp.float32)       # (6,)

    # Detection head.
    p["fc1_w"] = raw["fc1_w"].T.astype(jnp.bfloat16)                     # (256,256)
    p["fc1_b"] = raw["fc1_b"].reshape(1, 256).astype(jnp.float32)
    Cp = _round_up(num_classes, 128)
    p["fc2_w"] = jnp.pad(raw["fc2_w"].T,
                         ((0, 0), (0, Cp - num_classes))).astype(jnp.bfloat16)
    p["fc2_b"] = jnp.pad(raw["fc2_b"].reshape(1, num_classes),
                         ((0, 0), (0, Cp - num_classes))).astype(jnp.float32)
    return p


# ----------------------------------------------------------------------------
# Forward pass (matches ObjectDetectionModel.forward structure).
# ----------------------------------------------------------------------------
def object_detection_forward(params, x_nchw, num_classes=21):
    # NCHW (PyTorch) -> NHWC (kernel layout); bf16 MXU operands downstream.
    x = jnp.transpose(x_nchw, (0, 2, 3, 1)).astype(jnp.bfloat16)
    N = x.shape[0]

    # --- CNNBackbone ---
    # TODO(synk): pretrained ResNet-50 backbone cannot be reproduced in-script;
    # stand-in is a deterministic single 3x3 stride-4 conv (+ReLU) producing the
    # 2048-channel feature-map interface expected by the RPN.
    patches, Ho, Wo = _im2col(x, 3, 3, 4, 1)              # (N*8*8, 27)
    patches = jnp.pad(patches, ((0, 0), (0, 32 - 27)))    # K 27 -> 32 only
    feats_flat = backbone_matmul(patches, params["backbone_w"],
                                 params["backbone_b"])    # (N*64, 2048) bf16
    feats = feats_flat.reshape(N, Ho, Wo, 2048)

    # --- RPN (fused 3x3 conv + 1x1 cls/bbox heads, implicit im2col) ---
    xp = jnp.pad(feats, ((0, 0), (1, 1), (1, 1), (0, 0)))  # (N,10,10,2048) bf16
    hp = rpn_fused(xp, params["rpn_conv_w"], params["rpn_conv_b"],
                   params["rpn_heads_w"])                  # (2, N*64, 128) f32
    heads = (hp[0] + hp[1])[:, :6] + params["rpn_heads_b"][None, :]
    heads = heads.reshape(N, Ho, Wo, 6)
    rpn_cls = heads[..., :2]
    rpn_bbox = heads[..., 2:6]

    # --- ObjectDetectionHead ---
    # TODO(synk): the source head applies Linear(256,.) to a 2048*H'*W' flatten
    # (shape bug in the original module); we feed the first 256 flattened NCHW
    # features (= channels 0..3), sliced BEFORE the transpose so only ~2 KiB
    # is moved instead of the whole feature map.
    h_in = jnp.transpose(feats[..., :4], (0, 3, 1, 2)).reshape(N, 4 * Ho * Wo)
    det = pallas_detection_head(h_in, params["fc1_w"], params["fc1_b"],
                                params["fc2_w"], params["fc2_b"], num_classes)

    # Back to PyTorch NCHW for the RPN maps.
    return (
        jnp.transpose(rpn_cls, (0, 3, 1, 2)),
        jnp.transpose(rpn_bbox, (0, 3, 1, 2)),
        det,
    )


if __name__ == "__main__":
    key = jax.random.PRNGKey(0)
    pkey, xkey = jax.random.split(key)

    num_classes = 21
    raw_params = init_params(pkey, num_classes)
    params = prepare_params(raw_params, num_classes)       # one-time prep
    x = jax.random.normal(xkey, (2, 3, 32, 32), jnp.float32)  # NCHW like PyTorch

    fwd = jax.jit(object_detection_forward)
    rpn_cls, rpn_bbox, det = fwd(params, x)
    jax.block_until_ready((rpn_cls, rpn_bbox, det))

    assert rpn_cls.shape == (2, 2, 8, 8), rpn_cls.shape
    assert rpn_bbox.shape == (2, 4, 8, 8), rpn_bbox.shape
    assert det.shape == (2, 21), det.shape
    assert bool(jnp.all(jnp.isfinite(rpn_cls)))
    assert bool(jnp.all(jnp.isfinite(rpn_bbox)))
    assert bool(jnp.all(jnp.isfinite(det)))

    print("KERNEL_OK")
</pallas_src>

<mosaic_0001>
module attributes {stable_mosaic.version = 11 : i64} {
  func.func @_backbone_matmul_kernel(%arg0: i32, %arg1: memref<128x32xbf16, #tpu.memory_space<vmem>>, %arg2: memref<32x1024xbf16, #tpu.memory_space<vmem>>, %arg3: memref<1x1024xf32, #tpu.memory_space<vmem>>, %arg4: memref<128x1024xbf16, #tpu.memory_space<vmem>>) attributes {dimension_semantics = [#tpu.dimension_semantics<parallel>], iteration_bounds = array<i64: 2>, scalar_prefetch = 0 : i64, scratch_operands = 0 : i64, tpu.core_type = #tpu.core_type<tc>, window_params = [{pipeline_mode = #tpu.pipeline_mode<synchronous>, transform_indices = @transform_0, window_bounds = array<i64: 128, 32>}, {transform_indices = @transform_1, window_bounds = array<i64: 32, 1024>}, {transform_indices = @transform_2, window_bounds = array<i64: 1, 1024>}, {transform_indices = @transform_3, window_bounds = array<i64: 128, 1024>}]} {
    %c0 = arith.constant 0 : index
    %c0_0 = arith.constant 0 : index
    %0 = vector.load %arg1[%c0, %c0_0] : memref<128x32xbf16, #tpu.memory_space<vmem>>, vector<128x32xbf16>
    %c0_1 = arith.constant 0 : index
    %c0_2 = arith.constant 0 : index
    %1 = vector.load %arg2[%c0_1, %c0_2] : memref<32x1024xbf16, #tpu.memory_space<vmem>>, vector<32x1024xbf16>
    %cst = arith.constant dense<0.000000e+00> : vector<128x1024xf32>
    %2 = tpu.matmul %0, %1, %cst {dimension_numbers = #tpu.dot_dimension_numbers<[1], [0], [0], [1], [0, 0, 1, 1], [], []>} : vector<128x32xbf16>, vector<32x1024xbf16>, vector<128x1024xf32> -> vector<128x1024xf32>
    %c0_3 = arith.constant 0 : index
    %c0_4 = arith.constant 0 : index
    %3 = vector.load %arg3[%c0_3, %c0_4] : memref<1x1024xf32, #tpu.memory_space<vmem>>, vector<1x1024xf32>
    %4 = vector.broadcast %3 : vector<1x1024xf32> to vector<128x1024xf32>
    %5 = arith.addf %2, %4 : vector<128x1024xf32>
    %cst_5 = arith.constant 0.000000e+00 : f32
    %6 = vector.broadcast %cst_5 : f32 to vector<128x1024xf32>
    %7 = arith.maximumf %5, %6 : vector<128x1024xf32>
    %8 = arith.truncf %7 : vector<128x1024xf32> to vector<128x1024xbf16>
    %c0_6 = arith.constant 0 : index
    %c0_7 = arith.constant 0 : index
    %9 = vector.load %arg4[%c0_6, %c0_7] : memref<128x1024xbf16, #tpu.memory_space<vmem>>, vector<128x1024xbf16>
    tpu.vector_store %arg4[%c0_6, %c0_7], %8 {strides = array<i32>} : memref<128x1024xbf16, #tpu.memory_space<vmem>>, vector<128x1024xbf16>,
    return
  }
  func.func @transform_0(%arg0: i32) -> (i32, i32) {
    %c0_i32 = arith.constant 0 : i32
    %c0_i32_0 = arith.constant 0 : i32
    %c0_i32_1 = arith.constant 0 : i32
    return %c0_i32, %c0_i32_0 : i32, i32
  }
  func.func @transform_1(%arg0: i32) -> (i32, i32) {
    %c0_i32 = arith.constant 0 : i32
    %c0_i32_0 = arith.constant 0 : i32
    return %c0_i32, %arg0 : i32, i32
  }
  func.func @transform_2(%arg0: i32) -> (i32, i32) {
    %c0_i32 = arith.constant 0 : i32
    %c0_i32_0 = arith.constant 0 : i32
    return %c0_i32, %arg0 : i32, i32
  }
  func.func @transform_3(%arg0: i32) -> (i32, i32) {
    %c0_i32 = arith.constant 0 : i32
    %c0_i32_0 = arith.constant 0 : i32
    return %c0_i32, %arg0 : i32, i32
  }
}

module attributes {stable_mosaic.version = 11 : i64} {
  func.func @_head_kernel(%arg0: memref<8x256xbf16, #tpu.memory_space<vmem>>, %arg1: memref<256x256xbf16, #tpu.memory_space<vmem>>, %arg2: memref<1x256xf32, #tpu.memory_space<vmem>>, %arg3: memref<256x128xbf16, #tpu.memory_space<vmem>>, %arg4: memref<1x128xf32, #tpu.memory_space<vmem>>, %arg5: memref<8x128xf32, #tpu.memory_space<vmem>>) attributes {dimension_semantics = [], scalar_prefetch = 0 : i64, scratch_operands = 0 : i64, tpu.core_type = #tpu.core_type<tc>} {
    %c0 = arith.constant 0 : index
    %c0_0 = arith.constant 0 : index
    %0 = vector.load %arg0[%c0, %c0_0] : memref<8x256xbf16, #tpu.memory_space<vmem>>, vector<8x256xbf16>
    %c0_1 = arith.constant 0 : index
    %c0_2 = arith.constant 0 : index
    %1 = vector.load %arg1[%c0_1, %c0_2] : memref<256x256xbf16, #tpu.memory_space<vmem>>, vector<256x256xbf16>
    %cst = arith.constant dense<0.000000e+00> : vector<8x256xf32>
    %2 = tpu.matmul %0, %1, %cst {dimension_numbers = #tpu.dot_dimension_numbers<[1], [0], [0], [1], [0, 0, 1, 1], [], []>} : vector<8x256xbf16>, vector<256x256xbf16>, vector<8x256xf32> -> vector<8x256xf32>
    %c0_3 = arith.constant 0 : index
    %c0_4 = arith.constant 0 : index
    %3 = vector.load %arg2[%c0_3, %c0_4] : memref<1x256xf32, #tpu.memory_space<vmem>>, vector<1x256xf32>
    %4 = vector.broadcast %3 : vector<1x256xf32> to vector<8x256xf32>
    %5 = arith.addf %2, %4 : vector<8x256xf32>
    %cst_5 = arith.constant 0.000000e+00 : f32
    %6 = vector.broadcast %cst_5 : f32 to vector<8x256xf32>
    %7 = arith.maximumf %5, %6 : vector<8x256xf32>
    %8 = arith.truncf %7 : vector<8x256xf32> to vector<8x256xbf16>
    %c0_6 = arith.constant 0 : index
    %c0_7 = arith.constant 0 : index
    %9 = vector.load %arg3[%c0_6, %c0_7] : memref<256x128xbf16, #tpu.memory_space<vmem>>, vector<256x128xbf16>
    %cst_8 = arith.constant dense<0.000000e+00> : vector<8x128xf32>
    %10 = tpu.matmul %8, %9, %cst_8 {dimension_numbers = #tpu.dot_dimension_numbers<[1], [0], [0], [1], [0, 0, 1, 1], [], []>} : vector<8x256xbf16>, vector<256x128xbf16>, vector<8x128xf32> -> vector<8x128xf32>
    %c0_9 = arith.constant 0 : index
    %c0_10 = arith.constant 0 : index
    %11 = vector.load %arg4[%c0_9, %c0_10] : memref<1x128xf32, #tpu.memory_space<vmem>>, vector<1x128xf32>
    %12 = vector.broadcast %11 : vector<1x128xf32> to vector<8x128xf32>
    %13 = arith.addf %10, %12 : vector<8x128xf32>
    %c0_11 = arith.constant 0 : index
    %c0_12 = arith.constant 0 : index
    %14 = vector.load %arg5[%c0_11, %c0_12] : memref<8x128xf32, #tpu.memory_space<vmem>>, vector<8x128xf32>
    tpu.vector_store %arg5[%c0_11, %c0_12], %13 {strides = array<i32>} : memref<8x128xf32, #tpu.memory_space<vmem>>, vector<8x128xf32>,
    return
  }
}

module attributes {stable_mosaic.version = 11 : i64} {
  func.func @_rpn_fused_kernel(%arg0: i32, %arg1: i32, %arg2: memref<2x10x10x512xbf16, #tpu.memory_space<vmem>>, %arg3: memref<9x512x128xbf16, #tpu.memory_space<vmem>>, %arg4: memref<1x128xf32, #tpu.memory_space<vmem>>, %arg5: memref<1x128x128xbf16, #tpu.memory_space<vmem>>, %arg6: memref<1x128x128xf32, #tpu.memory_space<vmem>>, %arg7: memref<128x128xf32, #tpu.memory_space<vmem>>) attributes {dimension_semantics = [#tpu.dimension_semantics<parallel>, #tpu.dimension_semantics<arbitrary>], iteration_bounds = array<i64: 2, 4>, scalar_prefetch = 0 : i64, scratch_operands = 1 : i64, tpu.core_type = #tpu.core_type<tc>, window_params = [{transform_indices = @transform_0, window_bounds = array<i64: 2, 10, 10, 512>}, {transform_indices = @transform_1, window_bounds = array<i64: 9, 512, 128>}, {transform_indices = @transform_2, window_bounds = array<i64: 1, 128>}, {transform_indices = @transform_3, window_bounds = array<i64: 1, 128, 128>}, {transform_indices = @transform_4, window_bounds = array<i64: 1, 128, 128>}]} {
    %c0_i32 = arith.constant 0 : i32
    %0 = arith.cmpi eq, %arg1, %c0_i32 : i32
    %1 = arith.extui %0 : i1 to i32
    %c0_i32_0 = arith.constant 0 : i32
    %2 = arith.cmpi ne, %1, %c0_i32_0 : i32
    scf.if %2 {
      %cst_76 = arith.constant 0.000000e+00 : f32
      %69 = vector.broadcast %cst_76 : f32 to vector<128x128xf32>
      %c0_77 = arith.constant 0 : index
      %c0_78 = arith.constant 0 : index
      %70 = vector.load %arg7[%c0_77, %c0_78] : memref<128x128xf32, #tpu.memory_space<vmem>>, vector<128x128xf32>
      tpu.vector_store %arg7[%c0_77, %c0_78], %69 {strides = array<i32>} : memref<128x128xf32, #tpu.memory_space<vmem>>, vector<128x128xf32>,
    } else {
    }
    %c0 = arith.constant 0 : index
    %c0_1 = arith.constant 0 : index
    %3 = vector.load %arg7[%c0, %c0_1] : memref<128x128xf32, #tpu.memory_space<vmem>>, vector<128x128xf32>
    %c0_2 = arith.constant 0 : index
    %c0_3 = arith.constant 0 : index
    %c0_4 = arith.constant 0 : index
    %c0_5 = arith.constant 0 : index
    %4 = vector.load %arg2[%c0_2, %c0_3, %c0_4, %c0_5] : memref<2x10x10x512xbf16, #tpu.memory_space<vmem>>, vector<2x8x8x512xbf16>
    %5 = vector.shape_cast %4 : vector<2x8x8x512xbf16> to vector<128x512xbf16>
    %c0_6 = arith.constant 0 : index
    %c0_7 = arith.constant 0 : index
    %c0_8 = arith.constant 0 : index
    %6 = vector.load %arg3[%c0_6, %c0_7, %c0_8] : memref<9x512x128xbf16, #tpu.memory_space<vmem>>, vector<1x512x128xbf16>
    %7 = vector.shape_cast %6 : vector<1x512x128xbf16> to vector<512x128xbf16>
    %cst = arith.constant dense<0.000000e+00> : vector<128x128xf32>
    %8 = tpu.matmul %5, %7, %cst {dimension_numbers = #tpu.dot_dimension_numbers<[1], [0], [0], [1], [0, 0, 1, 1], [], []>} : vector<128x512xbf16>, vector<512x128xbf16>, vector<128x128xf32> -> vector<128x128xf32>
    %9 = arith.addf %3, %8 : vector<128x128xf32>
    %c0_9 = arith.constant 0 : index
    %c0_10 = arith.constant 0 : index
    %c1 = arith.constant 1 : index
    %c0_11 = arith.constant 0 : index
    %10 = vector.load %arg2[%c0_9, %c0_10, %c1, %c0_11] : memref<2x10x10x512xbf16, #tpu.memory_space<vmem>>, vector<2x8x8x512xbf16>
    %11 = vector.shape_cast %10 : vector<2x8x8x512xbf16> to vector<128x512xbf16>
    %c1_12 = arith.constant 1 : index
    %c0_13 = arith.constant 0 : index
    %c0_14 = arith.constant 0 : index
    %12 = vector.load %arg3[%c1_12, %c0_13, %c0_14] : memref<9x512x128xbf16, #tpu.memory_space<vmem>>, vector<1x512x128xbf16>
    %13 = vector.shape_cast %12 : vector<1x512x128xbf16> to vector<512x128xbf16>
    %cst_15 = arith.constant dense<0.000000e+00> : vector<128x128xf32>
    %14 = tpu.matmul %11, %13, %cst_15 {dimension_numbers = #tpu.dot_dimension_numbers<[1], [0], [0], [1], [0, 0, 1, 1], [], []>} : vector<128x512xbf16>, vector<512x128xbf16>, vector<128x128xf32> -> vector<128x128xf32>
    %15 = arith.addf %9, %14 : vector<128x128xf32>
    %c0_16 = arith.constant 0 : index
    %c0_17 = arith.constant 0 : index
    %c2 = arith.constant 2 : index
    %c0_18 = arith.constant 0 : index
    %16 = vector.load %arg2[%c0_16, %c0_17, %c2, %c0_18] : memref<2x10x10x512xbf16, #tpu.memory_space<vmem>>, vector<2x8x8x512xbf16>
    %17 = vector.shape_cast %16 : vector<2x8x8x512xbf16> to vector<128x512xbf16>
    %c2_19 = arith.constant 2 : index
    %c0_20 = arith.constant 0 : index
    %c0_21 = arith.constant 0 : index
    %18 = vector.load %arg3[%c2_19, %c0_20, %c0_21] : memref<9x512x128xbf16, #tpu.memory_space<vmem>>, vector<1x512x128xbf16>
    %19 = vector.shape_cast %18 : vector<1x512x128xbf16> to vector<512x128xbf16>
    %cst_22 = arith.constant dense<0.000000e+00> : vector<128x128xf32>
    %20 = tpu.matmul %17, %19, %cst_22 {dimension_numbers = #tpu.dot_dimension_numbers<[1], [0], [0], [1], [0, 0, 1, 1], [], []>} : vector<128x512xbf16>, vector<512x128xbf16>, vector<128x128xf32> -> vector<128x128xf32>
    %21 = arith.addf %15, %20 : vector<128x128xf32>
    %c0_23 = arith.constant 0 : index
    %c1_24 = arith.constant 1 : index
    %c0_25 = arith.constant 0 : index
    %c0_26 = arith.constant 0 : index
    %22 = vector.load %arg2[%c0_23, %c1_24, %c0_25, %c0_26] : memref<2x10x10x512xbf16, #tpu.memory_space<vmem>>, vector<2x8x8x512xbf16>
    %23 = vector.shape_cast %22 : vector<2x8x8x512xbf16> to vector<128x512xbf16>
    %c3 = arith.constant 3 : index
    %c0_27 = arith.constant 0 : index
    %c0_28 = arith.constant 0 : index
    %24 = vector.load %arg3[%c3, %c0_27, %c0_28] : memref<9x512x128xbf16, #tpu.memory_space<vmem>>, vector<1x512x128xbf16>
    %25 = vector.shape_cast %24 : vector<1x512x128xbf16> to vector<512x128xbf16>
    %cst_29 = arith.constant dense<0.000000e+00> : vector<128x128xf32>
    %26 = tpu.matmul %23, %25, %cst_29 {dimension_numbers = #tpu.dot_dimension_numbers<[1], [0], [0], [1], [0, 0, 1, 1], [], []>} : vector<128x512xbf16>, vector<512x128xbf16>, vector<128x128xf32> -> vector<128x128xf32>
    %27 = arith.addf %21, %26 : vector<128x128xf32>
    %c0_30 = arith.constant 0 : index
    %c1_31 = arith.constant 1 : index
    %c1_32 = arith.constant 1 : index
    %c0_33 = arith.constant 0 : index
    %28 = vector.load %arg2[%c0_30, %c1_31, %c1_32, %c0_33] : memref<2x10x10x512xbf16, #tpu.memory_space<vmem>>, vector<2x8x8x512xbf16>
    %29 = vector.shape_cast %28 : vector<2x8x8x512xbf16> to vector<128x512xbf16>
    %c4 = arith.constant 4 : index
    %c0_34 = arith.constant 0 : index
    %c0_35 = arith.constant 0 : index
    %30 = vector.load %arg3[%c4, %c0_34, %c0_35] : memref<9x512x128xbf16, #tpu.memory_space<vmem>>, vector<1x512x128xbf16>
    %31 = vector.shape_cast %30 : vector<1x512x128xbf16> to vector<512x128xbf16>
    %cst_36 = arith.constant dense<0.000000e+00> : vector<128x128xf32>
    %32 = tpu.matmul %29, %31, %cst_36 {dimension_numbers = #tpu.dot_dimension_numbers<[1], [0], [0], [1], [0, 0, 1, 1], [], []>} : vector<128x512xbf16>, vector<512x128xbf16>, vector<128x128xf32> -> vector<128x128xf32>
    %33 = arith.addf %27, %32 : vector<128x128xf32>
    %c0_37 = arith.constant 0 : index
    %c1_38 = arith.constant 1 : index
    %c2_39 = arith.constant 2 : index
    %c0_40 = arith.constant 0 : index
    %34 = vector.load %arg2[%c0_37, %c1_38, %c2_39, %c0_40] : memref<2x10x10x512xbf16, #tpu.memory_space<vmem>>, vector<2x8x8x512xbf16>
    %35 = vector.shape_cast %34 : vector<2x8x8x512xbf16> to vector<128x512xbf16>
    %c5 = arith.constant 5 : index
    %c0_41 = arith.constant 0 : index
    %c0_42 = arith.constant 0 : index
    %36 = vector.load %arg3[%c5, %c0_41, %c0_42] : memref<9x512x128xbf16, #tpu.memory_space<vmem>>, vector<1x512x128xbf16>
    %37 = vector.shape_cast %36 : vector<1x512x128xbf16> to vector<512x128xbf16>
    %cst_43 = arith.constant dense<0.000000e+00> : vector<128x128xf32>
    %38 = tpu.matmul %35, %37, %cst_43 {dimension_numbers = #tpu.dot_dimension_numbers<[1], [0], [0], [1], [0, 0, 1, 1], [], []>} : vector<128x512xbf16>, vector<512x128xbf16>, vector<128x128xf32> -> vector<128x128xf32>
    %39 = arith.addf %33, %38 : vector<128x128xf32>
    %c0_44 = arith.constant 0 : index
    %c2_45 = arith.constant 2 : index
    %c0_46 = arith.constant 0 : index
    %c0_47 = arith.constant 0 : index
    %40 = vector.load %arg2[%c0_44, %c2_45, %c0_46, %c0_47] : memref<2x10x10x512xbf16, #tpu.memory_space<vmem>>, vector<2x8x8x512xbf16>
    %41 = vector.shape_cast %40 : vector<2x8x8x512xbf16> to vector<128x512xbf16>
    %c6 = arith.constant 6 : index
    %c0_48 = arith.constant 0 : index
    %c0_49 = arith.constant 0 : index
    %42 = vector.load %arg3[%c6, %c0_48, %c0_49] : memref<9x512x128xbf16, #tpu.memory_space<vmem>>, vector<1x512x128xbf16>
    %43 = vector.shape_cast %42 : vector<1x512x128xbf16> to vector<512x128xbf16>
    %cst_50 = arith.constant dense<0.000000e+00> : vector<128x128xf32>
    %44 = tpu.matmul %41, %43, %cst_50 {dimension_numbers = #tpu.dot_dimension_numbers<[1], [0], [0], [1], [0, 0, 1, 1], [], []>} : vector<128x512xbf16>, vector<512x128xbf16>, vector<128x128xf32> -> vector<128x128xf32>
    %45 = arith.addf %39, %44 : vector<128x128xf32>
    %c0_51 = arith.constant 0 : index
    %c2_52 = arith.constant 2 : index
    %c1_53 = arith.constant 1 : index
    %c0_54 = arith.constant 0 : index
    %46 = vector.load %arg2[%c0_51, %c2_52, %c1_53, %c0_54] : memref<2x10x10x512xbf16, #tpu.memory_space<vmem>>, vector<2x8x8x512xbf16>
    %47 = vector.shape_cast %46 : vector<2x8x8x512xbf16> to vector<128x512xbf16>
    %c7 = arith.constant 7 : index
    %c0_55 = arith.constant 0 : index
    %c0_56 = arith.constant 0 : index
    %48 = vector.load %arg3[%c7, %c0_55, %c0_56] : memref<9x512x128xbf16, #tpu.memory_space<vmem>>, vector<1x512x128xbf16>
    %49 = vector.shape_cast %48 : vector<1x512x128xbf16> to vector<512x128xbf16>
    %cst_57 = arith.constant dense<0.000000e+00> : vector<128x128xf32>
    %50 = tpu.matmul %47, %49, %cst_57 {dimension_numbers = #tpu.dot_dimension_numbers<[1], [0], [0], [1], [0, 0, 1, 1], [], []>} : vector<128x512xbf16>, vector<512x128xbf16>, vector<128x128xf32> -> vector<128x128xf32>
    %51 = arith.addf %45, %50 : vector<128x128xf32>
    %c0_58 = arith.constant 0 : index
    %c2_59 = arith.constant 2 : index
    %c2_60 = arith.constant 2 : index
    %c0_61 = arith.constant 0 : index
    %52 = vector.load %arg2[%c0_58, %c2_59, %c2_60, %c0_61] : memref<2x10x10x512xbf16, #tpu.memory_space<vmem>>, vector<2x8x8x512xbf16>
    %53 = vector.shape_cast %52 : vector<2x8x8x512xbf16> to vector<128x512xbf16>
    %c8 = arith.constant 8 : index
    %c0_62 = arith.constant 0 : index
    %c0_63 = arith.constant 0 : index
    %54 = vector.load %arg3[%c8, %c0_62, %c0_63] : memref<9x512x128xbf16, #tpu.memory_space<vmem>>, vector<1x512x128xbf16>
    %55 = vector.shape_cast %54 : vector<1x512x128xbf16> to vector<512x128xbf16>
    %cst_64 = arith.constant dense<0.000000e+00> : vector<128x128xf32>
    %56 = tpu.matmul %53, %55, %cst_64 {dimension_numbers = #tpu.dot_dimension_numbers<[1], [0], [0], [1], [0, 0, 1, 1], [], []>} : vector<128x512xbf16>, vector<512x128xbf16>, vector<128x128xf32> -> vector<128x128xf32>
    %57 = arith.addf %51, %56 : vector<128x128xf32>
    %c0_65 = arith.constant 0 : index
    %c0_66 = arith.constant 0 : index
    %58 = vector.load %arg7[%c0_65, %c0_66] : memref<128x128xf32, #tpu.memory_space<vmem>>, vector<128x128xf32>
    tpu.vector_store %arg7[%c0_65, %c0_66], %57 {strides = array<i32>} : memref<128x128xf32, #tpu.memory_space<vmem>>, vector<128x128xf32>,
    %c0_67 = arith.constant 0 : index
    %c0_68 = arith.constant 0 : index
    %59 = vector.load %arg4[%c0_67, %c0_68] : memref<1x128xf32, #tpu.memory_space<vmem>>, vector<1x128xf32>
    %60 = vector.broadcast %59 : vector<1x128xf32> to vector<128x128xf32>
    %61 = arith.addf %57, %60 : vector<128x128xf32>
    %62 = arith.truncf %61 : vector<128x128xf32> to vector<128x128xbf16>
    %c0_69 = arith.constant 0 : index
    %c0_70 = arith.constant 0 : index
    %c0_71 = arith.constant 0 : index
    %63 = vector.load %arg5[%c0_69, %c0_70, %c0_71] : memref<1x128x128xbf16, #tpu.memory_space<vmem>>, vector<1x128x128xbf16>
    %64 = vector.shape_cast %63 : vector<1x128x128xbf16> to vector<128x128xbf16>
    %cst_72 = arith.constant dense<0.000000e+00> : vector<128x128xf32>
    %65 = tpu.matmul %62, %64, %cst_72 {dimension_numbers = #tpu.dot_dimension_numbers<[1], [0], [0], [1], [0, 0, 1, 1], [], []>} : vector<128x128xbf16>, vector<128x128xbf16>, vector<128x128xf32> -> vector<128x128xf32>
    %c0_73 = arith.constant 0 : index
    %c0_74 = arith.constant 0 : index
    %c0_75 = arith.constant 0 : index
    %66 = vector.load %arg6[%c0_73, %c0_74, %c0_75] : memref<1x128x128xf32, #tpu.memory_space<vmem>>, vector<1x128x128xf32>
    %67 = vector.shape_cast %66 : vector<1x128x128xf32> to vector<128x128xf32>
    %68 = vector.shape_cast %65 : vector<128x128xf32> to vector<1x128x128xf32>
    tpu.vector_store %arg6[%c0_73, %c0_74, %c0_75], %68 {strides = array<i32>} : memref<1x128x128xf32, #tpu.memory_space<vmem>>, vector<1x128x128xf32>,
    return
  }
  func.func @transform_0(%arg0: i32, %arg1: i32) -> (i32, i32, i32, i32) {
    %c0_i32 = arith.constant 0 : i32
    %c0_i32_0 = arith.constant 0 : i32
    %c0_i32_1 = arith.constant 0 : i32
    %c0_i32_2 = arith.constant 0 : i32
    return %c0_i32, %c0_i32_0, %c0_i32_1, %arg1 : i32, i32, i32, i32
  }
  func.func @transform_1(%arg0: i32, %arg1: i32) -> (i32, i32, i32) {
    %c0_i32 = arith.constant 0 : i32
    %c0_i32_0 = arith.constant 0 : i32
    return %c0_i32, %arg1, %arg0 : i32, i32, i32
  }
  func.func @transform_2(%arg0: i32, %arg1: i32) -> (i32, i32) {
    %c0_i32 = arith.constant 0 : i32
    %c0_i32_0 = arith.constant 0 : i32
    return %c0_i32, %arg0 : i32, i32
  }
  func.func @transform_3(%arg0: i32, %arg1: i32) -> (i32, i32, i32) {
    %c0_i32 = arith.constant 0 : i32
    %c0_i32_0 = arith.constant 0 : i32
    %c0_i32_1 = arith.constant 0 : i32
    return %arg0, %c0_i32, %c0_i32_0 : i32, i32, i32
  }
  func.func @transform_4(%arg0: i32, %arg1: i32) -> (i32, i32, i32) {
    %c0_i32 = arith.constant 0 : i32
    %c0_i32_0 = arith.constant 0 : i32
    %c0_i32_1 = arith.constant 0 : i32
    return %arg0, %c0_i32, %c0_i32_0 : i32, i32, i32
  }
}

</mosaic_0001>

<bundles_post_ra>
// kernel: object_detection_forward.3
= control target key start
LH: loop header
LB: loop body
LE: loop exit
PB: predicated region body
PF: predicated region fallthrough
CT: control target
= control target key end

     0   :  { %8 = vsyncpa [#allocation3], 0  ;;  %s2733_s0 = inlined_call_operand.vmem [shape: bf16[128,32], index: 0, kind: input, shape index: {}]   ;;  %s2734_s1 = inlined_call_operand.hbm [shape: bf16[32,2048], index: 1, kind: input, shape index: {}]   ;;  %s2735_s2 = inlined_call_operand.hbm [shape: f32[1,2048], index: 2, kind: input, shape index: {}]   ;;  %s2736_s3 = inlined_call_operand.vmem [shape: bf16[128,2048], index: 3, kind: output, shape index: {}]  }
   0x1   :  { %10 = vsyncpa [#allocation3 + $0x1], 0 }
   0x2   :  { %11 = vsyncpa [#allocation5], 0 }
   0x3   :  { %13 = vsyncpa [#allocation5 + $0x1], 0  ;;  %s2099_s12 = smov 0   ;;  %s2101_s13 = smov 0  }
   0x4   :  { %s2103_s14 = smov 0   ;;  %s2105_s15 = smov 0  }
   0x5 LB: > { %s2118_s16 = sadd.s32 4294967295, %s2071_s15   ;;  %s2121_s17 = sadd.s32 1, %s2071_s15   ;;  %s2071_s15 = sphi %s2105_s15, %s2749_s15   ;;  %s2067_s14 = sphi %s2103_s14, %s2748_s14   ;;  %s2063_s13 = sphi %s2101_s13, %s2747_s13   ;;  %s2059_s12 = sphi %s2099_s12, %s2746_s12  }
   0x6   : > { %s44_s18 = ssub.s32 %s2071_s15, %s2121_s17  ;;  %s47_s19 = sadd.s32 1, %s2067_s14 }
   0x7   : > { %p45_p0 = scmp.eq.s32.totalorder %s44_s18, 0  ;;  %p54_p1 = scmp.ne.s32.totalorder %s2067_s14, %s2063_s13 }
   0x8   : > { %p55_p2 = scmp.eq.s32.totalorder %s2071_s15, 0  ;;  %p60_p3 = scmp.ne.s32.totalorder %s2063_s13, %s2059_s12 }
   0x9   : > { %s2131_s20 = scalar_select %p45_p0, %s2067_s14, %s47_s19  }
   0xa   : > { %p2133_p4 = por %p55_p2, %p54_p1  ;;  %p61_p5 = scmp.eq.s32.totalorder %s2118_s16, 0 }
   0xb   : > { %p110_p6 = scmp.eq.s32.totalorder %s2118_s16, 1  ;;  %p1928_p8 = scmp.lt.s32.totalorder %s2071_s15, 2 }
   0xc   : > { %p2139_p7 = por %p61_p5, %p60_p3  ;;  %s2149_s24 = sand.u32 1, %s2067_s14  }
   0xd   : > { %p2144_p9 = por %p110_p6, %p54_p1  ;;  %s1715_s25 = sshll.u32 %s2149_s24, 7 }
   0xe   : > { %s2739_s22 = scalar_select %p2139_p7, 1, 0 }
   0xf   : > { %s2740_s23 = scalar_select %p2144_p9, 1, 0 }
  0x10   : > { %s1850_s26 = sshll.u32 %s2071_s15, 9  ;;  %s143_s30 = scalar_lea.vmem [#allocation2], %s1715_s25 }
  0x11   : > { %s2156_s29 = scalar_lea.hbm %s2734_s1, %s1850_s26  ;;  %s150_s4 = sshll.u32 %s143_s30, 4  ;;  %s2158_s4 = int_to_ptr.vmem [resolvable:$true] %s150_s4 }
  0x12   : > { %p2162_p10 = pnand %p1928_p8, %p2133_p4  ;;  %s140_s6 = scalar_lea.sflag [#allocation3], %s2149_s24 }
  0x13   : > { %s1973_s7 = scalar_lea.hbm %s2156_s29, 2048  ;;  %s1978_s10 = scalar_lea.hbm %s2734_s1, 4096 }
  0x14   : > { %p1974_p11 = scmp.ne.s32.totalorder %s2156_s29, %s1973_s7  ;;  %p1975_p12 = pneg %p2162_p10 }
  0x15   : > { %p1979_p1 = scmp.lt.u32.totalorder %s2156_s29, %s2734_s1  ;;  %p1980_p2 = scmp.lt.u32.totalorder %s1978_s10, %s1973_s7 }
  0x16   : > { %p1976_p13 = pnand %p1975_p12, %p1974_p11  ;;  %p1982_p4 = scmp.lt.u32.totalorder %s1973_s7, %s2156_s29 }
  0x17   : > { %p1981_p3 = por %p1980_p2, %p1979_p1 }
  0x18   : > { %p1977_p0 = pneg %p1976_p13 }
  0x19   : > { %p1983_p5 = por %p1982_p4, %p1981_p3 }
  0x1b   : > { %p1984_p6 = pnand %p1983_p5, %p1977_p0 }
  0x1d   : > { %1987 = shalt.err (!%p1984_p6)
}
  0x1e   : > { %s1988_s18 = scalar_lea.vmem %s2158_s4, 2048  ;;  %s2073_s19 = smov [#allocation2]  }
  0x1f   : > { %p1989_p8 = scmp.ne.s32.totalorder %s2158_s4, %s1988_s18  ;;  %s1993_s21 = sshll.u32 %s2073_s19, 4  ;;  %s1994_s21 = int_to_ptr.vmem [resolvable:$false] %s1993_s21 }
  0x20   : > { %s1995_s25 = scalar_lea.vmem %s1994_s21, 4096  ;;  %p1996_p9 = scmp.lt.s32.totalorder %s2158_s4, %s1994_s21 }
  0x21   : > { %p1991_p11 = pnand %p1989_p8, %p1975_p12  ;;  %p1997_p1 = scmp.lt.s32.totalorder %s1995_s25, %s1988_s18 }
  0x23   : > { %p1992_p13 = pneg %p1991_p11  ;;  %p1998_p2 = por %p1997_p1, %p1996_p9 }
  0x25   : > { %p1999_p3 = pnand %p1998_p2, %p1992_p13 }
  0x27   : > { %2002 = shalt.err (!%p1999_p3)
}
  0x28   : > { %s2074_s26 = smov 1024   ;;  %s2075_s27 = smov 512  }
  0x29   : > { %s2076_s28 = smov 32   ;;  %p1721_p0 = scmp.ge.s32.totalorder %s2071_s15, 1 }
  0x2a   : > { %1924 = dma.hbm_to_vmem [thread:$0]  (!%p2162_p10), %s2156_s29, 2048, %s2158_s4, %s140_s6, %s2074_s26, %s2075_s27, %s2076_s28  }
  0x2b   : > { %p177_p9 = scmp.lt.s32.totalorder %s2071_s15, 3  ;;  %s1718_s30 = sshll.u32 %s2149_s24, 3 }
  0x2c   : > { %s1851_s8 = sshll.u32 %s2071_s15, 7  ;;  %s164_s9 = scalar_lea.vmem [#allocation4], %s1718_s30 }
  0x2d   : > { %p2197_p4 = pnand %p1721_p0, %p177_p9  ;;  %s172_s10 = sshll.u32 %s164_s9, 4  ;;  %s173_s10 = int_to_ptr.vmem [resolvable:$true] %s172_s10 }
  0x2e   : > { %s2205_s18 = scalar_lea.hbm %s2735_s2, %s1851_s8  ;;  %s161_s29 = scalar_lea.sflag [#allocation5], %s2149_s24 }
  0x2f   : > { %s2742_s7 = scalar_select %p2197_p4, 1, 0 }
  0x30   : > { %s2003_s4 = scalar_lea.hbm %s2205_s18, 128  ;;  %s2008_s19 = scalar_lea.hbm %s2735_s2, 256 }
  0x31   : > { %p2004_p5 = scmp.ne.s32.totalorder %s2205_s18, %s2003_s4  ;;  %p2009_p11 = scmp.lt.u32.totalorder %s2205_s18, %s2735_s2 }
  0x32   : > { %p2010_p13 = scmp.lt.u32.totalorder %s2008_s19, %s2003_s4  ;;  %p2012_p2 = scmp.lt.u32.totalorder %s2003_s4, %s2205_s18 }
  0x33   : > { %p2006_p6 = pnand %p2004_p5, %p1975_p12 }
  0x34   : > { %p2011_p1 = por %p2010_p13, %p2009_p11 }
  0x35   : > { %p2007_p8 = pneg %p2006_p6 }
  0x36   : > { %p2013_p3 = por %p2012_p2, %p2011_p1 }
  0x38   : > { %p2014_p0 = pnand %p2013_p3, %p2007_p8 }
  0x3a   : > { %2017 = shalt.err (!%p2014_p0)
}
  0x3b   : > { %s2018_s24 = scalar_lea.vmem %s173_s10, 128  ;;  %s2077_s26 = smov [#allocation4]  }
  0x3c   : > { %p2019_p9 = scmp.ne.s32.totalorder %s173_s10, %s2018_s24  ;;  %s2023_s27 = sshll.u32 %s2077_s26, 4  ;;  %s2024_s27 = int_to_ptr.vmem [resolvable:$false] %s2023_s27 }
  0x3d   : > { %s2025_s28 = scalar_lea.vmem %s2024_s27, 256  ;;  %p2026_p7 = scmp.lt.s32.totalorder %s173_s10, %s2024_s27 }
  0x3e   : > { %p2021_p5 = pnand %p2019_p9, %p1975_p12  ;;  %p2027_p4 = scmp.lt.s32.totalorder %s2025_s28, %s2018_s24 }
  0x40   : > { %p2022_p6 = pneg %p2021_p5  ;;  %p2028_p11 = por %p2027_p4, %p2026_p7 }
  0x42   : > { %p2029_p13 = pnand %p2028_p11, %p2022_p6 }
  0x44   : > { %2032 = shalt.err (!%p2029_p13)
}
  0x45   : > { %1927 = dma.hbm_to_vmem [thread:$0]  (!%p2162_p10), %s2205_s18, 128, %s173_s10, %s161_s29  }
  0x46   : > { %p2743_p8 = scmp.ne.s32.totalorder %s2742_s7, 0 }
  0x47   : > { %s2230_s30 = sand.u32 (!%p2743_p8), 1, %s2063_s13   ;;  %p2744_p7 = scmp.ne.s32.totalorder (!%p2743_p8), %s2739_s22, 0 }
  0x48   : > { %181 = sbr.rel (%p2743_p8) target bundleno = 457 (0x1c9), region = 32  ;;  %s1722_s8 = sshll.u32 (!%p2743_p8), %s2230_s30, 7 }
  0x49   : > { %s184_s9 = scalar_lea.sflag (!%p2743_p8), [#allocation3], %s2230_s30  ;;  %s2234_s11 = scalar_lea.vmem (!%p2743_p8), [#allocation2], %s1722_s8 }
  0x4f   : > { %2050 = dma.done.wait (%p2744_p7), %s184_s9, 2048  }
  0x50   : > { %2052 = vsyncadd (%p2744_p7), %s184_s9, 4294965248  ;;  %s1723_s5 = sshll.u32 %s2230_s30, 3  ;;  %s193_s7 = scalar_lea.sflag [#allocation5], %s2230_s30 }
  0x51   : > { %s2242_s10 = scalar_lea.vmem [#allocation4], %s1723_s5 }
  0x52   : > { %2054 = dma.done.wait (%p2744_p7), %s193_s7, 128  }
  0x53   : > { %2056 = vsyncadd (%p2744_p7), %s193_s7, 4294967168  ;;  %v2078_v0 = vmov 0   ;;  %v243_v1 = vld [vmem:[%s2234_s11] sm:$0xff]  ;;  %v244_v3 = vld [vmem:[%s2234_s11 + $0x8] sm:$0xff]  ;;  %vm421_vm0 = vcmask 261120   ;;  %v261_v41 = vlaneseq  ;;  %p2745_p10 = scmp.ne.s32.totalorder %s2740_s23, 0 }
  0x54   : > { %478 = vmatprep.mubr.bf16.mxu0 %v2078_v0  ;;  %591 = vmatprep.mubr.bf16.mxu1 %v2078_v0  ;;  %v247_v2 = vld [vmem:[%s2234_s11 + $0x20] sm:$0xff]  ;;  %v248_v5 = vld [vmem:[%s2234_s11 + $0x28] sm:$0xff]  ;;  %v245_v15 = vld [vmem:[%s2234_s11 + $0x10] sm:$0xff]  ;;  %s1916_s5 = sshll.u32 (%p2745_p10), %s2118_s16, 5 }
  0x55   : > { %v1734_v4 = vcombine.high %v243_v1, %v247_v2  ;;  %v1733_v6 = vcombine.low %v243_v1, %v247_v2  ;;  %v251_v7 = vld [vmem:[%s2234_s11 + $0x40] sm:$0xff]  ;;  %v1736_v9 = vcombine.high %v244_v3, %v248_v5  ;;  %v1735_v10 = vcombine.low %v244_v3, %v248_v5  ;;  %v252_v12 = vld [vmem:[%s2234_s11 + $0x48] sm:$0xff]  ;;  %v249_v17 = vld [vmem:[%s2234_s11 + $0x30] sm:$0xff]  ;;  %s2593_s22 = scalar_lea.vmem (%p2745_p10), %s2736_s3, %s1916_s5 }
  0x56   : > { %v255_v8 = vld [vmem:[%s2234_s11 + $0x60] sm:$0xff]  ;;  %v256_v13 = vld [vmem:[%s2234_s11 + $0x68] sm:$0xff]  ;;  %v246_v18 = vld [vmem:[%s2234_s11 + $0x18] sm:$0xff]  ;;  %v1738_v21 = vcombine.high %v245_v15, %v249_v17  ;;  %v1737_v24 = vcombine.low %v245_v15, %v249_v17  ;;  %v2352_v42 = vshrl.u32 %v261_v41, 7 }
  0x57   : > { %v1742_v11 = vcombine.high %v251_v7, %v255_v8  ;;  %446 = vmatprep.subr.bf16.mxu0 %v1734_v4  ;;  %v1744_v14 = vcombine.high %v252_v12, %v256_v13  ;;  %559 = vmatprep.subr.bf16.mxu1 %v1736_v9  ;;  %v1741_v16 = vcombine.low %v251_v7, %v255_v8  ;;  %v250_v19 = vld [vmem:[%s2234_s11 + $0x38] sm:$0xff]  ;;  %v1965_v23 = vld [vmem:[%s2733_s0] sm:$0xff]   ;;  %v253_v26 = vld [vmem:[%s2234_s11 + $0x50] sm:$0xff] }
  0x58   : > { %447 = vmatpush1.bf16.msra.mxu0 %v1733_v6  ;;  %560 = vmatpush1.bf16.msra.mxu1 %v1735_v10  ;;  %v1743_v20 = vcombine.low %v252_v12, %v256_v13  ;;  %v1740_v22 = vcombine.high %v246_v18, %v250_v19  ;;  %v1739_v25 = vcombine.low %v246_v18, %v250_v19  ;;  %v257_v27 = vld [vmem:[%s2234_s11 + $0x70] sm:$0xff]  ;;  %v254_v28 = vld [vmem:[%s2234_s11 + $0x58] sm:$0xff]  ;;  %v1966_v34 = vld [vmem:[%s2733_s0 + $0x8] sm:$0xff]   ;;  %v263_v43 = vsub.s32 0, %v2352_v42 }
  0x59   : > { %448 = vmatprep.subr.bf16.mxu0 %v1742_v11  ;;  %561 = vmatprep.subr.bf16.mxu1 %v1744_v14  ;;  %v1746_v29 = vcombine.high %v253_v26, %v257_v27  ;;  %v258_v30 = vld [vmem:[%s2234_s11 + $0x78] sm:$0xff]  ;;  %v1745_v32 = vcombine.low %v253_v26, %v257_v27  ;;  %v1967_v35 = vld [vmem:[%s2733_s0 + $0x10] sm:$0xff]   ;;  %v1969_v37 = vld [vmem:[%s2733_s0 + $0x20] sm:$0xff]   ;;  %v271_v45 = vsub.s32 2, %v2352_v42  ;;  %v267_v46 = vsub.s32 1, %v2352_v42  ;;  %s1724_s11 = sshll.u32 %s2230_s30, 9 }
  0x5a   : > { %v1748_v31 = vcombine.high %v254_v28, %v258_v30  ;;  %v1747_v33 = vcombine.low %v254_v28, %v258_v30  ;;  %v1968_v36 = vld [vmem:[%s2733_s0 + $0x18] sm:$0xff]   ;;  %v1970_v38 = vld [vmem:[%s2733_s0 + $0x28] sm:$0xff]   ;;  %v1971_v39 = vld [vmem:[%s2733_s0 + $0x30] sm:$0xff]   ;;  %v275_v47 = vsub.s32 3, %v2352_v42  ;;  %s2382_s30 = scalar_lea.vmem [#allocation6], %s1724_s11 }
  0x5b   : > { %v1972_v40 = vld [vmem:[%s2733_s0 + $0x38] sm:$0xff]   ;;  %v2356_v44 = vld [vmem:[%s2242_s10] sm:$0xff] }
  0x5c   : > { %449 = vmatpush1.bf16.msra.mxu0 %v1741_v16  ;;  %562 = vmatpush1.bf16.msra.mxu1 %v1743_v20  ;;  %v2362_v48 = vrot.slane %v2356_v44, %v263_v43  ;;  %v2365_v49 = vrot.slane %v2356_v44, %v271_v45  ;;  %v2368_v50 = vrot.slane %v2356_v44, %v267_v46 }
  0x5d   : > { %672 = vmatprep.subr.bf16.mxu0 %v1738_v21  ;;  %785 = vmatprep.subr.bf16.mxu1 %v1740_v22  ;;  %v2371_v51 = vrot.slane %v2356_v44, %v275_v47 }
  0x5f   : > { %1749 = vmatmul.mubr.msk.bf16.vlgmr.msra.gmra.mrb[0].mxu0 %vm421_vm0, %v1965_v23  ;;  %1757 = vmatmul.mubr.msk.bf16.vlgmr.msra.gmra.mrb[0].mxu1 %vm421_vm0, %v1965_v23 }
  0x60   : > { %673 = vmatpush1.bf16.msra.mxu0 %v1737_v24  ;;  %786 = vmatpush1.bf16.msra.mxu1 %v1739_v25 }
  0x61   : > { %488 = vmatprep.mubr.bf16.mxu0 %v2078_v0  ;;  %601 = vmatprep.mubr.bf16.mxu1 %v2078_v0 }
  0x62   : > { %674 = vmatprep.subr.bf16.mxu0 %v1746_v29  ;;  %787 = vmatprep.subr.bf16.mxu1 %v1748_v31 }
  0x64   : > { %675 = vmatpush1.bf16.msra.mxu0 %v1745_v32  ;;  %788 = vmatpush1.bf16.msra.mxu1 %v1747_v33 }
  0x67   : > { %1750 = vmatmul.mubr.msk.bf16.gmra.mrb[4].mxu0 %vm421_vm0, %v1966_v34  ;;  %1758 = vmatmul.mubr.msk.bf16.gmra.mrb[4].mxu1 %vm421_vm0, %v1966_v34 }
  0x68   : > { %498 = vmatprep.mubr.bf16.mxu0 %v2078_v0  ;;  %611 = vmatprep.mubr.bf16.mxu1 %v2078_v0 }
  0x6f   : > { %1751 = vmatmul.mubr.msk.bf16.gmra.mrb[8].mxu0 %vm421_vm0, %v1967_v35  ;;  %1759 = vmatmul.mubr.msk.bf16.gmra.mrb[8].mxu1 %vm421_vm0, %v1967_v35 }
  0x70   : > { %508 = vmatprep.mubr.bf16.mxu0 %v2078_v0  ;;  %621 = vmatprep.mubr.bf16.mxu1 %v2078_v0 }
  0x77   : > { %1752 = vmatmul.mubr.msk.bf16.gmra.mrb[12].mxu0 %vm421_vm0, %v1968_v36  ;;  %1760 = vmatmul.mubr.msk.bf16.gmra.mrb[12].mxu1 %vm421_vm0, %v1968_v36 }
  0x78   : > { %518 = vmatprep.mubr.bf16.mxu0 %v2078_v0  ;;  %631 = vmatprep.mubr.bf16.mxu1 %v2078_v0 }
  0x7f   : > { %1753 = vmatmul.mubr.msk.bf16.gmra.mrb[16].mxu0 %vm421_vm0, %v1969_v37  ;;  %1761 = vmatmul.mubr.msk.bf16.gmra.mrb[16].mxu1 %vm421_vm0, %v1969_v37 }
  0x80   : > { %528 = vmatprep.mubr.bf16.mxu0 %v2078_v0  ;;  %641 = vmatprep.mubr.bf16.mxu1 %v2078_v0 }
  0x87   : > { %1754 = vmatmul.mubr.msk.bf16.gmra.mrb[20].mxu0 %vm421_vm0, %v1970_v38  ;;  %1762 = vmatmul.mubr.msk.bf16.gmra.mrb[20].mxu1 %vm421_vm0, %v1970_v38 }
  0x88   : > { %538 = vmatprep.mubr.bf16.mxu0 %v2078_v0  ;;  %651 = vmatprep.mubr.bf16.mxu1 %v2078_v0 }
  0x8f   : > { %1755 = vmatmul.mubr.msk.bf16.gmra.mrb[24].mxu0 %vm421_vm0, %v1971_v39  ;;  %1763 = vmatmul.mubr.msk.bf16.gmra.mrb[24].mxu1 %vm421_vm0, %v1971_v39 }
  0x90   : > { %548 = vmatprep.mubr.bf16.mxu0 %v2078_v0  ;;  %661 = vmatprep.mubr.bf16.mxu1 %v2078_v0 }
  0x97   : > { %1756 = vmatmul.mubr.msk.bf16.gmra.mrb[28].mxu0 %vm421_vm0, %v1972_v40  ;;  %1764 = vmatmul.mubr.msk.bf16.gmra.mrb[28].mxu1 %vm421_vm0, %v1972_v40 }
  0x98   : > { %704 = vmatprep.mubr.bf16.mxu0 %v2078_v0  ;;  %817 = vmatprep.mubr.bf16.mxu1 %v2078_v0 }
  0x9f   : > { %1765 = vmatmul.mubr.msk.bf16.vlgmr.msra.gmra.mrb[32].mxu0 %vm421_vm0, %v1965_v23  ;;  %1773 = vmatmul.mubr.msk.bf16.vlgmr.msra.gmra.mrb[32].mxu1 %vm421_vm0, %v1965_v23 }
  0xa0   : > { %714 = vmatprep.mubr.bf16.mxu0 %v2078_v0  ;;  %827 = vmatprep.mubr.bf16.mxu1 %v2078_v0 }
  0xa7   : > { %1766 = vmatmul.mubr.msk.bf16.gmra.mrb[36].mxu0 %vm421_vm0, %v1966_v34  ;;  %1774 = vmatmul.mubr.msk.bf16.gmra.mrb[36].mxu1 %vm421_vm0, %v1966_v34 }
  0xa8   : > { %724 = vmatprep.mubr.bf16.mxu0 %v2078_v0  ;;  %837 = vmatprep.mubr.bf16.mxu1 %v2078_v0 }
  0xaf   : > { %1767 = vmatmul.mubr.msk.bf16.gmra.mrb[40].mxu0 %vm421_vm0, %v1967_v35  ;;  %1775 = vmatmul.mubr.msk.bf16.gmra.mrb[40].mxu1 %vm421_vm0, %v1967_v35 }
  0xb0   : > { %734 = vmatprep.mubr.bf16.mxu0 %v2078_v0  ;;  %847 = vmatprep.mubr.bf16.mxu1 %v2078_v0 }
  0xb7   : > { %1768 = vmatmul.mubr.msk.bf16.gmra.mrb[44].mxu0 %vm421_vm0, %v1968_v36  ;;  %1776 = vmatmul.mubr.msk.bf16.gmra.mrb[44].mxu1 %vm421_vm0, %v1968_v36 }
  0xb8   : > { %744 = vmatprep.mubr.bf16.mxu0 %v2078_v0  ;;  %857 = vmatprep.mubr.bf16.mxu1 %v2078_v0 }
  0xbf   : > { %1769 = vmatmul.mubr.msk.bf16.gmra.mrb[48].mxu0 %vm421_vm0, %v1969_v37  ;;  %1777 = vmatmul.mubr.msk.bf16.gmra.mrb[48].mxu1 %vm421_vm0, %v1969_v37 }
  0xc0   : > { %754 = vmatprep.mubr.bf16.mxu0 %v2078_v0  ;;  %867 = vmatprep.mubr.bf16.mxu1 %v2078_v0 }
  0xc7   : > { %1770 = vmatmul.mubr.msk.bf16.gmra.mrb[52].mxu0 %vm421_vm0, %v1970_v38  ;;  %1778 = vmatmul.mubr.msk.bf16.gmra.mrb[52].mxu1 %vm421_vm0, %v1970_v38 }
  0xc8   : > { %764 = vmatprep.mubr.bf16.mxu0 %v2078_v0  ;;  %877 = vmatprep.mubr.bf16.mxu1 %v2078_v0 }
  0xcf   : > { %1771 = vmatmul.mubr.msk.bf16.gmra.mrb[56].mxu0 %vm421_vm0, %v1971_v39  ;;  %1779 = vmatmul.mubr.msk.bf16.gmra.mrb[56].mxu1 %vm421_vm0, %v1971_v39 }
  0xd0   : > { %774 = vmatprep.mubr.bf16.mxu0 %v2078_v0  ;;  %887 = vmatprep.mubr.bf16.mxu1 %v2078_v0 }
  0xd7   : > { %1772 = vmatmul.mubr.msk.bf16.gmra.mrb[60].mxu0 %vm421_vm0, %v1972_v40  ;;  %1780 = vmatmul.mubr.msk.bf16.gmra.mrb[60].mxu1 %vm421_vm0, %v1972_v40 }
 0x132   : > { %v480_v52 = vpop.f32.mrb[0].mxu0  ;;  %v593_v54 = vpop.f32.mrb[0].mxu1 }
 0x133   : > { %v481_v53 = vadd.f32 %v480_v52, %v2362_v48  ;;  %v482_v55 = vpop.f32.mrb[1].mxu0  ;;  %v594_v56 = vadd.f32 %v593_v54, %v2365_v49  ;;  %v595_v58 = vpop.f32.mrb[1].mxu1 }
 0x134   : > { %v483_v57 = vadd.f32 %v482_v55, %v2368_v50  ;;  %v484_v59 = vpop.f32.mrb[2].mxu0  ;;  %v596_v61 = vadd.f32 %v595_v58, %v2371_v51  ;;  %v597_v63 = vpop.f32.mrb[2].mxu1 }
 0x135   : > { %v898_v60 = vmax.f32 %v481_v53, 0.0  ;;  %v485_v62 = vadd.f32 %v484_v59, %v2362_v48  ;;  %v486_v0 = vpop.f32.mrb[3].mxu0  ;;  %v900_v1 = vmax.f32 %v594_v56, 0.0  ;;  %v598_v3 = vadd.f32 %v597_v63, %v2365_v49  ;;  %v599_v5 = vpop.f32.mrb[3].mxu1 }
 0x136   : > { %v899_v2 = vmax.f32 %v483_v57, 0.0  ;;  %v487_v4 = vadd.f32 %v486_v0, %v2368_v50  ;;  %v901_v6 = vmax.f32 %v596_v61, 0.0  ;;  %v600_v8 = vadd.f32 %v599_v5, %v2371_v51 }
 0x137   : > { %v906_v7 = vmax.f32 %v485_v62, 0.0  ;;  %v908_v10 = vmax.f32 %v598_v3, 0.0 }
 0x138   : > { %v1852_v9 = vpack.c.bf16 %v899_v2, %v898_v60  ;;  %v907_v11 = vmax.f32 %v487_v4, 0.0  ;;  %v1853_v12 = vpack.c.bf16 %v901_v6, %v900_v1  ;;  %v909_v13 = vmax.f32 %v600_v8, 0.0 }
 0x13a   : > { %1410 = vst [vmem:[%s2382_s30] sm:$0xff] %v1852_v9  ;;  %v1856_v14 = vpack.c.bf16 %v907_v11, %v906_v7  ;;  %v490_v15 = vpop.f32.mrb[4].mxu0  ;;  %1411 = vst [vmem:[%s2382_s30 + $0x8] sm:$0xff] %v1853_v12  ;;  %v1857_v16 = vpack.c.bf16 %v909_v13, %v908_v10  ;;  %v603_v18 = vpop.f32.mrb[4].mxu1 }
 0x13b   : > { %v491_v17 = vadd.f32 %v490_v15, %v2362_v48  ;;  %v492_v19 = vpop.f32.mrb[5].mxu0  ;;  %v604_v20 = vadd.f32 %v603_v18, %v2365_v49  ;;  %v605_v22 = vpop.f32.mrb[5].mxu1 }
 0x13c   : > { %1414 = vst [vmem:[%s2382_s30 + $0x20] sm:$0xff] %v1856_v14  ;;  %v493_v21 = vadd.f32 %v492_v19, %v2368_v50  ;;  %v494_v23 = vpop.f32.mrb[6].mxu0  ;;  %1415 = vst [vmem:[%s2382_s30 + $0x28] sm:$0xff] %v1857_v16  ;;  %v606_v25 = vadd.f32 %v605_v22, %v2371_v51  ;;  %v607_v27 = vpop.f32.mrb[6].mxu1 }
 0x13d   : > { %v914_v24 = vmax.f32 %v491_v17, 0.0  ;;  %v495_v26 = vadd.f32 %v494_v23, %v2362_v48  ;;  %v496_v28 = vpop.f32.mrb[7].mxu0  ;;  %v916_v29 = vmax.f32 %v604_v20, 0.0  ;;  %v608_v31 = vadd.f32 %v607_v27, %v2365_v49  ;;  %v609_v33 = vpop.f32.mrb[7].mxu1 }
 0x13e   : > { %v915_v30 = vmax.f32 %v493_v21, 0.0  ;;  %v497_v32 = vadd.f32 %v496_v28, %v2368_v50  ;;  %v917_v34 = vmax.f32 %v606_v25, 0.0  ;;  %v610_v36 = vadd.f32 %v609_v33, %v2371_v51 }
 0x13f   : > { %v922_v35 = vmax.f32 %v495_v26, 0.0  ;;  %v924_v38 = vmax.f32 %v608_v31, 0.0 }
 0x140   : > { %v1860_v37 = vpack.c.bf16 %v915_v30, %v914_v24  ;;  %v923_v39 = vmax.f32 %v497_v32, 0.0  ;;  %v1861_v40 = vpack.c.bf16 %v917_v34, %v916_v29  ;;  %v925_v41 = vmax.f32 %v610_v36, 0.0 }
 0x142   : > { %1418 = vst [vmem:[%s2382_s30 + $0x40] sm:$0xff] %v1860_v37  ;;  %v1864_v43 = vpack.c.bf16 %v923_v39, %v922_v35  ;;  %v500_v45 = vpop.f32.mrb[8].mxu0  ;;  %1419 = vst [vmem:[%s2382_s30 + $0x48] sm:$0xff] %v1861_v40  ;;  %v1865_v46 = vpack.c.bf16 %v925_v41, %v924_v38  ;;  %v613_v52 = vpop.f32.mrb[8].mxu1 }
 0x143   : > { %v501_v47 = vadd.f32 %v500_v45, %v2362_v48  ;;  %v502_v53 = vpop.f32.mrb[9].mxu0  ;;  %v614_v54 = vadd.f32 %v613_v52, %v2365_v49  ;;  %v615_v56 = vpop.f32.mrb[9].mxu1 }
 0x144   : > { %1422 = vst [vmem:[%s2382_s30 + $0x60] sm:$0xff] %v1864_v43  ;;  %v503_v55 = vadd.f32 %v502_v53, %v2368_v50  ;;  %v504_v57 = vpop.f32.mrb[10].mxu0  ;;  %1423 = vst [vmem:[%s2382_s30 + $0x68] sm:$0xff] %v1865_v46  ;;  %v616_v59 = vadd.f32 %v615_v56, %v2371_v51  ;;  %v617_v61 = vpop.f32.mrb[10].mxu1 }
 0x145   : > { %v930_v58 = vmax.f32 %v501_v47, 0.0  ;;  %v505_v60 = vadd.f32 %v504_v57, %v2362_v48  ;;  %v506_v62 = vpop.f32.mrb[11].mxu0  ;;  %v932_v63 = vmax.f32 %v614_v54, 0.0  ;;  %v618_v1 = vadd.f32 %v617_v61, %v2365_v49  ;;  %v619_v3 = vpop.f32.mrb[11].mxu1 }
 0x146   : > { %v931_v0 = vmax.f32 %v503_v55, 0.0  ;;  %v507_v2 = vadd.f32 %v506_v62, %v2368_v50  ;;  %v933_v4 = vmax.f32 %v616_v59, 0.0  ;;  %v620_v6 = vadd.f32 %v619_v3, %v2371_v51 }
 0x147   : > { %v938_v5 = vmax.f32 %v505_v60, 0.0  ;;  %v940_v8 = vmax.f32 %v618_v1, 0.0 }
 0x148   : > { %v1868_v7 = vpack.c.bf16 %v931_v0, %v930_v58  ;;  %v939_v9 = vmax.f32 %v507_v2, 0.0  ;;  %v1869_v10 = vpack.c.bf16 %v933_v4, %v932_v63  ;;  %v941_v11 = vmax.f32 %v620_v6, 0.0 }
 0x14a   : > { %1426 = vst [vmem:[%s2382_s30 + $0x80] sm:$0xff] %v1868_v7  ;;  %v1872_v12 = vpack.c.bf16 %v939_v9, %v938_v5  ;;  %v510_v13 = vpop.f32.mrb[12].mxu0  ;;  %1427 = vst [vmem:[%s2382_s30 + $0x88] sm:$0xff] %v1869_v10  ;;  %v1873_v14 = vpack.c.bf16 %v941_v11, %v940_v8  ;;  %v623_v16 = vpop.f32.mrb[12].mxu1 }
 0x14b   : > { %v511_v15 = vadd.f32 %v510_v13, %v2362_v48  ;;  %v512_v17 = vpop.f32.mrb[13].mxu0  ;;  %v624_v18 = vadd.f32 %v623_v16, %v2365_v49  ;;  %v625_v20 = vpop.f32.mrb[13].mxu1 }
 0x14c   : > { %1430 = vst [vmem:[%s2382_s30 + $0xa0] sm:$0xff] %v1872_v12  ;;  %v513_v19 = vadd.f32 %v512_v17, %v2368_v50  ;;  %v514_v21 = vpop.f32.mrb[14].mxu0  ;;  %1431 = vst [vmem:[%s2382_s30 + $0xa8] sm:$0xff] %v1873_v14  ;;  %v626_v23 = vadd.f32 %v625_v20, %v2371_v51  ;;  %v627_v25 = vpop.f32.mrb[14].mxu1 }
 0x14d   : > { %v946_v22 = vmax.f32 %v511_v15, 0.0  ;;  %v515_v24 = vadd.f32 %v514_v21, %v2362_v48  ;;  %v516_v26 = vpop.f32.mrb[15].mxu0  ;;  %v948_v27 = vmax.f32 %v624_v18, 0.0  ;;  %v628_v29 = vadd.f32 %v627_v25, %v2365_v49  ;;  %v629_v31 = vpop.f32.mrb[15].mxu1 }
 0x14e   : > { %v947_v28 = vmax.f32 %v513_v19, 0.0  ;;  %v517_v30 = vadd.f32 %v516_v26, %v2368_v50  ;;  %v949_v32 = vmax.f32 %v626_v23, 0.0  ;;  %v630_v34 = vadd.f32 %v629_v31, %v2371_v51 }
 0x14f   : > { %v954_v33 = vmax.f32 %v515_v24, 0.0  ;;  %v956_v36 = vmax.f32 %v628_v29, 0.0 }
 0x150   : > { %v1876_v35 = vpack.c.bf16 %v947_v28, %v946_v22  ;;  %v955_v37 = vmax.f32 %v517_v30, 0.0  ;;  %v1877_v38 = vpack.c.bf16 %v949_v32, %v948_v27  ;;  %v957_v39 = vmax.f32 %v630_v34, 0.0 }
 0x152   : > { %1434 = vst [vmem:[%s2382_s30 + $0xc0] sm:$0xff] %v1876_v35  ;;  %v1880_v40 = vpack.c.bf16 %v955_v37, %v954_v33  ;;  %v520_v41 = vpop.f32.mrb[16].mxu0  ;;  %1435 = vst [vmem:[%s2382_s30 + $0xc8] sm:$0xff] %v1877_v38  ;;  %v1881_v43 = vpack.c.bf16 %v957_v39, %v956_v36  ;;  %v633_v46 = vpop.f32.mrb[16].mxu1 }
 0x153   : > { %v521_v45 = vadd.f32 %v520_v41, %v2362_v48  ;;  %v522_v47 = vpop.f32.mrb[17].mxu0  ;;  %v634_v52 = vadd.f32 %v633_v46, %v2365_v49  ;;  %v635_v54 = vpop.f32.mrb[17].mxu1 }
 0x154   : > { %1438 = vst [vmem:[%s2382_s30 + $0xe0] sm:$0xff] %v1880_v40  ;;  %v523_v53 = vadd.f32 %v522_v47, %v2368_v50  ;;  %v524_v55 = vpop.f32.mrb[18].mxu0  ;;  %1439 = vst [vmem:[%s2382_s30 + $0xe8] sm:$0xff] %v1881_v43  ;;  %v636_v57 = vadd.f32 %v635_v54, %v2371_v51  ;;  %v637_v59 = vpop.f32.mrb[18].mxu1 }
 0x155   : > { %v962_v56 = vmax.f32 %v521_v45, 0.0  ;;  %v525_v58 = vadd.f32 %v524_v55, %v2362_v48  ;;  %v526_v60 = vpop.f32.mrb[19].mxu0  ;;  %v964_v61 = vmax.f32 %v634_v52, 0.0  ;;  %v638_v63 = vadd.f32 %v637_v59, %v2365_v49  ;;  %v639_v1 = vpop.f32.mrb[19].mxu1 }
 0x156   : > { %v963_v62 = vmax.f32 %v523_v53, 0.0  ;;  %v527_v0 = vadd.f32 %v526_v60, %v2368_v50  ;;  %v965_v2 = vmax.f32 %v636_v57, 0.0  ;;  %v640_v4 = vadd.f32 %v639_v1, %v2371_v51 }
 0x157   : > { %v970_v3 = vmax.f32 %v525_v58, 0.0  ;;  %v972_v6 = vmax.f32 %v638_v63, 0.0 }
 0x158   : > { %v1884_v5 = vpack.c.bf16 %v963_v62, %v962_v56  ;;  %v971_v7 = vmax.f32 %v527_v0, 0.0  ;;  %v1885_v8 = vpack.c.bf16 %v965_v2, %v964_v61  ;;  %v973_v9 = vmax.f32 %v640_v4, 0.0 }
 0x15a   : > { %1442 = vst [vmem:[%s2382_s30 + $0x100] sm:$0xff] %v1884_v5  ;;  %v1888_v10 = vpack.c.bf16 %v971_v7, %v970_v3  ;;  %v530_v11 = vpop.f32.mrb[20].mxu0  ;;  %1443 = vst [vmem:[%s2382_s30 + $0x108] sm:$0xff] %v1885_v8  ;;  %v1889_v12 = vpack.c.bf16 %v973_v9, %v972_v6  ;;  %v643_v14 = vpop.f32.mrb[20].mxu1  ;;  %v279_v8 = vsub.s32 4, %v2352_v42 }
 0x15b   : > { %v531_v13 = vadd.f32 %v530_v11, %v2362_v48  ;;  %v532_v15 = vpop.f32.mrb[21].mxu0  ;;  %v644_v16 = vadd.f32 %v643_v14, %v2365_v49  ;;  %v645_v18 = vpop.f32.mrb[21].mxu1 }
 0x15c   : > { %1446 = vst [vmem:[%s2382_s30 + $0x120] sm:$0xff] %v1888_v10  ;;  %v533_v17 = vadd.f32 %v532_v15, %v2368_v50  ;;  %v534_v19 = vpop.f32.mrb[22].mxu0  ;;  %1447 = vst [vmem:[%s2382_s30 + $0x128] sm:$0xff] %v1889_v12  ;;  %v646_v21 = vadd.f32 %v645_v18, %v2371_v51  ;;  %v647_v23 = vpop.f32.mrb[22].mxu1  ;;  %v287_v15 = vsub.s32 6, %v2352_v42 }
 0x15d   : > { %v978_v20 = vmax.f32 %v531_v13, 0.0  ;;  %v535_v22 = vadd.f32 %v534_v19, %v2362_v48  ;;  %v536_v24 = vpop.f32.mrb[23].mxu0  ;;  %v980_v25 = vmax.f32 %v644_v16, 0.0  ;;  %v648_v27 = vadd.f32 %v647_v23, %v2365_v49  ;;  %v649_v29 = vpop.f32.mrb[23].mxu1 }
 0x15e   : > { %v979_v26 = vmax.f32 %v533_v17, 0.0  ;;  %v537_v28 = vadd.f32 %v536_v24, %v2368_v50  ;;  %v981_v30 = vmax.f32 %v646_v21, 0.0  ;;  %v650_v32 = vadd.f32 %v649_v29, %v2371_v51 }
 0x15f   : > { %v986_v31 = vmax.f32 %v535_v22, 0.0  ;;  %v988_v34 = vmax.f32 %v648_v27, 0.0  ;;  %v291_v21 = vsub.s32 7, %v2352_v42  ;;  %v2470_v27 = vrot.slane %v2356_v44, %v279_v8 }
 0x160   : > { %v1892_v33 = vpack.c.bf16 %v979_v26, %v978_v20  ;;  %v987_v35 = vmax.f32 %v537_v28, 0.0  ;;  %v1893_v36 = vpack.c.bf16 %v981_v30, %v980_v25  ;;  %v989_v37 = vmax.f32 %v650_v32, 0.0 }
 0x161   : > { %v283_v20 = vsub.s32 5, %v2352_v42 }
 0x162   : > { %1450 = vst [vmem:[%s2382_s30 + $0x140] sm:$0xff] %v1892_v33  ;;  %v1896_v38 = vpack.c.bf16 %v987_v35, %v986_v31  ;;  %v540_v39 = vpop.f32.mrb[24].mxu0  ;;  %1451 = vst [vmem:[%s2382_s30 + $0x148] sm:$0xff] %v1893_v36  ;;  %v1897_v40 = vpack.c.bf16 %v989_v37, %v988_v34  ;;  %v653_v43 = vpop.f32.mrb[24].mxu1 }
 0x163   : > { %v541_v41 = vadd.f32 %v540_v39, %v2362_v48  ;;  %v542_v45 = vpop.f32.mrb[25].mxu0  ;;  %v654_v46 = vadd.f32 %v653_v43, %v2365_v49  ;;  %v655_v52 = vpop.f32.mrb[25].mxu1 }
 0x164   : > { %1454 = vst [vmem:[%s2382_s30 + $0x160] sm:$0xff] %v1896_v38  ;;  %v543_v47 = vadd.f32 %v542_v45, %v2368_v50  ;;  %v544_v53 = vpop.f32.mrb[26].mxu0  ;;  %1455 = vst [vmem:[%s2382_s30 + $0x168] sm:$0xff] %v1897_v40  ;;  %v656_v55 = vadd.f32 %v655_v52, %v2371_v51  ;;  %v657_v57 = vpop.f32.mrb[26].mxu1  ;;  %v2479_v38 = vrot.slane %v2356_v44, %v283_v20 }
 0x165   : > { %v994_v54 = vmax.f32 %v541_v41, 0.0  ;;  %v545_v56 = vadd.f32 %v544_v53, %v2362_v48  ;;  %v546_v58 = vpop.f32.mrb[27].mxu0  ;;  %v996_v59 = vmax.f32 %v654_v46, 0.0  ;;  %v658_v61 = vadd.f32 %v657_v57, %v2365_v49  ;;  %v659_v63 = vpop.f32.mrb[27].mxu1 }
 0x166   : > { %v995_v60 = vmax.f32 %v543_v47, 0.0  ;;  %v547_v62 = vadd.f32 %v546_v58, %v2368_v50  ;;  %v997_v0 = vmax.f32 %v656_v55, 0.0  ;;  %v660_v2 = vadd.f32 %v659_v63, %v2371_v51 }
 0x167   : > { %v1002_v1 = vmax.f32 %v545_v56, 0.0  ;;  %v1004_v4 = vmax.f32 %v658_v61, 0.0 }
 0x168   : > { %v1900_v3 = vpack.c.bf16 %v995_v60, %v994_v54  ;;  %v1003_v5 = vmax.f32 %v547_v62, 0.0  ;;  %v1901_v6 = vpack.c.bf16 %v997_v0, %v996_v59  ;;  %v1005_v7 = vmax.f32 %v660_v2, 0.0 }
 0x16a   : > { %1458 = vst [vmem:[%s2382_s30 + $0x180] sm:$0xff] %v1900_v3  ;;  %v1904_v9 = vpack.c.bf16 %v1003_v5, %v1002_v1  ;;  %v550_v10 = vpop.f32.mrb[28].mxu0  ;;  %1459 = vst [vmem:[%s2382_s30 + $0x188] sm:$0xff] %v1901_v6  ;;  %v1905_v11 = vpack.c.bf16 %v1005_v7, %v1004_v4  ;;  %v663_v13 = vpop.f32.mrb[28].mxu1 }
 0x16b   : > { %v551_v12 = vadd.f32 %v550_v10, %v2362_v48  ;;  %v552_v14 = vpop.f32.mrb[29].mxu0  ;;  %v664_v16 = vadd.f32 %v663_v13, %v2365_v49  ;;  %v665_v18 = vpop.f32.mrb[29].mxu1 }
 0x16c   : > { %1462 = vst [vmem:[%s2382_s30 + $0x1a0] sm:$0xff] %v1904_v9  ;;  %v553_v17 = vadd.f32 %v552_v14, %v2368_v50  ;;  %v554_v19 = vpop.f32.mrb[30].mxu0  ;;  %1463 = vst [vmem:[%s2382_s30 + $0x1a8] sm:$0xff] %v1905_v11  ;;  %v666_v23 = vadd.f32 %v665_v18, %v2371_v51  ;;  %v667_v25 = vpop.f32.mrb[30].mxu1 }
 0x16d   : > { %v1010_v22 = vmax.f32 %v551_v12, 0.0  ;;  %v555_v24 = vadd.f32 %v554_v19, %v2362_v48  ;;  %v556_v26 = vpop.f32.mrb[31].mxu0  ;;  %v1012_v28 = vmax.f32 %v664_v16, 0.0  ;;  %v668_v30 = vadd.f32 %v667_v25, %v2365_v49  ;;  %v669_v42 = vpop.f32.mrb[31].mxu1 }
 0x16e   : > { %v1011_v29 = vmax.f32 %v553_v17, 0.0  ;;  %v557_v31 = vadd.f32 %v556_v26, %v2368_v50  ;;  %v1013_v32 = vmax.f32 %v666_v23, 0.0  ;;  %v670_v34 = vadd.f32 %v669_v42, %v2371_v51 }
 0x16f   : > { %v1018_v33 = vmax.f32 %v555_v24, 0.0  ;;  %v2476_v48 = vrot.slane %v2356_v44, %v287_v15  ;;  %v1020_v36 = vmax.f32 %v668_v30, 0.0  ;;  %v2482_v50 = vrot.slane %v2356_v44, %v291_v21 }
 0x170   : > { %v1908_v35 = vpack.c.bf16 %v1011_v29, %v1010_v22  ;;  %v1019_v37 = vmax.f32 %v557_v31, 0.0  ;;  %v1909_v39 = vpack.c.bf16 %v1013_v32, %v1012_v28  ;;  %v1021_v49 = vmax.f32 %v670_v34, 0.0 }
 0x172   : > { %1466 = vst [vmem:[%s2382_s30 + $0x1c0] sm:$0xff] %v1908_v35  ;;  %v1912_v40 = vpack.c.bf16 %v1019_v37, %v1018_v33  ;;  %v706_v41 = vpop.f32.mrb[32].mxu0  ;;  %1467 = vst [vmem:[%s2382_s30 + $0x1c8] sm:$0xff] %v1909_v39  ;;  %v1913_v51 = vpack.c.bf16 %v1021_v49, %v1020_v36  ;;  %v819_v45 = vpop.f32.mrb[32].mxu1 }
 0x173   : > { %v707_v43 = vadd.f32 %v706_v41, %v2470_v27  ;;  %v708_v46 = vpop.f32.mrb[33].mxu0  ;;  %v820_v47 = vadd.f32 %v819_v45, %v2476_v48  ;;  %v821_v53 = vpop.f32.mrb[33].mxu1 }
 0x174   : > { %1470 = vst [vmem:[%s2382_s30 + $0x1e0] sm:$0xff] %v1912_v40  ;;  %v709_v52 = vadd.f32 %v708_v46, %v2479_v38  ;;  %v710_v54 = vpop.f32.mrb[34].mxu0  ;;  %1471 = vst [vmem:[%s2382_s30 + $0x1e8] sm:$0xff] %v1913_v51  ;;  %v822_v44 = vadd.f32 %v821_v53, %v2482_v50  ;;  %v823_v57 = vpop.f32.mrb[34].mxu1 }
 0x175   : > { %v902_v55 = vmax.f32 %v707_v43, 0.0  ;;  %v711_v56 = vadd.f32 %v710_v54, %v2470_v27  ;;  %v712_v58 = vpop.f32.mrb[35].mxu0  ;;  %v904_v59 = vmax.f32 %v820_v47, 0.0  ;;  %v824_v61 = vadd.f32 %v823_v57, %v2476_v48  ;;  %v825_v63 = vpop.f32.mrb[35].mxu1 }
 0x176   : > { %v903_v60 = vmax.f32 %v709_v52, 0.0  ;;  %v713_v62 = vadd.f32 %v712_v58, %v2479_v38  ;;  %v905_v0 = vmax.f32 %v822_v44, 0.0  ;;  %v826_v2 = vadd.f32 %v825_v63, %v2482_v50 }
 0x177   : > { %v910_v1 = vmax.f32 %v711_v56, 0.0  ;;  %v912_v4 = vmax.f32 %v824_v61, 0.0 }
 0x178   : > { %v1854_v3 = vpack.c.bf16 %v903_v60, %v902_v55  ;;  %v911_v5 = vmax.f32 %v713_v62, 0.0  ;;  %v1855_v6 = vpack.c.bf16 %v905_v0, %v904_v59  ;;  %v913_v7 = vmax.f32 %v826_v2, 0.0 }
 0x17a   : > { %1412 = vst [vmem:[%s2382_s30 + $0x10] sm:$0xff] %v1854_v3  ;;  %v1858_v8 = vpack.c.bf16 %v911_v5, %v910_v1  ;;  %v716_v9 = vpop.f32.mrb[36].mxu0  ;;  %1413 = vst [vmem:[%s2382_s30 + $0x18] sm:$0xff] %v1855_v6  ;;  %v1859_v10 = vpack.c.bf16 %v913_v7, %v912_v4  ;;  %v829_v12 = vpop.f32.mrb[36].mxu1 }
 0x17b   : > { %v717_v11 = vadd.f32 %v716_v9, %v2470_v27  ;;  %v718_v13 = vpop.f32.mrb[37].mxu0  ;;  %v830_v14 = vadd.f32 %v829_v12, %v2476_v48  ;;  %v831_v16 = vpop.f32.mrb[37].mxu1 }
 0x17c   : > { %1416 = vst [vmem:[%s2382_s30 + $0x30] sm:$0xff] %v1858_v8  ;;  %v719_v15 = vadd.f32 %v718_v13, %v2479_v38  ;;  %v720_v17 = vpop.f32.mrb[38].mxu0  ;;  %1417 = vst [vmem:[%s2382_s30 + $0x38] sm:$0xff] %v1859_v10  ;;  %v832_v19 = vadd.f32 %v831_v16, %v2482_v50  ;;  %v833_v21 = vpop.f32.mrb[38].mxu1 }
 0x17d   : > { %v918_v18 = vmax.f32 %v717_v11, 0.0  ;;  %v721_v20 = vadd.f32 %v720_v17, %v2470_v27  ;;  %v722_v22 = vpop.f32.mrb[39].mxu0  ;;  %v920_v23 = vmax.f32 %v830_v14, 0.0  ;;  %v834_v25 = vadd.f32 %v833_v21, %v2476_v48  ;;  %v835_v28 = vpop.f32.mrb[39].mxu1 }
 0x17e   : > { %v919_v24 = vmax.f32 %v719_v15, 0.0  ;;  %v723_v26 = vadd.f32 %v722_v22, %v2479_v38  ;;  %v921_v29 = vmax.f32 %v832_v19, 0.0  ;;  %v836_v31 = vadd.f32 %v835_v28, %v2482_v50 }
 0x17f   : > { %v926_v30 = vmax.f32 %v721_v20, 0.0  ;;  %v928_v32 = vmax.f32 %v834_v25, 0.0 }
 0x180   : > { %v1862_v42 = vpack.c.bf16 %v919_v24, %v918_v18  ;;  %v927_v33 = vmax.f32 %v723_v26, 0.0  ;;  %v1863_v34 = vpack.c.bf16 %v921_v29, %v920_v23  ;;  %v929_v35 = vmax.f32 %v836_v31, 0.0 }
 0x182   : > { %1420 = vst [vmem:[%s2382_s30 + $0x50] sm:$0xff] %v1862_v42  ;;  %v1866_v36 = vpack.c.bf16 %v927_v33, %v926_v30  ;;  %v726_v37 = vpop.f32.mrb[40].mxu0  ;;  %1421 = vst [vmem:[%s2382_s30 + $0x58] sm:$0xff] %v1863_v34  ;;  %v1867_v39 = vpack.c.bf16 %v929_v35, %v928_v32  ;;  %v839_v40 = vpop.f32.mrb[40].mxu1 }
 0x183   : > { %v727_v49 = vadd.f32 %v726_v37, %v2470_v27  ;;  %v728_v41 = vpop.f32.mrb[41].mxu0  ;;  %v840_v51 = vadd.f32 %v839_v40, %v2476_v48  ;;  %v841_v45 = vpop.f32.mrb[41].mxu1 }
 0x184   : > { %1424 = vst [vmem:[%s2382_s30 + $0x70] sm:$0xff] %v1866_v36  ;;  %v729_v43 = vadd.f32 %v728_v41, %v2479_v38  ;;  %v730_v46 = vpop.f32.mrb[42].mxu0  ;;  %1425 = vst [vmem:[%s2382_s30 + $0x78] sm:$0xff] %v1867_v39  ;;  %v842_v52 = vadd.f32 %v841_v45, %v2482_v50  ;;  %v843_v54 = vpop.f32.mrb[42].mxu1 }
 0x185   : > { %v934_v47 = vmax.f32 %v727_v49, 0.0  ;;  %v731_v53 = vadd.f32 %v730_v46, %v2470_v27  ;;  %v732_v55 = vpop.f32.mrb[43].mxu0  ;;  %v936_v44 = vmax.f32 %v840_v51, 0.0  ;;  %v844_v57 = vadd.f32 %v843_v54, %v2476_v48  ;;  %v845_v59 = vpop.f32.mrb[43].mxu1 }
 0x186   : > { %v935_v56 = vmax.f32 %v729_v43, 0.0  ;;  %v733_v58 = vadd.f32 %v732_v55, %v2479_v38  ;;  %v937_v60 = vmax.f32 %v842_v52, 0.0  ;;  %v846_v62 = vadd.f32 %v845_v59, %v2482_v50 }
 0x187   : > { %v942_v61 = vmax.f32 %v731_v53, 0.0  ;;  %v944_v0 = vmax.f32 %v844_v57, 0.0 }
 0x188   : > { %v1870_v63 = vpack.c.bf16 %v935_v56, %v934_v47  ;;  %v943_v1 = vmax.f32 %v733_v58, 0.0  ;;  %v1871_v2 = vpack.c.bf16 %v937_v60, %v936_v44  ;;  %v945_v3 = vmax.f32 %v846_v62, 0.0 }
 0x18a   : > { %1428 = vst [vmem:[%s2382_s30 + $0x90] sm:$0xff] %v1870_v63  ;;  %v1874_v4 = vpack.c.bf16 %v943_v1, %v942_v61  ;;  %v736_v5 = vpop.f32.mrb[44].mxu0  ;;  %1429 = vst [vmem:[%s2382_s30 + $0x98] sm:$0xff] %v1871_v2  ;;  %v1875_v6 = vpack.c.bf16 %v945_v3, %v944_v0  ;;  %v849_v8 = vpop.f32.mrb[44].mxu1 }
 0x18b   : > { %v737_v7 = vadd.f32 %v736_v5, %v2470_v27  ;;  %v738_v9 = vpop.f32.mrb[45].mxu0  ;;  %v850_v10 = vadd.f32 %v849_v8, %v2476_v48  ;;  %v851_v12 = vpop.f32.mrb[45].mxu1 }
 0x18c   : > { %1432 = vst [vmem:[%s2382_s30 + $0xb0] sm:$0xff] %v1874_v4  ;;  %v739_v11 = vadd.f32 %v738_v9, %v2479_v38  ;;  %v740_v13 = vpop.f32.mrb[46].mxu0  ;;  %1433 = vst [vmem:[%s2382_s30 + $0xb8] sm:$0xff] %v1875_v6  ;;  %v852_v15 = vadd.f32 %v851_v12, %v2482_v50  ;;  %v853_v17 = vpop.f32.mrb[46].mxu1 }
 0x18d   : > { %v950_v14 = vmax.f32 %v737_v7, 0.0  ;;  %v741_v16 = vadd.f32 %v740_v13, %v2470_v27  ;;  %v742_v18 = vpop.f32.mrb[47].mxu0  ;;  %v952_v19 = vmax.f32 %v850_v10, 0.0  ;;  %v854_v21 = vadd.f32 %v853_v17, %v2476_v48  ;;  %v855_v23 = vpop.f32.mrb[47].mxu1 }
 0x18e   : > { %v951_v20 = vmax.f32 %v739_v11, 0.0  ;;  %v743_v22 = vadd.f32 %v742_v18, %v2479_v38  ;;  %v953_v24 = vmax.f32 %v852_v15, 0.0  ;;  %v856_v26 = vadd.f32 %v855_v23, %v2482_v50 }
 0x18f   : > { %v958_v25 = vmax.f32 %v741_v16, 0.0  ;;  %v960_v29 = vmax.f32 %v854_v21, 0.0 }
 0x190   : > { %v1878_v28 = vpack.c.bf16 %v951_v20, %v950_v14  ;;  %v959_v30 = vmax.f32 %v743_v22, 0.0  ;;  %v1879_v31 = vpack.c.bf16 %v953_v24, %v952_v19  ;;  %v961_v42 = vmax.f32 %v856_v26, 0.0 }
 0x192   : > { %1436 = vst [vmem:[%s2382_s30 + $0xd0] sm:$0xff] %v1878_v28  ;;  %v1882_v32 = vpack.c.bf16 %v959_v30, %v958_v25  ;;  %v746_v33 = vpop.f32.mrb[48].mxu0  ;;  %1437 = vst [vmem:[%s2382_s30 + $0xd8] sm:$0xff] %v1879_v31  ;;  %v1883_v34 = vpack.c.bf16 %v961_v42, %v960_v29  ;;  %v859_v36 = vpop.f32.mrb[48].mxu1 }
 0x193   : > { %v747_v35 = vadd.f32 %v746_v33, %v2470_v27  ;;  %v748_v37 = vpop.f32.mrb[49].mxu0  ;;  %v860_v39 = vadd.f32 %v859_v36, %v2476_v48  ;;  %v861_v40 = vpop.f32.mrb[49].mxu1 }
 0x194   : > { %1440 = vst [vmem:[%s2382_s30 + $0xf0] sm:$0xff] %v1882_v32  ;;  %v749_v49 = vadd.f32 %v748_v37, %v2479_v38  ;;  %v750_v41 = vpop.f32.mrb[50].mxu0  ;;  %1441 = vst [vmem:[%s2382_s30 + $0xf8] sm:$0xff] %v1883_v34  ;;  %v862_v43 = vadd.f32 %v861_v40, %v2482_v50  ;;  %v863_v46 = vpop.f32.mrb[50].mxu1 }
 0x195   : > { %v966_v51 = vmax.f32 %v747_v35, 0.0  ;;  %v751_v45 = vadd.f32 %v750_v41, %v2470_v27  ;;  %v752_v47 = vpop.f32.mrb[51].mxu0  ;;  %v968_v52 = vmax.f32 %v860_v39, 0.0  ;;  %v864_v54 = vadd.f32 %v863_v46, %v2476_v48  ;;  %v865_v44 = vpop.f32.mrb[51].mxu1 }
 0x196   : > { %v967_v53 = vmax.f32 %v749_v49, 0.0  ;;  %v753_v55 = vadd.f32 %v752_v47, %v2479_v38  ;;  %v969_v56 = vmax.f32 %v862_v43, 0.0  ;;  %v866_v58 = vadd.f32 %v865_v44, %v2482_v50 }
 0x197   : > { %v974_v57 = vmax.f32 %v751_v45, 0.0  ;;  %v976_v60 = vmax.f32 %v864_v54, 0.0 }
 0x198   : > { %v1886_v59 = vpack.c.bf16 %v967_v53, %v966_v51  ;;  %v975_v61 = vmax.f32 %v753_v55, 0.0  ;;  %v1887_v62 = vpack.c.bf16 %v969_v56, %v968_v52  ;;  %v977_v63 = vmax.f32 %v866_v58, 0.0 }
 0x19a   : > { %1444 = vst [vmem:[%s2382_s30 + $0x110] sm:$0xff] %v1886_v59  ;;  %v1890_v0 = vpack.c.bf16 %v975_v61, %v974_v57  ;;  %v756_v1 = vpop.f32.mrb[52].mxu0  ;;  %1445 = vst [vmem:[%s2382_s30 + $0x118] sm:$0xff] %v1887_v62  ;;  %v1891_v2 = vpack.c.bf16 %v977_v63, %v976_v60  ;;  %v869_v4 = vpop.f32.mrb[52].mxu1 }
 0x19b   : > { %v757_v3 = vadd.f32 %v756_v1, %v2470_v27  ;;  %v758_v5 = vpop.f32.mrb[53].mxu0  ;;  %v870_v6 = vadd.f32 %v869_v4, %v2476_v48  ;;  %v871_v8 = vpop.f32.mrb[53].mxu1 }
 0x19c   : > { %1448 = vst [vmem:[%s2382_s30 + $0x130] sm:$0xff] %v1890_v0  ;;  %v759_v7 = vadd.f32 %v758_v5, %v2479_v38  ;;  %v760_v9 = vpop.f32.mrb[54].mxu0  ;;  %1449 = vst [vmem:[%s2382_s30 + $0x138] sm:$0xff] %v1891_v2  ;;  %v872_v11 = vadd.f32 %v871_v8, %v2482_v50  ;;  %v873_v13 = vpop.f32.mrb[54].mxu1 }
 0x19d   : > { %v982_v10 = vmax.f32 %v757_v3, 0.0  ;;  %v761_v12 = vadd.f32 %v760_v9, %v2470_v27  ;;  %v762_v14 = vpop.f32.mrb[55].mxu0  ;;  %v984_v15 = vmax.f32 %v870_v6, 0.0  ;;  %v874_v17 = vadd.f32 %v873_v13, %v2476_v48  ;;  %v875_v19 = vpop.f32.mrb[55].mxu1 }
 0x19e   : > { %v983_v16 = vmax.f32 %v759_v7, 0.0  ;;  %v763_v18 = vadd.f32 %v762_v14, %v2479_v38  ;;  %v985_v20 = vmax.f32 %v872_v11, 0.0  ;;  %v876_v22 = vadd.f32 %v875_v19, %v2482_v50 }
 0x19f   : > { %v990_v21 = vmax.f32 %v761_v12, 0.0  ;;  %v992_v24 = vmax.f32 %v874_v17, 0.0 }
 0x1a0   : > { %v1894_v23 = vpack.c.bf16 %v983_v16, %v982_v10  ;;  %v991_v25 = vmax.f32 %v763_v18, 0.0  ;;  %v1895_v26 = vpack.c.bf16 %v985_v20, %v984_v15  ;;  %v993_v28 = vmax.f32 %v876_v22, 0.0 }
 0x1a2   : > { %1452 = vst [vmem:[%s2382_s30 + $0x150] sm:$0xff] %v1894_v23  ;;  %v1898_v29 = vpack.c.bf16 %v991_v25, %v990_v21  ;;  %v766_v30 = vpop.f32.mrb[56].mxu0  ;;  %1453 = vst [vmem:[%s2382_s30 + $0x158] sm:$0xff] %v1895_v26  ;;  %v1899_v31 = vpack.c.bf16 %v993_v28, %v992_v24  ;;  %v879_v32 = vpop.f32.mrb[56].mxu1  ;;  %v1502_v25 = vld [vmem:[%s2382_s30 + $0x18] sm:$0xff] (%p2745_p10)  ;;  %v1504_v26 = vld [vmem:[%s2382_s30 + $0x20] sm:$0xff] (%p2745_p10) }
 0x1a3   : > { %v767_v42 = vadd.f32 %v766_v30, %v2470_v27  ;;  %v768_v33 = vpop.f32.mrb[57].mxu0  ;;  %v880_v34 = vadd.f32 %v879_v32, %v2476_v48  ;;  %v881_v36 = vpop.f32.mrb[57].mxu1  ;;  %v1506_v28 = vld [vmem:[%s2382_s30 + $0x28] sm:$0xff] (%p2745_p10)  ;;  %1503 = vst [vmem:[%s2593_s22 + $0x18] sm:$0xff] (%p2745_p10), %v1502_v25  ;;  %1505 = vst [vmem:[%s2593_s22 + $0x40] sm:$0xff] (%p2745_p10), %v1504_v26  ;;  %v1510_v30 = vld [vmem:[%s2382_s30 + $0x38] sm:$0xff] (%p2745_p10) }
 0x1a4   : > { %1456 = vst [vmem:[%s2382_s30 + $0x170] sm:$0xff] %v1898_v29  ;;  %v769_v35 = vadd.f32 %v768_v33, %v2479_v38  ;;  %v770_v37 = vpop.f32.mrb[58].mxu0  ;;  %1457 = vst [vmem:[%s2382_s30 + $0x178] sm:$0xff] %v1899_v31  ;;  %v882_v49 = vadd.f32 %v881_v36, %v2482_v50  ;;  %v883_v41 = vpop.f32.mrb[58].mxu1  ;;  %v1508_v29 = vld [vmem:[%s2382_s30 + $0x30] sm:$0xff] (%p2745_p10)  ;;  %v1512_v31 = vld [vmem:[%s2382_s30 + $0x40] sm:$0xff] (%p2745_p10) }
 0x1a5   : > { %v998_v39 = vmax.f32 %v767_v42, 0.0  ;;  %v771_v40 = vadd.f32 %v770_v37, %v2470_v27  ;;  %v772_v51 = vpop.f32.mrb[59].mxu0  ;;  %v1000_v43 = vmax.f32 %v880_v34, 0.0  ;;  %v884_v46 = vadd.f32 %v883_v41, %v2476_v48  ;;  %v885_v52 = vpop.f32.mrb[59].mxu1  ;;  %1507 = vst [vmem:[%s2593_s22 + $0x48] sm:$0xff] (%p2745_p10), %v1506_v28  ;;  %1509 = vst [vmem:[%s2593_s22 + $0x50] sm:$0xff] (%p2745_p10), %v1508_v29 }
 0x1a6   : > { %v999_v45 = vmax.f32 %v769_v35, 0.0  ;;  %v773_v47 = vadd.f32 %v772_v51, %v2479_v38  ;;  %v1001_v53 = vmax.f32 %v882_v49, 0.0  ;;  %v886_v55 = vadd.f32 %v885_v52, %v2482_v50  ;;  %1511 = vst [vmem:[%s2593_s22 + $0x58] sm:$0xff] (%p2745_p10), %v1510_v30  ;;  %1513 = vst [vmem:[%s2593_s22 + $0x80] sm:$0xff] (%p2745_p10), %v1512_v31  ;;  %v1514_v42 = vld [vmem:[%s2382_s30 + $0x48] sm:$0xff] (%p2745_p10)  ;;  %v1516_v32 = vld [vmem:[%s2382_s30 + $0x50] sm:$0xff] (%p2745_p10) }
 0x1a7   : > { %v1006_v54 = vmax.f32 %v771_v40, 0.0  ;;  %v1008_v56 = vmax.f32 %v884_v46, 0.0  ;;  %v1518_v33 = vld [vmem:[%s2382_s30 + $0x58] sm:$0xff] (%p2745_p10)  ;;  %1515 = vst [vmem:[%s2593_s22 + $0x88] sm:$0xff] (%p2745_p10), %v1514_v42  ;;  %1517 = vst [vmem:[%s2593_s22 + $0x90] sm:$0xff] (%p2745_p10), %v1516_v32  ;;  %v1520_v34 = vld [vmem:[%s2382_s30 + $0x60] sm:$0xff] (%p2745_p10) }
 0x1a8   : > { %v1902_v44 = vpack.c.bf16 %v999_v45, %v998_v39  ;;  %v1007_v57 = vmax.f32 %v773_v47, 0.0  ;;  %v1903_v58 = vpack.c.bf16 %v1001_v53, %v1000_v43  ;;  %v1009_v59 = vmax.f32 %v886_v55, 0.0  ;;  %1519 = vst [vmem:[%s2593_s22 + $0x98] sm:$0xff] (%p2745_p10), %v1518_v33  ;;  %v1522_v35 = vld [vmem:[%s2382_s30 + $0x68] sm:$0xff] (%p2745_p10)  ;;  %v1524_v36 = vld [vmem:[%s2382_s30 + $0x70] sm:$0xff] (%p2745_p10)  ;;  %1521 = vst [vmem:[%s2593_s22 + $0xc0] sm:$0xff] (%p2745_p10), %v1520_v34 }
 0x1a9   : > { %1523 = vst [vmem:[%s2593_s22 + $0xc8] sm:$0xff] (%p2745_p10), %v1522_v35  ;;  %1525 = vst [vmem:[%s2593_s22 + $0xd0] sm:$0xff] (%p2745_p10), %v1524_v36  ;;  %v1526_v37 = vld [vmem:[%s2382_s30 + $0x78] sm:$0xff] (%p2745_p10)  ;;  %v1528_v39 = vld [vmem:[%s2382_s30 + $0x80] sm:$0xff] (%p2745_p10) }
 0x1aa   : > { %1460 = vst [vmem:[%s2382_s30 + $0x190] sm:$0xff] %v1902_v44  ;;  %v1906_v60 = vpack.c.bf16 %v1007_v57, %v1006_v54  ;;  %v776_v61 = vpop.f32.mrb[60].mxu0  ;;  %1461 = vst [vmem:[%s2382_s30 + $0x198] sm:$0xff] %v1903_v58  ;;  %v1907_v62 = vpack.c.bf16 %v1009_v59, %v1008_v56  ;;  %v889_v0 = vpop.f32.mrb[60].mxu1  ;;  %v1530_v49 = vld [vmem:[%s2382_s30 + $0x88] sm:$0xff] (%p2745_p10)  ;;  %v1532_v40 = vld [vmem:[%s2382_s30 + $0x90] sm:$0xff] (%p2745_p10) }
 0x1ab   : > { %v777_v63 = vadd.f32 %v776_v61, %v2470_v27  ;;  %v778_v1 = vpop.f32.mrb[61].mxu0  ;;  %v890_v2 = vadd.f32 %v889_v0, %v2476_v48  ;;  %v891_v4 = vpop.f32.mrb[61].mxu1  ;;  %1527 = vst [vmem:[%s2593_s22 + $0xd8] sm:$0xff] (%p2745_p10), %v1526_v37  ;;  %1529 = vst [vmem:[%s2593_s22 + $0x100] sm:$0xff] (%p2745_p10), %v1528_v39  ;;  %v1534_v41 = vld [vmem:[%s2382_s30 + $0x98] sm:$0xff] (%p2745_p10)  ;;  %v1536_v51 = vld [vmem:[%s2382_s30 + $0xa0] sm:$0xff] (%p2745_p10) }
 0x1ac   : > { %1464 = vst [vmem:[%s2382_s30 + $0x1b0] sm:$0xff] %v1906_v60  ;;  %v779_v3 = vadd.f32 %v778_v1, %v2479_v38  ;;  %v780_v5 = vpop.f32.mrb[62].mxu0  ;;  %1465 = vst [vmem:[%s2382_s30 + $0x1b8] sm:$0xff] %v1907_v62  ;;  %v892_v7 = vadd.f32 %v891_v4, %v2482_v50  ;;  %v893_v9 = vpop.f32.mrb[62].mxu1  ;;  %v1538_v43 = vld [vmem:[%s2382_s30 + $0xa8] sm:$0xff] (%p2745_p10)  ;;  %v1540_v45 = vld [vmem:[%s2382_s30 + $0xb0] sm:$0xff] (%p2745_p10) }
 0x1ad   : > { %v1014_v6 = vmax.f32 %v777_v63, 0.0  ;;  %v781_v8 = vadd.f32 %v780_v5, %v2470_v27  ;;  %v782_v10 = vpop.f32.mrb[63].mxu0  ;;  %v1016_v11 = vmax.f32 %v890_v2, 0.0  ;;  %v894_v13 = vadd.f32 %v893_v9, %v2476_v48  ;;  %v895_v15 = vpop.f32.mrb[63].mxu1  ;;  %v1496_v48 = vld [vmem:[%s2382_s30] sm:$0xff] (%p2745_p10)  ;;  %1531 = vst [vmem:[%s2593_s22 + $0x108] sm:$0xff] (%p2745_p10), %v1530_v49 }
 0x1ae   : > { %v1015_v12 = vmax.f32 %v779_v3, 0.0  ;;  %v783_v14 = vadd.f32 %v782_v10, %v2479_v38  ;;  %v1017_v16 = vmax.f32 %v892_v7, 0.0  ;;  %v896_v18 = vadd.f32 %v895_v15, %v2482_v50  ;;  %1480 = sbr.rel (!%p2745_p10) target bundleno = 457 (0x1c9), region = 44  ;;  %v1498_v38 = vld [vmem:[%s2382_s30 + $0x8] sm:$0xff] (%p2745_p10)  ;;  %v1500_v50 = vld [vmem:[%s2382_s30 + $0x10] sm:$0xff] (%p2745_p10)  ;;  %1497 = vst [vmem:[%s2593_s22] sm:$0xff] (%p2745_p10), %v1496_v48  ;;  %1533 = vst [vmem:[%s2593_s22 + $0x110] sm:$0xff] (%p2745_p10), %v1532_v40 }
 0x1af   : > { %v1022_v17 = vmax.f32 %v781_v8, 0.0  ;;  %v1024_v20 = vmax.f32 %v894_v13, 0.0  ;;  %1499 = vst [vmem:[%s2593_s22 + $0x8] sm:$0xff] (%p2745_p10), %v1498_v38  ;;  %1501 = vst [vmem:[%s2593_s22 + $0x10] sm:$0xff] (%p2745_p10), %v1500_v50  ;;  %v1542_v46 = vld [vmem:[%s2382_s30 + $0xb8] sm:$0xff] (%p2745_p10)  ;;  %v1544_v47 = vld [vmem:[%s2382_s30 + $0xc0] sm:$0xff] (%p2745_p10) }
 0x1b0   : > { %v1910_v19 = vpack.c.bf16 %v1015_v12, %v1014_v6  ;;  %v1023_v27 = vmax.f32 %v783_v14, 0.0  ;;  %v1911_v21 = vpack.c.bf16 %v1017_v16, %v1016_v11  ;;  %v1025_v22 = vmax.f32 %v896_v18, 0.0  ;;  %1535 = vst [vmem:[%s2593_s22 + $0x118] sm:$0xff] (%p2745_p10), %v1534_v41  ;;  %1537 = vst [vmem:[%s2593_s22 + $0x140] sm:$0xff] (%p2745_p10), %v1536_v51  ;;  %v1546_v52 = vld [vmem:[%s2382_s30 + $0xc8] sm:$0xff] (%p2745_p10)  ;;  %v1548_v53 = vld [vmem:[%s2382_s30 + $0xd0] sm:$0xff] (%p2745_p10) }
 0x1b1   : > { %1539 = vst [vmem:[%s2593_s22 + $0x148] sm:$0xff] (%p2745_p10), %v1538_v43  ;;  %1541 = vst [vmem:[%s2593_s22 + $0x150] sm:$0xff] (%p2745_p10), %v1540_v45  ;;  %v1550_v54 = vld [vmem:[%s2382_s30 + $0xd8] sm:$0xff] (%p2745_p10)  ;;  %v1552_v55 = vld [vmem:[%s2382_s30 + $0xe0] sm:$0xff] (%p2745_p10) }
 0x1b2   : > { %1468 = vst [vmem:[%s2382_s30 + $0x1d0] sm:$0xff] %v1910_v19  ;;  %v1914_v23 = vpack.c.bf16 %v1023_v27, %v1022_v17  ;;  %1469 = vst [vmem:[%s2382_s30 + $0x1d8] sm:$0xff] %v1911_v21  ;;  %v1915_v24 = vpack.c.bf16 %v1025_v22, %v1024_v20  ;;  %v1554_v44 = vld [vmem:[%s2382_s30 + $0xe8] sm:$0xff] (%p2745_p10)  ;;  %v1556_v56 = vld [vmem:[%s2382_s30 + $0xf0] sm:$0xff] (%p2745_p10) }
 0x1b3   : > { %1543 = vst [vmem:[%s2593_s22 + $0x158] sm:$0xff] (%p2745_p10), %v1542_v46  ;;  %1545 = vst [vmem:[%s2593_s22 + $0x180] sm:$0xff] (%p2745_p10), %v1544_v47  ;;  %v1558_v57 = vld [vmem:[%s2382_s30 + $0xf8] sm:$0xff] (%p2745_p10)  ;;  %v1560_v58 = vld [vmem:[%s2382_s30 + $0x100] sm:$0xff] (%p2745_p10) }
 0x1b4   : > { %1472 = vst [vmem:[%s2382_s30 + $0x1f0] sm:$0xff] %v1914_v23  ;;  %1473 = vst [vmem:[%s2382_s30 + $0x1f8] sm:$0xff] %v1915_v24  ;;  %v1562_v59 = vld [vmem:[%s2382_s30 + $0x108] sm:$0xff] (%p2745_p10)  ;;  %v1564_v60 = vld [vmem:[%s2382_s30 + $0x110] sm:$0xff] (%p2745_p10) }
 0x1b5   : > { %1547 = vst [vmem:[%s2593_s22 + $0x188] sm:$0xff] %v1546_v52  ;;  %1549 = vst [vmem:[%s2593_s22 + $0x190] sm:$0xff] %v1548_v53  ;;  %v1566_v61 = vld [vmem:[%s2382_s30 + $0x118] sm:$0xff]  ;;  %v1568_v62 = vld [vmem:[%s2382_s30 + $0x120] sm:$0xff] }
 0x1b6   : > { %1551 = vst [vmem:[%s2593_s22 + $0x198] sm:$0xff] %v1550_v54  ;;  %1553 = vst [vmem:[%s2593_s22 + $0x1c0] sm:$0xff] %v1552_v55  ;;  %v1570_v63 = vld [vmem:[%s2382_s30 + $0x128] sm:$0xff]  ;;  %v1572_v0 = vld [vmem:[%s2382_s30 + $0x130] sm:$0xff] }
 0x1b7   : > { %1555 = vst [vmem:[%s2593_s22 + $0x1c8] sm:$0xff] %v1554_v44  ;;  %1557 = vst [vmem:[%s2593_s22 + $0x1d0] sm:$0xff] %v1556_v56  ;;  %v1574_v1 = vld [vmem:[%s2382_s30 + $0x138] sm:$0xff]  ;;  %v1576_v2 = vld [vmem:[%s2382_s30 + $0x140] sm:$0xff] }
 0x1b8   : > { %1559 = vst [vmem:[%s2593_s22 + $0x1d8] sm:$0xff] %v1558_v57  ;;  %1561 = vst [vmem:[%s2593_s22 + $0x200] sm:$0xff] %v1560_v58  ;;  %v1578_v3 = vld [vmem:[%s2382_s30 + $0x148] sm:$0xff]  ;;  %v1580_v4 = vld [vmem:[%s2382_s30 + $0x150] sm:$0xff] }
 0x1b9   : > { %1563 = vst [vmem:[%s2593_s22 + $0x208] sm:$0xff] %v1562_v59  ;;  %1565 = vst [vmem:[%s2593_s22 + $0x210] sm:$0xff] %v1564_v60  ;;  %v1582_v5 = vld [vmem:[%s2382_s30 + $0x158] sm:$0xff]  ;;  %v1584_v6 = vld [vmem:[%s2382_s30 + $0x160] sm:$0xff] }
 0x1ba   : > { %1567 = vst [vmem:[%s2593_s22 + $0x218] sm:$0xff] %v1566_v61  ;;  %1569 = vst [vmem:[%s2593_s22 + $0x240] sm:$0xff] %v1568_v62  ;;  %v1586_v7 = vld [vmem:[%s2382_s30 + $0x168] sm:$0xff]  ;;  %v1588_v8 = vld [vmem:[%s2382_s30 + $0x170] sm:$0xff] }
 0x1bb   : > { %1571 = vst [vmem:[%s2593_s22 + $0x248] sm:$0xff] %v1570_v63  ;;  %1573 = vst [vmem:[%s2593_s22 + $0x250] sm:$0xff] %v1572_v0  ;;  %v1590_v9 = vld [vmem:[%s2382_s30 + $0x178] sm:$0xff]  ;;  %v1592_v10 = vld [vmem:[%s2382_s30 + $0x180] sm:$0xff] }
 0x1bc   : > { %1575 = vst [vmem:[%s2593_s22 + $0x258] sm:$0xff] %v1574_v1  ;;  %1577 = vst [vmem:[%s2593_s22 + $0x280] sm:$0xff] %v1576_v2  ;;  %v1594_v11 = vld [vmem:[%s2382_s30 + $0x188] sm:$0xff]  ;;  %v1596_v12 = vld [vmem:[%s2382_s30 + $0x190] sm:$0xff] }
 0x1bd   : > { %1579 = vst [vmem:[%s2593_s22 + $0x288] sm:$0xff] %v1578_v3  ;;  %1581 = vst [vmem:[%s2593_s22 + $0x290] sm:$0xff] %v1580_v4  ;;  %v1598_v13 = vld [vmem:[%s2382_s30 + $0x198] sm:$0xff]  ;;  %v1600_v14 = vld [vmem:[%s2382_s30 + $0x1a0] sm:$0xff] }
 0x1be   : > { %1583 = vst [vmem:[%s2593_s22 + $0x298] sm:$0xff] %v1582_v5  ;;  %1585 = vst [vmem:[%s2593_s22 + $0x2c0] sm:$0xff] %v1584_v6  ;;  %v1602_v15 = vld [vmem:[%s2382_s30 + $0x1a8] sm:$0xff]  ;;  %v1604_v16 = vld [vmem:[%s2382_s30 + $0x1b0] sm:$0xff] }
 0x1bf   : > { %1587 = vst [vmem:[%s2593_s22 + $0x2c8] sm:$0xff] %v1586_v7  ;;  %1589 = vst [vmem:[%s2593_s22 + $0x2d0] sm:$0xff] %v1588_v8  ;;  %v1606_v17 = vld [vmem:[%s2382_s30 + $0x1b8] sm:$0xff]  ;;  %v1608_v18 = vld [vmem:[%s2382_s30 + $0x1c0] sm:$0xff] }
 0x1c0   : > { %1591 = vst [vmem:[%s2593_s22 + $0x2d8] sm:$0xff] %v1590_v9  ;;  %1593 = vst [vmem:[%s2593_s22 + $0x300] sm:$0xff] %v1592_v10  ;;  %v1610_v19 = vld [vmem:[%s2382_s30 + $0x1c8] sm:$0xff]  ;;  %v1612_v20 = vld [vmem:[%s2382_s30 + $0x1d0] sm:$0xff] }
 0x1c1   : > { %1595 = vst [vmem:[%s2593_s22 + $0x308] sm:$0xff] %v1594_v11  ;;  %1597 = vst [vmem:[%s2593_s22 + $0x310] sm:$0xff] %v1596_v12  ;;  %v1614_v27 = vld [vmem:[%s2382_s30 + $0x1d8] sm:$0xff]  ;;  %v1616_v21 = vld [vmem:[%s2382_s30 + $0x1e0] sm:$0xff] }
 0x1c2   : > { %1599 = vst [vmem:[%s2593_s22 + $0x318] sm:$0xff] %v1598_v13  ;;  %1601 = vst [vmem:[%s2593_s22 + $0x340] sm:$0xff] %v1600_v14  ;;  %v1618_v22 = vld [vmem:[%s2382_s30 + $0x1e8] sm:$0xff]  ;;  %v1620_v23 = vld [vmem:[%s2382_s30 + $0x1f0] sm:$0xff] }
 0x1c3   : > { %1603 = vst [vmem:[%s2593_s22 + $0x348] sm:$0xff] %v1602_v15  ;;  %1605 = vst [vmem:[%s2593_s22 + $0x350] sm:$0xff] %v1604_v16  ;;  %v1622_v24 = vld [vmem:[%s2382_s30 + $0x1f8] sm:$0xff] }
 0x1c4   : > { %1607 = vst [vmem:[%s2593_s22 + $0x358] sm:$0xff] %v1606_v17  ;;  %1609 = vst [vmem:[%s2593_s22 + $0x380] sm:$0xff] %v1608_v18 }
 0x1c5   : > { %1611 = vst [vmem:[%s2593_s22 + $0x388] sm:$0xff] %v1610_v19  ;;  %1613 = vst [vmem:[%s2593_s22 + $0x390] sm:$0xff] %v1612_v20 }
 0x1c6   : > { %1615 = vst [vmem:[%s2593_s22 + $0x398] sm:$0xff] %v1614_v27  ;;  %1617 = vst [vmem:[%s2593_s22 + $0x3c0] sm:$0xff] %v1616_v21 }
 0x1c7   : > { %1619 = vst [vmem:[%s2593_s22 + $0x3c8] sm:$0xff] %v1618_v22  ;;  %1621 = vst [vmem:[%s2593_s22 + $0x3d0] sm:$0xff] %v1620_v23 }
 0x1c8   : > { %1623 = vst [vmem:[%s2593_s22 + $0x3d8] sm:$0xff] %v1622_v24 }
 0x1c9 PF: > { %p16_p12 = scmp.ge.s32.totalorder %s2121_s17, 4   ;;  %s2746_s12 = smov %s2063_s13 }
 0x1ca   : > { %s2747_s13 = smov %s2067_s14  ;;  %s2748_s14 = smov %s2131_s20 }
 0x1cb   : > { %s2749_s15 = smov %s2121_s17  ;;  %18 = sbr.rel (!%p16_p12) target bundleno = 5 (0x5), region = 108 }
 0x1d2   :  { %1639 = vsyncpa [#allocation3], 1 }
 0x1d3   :  { %1641 = vsyncpa [#allocation3 + $0x1], 1 }
 0x1d4   :  { %1642 = vsyncpa [#allocation5], 1 }
 0x1d5   :  { %1644 = vsyncpa [#allocation5 + $0x1], 1 }

// kernel: object_detection_forward.5
= control target key start
LH: loop header
LB: loop body
LE: loop exit
PB: predicated region body
PF: predicated region fallthrough
CT: control target
= control target key end

     0   :  { %10 = vsyncpa [#allocation3], 0  ;;  %s858_s0 = inlined_call_operand.vmem [shape: bf16[8,256], index: 0, kind: input, shape index: {}]   ;;  %s859_s1 = inlined_call_operand.hbm [shape: bf16[256,256], index: 1, kind: input, shape index: {}]   ;;  %s860_s2 = inlined_call_operand.hbm [shape: f32[1,256], index: 2, kind: input, shape index: {}]   ;;  %s861_s3 = inlined_call_operand.hbm [shape: bf16[256,128], index: 3, kind: input, shape index: {}]   ;;  %s862_s4 = inlined_call_operand.hbm [shape: f32[1,128], index: 4, kind: input, shape index: {}]   ;;  %s863_s5 = inlined_call_operand.vmem [shape: f32[8,128], index: 5, kind: output, shape index: {}]  }
   0x1   :  { %11 = vsyncpa [#allocation5], 0 }
   0x2   :  { %12 = vsyncpa [#allocation8], 0  ;;  %s753_s18 = smov [#allocation4]   ;;  %s754_s20 = smov [#allocation2]  }
   0x3   :  { %s33_s19 = sshll.u32 %s753_s18, 4  ;;  %s20_s21 = sshll.u32 %s754_s20, 4  ;;  %s34_s19 = int_to_ptr.vmem [resolvable:$true] %s33_s19  ;;  %s791_s21 = int_to_ptr.vmem [resolvable:$true] %s20_s21 }
   0x4   :  { %s659_s24 = scalar_lea.hbm %s860_s2, 32 }
   0x5   :  { %p660_p0 = scmp.ne.s32.totalorder %s860_s2, %s659_s24  ;;  %p663_p1 = scmp.lt.u32.totalorder %s659_s24, %s860_s2 }
   0x7   :  { %p665_p2 = pnand %p663_p1, %p660_p0 }
   0x9   :  { %668 = shalt.err (!%p665_p2)
}
   0xa   :  { %s669_s29 = scalar_lea.vmem %s34_s19, 32  ;;  %p674_p4 = scmp.lt.s32.totalorder %s34_s19, %s34_s19 }
   0xb   :  { %p670_p3 = scmp.ne.s32.totalorder %s34_s19, %s669_s29  ;;  %p675_p5 = scmp.lt.s32.totalorder %s669_s29, %s669_s29 }
   0xd   :  { %p676_p6 = por %p675_p5, %p674_p4 }
   0xf   :  { %p677_p7 = pnand %p676_p6, %p670_p3 }
  0x11   :  { %680 = shalt.err (!%p677_p7)
}
  0x12   :  { %36 = dma.hbm_to_vmem [thread:$0]  %s860_s2, 32, %s34_s19, [#allocation5]  }
  0x13   :  { %s681_s9 = scalar_lea.hbm %s859_s1, 4096 }
  0x14   :  { %p682_p8 = scmp.ne.s32.totalorder %s859_s1, %s681_s9  ;;  %p685_p9 = scmp.lt.u32.totalorder %s681_s9, %s859_s1 }
  0x16   :  { %p687_p10 = pnand %p685_p9, %p682_p8 }
  0x18   :  { %690 = shalt.err (!%p687_p10)
}
  0x19   :  { %s691_s14 = scalar_lea.vmem %s791_s21, 4096  ;;  %p696_p12 = scmp.lt.s32.totalorder %s791_s21, %s791_s21 }
  0x1a   :  { %p692_p11 = scmp.ne.s32.totalorder %s791_s21, %s691_s14  ;;  %p697_p13 = scmp.lt.s32.totalorder %s691_s14, %s691_s14 }
  0x1c   :  { %p698_p0 = por %p697_p13, %p696_p12 }
  0x1e   :  { %p699_p1 = pnand %p698_p0, %p692_p11 }
  0x20   :  { %702 = shalt.err (!%p699_p1)
}
  0x21   :  { %s755_s2 = smov 128   ;;  %s756_s15 = smov 8  }
  0x22   :  { %26 = dma.hbm_to_vmem [thread:$0]  %s859_s1, 4096, %s791_s21, [#allocation3], %s755_s2, %s755_s2, %s756_s15  }
  0x23   :  { %s757_s18 = smov [#allocation6]   ;;  %s703_s23 = scalar_lea.hbm %s861_s3, 2048 }
  0x24   :  { %s42_s19 = sshll.u32 %s757_s18, 4  ;;  %p704_p2 = scmp.ne.s32.totalorder %s861_s3, %s703_s23  ;;  %s43_s19 = int_to_ptr.vmem [resolvable:$true] %s42_s19 }
  0x25   :  { %p707_p3 = scmp.lt.u32.totalorder %s703_s23, %s861_s3 }
  0x27   :  { %p709_p4 = pnand %p707_p3, %p704_p2 }
  0x29   :  { %712 = shalt.err (!%p709_p4)
}
  0x2a   :  { %s713_s28 = scalar_lea.vmem %s43_s19, 2048  ;;  %p718_p6 = scmp.lt.s32.totalorder %s43_s19, %s43_s19 }
  0x2b   :  { %p714_p5 = scmp.ne.s32.totalorder %s43_s19, %s713_s28  ;;  %p719_p7 = scmp.lt.s32.totalorder %s713_s28, %s713_s28 }
  0x2d   :  { %p720_p8 = por %p719_p7, %p718_p6 }
  0x2f   :  { %p721_p9 = pnand %p720_p8, %p714_p5 }
  0x31   :  { %724 = shalt.err (!%p721_p9)
}
  0x32   :  { %s758_s1 = smov 64   ;;  %s759_s21 = smov 4  }
  0x33   :  { %48 = dma.hbm_to_vmem [thread:$0]  %s861_s3, 2048, %s43_s19, [#allocation5], %s758_s1, %s758_s1, %s759_s21  }
  0x34   :  { %s760_s6 = smov [#allocation7]   ;;  %s725_s10 = scalar_lea.hbm %s862_s4, 16 }
  0x35   :  { %s55_s7 = sshll.u32 %s760_s6, 4  ;;  %p726_p10 = scmp.ne.s32.totalorder %s862_s4, %s725_s10  ;;  %s56_s7 = int_to_ptr.vmem [resolvable:$true] %s55_s7 }
  0x36   :  { %p729_p11 = scmp.lt.u32.totalorder %s725_s10, %s862_s4 }
  0x38   :  { %p731_p12 = pnand %p729_p11, %p726_p10 }
  0x3a   :  { %734 = shalt.err (!%p731_p12)
}
  0x3b   :  { %s735_s2 = scalar_lea.vmem %s56_s7, 16  ;;  %s739_s3 = scalar_lea.vmem %s56_s7, 32 }
  0x3c   :  { %p736_p13 = scmp.ne.s32.totalorder %s56_s7, %s735_s2  ;;  %p740_p0 = scmp.lt.s32.totalorder %s56_s7, %s56_s7 }
  0x3d   :  { %p741_p1 = scmp.lt.s32.totalorder %s739_s3, %s735_s2 }
  0x3f   :  { %p742_p2 = por %p741_p1, %p740_p0 }
  0x41   :  { %p743_p3 = pnand %p742_p2, %p736_p13 }
  0x43   :  { %746 = shalt.err (!%p743_p3)
}
  0x44   :  { %58 = dma.hbm_to_vmem [thread:$0]  %s862_s4, 16, %s56_s7, [#allocation8]  }
  0x45   :  { %747 = dma.done.wait [#allocation3], 4096  }
  0x46   :  { %748 = vsyncadd [#allocation3], 4294963200 }
  0x47   :  { %749 = dma.done.wait [#allocation5], 2080  }
  0x48   :  { %750 = vsyncadd [#allocation5], 4294965216 }
  0x49   :  { %751 = dma.done.wait [#allocation8], 16  }
  0x4a   :  { %752 = vsyncadd [#allocation8], 4294967280  ;;  %v593_v0 = vld [vmem:[#allocation2 + $0x4] ss:$8 sps:$4 sm:$0xff]   ;;  %v595_v1 = vld [vmem:[#allocation2] ss:$8 sps:$4 sm:$0xff]   ;;  %v107_v51 = vlaneseq }
  0x4b   :  { %284 = vmatprep.subr.bf16.mxu0 %v593_v0  ;;  %v596_v2 = vld [vmem:[#allocation2 + $0x14] ss:$8 sps:$4 sm:$0xff]   ;;  %v598_v3 = vld [vmem:[#allocation2 + $0x10] ss:$8 sps:$4 sm:$0xff]   ;;  %v599_v4 = vld [vmem:[#allocation2 + $0x24] ss:$8 sps:$4 sm:$0xff]  }
  0x4c   :  { %285 = vmatpush1.bf16.msra.mxu0 %v595_v1  ;;  %v601_v5 = vld [vmem:[#allocation2 + $0x20] ss:$8 sps:$4 sm:$0xff]   ;;  %v602_v6 = vld [vmem:[#allocation2 + $0x34] ss:$8 sps:$4 sm:$0xff]   ;;  %v604_v7 = vld [vmem:[#allocation2 + $0x30] ss:$8 sps:$4 sm:$0xff]  }
  0x4d   :  { %286 = vmatprep.subr.bf16.mxu0 %v596_v2  ;;  %v605_v8 = vld [vmem:[#allocation2 + $0x44] ss:$8 sps:$4 sm:$0xff]   ;;  %v607_v9 = vld [vmem:[#allocation2 + $0x40] ss:$8 sps:$4 sm:$0xff]   ;;  %v608_v10 = vld [vmem:[#allocation2 + $0x54] ss:$8 sps:$4 sm:$0xff]  }
  0x4e   :  { %v610_v11 = vld [vmem:[#allocation2 + $0x50] ss:$8 sps:$4 sm:$0xff]   ;;  %v611_v12 = vld [vmem:[#allocation2 + $0x64] ss:$8 sps:$4 sm:$0xff]   ;;  %v613_v13 = vld [vmem:[#allocation2 + $0x60] ss:$8 sps:$4 sm:$0xff]  }
  0x4f   :  { %v849_v14 = vld [vmem:[%s858_s0] sm:$0xff]  ;;  %v614_v15 = vld [vmem:[#allocation2 + $0x74] ss:$8 sps:$4 sm:$0xff]   ;;  %v645_v19 = vld [vmem:[#allocation6 + $0x48] sm:$0xff]   ;;  %v108_v52 = vshrl.u32 %v107_v51, 7 }
  0x50   :  { %287 = vmatpush1.bf16.msra.mxu0 %v598_v3  ;;  %v513_v16 = vcombine.high %v849_v14, %v849_v14  ;;  %v643_v17 = vld [vmem:[#allocation6 + $0x40] sm:$0xff]   ;;  %v616_v20 = vld [vmem:[#allocation2 + $0x70] ss:$8 sps:$4 sm:$0xff]   ;;  %v620_v27 = vld [vmem:[#allocation2 + $0x94] ss:$8 sps:$4 sm:$0xff]   ;;  %v512_v46 = vcombine.low %v849_v14, %v849_v14 }
  0x51   :  { %288 = vmatprep.subr.bf16.mxu0 %v599_v4  ;;  %v644_v18 = vld [vmem:[#allocation6] sm:$0xff]   ;;  %563 = vmatprep.subr.bf16.mxu1 %v643_v17  ;;  %v646_v21 = vld [vmem:[#allocation6 + $0x8] sm:$0xff]   ;;  %v647_v22 = vld [vmem:[#allocation6 + $0x50] sm:$0xff]   ;;  %v109_v53 = vsub.s32 0, %v108_v52  ;;  %v113_v55 = vsub.s32 1, %v108_v52 }
  0x52   :  { %316 = vmatprep.mubr.bf16.mxu0 %v513_v16  ;;  %564 = vmatpush3.bf16.msra.mxu1 %v644_v18  ;;  %v617_v23 = vld [vmem:[#allocation2 + $0x84] ss:$8 sps:$4 sm:$0xff]   ;;  %v619_v24 = vld [vmem:[#allocation2 + $0x80] ss:$8 sps:$4 sm:$0xff]   ;;  %v648_v25 = vld [vmem:[#allocation6 + $0x10] sm:$0xff]  }
  0x53   :  { %565 = vmatprep.subr.bf16.mxu1 %v645_v19  ;;  %v649_v26 = vld [vmem:[#allocation6 + $0x58] sm:$0xff]   ;;  %v651_v30 = vld [vmem:[#allocation6 + $0x60] sm:$0xff]   ;;  %v653_v34 = vld [vmem:[#allocation6 + $0x68] sm:$0xff]  }
  0x54   :  { %289 = vmatpush1.bf16.msra.mxu0 %v601_v5  ;;  %v622_v28 = vld [vmem:[#allocation2 + $0x90] ss:$8 sps:$4 sm:$0xff]   ;;  %v623_v31 = vld [vmem:[#allocation2 + $0xa4] ss:$8 sps:$4 sm:$0xff]   ;;  %v625_v33 = vld [vmem:[#allocation2 + $0xa0] ss:$8 sps:$4 sm:$0xff]  }
  0x55   :  { %290 = vmatprep.subr.bf16.mxu0 %v602_v6  ;;  %v650_v29 = vld [vmem:[#allocation6 + $0x18] sm:$0xff]   ;;  %v652_v32 = vld [vmem:[#allocation6 + $0x20] sm:$0xff]   ;;  %v654_v36 = vld [vmem:[#allocation6 + $0x28] sm:$0xff]  }
  0x56   :  { %566 = vmatpush3.bf16.msra.mxu1 %v646_v21  ;;  %v626_v35 = vld [vmem:[#allocation2 + $0xb4] ss:$8 sps:$4 sm:$0xff]   ;;  %v628_v37 = vld [vmem:[#allocation2 + $0xb0] ss:$8 sps:$4 sm:$0xff]   ;;  %v629_v38 = vld [vmem:[#allocation2 + $0xc4] ss:$8 sps:$4 sm:$0xff]  }
  0x57   :  { %567 = vmatprep.subr.bf16.mxu1 %v647_v22  ;;  %v631_v39 = vld [vmem:[#allocation2 + $0xc0] ss:$8 sps:$4 sm:$0xff]   ;;  %v632_v40 = vld [vmem:[#allocation2 + $0xd4] ss:$8 sps:$4 sm:$0xff]   ;;  %v634_v41 = vld [vmem:[#allocation2 + $0xd0] ss:$8 sps:$4 sm:$0xff]  }
  0x58   :  { %291 = vmatpush1.bf16.msra.mxu0 %v604_v7  ;;  %v635_v42 = vld [vmem:[#allocation2 + $0xe4] ss:$8 sps:$4 sm:$0xff]   ;;  %v637_v43 = vld [vmem:[#allocation2 + $0xe0] ss:$8 sps:$4 sm:$0xff]   ;;  %v638_v44 = vld [vmem:[#allocation2 + $0xf4] ss:$8 sps:$4 sm:$0xff]  }
  0x59   :  { %292 = vmatprep.subr.bf16.mxu0 %v605_v8  ;;  %v640_v45 = vld [vmem:[#allocation2 + $0xf0] ss:$8 sps:$4 sm:$0xff]   ;;  %v105_v54 = vld [vmem:[#allocation4] sm:$0x3]  ;;  %v546_v5 = vld [vmem:[#allocation7] ss:$0 sm:$0xff] }
  0x5a   :  { %568 = vmatpush3.bf16.msra.mxu1 %v648_v25  ;;  %v655_v47 = vld [vmem:[#allocation6 + $0x70] sm:$0xff]   ;;  %v657_v49 = vld [vmem:[#allocation6 + $0x78] sm:$0xff]   ;;  %v110_v56 = vrot.slane %v105_v54, %v109_v53  ;;  %v114_v57 = vrot.slane %v105_v54, %v113_v55 }
  0x5b   :  { %569 = vmatprep.subr.bf16.mxu1 %v649_v26  ;;  %v656_v48 = vld [vmem:[#allocation6 + $0x30] sm:$0xff]   ;;  %v658_v50 = vld [vmem:[#allocation6 + $0x38] sm:$0xff]  }
  0x5c   :  { %293 = vmatpush1.bf16.msra.mxu0 %v607_v9 }
  0x5d   :  { %294 = vmatprep.subr.bf16.mxu0 %v608_v10 }
  0x5e   :  { %570 = vmatpush3.bf16.msra.mxu1 %v650_v29 }
  0x5f   :  { %571 = vmatprep.subr.bf16.mxu1 %v651_v30 }
  0x60   :  { %295 = vmatpush1.bf16.msra.mxu0 %v610_v11 }
  0x61   :  { %296 = vmatprep.subr.bf16.mxu0 %v611_v12 }
  0x62   :  { %572 = vmatpush3.bf16.msra.mxu1 %v652_v32 }
  0x63   :  { %573 = vmatprep.subr.bf16.mxu1 %v653_v34 }
  0x64   :  { %297 = vmatpush1.bf16.msra.mxu0 %v613_v13 }
  0x65   :  { %298 = vmatprep.subr.bf16.mxu0 %v614_v15 }
  0x66   :  { %574 = vmatpush3.bf16.msra.mxu1 %v654_v36 }
  0x67   :  { %575 = vmatprep.subr.bf16.mxu1 %v655_v47 }
  0x68   :  { %299 = vmatpush1.bf16.msra.mxu0 %v616_v20 }
  0x69   :  { %300 = vmatprep.subr.bf16.mxu0 %v617_v23 }
  0x6a   :  { %576 = vmatpush3.bf16.msra.mxu1 %v656_v48 }
  0x6b   :  { %577 = vmatprep.subr.bf16.mxu1 %v657_v49 }
  0x6c   :  { %301 = vmatpush1.bf16.msra.mxu0 %v619_v24 }
  0x6d   :  { %302 = vmatprep.subr.bf16.mxu0 %v620_v27 }
  0x6e   :  { %578 = vmatpush3.bf16.msra.mxu1 %v658_v50 }
  0x70   :  { %303 = vmatpush1.bf16.msra.mxu0 %v622_v28 }
  0x71   :  { %304 = vmatprep.subr.bf16.mxu0 %v623_v31 }
  0x74   :  { %305 = vmatpush1.bf16.msra.mxu0 %v625_v33 }
  0x75   :  { %306 = vmatprep.subr.bf16.mxu0 %v626_v35 }
  0x78   :  { %307 = vmatpush1.bf16.msra.mxu0 %v628_v37 }
  0x79   :  { %308 = vmatprep.subr.bf16.mxu0 %v629_v38 }
  0x7c   :  { %309 = vmatpush1.bf16.msra.mxu0 %v631_v39 }
  0x7d   :  { %310 = vmatprep.subr.bf16.mxu0 %v632_v40 }
  0x80   :  { %311 = vmatpush1.bf16.msra.mxu0 %v634_v41 }
  0x81   :  { %312 = vmatprep.subr.bf16.mxu0 %v635_v42 }
  0x84   :  { %313 = vmatpush1.bf16.msra.mxu0 %v637_v43 }
  0x85   :  { %314 = vmatprep.subr.bf16.mxu0 %v638_v44 }
  0x88   :  { %315 = vmatpush1.bf16.msra.mxu0 %v640_v45 }
  0x8b   :  { %317 = vmatmul.mubr.bf16.vlgmr.msra.gmra.mrb[0].mxu0 %v512_v46 }
 0x15e   :  { %v318_v58 = vpop.f32.mrb[0].mxu0 }
 0x15f   :  { %v319_v59 = vadd.f32 %v318_v58, %v110_v56  ;;  %v320_v60 = vpop.f32.mrb[1].mxu0 }
 0x160   :  { %v321_v61 = vadd.f32 %v320_v60, %v114_v57  ;;  %v322_v62 = vpop.f32.mrb[2].mxu0 }
 0x161   :  { %v325_v63 = vmax.f32 %v319_v59, 0.0  ;;  %v323_v0 = vpop.f32.mrb[3].mxu0 }
 0x162   :  { %v326_v1 = vmax.f32 %v321_v61, 0.0 }
 0x163   :  { %v327_v3 = vpack.c.bf16 %v325_v63, %v325_v63 }
 0x164   :  { %v328_v2 = vpack.c.bf16 %v326_v1, %v326_v1 }
 0x166   :  { %496 = vmatprep.mubr.bf16.mxu1 %v328_v2 }
 0x167   :  { %497 = vmatmul.mubr.bf16.vlgmr.msra.gmra.mrb[0].mxu1 %v327_v3 }
 0x23a   :  { %v579_v4 = vpop.f32.mrb[0].mxu1 }
 0x23b   :  { %v580_v6 = vpop.f32.mrb[1].mxu1 }
 0x23c   :  { %v581_v7 = vadd.f32 %v580_v6, %v579_v4  ;;  %v582_v8 = vpop.f32.mrb[2].mxu1 }
 0x23d   :  { %v583_v9 = vpop.f32.mrb[3].mxu1 }
 0x23e   :  { %v499_v10 = vadd.f32 %v581_v7, %v546_v5 }
 0x240   :  { %504 = vst [vmem:[%s863_s5] sm:$0xff] %v499_v10 }
 0x241   :  { %509 = vsyncpa [#allocation3], 1 }
 0x242   :  { %510 = vsyncpa [#allocation5], 1 }
 0x243   :  { %511 = vsyncpa [#allocation8], 1 }

// kernel: object_detection_forward.4
= control target key start
LH: loop header
LB: loop body
LE: loop exit
PB: predicated region body
PF: predicated region fallthrough
CT: control target
= control target key end

     0   :  { %s16446_s0 = inlined_call_operand.vmem [shape: bf16[2,10,10,2048], index: 0, kind: input, shape index: {}]   ;;  %s16447_s1 = inlined_call_operand.hbm [shape: bf16[9,2048,256], index: 1, kind: input, shape index: {}]   ;;  %s16448_s2 = inlined_call_operand.hbm [shape: f32[1,256], index: 2, kind: input, shape index: {}]   ;;  %s16449_s3 = inlined_call_operand.hbm [shape: bf16[2,128,128], index: 3, kind: input, shape index: {}]   ;;  %s16450_s4 = inlined_call_operand.vmem [shape: f32[2,128,128], index: 4, kind: output, shape index: {}]  }
   0x1   :  { %16483 = sst [smem:[#allocation40_spill]] %s16446_s0 }
   0x2   :  { %16484 = sst [smem:[#allocation41_spill]] %s16447_s1 }
   0x3   :  { %9 = vsyncpa [#allocation5], 0 }
   0x4   :  { %11 = vsyncpa [#allocation5 + $0x1], 0 }
   0x5   :  { %12 = vsyncpa [#allocation7], 0 }
   0x6   :  { %14 = vsyncpa [#allocation7 + $0x1], 0  ;;  %s12060_s15 = smov 0   ;;  %s12062_s16 = smov 0  }
   0x7   :  { %s12064_s17 = smov 0   ;;  %s12066_s18 = smov 0  }
   0x8   :  { %s12068_s19 = smov 0   ;;  %s12070_s20 = smov 0  }
   0x9   :  { %s12072_s21 = smov 0   ;;  %s12074_s22 = smov 0  }
   0xa   :  { %s12076_s23 = smov 0   ;;  %s12078_s24 = smov 0  }
   0xb   :  { %s12080_s25 = smov 0   ;;  %s12082_s26 = smov 0  }
   0xc   :  { %s12084_s27 = smov 0  }
   0xd LB: > { %16485 = sst [smem:[#allocation14_spill]] %s11994_s20  ;;  %s16452_s28 = sadd.s32 4294967295, %s12022_s27   ;;  %s12022_s27 = sphi %s12084_s27, %s20_s27   ;;  %s12018_s26 = sphi %s12082_s26, %s16730_s26   ;;  %s12014_s25 = sphi %s12080_s25, %s16720_s25   ;;  %s12010_s24 = sphi %s12078_s24, %s16729_s24   ;;  %s12006_s23 = sphi %s12076_s23, %s16728_s23   ;;  %s12002_s22 = sphi %s12074_s22, %s16718_s22   ;;  %s11998_s21 = sphi %s12072_s21, %s16717_s21   ;;  %s11994_s20 = sphi %s12070_s20, %s16716_s20   ;;  %s11990_s19 = sphi %s12068_s19, %s16727_s19   ;;  %s11986_s18 = sphi %s12066_s18, %s16726_s18   ;;  %s11982_s17 = sphi %s12064_s17, %s16725_s17   ;;  %s11978_s16 = sphi %s12062_s16, %s16724_s16   ;;  %s11974_s15 = sphi %s12060_s15, %s16723_s15  }
   0xe   : > { %16486 = sst [smem:[#allocation15_spill]] %s12002_s22  ;;  %s29_s29 = sadd.s32 1, %s12014_s25 }
   0xf   : > { %16487 = sst [smem:[#allocation16_spill]] %s12014_s25  ;;  %p30_p0 = scmp.ge.s32.totalorder %s29_s29, 4 }
  0x10   : > { %s32_s30 = sadd.s32 1, %s12018_s26  ;;  %s39_s5 = sadd.s32 1, %s12002_s22 }
  0x11   : > { %p46_p1 = scmp.ne.s32.totalorder %s12002_s22, %s11998_s21  ;;  %s16732_s29 = smov (%p30_p0, %s29_s29), 0 }
  0x12   : > { %16488 = sst [smem:[#allocation17_spill]] %s16732_s29  ;;  %s16734_s30 = smov (!%p30_p0, %s32_s30), %s12018_s26 }
  0x13   : > { %s36_s6 = ssub.s32 %s12014_s25, %s16732_s29  ;;  %p47_p2 = scmp.eq.s32.totalorder %s12022_s27, 0 }
  0x14   : > { %p34_p3 = scmp.ge.s32.totalorder %s16734_s30, 2  ;;  %p37_p4 = scmp.eq.s32.totalorder %s36_s6, 0 }
  0x15   : > { %p12139_p5 = por %p47_p2, %p46_p1  ;;  %s67_s8 = sadd.s32 1, %s11994_s20 }
  0x16   : > { %s16736_s30 = smov (%p34_p3, %s16734_s30), 0  ;;  %p74_p6 = scmp.ne.s32.totalorder %s11994_s20, %s11990_s19 }
  0x17   : > { %16490 = sst [smem:[#allocation18_spill]] %s16736_s30  ;;  %s63_s10 = ssub.s32 %s12018_s26, %s16736_s30 }
  0x18   : > { %s12147_s9 = scalar_select %p37_p4, %s12002_s22, %s39_s5  }
  0x19   : > { %s64_s11 = sor.u32 %s63_s10, %s36_s6  ;;  %p80_p7 = scmp.ne.s32.totalorder %s11990_s19, %s11986_s18 }
  0x1a   : > { %16491 = sst [smem:[#allocation19_spill]] %s12147_s9  ;;  %p65_p8 = scmp.eq.s32.totalorder %s64_s11, 0 }
  0x1b   : > { %p12157_p9 = por %p74_p6, %p47_p2  ;;  %p81_p10 = scmp.eq.s32.totalorder %s16452_s28, 0 }
  0x1c   : > { %p91_p11 = scmp.eq.s32.totalorder %s63_s10, 0  ;;  %s93_s5 = sadd.s32 1, %s11982_s17 }
  0x1d   : > { %s12164_s13 = scalar_select %p65_p8, %s11994_s20, %s67_s8  }
  0x1e   : > { %p12166_p12 = por %p81_p10, %p80_p7  ;;  %p100_p13 = scmp.ne.s32.totalorder %s11982_s17, %s11978_s16 }
  0x1f   : > { %16493 = sst [smem:[#allocation20_spill]] %s12164_s13  ;;  %p106_p0 = scmp.ne.s32.totalorder %s11978_s16, %s11974_s15 }
  0x20   : > { %s16494_s14 = scalar_select %p12166_p12, 1, 0 }
  0x21   : > { %s12172_s30 = scalar_select %p91_p11, %s11982_s17, %s93_s5  }
  0x22   : > { %p12180_p1 = por %p100_p13, %p47_p2  ;;  %p12184_p3 = por %p106_p0, %p81_p10 }
  0x23   : > { %16495 = sst [smem:[#allocation21_spill]] %s12172_s30  ;;  %p8694_p4 = scmp.ge.s32.totalorder %s12022_s27, 8 }
  0x24   : > { %s16497_s6 = scalar_select %p12184_p3, 1, 0 }
  0x25   : > { %178 = sbr.rel (%p8694_p4) target bundleno = 159 (0x9f), region = 16 }
  0x2c   : > { %181 = sbr.rel (!%p12139_p5) target bundleno = 94 (0x5e), region = 20  ;;  %s183_s8 = sand.u32 (%p12139_p5), 1, %s12002_s22  }
  0x2d   : > { %s10162_s10 = sshll.u32 (%p12139_p5), %s12014_s25, 4  ;;  %s11382_s15 = smul.u32 (%p12139_p5), 640, %s183_s8 }
  0x2e   : > { %s16498_s0 = sld [smem:[#allocation40_spill]] (%p12139_p5) }
  0x2f   : > { %s12204_s7 = scalar_lea.vmem (%p12139_p5), [#allocation3], %s11382_s15 }
  0x34   : > { %s12196_s28 = scalar_lea.vmem %s16498_s0, %s10162_s10 }
  0x35   : > { %v201_v0 = vld [vmem:[%s12196_s28] sm:$0xff]  ;;  %v203_v1 = vld [vmem:[%s12196_s28 + $0x8] sm:$0xff] }
  0x36   : > { %v205_v2 = vld [vmem:[%s12196_s28 + $0x40] sm:$0xff]  ;;  %v207_v3 = vld [vmem:[%s12196_s28 + $0x48] sm:$0xff]  ;;  %202 = vst [vmem:[%s12204_s7] sm:$0xff] %v201_v0  ;;  %204 = vst [vmem:[%s12204_s7 + $0x8] sm:$0xff] %v203_v1 }
  0x37   : > { %v209_v4 = vld [vmem:[%s12196_s28 + $0x80] sm:$0xff]  ;;  %v211_v5 = vld [vmem:[%s12196_s28 + $0x88] sm:$0xff]  ;;  %206 = vst [vmem:[%s12204_s7 + $0x10] sm:$0xff] %v205_v2  ;;  %208 = vst [vmem:[%s12204_s7 + $0x18] sm:$0xff] %v207_v3 }
  0x38   : > { %210 = vst [vmem:[%s12204_s7 + $0x20] sm:$0xff] %v209_v4  ;;  %212 = vst [vmem:[%s12204_s7 + $0x28] sm:$0xff] %v211_v5  ;;  %v213_v6 = vld [vmem:[%s12196_s28 + $0xc0] sm:$0xff]  ;;  %v215_v7 = vld [vmem:[%s12196_s28 + $0xc8] sm:$0xff] }
  0x39   : > { %v217_v8 = vld [vmem:[%s12196_s28 + $0x100] sm:$0xff]  ;;  %214 = vst [vmem:[%s12204_s7 + $0x30] sm:$0xff] %v213_v6  ;;  %216 = vst [vmem:[%s12204_s7 + $0x38] sm:$0xff] %v215_v7  ;;  %v219_v9 = vld [vmem:[%s12196_s28 + $0x108] sm:$0xff] }
  0x3a   : > { %218 = vst [vmem:[%s12204_s7 + $0x40] sm:$0xff] %v217_v8  ;;  %v221_v10 = vld [vmem:[%s12196_s28 + $0x140] sm:$0xff]  ;;  %v223_v11 = vld [vmem:[%s12196_s28 + $0x148] sm:$0xff]  ;;  %220 = vst [vmem:[%s12204_s7 + $0x48] sm:$0xff] %v219_v9 }
  0x3b   : > { %222 = vst [vmem:[%s12204_s7 + $0x50] sm:$0xff] %v221_v10  ;;  %224 = vst [vmem:[%s12204_s7 + $0x58] sm:$0xff] %v223_v11  ;;  %v225_v12 = vld [vmem:[%s12196_s28 + $0x180] sm:$0xff]  ;;  %v227_v13 = vld [vmem:[%s12196_s28 + $0x188] sm:$0xff] }
  0x3c   : > { %v229_v14 = vld [vmem:[%s12196_s28 + $0x1c0] sm:$0xff]  ;;  %226 = vst [vmem:[%s12204_s7 + $0x60] sm:$0xff] %v225_v12  ;;  %228 = vst [vmem:[%s12204_s7 + $0x68] sm:$0xff] %v227_v13  ;;  %v231_v15 = vld [vmem:[%s12196_s28 + $0x1c8] sm:$0xff] }
  0x3d   : > { %230 = vst [vmem:[%s12204_s7 + $0x70] sm:$0xff] %v229_v14  ;;  %v233_v16 = vld [vmem:[%s12196_s28 + $0x200] sm:$0xff]  ;;  %v235_v17 = vld [vmem:[%s12196_s28 + $0x208] sm:$0xff]  ;;  %232 = vst [vmem:[%s12204_s7 + $0x78] sm:$0xff] %v231_v15 }
  0x3e   : > { %234 = vst [vmem:[%s12204_s7 + $0x80] sm:$0xff] %v233_v16  ;;  %236 = vst [vmem:[%s12204_s7 + $0x88] sm:$0xff] %v235_v17  ;;  %v237_v18 = vld [vmem:[%s12196_s28 + $0x240] sm:$0xff]  ;;  %v239_v19 = vld [vmem:[%s12196_s28 + $0x248] sm:$0xff] }
  0x3f   : > { %v241_v20 = vld [vmem:[%s12196_s28 + $0x280] sm:$0xff]  ;;  %238 = vst [vmem:[%s12204_s7 + $0x90] sm:$0xff] %v237_v18  ;;  %240 = vst [vmem:[%s12204_s7 + $0x98] sm:$0xff] %v239_v19  ;;  %v243_v21 = vld [vmem:[%s12196_s28 + $0x288] sm:$0xff] }
  0x40   : > { %242 = vst [vmem:[%s12204_s7 + $0xa0] sm:$0xff] %v241_v20  ;;  %v245_v22 = vld [vmem:[%s12196_s28 + $0x2c0] sm:$0xff]  ;;  %v247_v23 = vld [vmem:[%s12196_s28 + $0x2c8] sm:$0xff]  ;;  %244 = vst [vmem:[%s12204_s7 + $0xa8] sm:$0xff] %v243_v21 }
  0x41   : > { %246 = vst [vmem:[%s12204_s7 + $0xb0] sm:$0xff] %v245_v22  ;;  %248 = vst [vmem:[%s12204_s7 + $0xb8] sm:$0xff] %v247_v23  ;;  %v249_v24 = vld [vmem:[%s12196_s28 + $0x300] sm:$0xff]  ;;  %v251_v25 = vld [vmem:[%s12196_s28 + $0x308] sm:$0xff] }
  0x42   : > { %v253_v26 = vld [vmem:[%s12196_s28 + $0x340] sm:$0xff]  ;;  %250 = vst [vmem:[%s12204_s7 + $0xc0] sm:$0xff] %v249_v24  ;;  %252 = vst [vmem:[%s12204_s7 + $0xc8] sm:$0xff] %v251_v25  ;;  %v255_v27 = vld [vmem:[%s12196_s28 + $0x348] sm:$0xff] }
  0x43   : > { %254 = vst [vmem:[%s12204_s7 + $0xd0] sm:$0xff] %v253_v26  ;;  %v257_v28 = vld [vmem:[%s12196_s28 + $0x380] sm:$0xff]  ;;  %v259_v29 = vld [vmem:[%s12196_s28 + $0x388] sm:$0xff]  ;;  %256 = vst [vmem:[%s12204_s7 + $0xd8] sm:$0xff] %v255_v27 }
  0x44   : > { %258 = vst [vmem:[%s12204_s7 + $0xe0] sm:$0xff] %v257_v28  ;;  %260 = vst [vmem:[%s12204_s7 + $0xe8] sm:$0xff] %v259_v29  ;;  %v261_v30 = vld [vmem:[%s12196_s28 + $0x3c0] sm:$0xff]  ;;  %v263_v31 = vld [vmem:[%s12196_s28 + $0x3c8] sm:$0xff] }
  0x45   : > { %v265_v32 = vld [vmem:[%s12196_s28 + $0x400] sm:$0xff]  ;;  %262 = vst [vmem:[%s12204_s7 + $0xf0] sm:$0xff] %v261_v30  ;;  %264 = vst [vmem:[%s12204_s7 + $0xf8] sm:$0xff] %v263_v31  ;;  %v267_v33 = vld [vmem:[%s12196_s28 + $0x408] sm:$0xff] }
  0x46   : > { %266 = vst [vmem:[%s12204_s7 + $0x100] sm:$0xff] %v265_v32  ;;  %v269_v34 = vld [vmem:[%s12196_s28 + $0x440] sm:$0xff]  ;;  %v271_v35 = vld [vmem:[%s12196_s28 + $0x448] sm:$0xff]  ;;  %268 = vst [vmem:[%s12204_s7 + $0x108] sm:$0xff] %v267_v33 }
  0x47   : > { %270 = vst [vmem:[%s12204_s7 + $0x110] sm:$0xff] %v269_v34  ;;  %272 = vst [vmem:[%s12204_s7 + $0x118] sm:$0xff] %v271_v35  ;;  %v273_v36 = vld [vmem:[%s12196_s28 + $0x480] sm:$0xff]  ;;  %v275_v37 = vld [vmem:[%s12196_s28 + $0x488] sm:$0xff] }
  0x48   : > { %v277_v38 = vld [vmem:[%s12196_s28 + $0x4c0] sm:$0xff]  ;;  %274 = vst [vmem:[%s12204_s7 + $0x120] sm:$0xff] %v273_v36  ;;  %276 = vst [vmem:[%s12204_s7 + $0x128] sm:$0xff] %v275_v37  ;;  %v279_v39 = vld [vmem:[%s12196_s28 + $0x4c8] sm:$0xff] }
  0x49   : > { %278 = vst [vmem:[%s12204_s7 + $0x130] sm:$0xff] %v277_v38  ;;  %v281_v40 = vld [vmem:[%s12196_s28 + $0x500] sm:$0xff]  ;;  %v283_v41 = vld [vmem:[%s12196_s28 + $0x508] sm:$0xff]  ;;  %280 = vst [vmem:[%s12204_s7 + $0x138] sm:$0xff] %v279_v39 }
  0x4a   : > { %282 = vst [vmem:[%s12204_s7 + $0x140] sm:$0xff] %v281_v40  ;;  %284 = vst [vmem:[%s12204_s7 + $0x148] sm:$0xff] %v283_v41  ;;  %v285_v42 = vld [vmem:[%s12196_s28 + $0x540] sm:$0xff]  ;;  %v287_v43 = vld [vmem:[%s12196_s28 + $0x548] sm:$0xff] }
  0x4b   : > { %v289_v44 = vld [vmem:[%s12196_s28 + $0x580] sm:$0xff]  ;;  %286 = vst [vmem:[%s12204_s7 + $0x150] sm:$0xff] %v285_v42  ;;  %288 = vst [vmem:[%s12204_s7 + $0x158] sm:$0xff] %v287_v43  ;;  %v291_v45 = vld [vmem:[%s12196_s28 + $0x588] sm:$0xff] }
  0x4c   : > { %290 = vst [vmem:[%s12204_s7 + $0x160] sm:$0xff] %v289_v44  ;;  %v293_v46 = vld [vmem:[%s12196_s28 + $0x5c0] sm:$0xff]  ;;  %v295_v47 = vld [vmem:[%s12196_s28 + $0x5c8] sm:$0xff]  ;;  %292 = vst [vmem:[%s12204_s7 + $0x168] sm:$0xff] %v291_v45 }
  0x4d   : > { %294 = vst [vmem:[%s12204_s7 + $0x170] sm:$0xff] %v293_v46  ;;  %296 = vst [vmem:[%s12204_s7 + $0x178] sm:$0xff] %v295_v47  ;;  %v297_v48 = vld [vmem:[%s12196_s28 + $0x600] sm:$0xff]  ;;  %v299_v49 = vld [vmem:[%s12196_s28 + $0x608] sm:$0xff] }
  0x4e   : > { %v301_v50 = vld [vmem:[%s12196_s28 + $0x640] sm:$0xff]  ;;  %298 = vst [vmem:[%s12204_s7 + $0x180] sm:$0xff] %v297_v48  ;;  %300 = vst [vmem:[%s12204_s7 + $0x188] sm:$0xff] %v299_v49  ;;  %v303_v51 = vld [vmem:[%s12196_s28 + $0x648] sm:$0xff] }
  0x4f   : > { %302 = vst [vmem:[%s12204_s7 + $0x190] sm:$0xff] %v301_v50  ;;  %v305_v52 = vld [vmem:[%s12196_s28 + $0x680] sm:$0xff]  ;;  %v307_v53 = vld [vmem:[%s12196_s28 + $0x688] sm:$0xff]  ;;  %304 = vst [vmem:[%s12204_s7 + $0x198] sm:$0xff] %v303_v51 }
  0x50   : > { %306 = vst [vmem:[%s12204_s7 + $0x1a0] sm:$0xff] %v305_v52  ;;  %308 = vst [vmem:[%s12204_s7 + $0x1a8] sm:$0xff] %v307_v53  ;;  %v309_v54 = vld [vmem:[%s12196_s28 + $0x6c0] sm:$0xff]  ;;  %v311_v55 = vld [vmem:[%s12196_s28 + $0x6c8] sm:$0xff] }
  0x51   : > { %v313_v56 = vld [vmem:[%s12196_s28 + $0x700] sm:$0xff]  ;;  %310 = vst [vmem:[%s12204_s7 + $0x1b0] sm:$0xff] %v309_v54  ;;  %312 = vst [vmem:[%s12204_s7 + $0x1b8] sm:$0xff] %v311_v55  ;;  %v315_v57 = vld [vmem:[%s12196_s28 + $0x708] sm:$0xff] }
  0x52   : > { %314 = vst [vmem:[%s12204_s7 + $0x1c0] sm:$0xff] %v313_v56  ;;  %v317_v58 = vld [vmem:[%s12196_s28 + $0x740] sm:$0xff]  ;;  %v319_v59 = vld [vmem:[%s12196_s28 + $0x748] sm:$0xff]  ;;  %316 = vst [vmem:[%s12204_s7 + $0x1c8] sm:$0xff] %v315_v57 }
  0x53   : > { %318 = vst [vmem:[%s12204_s7 + $0x1d0] sm:$0xff] %v317_v58  ;;  %320 = vst [vmem:[%s12204_s7 + $0x1d8] sm:$0xff] %v319_v59  ;;  %v321_v60 = vld [vmem:[%s12196_s28 + $0x780] sm:$0xff]  ;;  %v323_v61 = vld [vmem:[%s12196_s28 + $0x788] sm:$0xff] }
  0x54   : > { %v325_v62 = vld [vmem:[%s12196_s28 + $0x7c0] sm:$0xff]  ;;  %322 = vst [vmem:[%s12204_s7 + $0x1e0] sm:$0xff] %v321_v60  ;;  %324 = vst [vmem:[%s12204_s7 + $0x1e8] sm:$0xff] %v323_v61  ;;  %v327_v63 = vld [vmem:[%s12196_s28 + $0x7c8] sm:$0xff] }
  0x55   : > { %326 = vst [vmem:[%s12204_s7 + $0x1f0] sm:$0xff] %v325_v62  ;;  %v329_v0 = vld [vmem:[%s12196_s28 + $0x800] sm:$0xff]  ;;  %v331_v1 = vld [vmem:[%s12196_s28 + $0x808] sm:$0xff]  ;;  %328 = vst [vmem:[%s12204_s7 + $0x1f8] sm:$0xff] %v327_v63 }
  0x56   : > { %330 = vst [vmem:[%s12204_s7 + $0x200] sm:$0xff] %v329_v0  ;;  %332 = vst [vmem:[%s12204_s7 + $0x208] sm:$0xff] %v331_v1  ;;  %v333_v2 = vld [vmem:[%s12196_s28 + $0x840] sm:$0xff]  ;;  %v335_v3 = vld [vmem:[%s12196_s28 + $0x848] sm:$0xff] }
  0x57   : > { %v337_v4 = vld [vmem:[%s12196_s28 + $0x880] sm:$0xff]  ;;  %334 = vst [vmem:[%s12204_s7 + $0x210] sm:$0xff] %v333_v2  ;;  %336 = vst [vmem:[%s12204_s7 + $0x218] sm:$0xff] %v335_v3  ;;  %v339_v5 = vld [vmem:[%s12196_s28 + $0x888] sm:$0xff] }
  0x58   : > { %338 = vst [vmem:[%s12204_s7 + $0x220] sm:$0xff] %v337_v4  ;;  %v341_v6 = vld [vmem:[%s12196_s28 + $0x8c0] sm:$0xff]  ;;  %v343_v7 = vld [vmem:[%s12196_s28 + $0x8c8] sm:$0xff]  ;;  %340 = vst [vmem:[%s12204_s7 + $0x228] sm:$0xff] %v339_v5 }
  0x59   : > { %342 = vst [vmem:[%s12204_s7 + $0x230] sm:$0xff] %v341_v6  ;;  %344 = vst [vmem:[%s12204_s7 + $0x238] sm:$0xff] %v343_v7  ;;  %v345_v8 = vld [vmem:[%s12196_s28 + $0x900] sm:$0xff]  ;;  %v347_v9 = vld [vmem:[%s12196_s28 + $0x908] sm:$0xff] }
  0x5a   : > { %v349_v10 = vld [vmem:[%s12196_s28 + $0x940] sm:$0xff]  ;;  %346 = vst [vmem:[%s12204_s7 + $0x240] sm:$0xff] %v345_v8  ;;  %348 = vst [vmem:[%s12204_s7 + $0x248] sm:$0xff] %v347_v9  ;;  %v351_v11 = vld [vmem:[%s12196_s28 + $0x948] sm:$0xff] }
  0x5b   : > { %350 = vst [vmem:[%s12204_s7 + $0x250] sm:$0xff] %v349_v10  ;;  %v353_v12 = vld [vmem:[%s12196_s28 + $0x980] sm:$0xff]  ;;  %v355_v13 = vld [vmem:[%s12196_s28 + $0x988] sm:$0xff]  ;;  %352 = vst [vmem:[%s12204_s7 + $0x258] sm:$0xff] %v351_v11 }
  0x5c   : > { %354 = vst [vmem:[%s12204_s7 + $0x260] sm:$0xff] %v353_v12  ;;  %356 = vst [vmem:[%s12204_s7 + $0x268] sm:$0xff] %v355_v13  ;;  %v357_v14 = vld [vmem:[%s12196_s28 + $0x9c0] sm:$0xff]  ;;  %v359_v15 = vld [vmem:[%s12196_s28 + $0x9c8] sm:$0xff] }
  0x5d   : > { %358 = vst [vmem:[%s12204_s7 + $0x270] sm:$0xff] %v357_v14  ;;  %360 = vst [vmem:[%s12204_s7 + $0x278] sm:$0xff] %v359_v15 }
  0x5e PF: > { %s367_s8 = sand.u32 1, %s11994_s20   ;;  %s10163_s10 = sshll.u32 %s12014_s25, 7 }
  0x5f   : > { %s11383_s15 = smul.u32 2304, %s367_s8  ;;  %s377_s11 = sadd.s32 %s12018_s26, %s10163_s10 }
  0x60   : > { %s8699_s5 = sshll.u32 %s377_s11, 6  ;;  %s16499_s1 = sld [smem:[#allocation41_spill]] }
  0x61   : > { %s11386_s7 = scalar_select %p12157_p9, [#allocation0], [#allocation11] }
  0x62   : > { %s371_s9 = scalar_lea.vmem [#allocation4], %s11383_s15  ;;  %s12024_s13 = smov 32768  }
  0x63   : > { %s392_s22 = sshll.u32 %s371_s9, 4  ;;  %11387 = sst [smem:[#allocation10]] (%p12157_p9), %s12024_s13  ;;  %s393_s22 = int_to_ptr.vmem [resolvable:$true] %s392_s22 }
  0x64   : > { %s384_s20 = sld [smem:[%s11386_s7]]   ;;  %s12025_s25 = smov 4096  }
  0x65   : > { %11388 = sst [smem:[#allocation10 + $0x1]] (%p12157_p9), %s12025_s25  ;;  %s12026_s10 = smov 64  }
  0x66   : > { %s379_s28 = scalar_lea.hbm %s16499_s1, %s8699_s5  ;;  %11389 = sst [smem:[#allocation10 + $0x2]] (%p12157_p9), %s12026_s10 }
  0x67   : > { %s12027_s11 = smov 128   ;;  %11391 = sst [smem:[#allocation10 + $0x4]] (%p12157_p9), %s12026_s10 }
  0x68   : > { %11390 = sst [smem:[#allocation10 + $0x3]] (%p12157_p9), %s12027_s11  ;;  %s12028_s0 = smov 4  }
  0x69   : > { %11392 = sst [smem:[#allocation10 + $0x5]] (%p12157_p9), %s12028_s0  ;;  %s368_s13 = scalar_lea.sflag [#allocation5], %s367_s8 }
  0x6a   : > { %s8700_s29 = sshll.u32 %s384_s20, 26  ;;  %s12029_s15 = smov [#allocation9]  }
  0x6b   : > { %s8701_s9 = sadd.s32 134217728, %s8700_s29  ;;  %s415_s25 = sand.u32 1, %s12022_s27  }
  0x6c   : > { %11393 = dma.general (%p12157_p9), %s379_s28, 36864, %s393_s22, %s368_s13, %s12029_s15, [#allocation10], %s8701_s9, 0  }
  0x6d   : > { %s417_s5 = sand.u32 1, %s11982_s17   ;;  %s8702_s7 = sshll.u32 %s12018_s26, 4 }
  0x6e   : > { %s418_s11 = scalar_lea.vmem [#allocation6], %s417_s5  ;;  %s12390_s20 = scalar_lea.hbm %s16448_s2, %s8702_s7 }
  0x6f   : > { %s425_s10 = sshll.u32 %s418_s11, 4  ;;  %s12392_s22 = scalar_lea.sflag [#allocation7], %s415_s25  ;;  %s426_s10 = int_to_ptr.vmem [resolvable:$true] %s425_s10 }
  0x70   : > { %s11856_s12 = scalar_lea.hbm %s12390_s20, 16  ;;  %s11860_s0 = scalar_lea.hbm %s16448_s2, 32 }
  0x71   : > { %p11857_p2 = scmp.ne.s32.totalorder %s12390_s20, %s11856_s12  ;;  %p11861_p7 = scmp.lt.u32.totalorder %s12390_s20, %s16448_s2 }
  0x72   : > { %p11862_p8 = scmp.lt.u32.totalorder %s11860_s0, %s11856_s12  ;;  %p11864_p10 = scmp.lt.u32.totalorder %s11856_s12, %s12390_s20 }
  0x73   : > { %p11858_p5 = pnand %p11857_p2, %p12180_p1 }
  0x74   : > { %p11863_p9 = por %p11862_p8, %p11861_p7 }
  0x75   : > { %p11859_p6 = pneg %p11858_p5 }
  0x76   : > { %p11865_p11 = por %p11864_p10, %p11863_p9 }
  0x78   : > { %p11866_p13 = pnand %p11865_p11, %p11859_p6 }
  0x7a   : > { %11869 = shalt.err (!%p11866_p13)
}
  0x7b   : > { %s11870_s30 = scalar_lea.vmem %s426_s10, 16  ;;  %s12030_s9 = smov [#allocation6]  }
  0x7c   : > { %p11871_p0 = scmp.ne.s32.totalorder %s426_s10, %s11870_s30  ;;  %s11874_s13 = sshll.u32 %s12030_s9, 4  ;;  %s11875_s13 = int_to_ptr.vmem [resolvable:$false] %s11874_s13 }
  0x7d   : > { %s11876_s15 = scalar_lea.vmem %s11875_s13, 32  ;;  %p11877_p5 = scmp.lt.s32.totalorder %s426_s10, %s11875_s13 }
  0x7e   : > { %p11872_p4 = pnand %p11871_p0, %p12180_p1  ;;  %p11878_p3 = scmp.lt.s32.totalorder %s11876_s15, %s11870_s30 }
  0x80   : > { %p11873_p2 = pneg %p11872_p4  ;;  %p11879_p12 = por %p11878_p3, %p11877_p5 }
  0x82   : > { %p11880_p7 = pnand %p11879_p12, %p11873_p2 }
  0x84   : > { %11883 = shalt.err (!%p11880_p7)
}
  0x85   : > { %11394 = dma.hbm_to_vmem [thread:$0]  (%p12180_p1), %s12390_s20, 16, %s426_s10, %s12392_s22  }
  0x86   : > { %s8703_s25 = sshll.u32 %s417_s5, 6  ;;  %s10164_s7 = sshll.u32 %s12018_s26, 10 }
  0x87   : > { %s12418_s8 = scalar_lea.hbm %s16449_s3, %s10164_s7  ;;  %s436_s28 = scalar_lea.vmem [#allocation8], %s8703_s25 }
  0x88   : > { %s443_s0 = sshll.u32 %s436_s28, 4  ;;  %s11884_s29 = scalar_lea.hbm %s12418_s8, 1024  ;;  %s12420_s0 = int_to_ptr.vmem [resolvable:$true] %s443_s0 }
  0x89   : > { %p11885_p12 = scmp.ne.s32.totalorder %s12418_s8, %s11884_s29  ;;  %s11888_s20 = scalar_lea.hbm %s16449_s3, 2048 }
  0x8a   : > { %p11889_p8 = scmp.lt.u32.totalorder %s12418_s8, %s16449_s3  ;;  %p11890_p9 = scmp.lt.u32.totalorder %s11888_s20, %s11884_s29 }
  0x8b   : > { %p11886_p3 = pnand %p11885_p12, %p12180_p1  ;;  %p11892_p11 = scmp.lt.u32.totalorder %s11884_s29, %s12418_s8 }
  0x8c   : > { %p11891_p10 = por %p11890_p9, %p11889_p8 }
  0x8d   : > { %p11887_p6 = pneg %p11886_p3 }
  0x8e   : > { %p11893_p13 = por %p11892_p11, %p11891_p10 }
  0x90   : > { %p11894_p0 = pnand %p11893_p13, %p11887_p6 }
  0x92   : > { %11897 = shalt.err (!%p11894_p0)
}
  0x93   : > { %s11898_s9 = scalar_lea.vmem %s12420_s0, 1024  ;;  %s12031_s13 = smov [#allocation8]  }
  0x94   : > { %p11899_p4 = scmp.ne.s32.totalorder %s12420_s0, %s11898_s9  ;;  %s11902_s15 = sshll.u32 %s12031_s13, 4  ;;  %s11903_s15 = int_to_ptr.vmem [resolvable:$false] %s11902_s15 }
  0x95   : > { %s11904_s25 = scalar_lea.vmem %s11903_s15, 2048  ;;  %p11905_p7 = scmp.lt.s32.totalorder %s12420_s0, %s11903_s15 }
  0x96   : > { %p11900_p2 = pnand %p11899_p4, %p12180_p1  ;;  %p11906_p12 = scmp.lt.s32.totalorder %s11904_s25, %s11898_s9 }
  0x98   : > { %p11901_p5 = pneg %p11900_p2  ;;  %p11907_p3 = por %p11906_p12, %p11905_p7 }
  0x9a   : > { %p11908_p8 = pnand %p11907_p3, %p11901_p5 }
  0x9c   : > { %11911 = shalt.err (!%p11908_p8)
}
  0x9d   : > { %s12032_s7 = smov 64   ;;  %s12033_s11 = smov 4  }
  0x9e   : > { %11395 = dma.hbm_to_vmem [thread:$0]  (%p12180_p1), %s12418_s8, 1024, %s12420_s0, %s12392_s22, %s12032_s7, %s12032_s7, %s12033_s11  }
  0x9f PF: > { %p8706_p6 = scmp.ge.s32.totalorder %s12022_s27, 1  ;;  %p451_p9 = scmp.lt.s32.totalorder %s12022_s27, 9 }
  0xa1   : > { %p452_p10 = pnand %p8706_p6, %p451_p9 }
  0xa3   : > { %455 = sbr.rel (%p452_p10) target bundleno = 1243 (0x4db), region = 55 }
  0xaa   : > { %s458_s12 = sand.u32 1, %s11998_s21   ;;  %s464_s28 = sand.u32 1, %s11990_s19  }
  0xab   : > { %s11384_s29 = smul.u32 640, %s458_s12  ;;  %s465_s20 = scalar_lea.sflag [#allocation5], %s464_s28 }
  0xac   : > { %s11385_s5 = smul.u32 2304, %s464_s28  ;;  %p16500_p1 = scmp.ne.s32.totalorder %s16494_s14, 0 }
  0xad   : > { %s12448_s10 = scalar_lea.vmem [#allocation3], %s11384_s29 }
  0xae   : > { %s12450_s1 = scalar_lea.vmem [#allocation4], %s11385_s5 }
  0xaf   : > { %11965 = dma.done.wait (%p16500_p1), %s465_s20, 36864  }
  0xb0   : > { %11967 = vsyncadd (%p16500_p1), %s465_s20, 4294930432  ;;  %s16501_s18 = sadd.s32 4294967295, %s12022_s27   ;;  %s475_s8 = sand.u32 1, %s11978_s16  }
  0xb1   : > { %s473_s22 = sand.u32 1, %s16501_s18   ;;  %s12459_s0 = scalar_lea.vmem [#allocation6], %s475_s8 }
  0xb2   : > { %s474_s21 = scalar_lea.sflag [#allocation7], %s473_s22  ;;  %p16502_p11 = scmp.ne.s32.totalorder %s16497_s6, 0 }
  0xb4   : > { %11969 = dma.done.wait (%p16502_p11), %s474_s21, 1040  }
  0xb5   : > { %11971 = vsyncadd (%p16502_p11), %s474_s21, 4294966256  ;;  %s8707_s30 = sshll.u32 %s475_s8, 6  ;;  %p525_p13 = scmp.lt.s32.totalorder %s12010_s24, 1 }
  0xb6   : > { %s12472_s25 = scalar_lea.vmem [#allocation8], %s8707_s30  ;;  %p8710_p0 = scmp.ne.s32.totalorder %s12006_s23, 0 }
  0xb7   : > { %s16738_s24 = smov (!%p525_p13, %s12010_s24), 1  ;;  %v12034_v16 = vmov (!%p8710_p0), 0.0  }
  0xb8   : > { %s10165_s14 = sshll.u32 %s16738_s24, 7  ;;  %534 = sbr.rel (%p8710_p0) target bundleno = 192 (0xc0), region = 75  ;;  %535 = vst [vmem:[#allocation2] sm:$0xff] (!%p8710_p0), %v12034_v16  ;;  %536 = vst [vmem:[#allocation2 + $0x8] sm:$0xff] (!%p8710_p0), %v12034_v16 }
  0xb9   : > { %s12470_s15 = scalar_lea.vmem %s16450_s4, %s10165_s14  ;;  %537 = vst [vmem:[#allocation2 + $0x10] sm:$0xff] (!%p8710_p0), %v12034_v16  ;;  %538 = vst [vmem:[#allocation2 + $0x18] sm:$0xff] (!%p8710_p0), %v12034_v16 }
  0xba   : > { %539 = vst [vmem:[#allocation2 + $0x20] sm:$0xff] (!%p8710_p0), %v12034_v16  ;;  %540 = vst [vmem:[#allocation2 + $0x28] sm:$0xff] (!%p8710_p0), %v12034_v16 }
  0xbb   : > { %541 = vst [vmem:[#allocation2 + $0x30] sm:$0xff] (!%p8710_p0), %v12034_v16  ;;  %542 = vst [vmem:[#allocation2 + $0x38] sm:$0xff] (!%p8710_p0), %v12034_v16 }
  0xbc   : > { %543 = vst [vmem:[#allocation2 + $0x40] sm:$0xff] (!%p8710_p0), %v12034_v16  ;;  %544 = vst [vmem:[#allocation2 + $0x48] sm:$0xff] (!%p8710_p0), %v12034_v16 }
  0xbd   : > { %545 = vst [vmem:[#allocation2 + $0x50] sm:$0xff] (!%p8710_p0), %v12034_v16  ;;  %546 = vst [vmem:[#allocation2 + $0x58] sm:$0xff] (!%p8710_p0), %v12034_v16 }
  0xbe   : > { %547 = vst [vmem:[#allocation2 + $0x60] sm:$0xff] (!%p8710_p0), %v12034_v16  ;;  %548 = vst [vmem:[#allocation2 + $0x68] sm:$0xff] (!%p8710_p0), %v12034_v16 }
  0xbf   : > { %549 = vst [vmem:[#allocation2 + $0x70] sm:$0xff] %v12034_v16  ;;  %550 = vst [vmem:[#allocation2 + $0x78] sm:$0xff] %v12034_v16 }
  0xc0 PF: > { %v11512_v17 = vld [vmem:[%s12450_s1 + $0x40] sm:$0xff]   ;;  %v11516_v21 = vld [vmem:[%s12450_s1 + $0x48] sm:$0xff]   ;;  %v11520_v25 = vld [vmem:[%s12450_s1 + $0x50] sm:$0xff]   ;;  %vm1289_vm0 = vsmask.f32 3328  ;;  %vm2431_vm3 = vcmask 1042432  }
  0xc1   : > { %v11513_v18 = vld [vmem:[%s12450_s1 + $0xc0] sm:$0xff]   ;;  %10166 = vmatprep.subr.bf16.mxu0 %v11512_v17  ;;  %v11517_v22 = vld [vmem:[%s12450_s1 + $0xc8] sm:$0xff]   ;;  %v11521_v26 = vld [vmem:[%s12450_s1 + $0xd0] sm:$0xff]   ;;  %vm1290_vm1 = vsmask.f32 7440  ;;  %vm2432_vm4 = vcmask 1046532  }
  0xc2   : > { %v11514_v19 = vld [vmem:[%s12450_s1] sm:$0xff]   ;;  %10230 = vmatprep.subr.bf16.mxu1 %v11513_v18  ;;  %v11518_v23 = vld [vmem:[%s12450_s1 + $0x8] sm:$0xff]   ;;  %v11522_v27 = vld [vmem:[%s12450_s1 + $0x10] sm:$0xff]  }
  0xc3   : > { %v11515_v20 = vld [vmem:[%s12450_s1 + $0x80] sm:$0xff]   ;;  %10167 = vmatpush3.bf16.msra.mxu0 %v11514_v19  ;;  %v11519_v24 = vld [vmem:[%s12450_s1 + $0x88] sm:$0xff]   ;;  %v11523_v28 = vld [vmem:[%s12450_s1 + $0x90] sm:$0xff]  }
  0xc4   : > { %10231 = vmatpush3.bf16.msra.mxu1 %v11515_v20  ;;  %10168 = vmatprep.subr.bf16.mxu0 %v11516_v21  ;;  %v11524_v29 = vld [vmem:[%s12450_s1 + $0x58] sm:$0xff]   ;;  %v11528_v33 = vld [vmem:[%s12450_s1 + $0x60] sm:$0xff]   ;;  %v11532_v37 = vld [vmem:[%s12450_s1 + $0x68] sm:$0xff]  }
  0xc5   : > { %10232 = vmatprep.subr.bf16.mxu1 %v11517_v22  ;;  %v11525_v30 = vld [vmem:[%s12450_s1 + $0xd8] sm:$0xff]   ;;  %v11529_v34 = vld [vmem:[%s12450_s1 + $0xe0] sm:$0xff]   ;;  %v11533_v38 = vld [vmem:[%s12450_s1 + $0xe8] sm:$0xff]  }
  0xc6   : > { %v11526_v31 = vld [vmem:[%s12450_s1 + $0x18] sm:$0xff]   ;;  %v11530_v35 = vld [vmem:[%s12450_s1 + $0x20] sm:$0xff]   ;;  %v11534_v39 = vld [vmem:[%s12450_s1 + $0x28] sm:$0xff]  }
  0xc7   : > { %10169 = vmatpush3.bf16.msra.mxu0 %v11518_v23  ;;  %v11527_v32 = vld [vmem:[%s12450_s1 + $0x98] sm:$0xff]   ;;  %v11531_v36 = vld [vmem:[%s12450_s1 + $0xa0] sm:$0xff]   ;;  %v11535_v40 = vld [vmem:[%s12450_s1 + $0xa8] sm:$0xff]  }
  0xc8   : > { %10233 = vmatpush3.bf16.msra.mxu1 %v11519_v24  ;;  %10170 = vmatprep.subr.bf16.mxu0 %v11520_v25  ;;  %v11536_v41 = vld [vmem:[%s12450_s1 + $0x70] sm:$0xff]   ;;  %v11540_v45 = vld [vmem:[%s12450_s1 + $0x78] sm:$0xff]   ;;  %v567_v49 = vld [vmem:[%s12448_s10] sm:$0xff] }
  0xc9   : > { %10234 = vmatprep.subr.bf16.mxu1 %v11521_v26  ;;  %v11537_v42 = vld [vmem:[%s12450_s1 + $0xf0] sm:$0xff]   ;;  %v11541_v46 = vld [vmem:[%s12450_s1 + $0xf8] sm:$0xff]   ;;  %v569_v50 = vld [vmem:[%s12448_s10 + $0x20] sm:$0xff]  ;;  %v1293_v55 = vshrl.u32 %v567_v49, 16  ;;  %v1296_v59 = vshll.u32 %v567_v49, 16 }
  0xca   : > { %v11538_v43 = vld [vmem:[%s12450_s1 + $0x30] sm:$0xff]   ;;  %v11542_v47 = vld [vmem:[%s12450_s1 + $0x38] sm:$0xff]   ;;  %v12510_v51 = vld [vmem:[%s12448_s10 + $0x8] sm:$0xff]  ;;  %v8711_v52 = vcombine.low %v567_v49, %v569_v50  ;;  %v8712_v53 = vcombine.high %v567_v49, %v569_v50  ;;  %v1321_v6 = vshrl.u32 %v569_v50, 16  ;;  %v1324_v9 = vshll.u32 %v569_v50, 16 }
  0xcb   : > { %10171 = vmatpush3.bf16.msra.mxu0 %v11522_v27  ;;  %v11539_v44 = vld [vmem:[%s12450_s1 + $0xb0] sm:$0xff]   ;;  %v11543_v48 = vld [vmem:[%s12450_s1 + $0xb8] sm:$0xff]   ;;  %v12513_v54 = vld [vmem:[%s12448_s10 + $0x28] sm:$0xff]  ;;  %v1295_v1 = vrot.slane %v1293_v55, 4  ;;  %v1298_v5 = vrot.slane %v1296_v59, 5  ;;  %v1307_v26 = vshrl.u32 %v12510_v51, 16 }
  0xcc   : > { %10235 = vmatpush3.bf16.msra.mxu1 %v11523_v28  ;;  %10172 = vmatprep.subr.bf16.mxu0 %v11524_v29  ;;  %v8713_v56 = vcombine.low %v12510_v51, %v12513_v54  ;;  %v8714_v57 = vcombine.high %v12510_v51, %v12513_v54  ;;  %v11544_v58 = vld [vmem:[%s12450_s1 + $0x140] sm:$0xff]   ;;  %v12532_v3 = vld [vmem:[%s12448_s10 + $0x48] sm:$0xff]  ;;  %v1323_v20 = vrot.slane %v1321_v6, 4  ;;  %v1326_v21 = vrot.slane %v1324_v9, 5  ;;  %v11552_v24 = vld [vmem:[%s12450_s1 + $0x150] sm:$0xff]  }
  0xcd   : > { %10236 = vmatprep.subr.bf16.mxu1 %v11525_v30  ;;  %1047 = vmatprep.mubr.bf16.mxu0 %v8712_v53  ;;  %v11545_v60 = vld [vmem:[%s12450_s1 + $0x1c0] sm:$0xff]   ;;  %v12535_v4 = vld [vmem:[%s12448_s10 + $0x68] sm:$0xff]  ;;  %v1299_v19 = vor.u32 %v1298_v5, %v1295_v1  ;;  %v11553_v25 = vld [vmem:[%s12450_s1 + $0x1d0] sm:$0xff]   ;;  %v1310_v28 = vshll.u32 %v12510_v51, 16 }
  0xce   : > { %1144 = vmatprep.mubr.bf16.mxu1 %v8714_v57  ;;  %v11546_v61 = vld [vmem:[%s12450_s1 + $0x100] sm:$0xff]   ;;  %v8718_v7 = vcombine.high %v12532_v3, %v12535_v4  ;;  %v11548_v8 = vld [vmem:[%s12450_s1 + $0x148] sm:$0xff]   ;;  %v8717_v12 = vcombine.low %v12532_v3, %v12535_v4  ;;  %v11554_v27 = vld [vmem:[%s12450_s1 + $0x110] sm:$0xff]  }
  0xcf   : > { %10173 = vmatpush3.bf16.msra.mxu0 %v11526_v31  ;;  %v11547_v62 = vld [vmem:[%s12450_s1 + $0x180] sm:$0xff]   ;;  %v11549_v11 = vld [vmem:[%s12450_s1 + $0x1c8] sm:$0xff]   ;;  %v11555_v29 = vld [vmem:[%s12450_s1 + $0x190] sm:$0xff]   ;;  %v12569_v30 = vrot.slane %v1299_v19, 4  ;;  %v1327_v31 = vor.u32 %v1326_v21, %v1323_v20  ;;  %v1394_v19 = vshll.u32 %v12535_v4, 16 }
  0xd0   : > { %10237 = vmatpush3.bf16.msra.mxu1 %v11527_v32  ;;  %10174 = vmatprep.subr.bf16.mxu0 %v11528_v33  ;;  %v12524_v63 = vld [vmem:[%s12448_s10 + $0x40] sm:$0xff]  ;;  %v11550_v13 = vld [vmem:[%s12450_s1 + $0x108] sm:$0xff]   ;;  %v11559_v50 = vld [vmem:[%s12450_s1 + $0x198] sm:$0xff]  }
  0xd1   : > { %10238 = vmatprep.subr.bf16.mxu1 %v11529_v34  ;;  %v12527_v0 = vld [vmem:[%s12448_s10 + $0x60] sm:$0xff]  ;;  %v11551_v14 = vld [vmem:[%s12450_s1 + $0x188] sm:$0xff]   ;;  %v1352_v55 = vshll.u32 %v12524_v63, 16  ;;  %vm12750_vm2 = vmor %vm1289_vm0, %vm1290_vm1 }
  0xd2   : > { %v8716_v2 = vcombine.high %v12524_v63, %v12527_v0  ;;  %v8715_v10 = vcombine.low %v12524_v63, %v12527_v0  ;;  %v12548_v15 = vld [vmem:[%s12448_s10 + $0x80] sm:$0xff]  ;;  %v12554_v17 = vld [vmem:[%s12448_s10 + $0x88] sm:$0xff]  ;;  %v1377_v59 = vshrl.u32 %v12527_v0, 16  ;;  %vm13168_vm5 = vmor %vm2431_vm3, %vm2432_vm4 }
  0xd3   : > { %10175 = vmatpush3.bf16.msra.mxu0 %v11530_v35  ;;  %v12551_v16 = vld [vmem:[%s12448_s10 + $0xa0] sm:$0xff]  ;;  %v12557_v18 = vld [vmem:[%s12448_s10 + $0xa8] sm:$0xff] }
  0xd4   : > { %10239 = vmatpush3.bf16.msra.mxu1 %v11531_v36  ;;  %10176 = vmatprep.subr.bf16.mxu0 %v11532_v37  ;;  %v8720_v22 = vcombine.high %v12548_v15, %v12551_v16  ;;  %v8722_v23 = vcombine.high %v12554_v17, %v12557_v18  ;;  %v8719_v32 = vcombine.low %v12548_v15, %v12551_v16  ;;  %v12574_v33 = vld [vmem:[%s12448_s10 + $0xc0] sm:$0xff]  ;;  %v12580_v35 = vld [vmem:[%s12448_s10 + $0xc8] sm:$0xff]  ;;  %v1335_v36 = vshrl.u32 %v12513_v54, 16 }
  0xd5   : > { %10240 = vmatprep.subr.bf16.mxu1 %v11533_v38  ;;  %v12577_v34 = vld [vmem:[%s12448_s10 + $0xe0] sm:$0xff]  ;;  %v1338_v37 = vshll.u32 %v12513_v54, 16  ;;  %v1349_v38 = vshrl.u32 %v12524_v63, 16  ;;  %v12613_v57 = vld [vmem:[%s12448_s10 + $0x168] sm:$0xff] }
  0xd6   : > { %v1337_v49 = vrot.slane %v1335_v36, 4  ;;  %v12601_v51 = vld [vmem:[%s12448_s10 + $0x140] sm:$0xff]  ;;  %v8723_v63 = vcombine.low %v12574_v33, %v12577_v34 }
  0xd7   : > { %10177 = vmatpush3.bf16.msra.mxu0 %v11534_v39  ;;  %v8721_v39 = vcombine.low %v12554_v17, %v12557_v18  ;;  %v1340_v53 = vrot.slane %v1338_v37, 5  ;;  %v12606_v54 = vrot.slane %v1349_v38, 4  ;;  %v11561_v1 = vld [vmem:[%s12450_s1 + $0x1e0] sm:$0xff]  }
  0xd8   : > { %10241 = vmatpush3.bf16.msra.mxu1 %v11535_v40  ;;  %10178 = vmatprep.subr.bf16.mxu0 %v11536_v41  ;;  %v8724_v40 = vcombine.high %v12574_v33, %v12577_v34  ;;  %v12590_v41 = vld [vmem:[%s12448_s10 + $0xe8] sm:$0xff]  ;;  %v11563_v9 = vld [vmem:[%s12450_s1 + $0x1a0] sm:$0xff]  }
  0xd9   : > { %10242 = vmatprep.subr.bf16.mxu1 %v11537_v42  ;;  %v1309_v42 = vrot.slane %v1307_v26, 4  ;;  %v8725_v5 = vcombine.low %v12580_v35, %v12590_v41  ;;  %v12636_v20 = vld [vmem:[%s12448_s10 + $0x180] sm:$0xff]  ;;  %v11565_v26 = vld [vmem:[%s12450_s1 + $0x1e8] sm:$0xff]  }
  0xda   : > { %v12639_v21 = vld [vmem:[%s12448_s10 + $0x1a0] sm:$0xff] }
  0xdb   : > { %10179 = vmatpush3.bf16.msra.mxu0 %v11538_v43  ;;  %v8726_v43 = vcombine.high %v12580_v35, %v12590_v41 }
  0xdc   : > { %10243 = vmatpush3.bf16.msra.mxu1 %v11539_v44  ;;  %10180 = vmatprep.subr.bf16.mxu0 %v11540_v45  ;;  %v11556_v44 = vld [vmem:[%s12450_s1 + $0x158] sm:$0xff]   ;;  %v1312_v45 = vrot.slane %v1310_v28, 5  ;;  %v1396_v28 = vrot.slane %v1394_v19, 5  ;;  %v12713_v19 = vld [vmem:[%s12448_s10 + $0x10] sm:$0x11] }
  0xdd   : > { %10244 = vmatprep.subr.bf16.mxu1 %v11541_v46  ;;  %v11557_v46 = vld [vmem:[%s12450_s1 + $0x1d8] sm:$0xff]  }
  0xdf   : > { %10181 = vmatpush3.bf16.msra.mxu0 %v11542_v47  ;;  %v12596_v47 = vrot.slane %v1327_v31, 4 }
  0xe0   : > { %10245 = vmatpush3.bf16.msra.mxu1 %v11543_v48  ;;  %10294 = vmatprep.subr.bf16.mxu0 %v11544_v58  ;;  %v11558_v48 = vld [vmem:[%s12450_s1 + $0x118] sm:$0xff]   ;;  %v1313_v58 = vor.u32 %v1312_v45, %v1309_v42  ;;  %v1405_v42 = vshrl.u32 %v12548_v15, 16  ;;  %v11568_v45 = vld [vmem:[%s12450_s1 + $0x170] sm:$0xff]  }
  0xe1   : > { %10358 = vmatprep.subr.bf16.mxu1 %v11545_v60  ;;  %v1380_v60 = vshll.u32 %v12527_v0, 16  ;;  %v11562_v0 = vld [vmem:[%s12450_s1 + $0x120] sm:$0xff]  }
  0xe2   : > { %1048 = vmatmul.mubr.bf16.vlgmr.msra.gmra.mrb[0].mxu0 %v8711_v52  ;;  %v12604_v52 = vld [vmem:[%s12448_s10 + $0x160] sm:$0xff] }
  0xe3   : > { %1145 = vmatmul.mubr.bf16.vlgmr.msra.gmra.mrb[0].mxu1 %v8713_v56  ;;  %10295 = vmatpush3.bf16.msra.mxu0 %v11546_v61  ;;  %v12610_v56 = vld [vmem:[%s12448_s10 + $0x148] sm:$0xff]  ;;  %v11560_v61 = vld [vmem:[%s12450_s1 + $0x160] sm:$0xff]   ;;  %v8728_v6 = vcombine.high %v12601_v51, %v12604_v52 }
  0xe4   : > { %10359 = vmatpush3.bf16.msra.mxu1 %v11547_v62  ;;  %1055 = vmatprep.mubr.bf16.mxu0 %v8716_v2  ;;  %v1363_v62 = vshrl.u32 %v12532_v3, 16  ;;  %v1366_v2 = vshll.u32 %v12532_v3, 16  ;;  %v1341_v3 = vor.u32 %v1340_v53, %v1337_v49  ;;  %v8729_v36 = vcombine.low %v12610_v56, %v12613_v57  ;;  %v11569_v49 = vld [vmem:[%s12450_s1 + $0x1f0] sm:$0xff]   ;;  %v12669_v53 = vld [vmem:[%s12448_s10 + $0x1c0] sm:$0xff] }
  0xe5   : > { %1152 = vmatprep.mubr.bf16.mxu1 %v8718_v7  ;;  %10296 = vmatprep.subr.bf16.mxu0 %v11548_v8  ;;  %v1391_v7 = vshrl.u32 %v12535_v4, 16  ;;  %v8730_v8 = vcombine.high %v12610_v56, %v12613_v57  ;;  %v11566_v4 = vld [vmem:[%s12450_s1 + $0x128] sm:$0xff]  }
  0xe6   : > { %10360 = vmatprep.subr.bf16.mxu1 %v11549_v11  ;;  %v1354_v11 = vrot.slane %v1352_v55, 5  ;;  %v12651_v31 = vrot.slane %v1341_v3, 4 }
  0xe7   : > { %10297 = vmatpush3.bf16.msra.mxu0 %v11550_v13  ;;  %v1382_v13 = vrot.slane %v1380_v60, 5 }
  0xe8   : > { %10361 = vmatpush3.bf16.msra.mxu1 %v11551_v14  ;;  %10298 = vmatprep.subr.bf16.mxu0 %v11552_v24  ;;  %v1365_v14 = vrot.slane %v1363_v62, 4  ;;  %v12643_v24 = vld [vmem:[%s12448_s10 + $0x188] sm:$0xff]  ;;  %v1355_v37 = vor.u32 %v1354_v11, %v12606_v54  ;;  %v11570_v54 = vld [vmem:[%s12450_s1 + $0x130] sm:$0xff]   ;;  %v11574_v11 = vld [vmem:[%s12450_s1 + $0x138] sm:$0xff]  }
  0xe9   : > { %10362 = vmatprep.subr.bf16.mxu1 %v11553_v25  ;;  %v12646_v25 = vld [vmem:[%s12448_s10 + $0x1a8] sm:$0xff] }
  0xea   : > { %1056 = vmatmul.mubr.bf16.gmra.mrb[4].mxu0 %v8715_v10  ;;  %v12632_v10 = vrot.slane %v1313_v58, 4  ;;  %v12672_v55 = vrot.slane %v1355_v37, 4  ;;  %v12678_v58 = vld [vmem:[%s12448_s10 + $0x1c8] sm:$0xff] }
  0xeb   : > { %1153 = vmatmul.mubr.bf16.gmra.mrb[4].mxu1 %v8717_v12  ;;  %1063 = vmatprep.mubr.bf16.mxu0 %v8720_v22  ;;  %v1379_v12 = vrot.slane %v1377_v59, 4  ;;  %v11564_v22 = vld [vmem:[%s12450_s1 + $0x168] sm:$0xff]   ;;  %v11571_v59 = vld [vmem:[%s12450_s1 + $0x1b0] sm:$0xff]  }
  0xec   : > { %1160 = vmatprep.mubr.bf16.mxu1 %v8722_v23  ;;  %10299 = vmatpush3.bf16.msra.mxu0 %v11554_v27  ;;  %v1368_v23 = vrot.slane %v1366_v2, 5  ;;  %v1393_v27 = vrot.slane %v1391_v7, 4  ;;  %v12688_v62 = vld [vmem:[%s12448_s10 + $0x1e8] sm:$0xff]  ;;  %v11573_v7 = vld [vmem:[%s12450_s1 + $0x1f8] sm:$0xff]  }
  0xed   : > { %10363 = vmatpush3.bf16.msra.mxu1 %v11555_v29  ;;  %10300 = vmatprep.subr.bf16.mxu0 %v11556_v44  ;;  %v11567_v29 = vld [vmem:[%s12450_s1 + $0x1a8] sm:$0xff]   ;;  %v1383_v38 = vor.u32 %v1382_v13, %v1379_v12  ;;  %v8734_v44 = vcombine.high %v12643_v24, %v12646_v25  ;;  %v1422_v12 = vshll.u32 %v12554_v17, 16  ;;  %v8738_v13 = vcombine.high %v12678_v58, %v12688_v62 }
  0xee   : > { %10364 = vmatprep.subr.bf16.mxu1 %v11557_v46  ;;  %v1397_v46 = vor.u32 %v1396_v28, %v1393_v27  ;;  %v1450_v27 = vshll.u32 %v12557_v18, 16  ;;  %v12728_v28 = vld [vmem:[%s12448_s10 + $0x220] sm:$0xff]  ;;  %v12736_v37 = vld [vmem:[%s12448_s10 + $0x208] sm:$0xff] }
  0xf0   : > { %10301 = vmatpush3.bf16.msra.mxu0 %v11558_v48  ;;  %v1433_v48 = vshrl.u32 %v12551_v16, 16 }
  0xf1   : > { %10365 = vmatpush3.bf16.msra.mxu1 %v11559_v50  ;;  %10302 = vmatprep.subr.bf16.mxu0 %v11560_v61  ;;  %v1436_v50 = vshll.u32 %v12551_v16, 16  ;;  %v12681_v16 = vrot.slane %v1383_v38, 4  ;;  %v12685_v61 = vrot.slane %v1405_v42, 4  ;;  %v12739_v38 = vld [vmem:[%s12448_s10 + $0x228] sm:$0xff] }
  0xf2   : > { %1064 = vmatmul.mubr.bf16.gmra.mrb[8].mxu0 %v8719_v32  ;;  %10366 = vmatprep.subr.bf16.mxu1 %v11561_v1  ;;  %v8727_v32 = vcombine.low %v12601_v51, %v12604_v52  ;;  %v12694_v2 = vrot.slane %v1433_v48, 4 }
  0xf3   : > { %1161 = vmatmul.mubr.bf16.gmra.mrb[8].mxu1 %v8721_v39  ;;  %1071 = vmatprep.mubr.bf16.mxu0 %v8724_v40  ;;  %v8732_v39 = vcombine.high %v12636_v20, %v12639_v21  ;;  %v1369_v40 = vor.u32 %v1368_v23, %v1365_v14  ;;  %v11575_v14 = vld [vmem:[%s12450_s1 + $0x1b8] sm:$0xff]   ;;  %v12717_v23 = vld [vmem:[%s12448_s10 + $0x30] sm:$0x11] }
  0xf4   : > { %1168 = vmatprep.mubr.bf16.mxu1 %v8726_v43  ;;  %10303 = vmatpush3.bf16.msra.mxu0 %v11562_v0  ;;  %v1408_v43 = vshll.u32 %v12548_v15, 16  ;;  %v12675_v15 = vld [vmem:[%s12448_s10 + $0x1e0] sm:$0xff]  ;;  %v8731_v0 = vcombine.low %v12636_v20, %v12639_v21 }
  0xf5   : > { %10367 = vmatpush3.bf16.msra.mxu1 %v11563_v9  ;;  %10304 = vmatprep.subr.bf16.mxu0 %v11564_v22  ;;  %v12683_v60 = vrot.slane %v1369_v40, 4  ;;  %v8733_v9 = vcombine.low %v12643_v24, %v12646_v25  ;;  %v8736_v3 = vcombine.high %v12669_v53, %v12675_v15  ;;  %v1447_v22 = vshrl.u32 %v12557_v18, 16  ;;  %v11577_v40 = vld [vmem:[%s12450_s1 + $0x2c0] sm:$0xff]  }
  0xf6   : > { %10368 = vmatprep.subr.bf16.mxu1 %v11565_v26  ;;  %v12692_v1 = vrot.slane %v1408_v43, 5  ;;  %v1302_v26 = vshll.u32 %v12713_v19, 16  ;;  %v1424_v43 = vrot.slane %v1422_v12, 5  ;;  %v8735_v48 = vcombine.low %v12669_v53, %v12675_v15 }
  0xf8   : > { %10305 = vmatpush3.bf16.msra.mxu0 %v11566_v4  ;;  %v12725_v4 = vld [vmem:[%s12448_s10 + $0x200] sm:$0xff] }
  0xf9   : > { %10369 = vmatpush3.bf16.msra.mxu1 %v11567_v29  ;;  %10306 = vmatprep.subr.bf16.mxu0 %v11568_v45  ;;  %v1330_v29 = vshll.u32 %v12717_v23, 16  ;;  %v1304_v45 = vrot.slane %v1302_v26, 5  ;;  %v1452_v26 = vrot.slane %v1450_v27, 5 }
  0xfa   : > { %1072 = vmatmul.mubr.bf16.gmra.mrb[12].mxu0 %v8723_v63  ;;  %10370 = vmatprep.subr.bf16.mxu1 %v11569_v49  ;;  %v12690_v63 = vrot.slane %v1397_v46, 4  ;;  %v16503_v49 = vmov 0 }
  0xfb   : > { %1169 = vmatmul.mubr.bf16.gmra.mrb[12].mxu1 %v8725_v5  ;;  %1079 = vmatprep.mubr.bf16.mxu0 %v8728_v6  ;;  %v11572_v5 = vld [vmem:[%s12450_s1 + $0x178] sm:$0xff]   ;;  %v12697_v6 = vrot.slane %v1436_v50, 5  ;;  %v1332_v46 = vrot.slane %v1330_v29, 5  ;;  %v16504_v49 = vsel %vm12750_vm2, 4294967295, %v16503_v49  ;;  %v12783_v29 = vsel %vm12750_vm2, %v12569_v30, %v1304_v45  ;;  %v12809_v45 = vld [vmem:[%s12448_s10 + $0xb0] sm:$0x11] }
  0xfc   : > { %1176 = vmatprep.mubr.bf16.mxu1 %v8730_v8  ;;  %10307 = vmatpush3.bf16.msra.mxu0 %v11570_v54  ;;  %v1419_v8 = vshrl.u32 %v12554_v17, 16  ;;  %v12721_v17 = vld [vmem:[%s12448_s10 + $0x18] sm:$0x11]  ;;  %16505 = vst [vmem:[#allocation22_spill] sm:$0xff] %v16504_v49  ;;  %16507 = vst [vmem:[#allocation24_spill] sm:$0xff] %v12809_v45 }
  0xfd   : > { %10371 = vmatpush3.bf16.msra.mxu1 %v11571_v59  ;;  %10308 = vmatprep.subr.bf16.mxu0 %v11572_v5  ;;  %v1411_v59 = vor.u32 %v12692_v1, %v12685_v61  ;;  %v8737_v5 = vcombine.low %v12678_v58, %v12688_v62  ;;  %v12774_v61 = vld [vmem:[%s12448_s10 + $0x78] sm:$0x11]  ;;  %v1439_v1 = vor.u32 %v12697_v6, %v12694_v2  ;;  %v1461_v6 = vshrl.u32 %v12574_v33, 16 }
  0xfe   : > { %10372 = vmatprep.subr.bf16.mxu1 %v11573_v7  ;;  %v1421_v42 = vrot.slane %v1419_v8, 4  ;;  %v12761_v7 = vld [vmem:[%s12448_s10 + $0x50] sm:$0x11] }
  0xff   : > { %v12764_v8 = vld [vmem:[%s12448_s10 + $0x70] sm:$0x11]  ;;  %v1412_v2 = vrot.slane %v1411_v59, 4 }
 0x100   : > { %10309 = vmatpush3.bf16.msra.mxu0 %v11574_v11  ;;  %v1358_v11 = vshll.u32 %v12761_v7, 16  ;;  %v1386_v12 = vshll.u32 %v12764_v8, 16 }
 0x101   : > { %10373 = vmatpush3.bf16.msra.mxu1 %v11575_v14  ;;  %v1400_v14 = vshll.u32 %v12774_v61, 16 }
 0x102   : > { %1080 = vmatmul.mubr.bf16.gmra.mrb[16].mxu0 %v8727_v32  ;;  %v12732_v32 = vld [vmem:[%s12448_s10 + $0x38] sm:$0x11]  ;;  %10486 = vmatprep.subr.bf16.mxu1 %v11577_v40 }
 0x103   : > { %1177 = vmatmul.mubr.bf16.gmra.mrb[16].mxu1 %v8729_v36  ;;  %1087 = vmatprep.mubr.bf16.mxu0 %v8732_v39  ;;  %v1316_v36 = vshll.u32 %v12721_v17, 16  ;;  %v1344_v18 = vshll.u32 %v12732_v32, 16  ;;  %v11576_v39 = vld [vmem:[%s12450_s1 + $0x240] sm:$0xff]  }
 0x104   : > { %1184 = vmatprep.mubr.bf16.mxu1 %v8734_v44  ;;  %v12744_v44 = vrot.slane %v1447_v22, 4  ;;  %10422 = vmatprep.subr.bf16.mxu0 %v11576_v39  ;;  %v1425_v22 = vor.u32 %v1424_v43, %v1421_v42  ;;  %v1388_v39 = vrot.slane %v1386_v12, 5  ;;  %v1402_v42 = vrot.slane %v1400_v14, 5 }
 0x105   : > { %v1318_v50 = vrot.slane %v1316_v36, 5  ;;  %v1346_v54 = vrot.slane %v1344_v18, 5  ;;  %v12788_v36 = vsel %vm12750_vm2, %v12596_v47, %v1332_v46  ;;  %v1360_v18 = vrot.slane %v1358_v11, 5 }
 0x106   : > { %v8739_v47 = vcombine.low %v12725_v4, %v12728_v28  ;;  %v8741_v43 = vcombine.low %v12736_v37, %v12739_v38  ;;  %v1440_v46 = vrot.slane %v1439_v1, 4 }
 0x107   : > { %v12794_v27 = vsel %vm12750_vm2, %v12632_v10, %v1318_v50  ;;  %v12799_v30 = vsel %vm12750_vm2, %v12651_v31, %v1346_v54  ;;  %v12806_v10 = vld [vmem:[%s12448_s10 + $0x90] sm:$0x11]  ;;  %v1426_v31 = vrot.slane %v1425_v22, 4  ;;  %v8840_v50 = vcombine.high %v12783_v29, %v12788_v36 }
 0x108   : > { %16506 = vst [vmem:[#allocation23_spill] sm:$0xff] %v12806_v10  ;;  %v8842_v54 = vcombine.high %v12794_v27, %v12799_v30  ;;  %v1414_v59 = vshll.u32 %v12806_v10, 16  ;;  %v8841_v14 = vcombine.low %v12794_v27, %v12799_v30  ;;  %v12859_v27 = vld [vmem:[%s12448_s10 + $0xd0] sm:$0x11]  ;;  %v1463_v30 = vrot.slane %v1461_v6, 4  ;;  %v11583_v10 = vld [vmem:[%s12450_s1 + $0x288] sm:$0xff]  }
 0x109   : > { %16510 = vst [vmem:[#allocation27_spill] sm:$0xff] %v12859_v27  ;;  %v1470_v6 = vshll.u32 %v12859_v27, 16 }
 0x10a   : > { %1088 = vmatmul.mubr.bf16.gmra.mrb[20].mxu0 %v8731_v0  ;;  %v8740_v0 = vcombine.high %v12725_v4, %v12728_v28  ;;  %v1416_v1 = vrot.slane %v1414_v59, 5  ;;  %v12886_v59 = vld [vmem:[%s12448_s10 + $0xf8] sm:$0x11] }
 0x10b   : > { %1185 = vmatmul.mubr.bf16.gmra.mrb[20].mxu1 %v8733_v9  ;;  %1095 = vmatprep.mubr.bf16.mxu0 %v8736_v3  ;;  %v12767_v9 = vld [vmem:[%s12448_s10 + $0x58] sm:$0x11]  ;;  %v8742_v3 = vcombine.high %v12736_v37, %v12739_v38  ;;  %v12827_v38 = vsel %vm12750_vm2, %v12672_v55, %v1360_v18  ;;  %v12844_v55 = vsel %vm12750_vm2, %v12690_v63, %v1402_v42 }
 0x10c   : > { %1192 = vmatprep.mubr.bf16.mxu1 %v8738_v13  ;;  %v1372_v13 = vshll.u32 %v12767_v9, 16  ;;  %v12822_v37 = vld [vmem:[%s12448_s10 + $0xb8] sm:$0x11] }
 0x10d   : > { %16509 = vst [vmem:[#allocation26_spill] sm:$0xff] %v12822_v37  ;;  %v1456_v11 = vshll.u32 %v12822_v37, 16 }
 0x10e   : > { %v1374_v40 = vrot.slane %v1372_v13, 5 }
 0x10f   : > { %v1458_v18 = vrot.slane %v1456_v11, 5  ;;  %v1478_v11 = vshll.u32 %v12580_v35, 16 }
 0x110   : > { %v12839_v12 = vsel %vm12750_vm2, %v12683_v60, %v1374_v40 }
 0x111   : > { %v1480_v27 = vrot.slane %v1478_v11, 5 }
 0x112   : > { %1096 = vmatmul.mubr.bf16.gmra.mrb[24].mxu0 %v8735_v48  ;;  %v1453_v48 = vor.u32 %v1452_v26, %v12744_v44  ;;  %v12832_v44 = vsel %vm12750_vm2, %v12681_v16, %v1388_v39  ;;  %v8839_v16 = vcombine.low %v12783_v29, %v12788_v36  ;;  %v8846_v29 = vcombine.high %v12839_v12, %v12844_v55  ;;  %v11581_v26 = vld [vmem:[%s12450_s1 + $0x2c8] sm:$0xff]  }
 0x113   : > { %1193 = vmatmul.mubr.bf16.gmra.mrb[24].mxu1 %v8737_v5  ;;  %1103 = vmatprep.mubr.bf16.mxu0 %v8740_v0  ;;  %v1442_v5 = vshll.u32 %v12809_v45, 16  ;;  %v12819_v0 = vld [vmem:[%s12448_s10 + $0x98] sm:$0x11]  ;;  %v8844_v60 = vcombine.high %v12827_v38, %v12832_v44  ;;  %v1464_v39 = vshll.u32 %v12574_v33, 16  ;;  %v11578_v33 = vld [vmem:[%s12450_s1 + $0x200] sm:$0xff]  }
 0x114   : > { %1200 = vmatprep.mubr.bf16.mxu1 %v8742_v3  ;;  %16508 = vst [vmem:[#allocation25_spill] sm:$0xff] %v12819_v0  ;;  %v1428_v3 = vshll.u32 %v12819_v0, 16  ;;  %v1454_v63 = vrot.slane %v1453_v48, 4  ;;  %v12879_v48 = vld [vmem:[%s12448_s10 + $0xd8] sm:$0x11] }
 0x115   : > { %v1444_v13 = vrot.slane %v1442_v5, 5  ;;  %16512 = vst [vmem:[#allocation29_spill] sm:$0xff] %v12879_v48 }
 0x116   : > { %v1430_v22 = vrot.slane %v1428_v3, 5  ;;  %v12891_v5 = vsel %vm12750_vm2, %v1454_v63, %v1458_v18  ;;  %v1475_v3 = vshrl.u32 %v12580_v35, 16  ;;  %v1503_v63 = vshrl.u32 %v12590_v41, 16  ;;  %v11582_v18 = vld [vmem:[%s12450_s1 + $0x208] sm:$0xff]  }
 0x117   : > { %v12868_v40 = vsel %vm12750_vm2, %v1440_v46, %v1444_v13  ;;  %v11580_v13 = vld [vmem:[%s12450_s1 + $0x248] sm:$0xff]   ;;  %v1506_v35 = vshll.u32 %v12590_v41, 16 }
 0x118   : > { %v12872_v42 = vsel %vm12750_vm2, %v1426_v31, %v1430_v22  ;;  %v11579_v31 = vld [vmem:[%s12450_s1 + $0x280] sm:$0xff]  }
 0x11a   : > { %1104 = vmatmul.mubr.bf16.gmra.mrb[28].mxu0 %v8739_v47  ;;  %v12864_v47 = vsel %vm12750_vm2, %v1412_v2, %v1416_v1  ;;  %v1489_v2 = vshrl.u32 %v12577_v34, 16  ;;  %v1484_v1 = vshll.u32 %v12879_v48, 16  ;;  %v1512_v48 = vshll.u32 %v12886_v59, 16 }
 0x11b   : > { %1201 = vmatmul.mubr.bf16.gmra.mrb[28].mxu1 %v8741_v43  ;;  %2157 = vmatprep.mubr.bf16.mxu0 %v8840_v50  ;;  %v12875_v43 = vld [vmem:[%s12448_s10 + $0xf0] sm:$0x11]  ;;  %v1466_v50 = vrot.slane %v1464_v39, 5 }
 0x11c   : > { %2254 = vmatprep.mubr.bf16.mxu1 %v8842_v54  ;;  %16511 = vst [vmem:[#allocation28_spill] sm:$0xff] %v12875_v43  ;;  %v1492_v54 = vshll.u32 %v12577_v34, 16  ;;  %v1498_v46 = vshll.u32 %v12875_v43, 16  ;;  %v1472_v34 = vrot.slane %v1470_v6, 5  ;;  %v1491_v39 = vrot.slane %v1489_v2, 4 }
 0x11d   : > { %v1467_v22 = vor.u32 %v1466_v50, %v1463_v30  ;;  %v1477_v43 = vrot.slane %v1475_v3, 4  ;;  %v8848_v30 = vcombine.high %v12864_v47, %v12868_v40  ;;  %v1486_v50 = vrot.slane %v1484_v1, 5  ;;  %v11586_v1 = vld [vmem:[%s12450_s1 + $0x210] sm:$0xff]  }
 0x11e   : > { %v1494_v36 = vrot.slane %v1492_v54, 5  ;;  %v1500_v37 = vrot.slane %v1498_v46, 5  ;;  %v1505_v2 = vrot.slane %v1503_v63, 4  ;;  %v11584_v54 = vld [vmem:[%s12450_s1 + $0x250] sm:$0xff]   ;;  %v1508_v46 = vrot.slane %v1506_v35, 5  ;;  %v11588_v63 = vld [vmem:[%s12450_s1 + $0x258] sm:$0xff]  }
 0x11f   : > { %v1468_v0 = vrot.slane %v1467_v22, 4  ;;  %v1481_v6 = vor.u32 %v1480_v27, %v1477_v43  ;;  %v8850_v27 = vcombine.high %v12872_v42, %v12891_v5  ;;  %v1520_v3 = vshll.u32 %v12601_v51, 16 }
 0x120   : > { %v1495_v45 = vor.u32 %v1494_v36, %v1491_v39 }
 0x121   : > { %v12908_v36 = vsel %vm12750_vm2, %v1468_v0, %v1472_v34  ;;  %v1482_v43 = vrot.slane %v1481_v6, 4  ;;  %v1517_v0 = vshrl.u32 %v12601_v51, 16  ;;  %v12938_v34 = vld [vmem:[%s12448_s10 + $0x158] sm:$0x11]  ;;  %v11587_v51 = vld [vmem:[%s12450_s1 + $0x290] sm:$0xff]   ;;  %v1522_v35 = vrot.slane %v1520_v3, 5 }
 0x122   : > { %2158 = vmatmul.mubr.bf16.vlgmr.msra.gmra.mrb[32].mxu0 %v8839_v16  ;;  %v1496_v41 = vrot.slane %v1495_v45, 4  ;;  %v1514_v16 = vrot.slane %v1512_v48, 5  ;;  %v11585_v45 = vld [vmem:[%s12450_s1 + $0x2d0] sm:$0xff]   ;;  %v1509_v48 = vor.u32 %v1508_v46, %v1505_v2  ;;  %v1545_v6 = vshrl.u32 %v12604_v52, 16  ;;  %v12944_v2 = vld [vmem:[%s12448_s10 + $0x178] sm:$0x11] }
 0x123   : > { %2255 = vmatmul.mubr.bf16.vlgmr.msra.gmra.mrb[32].mxu1 %v8841_v14  ;;  %10423 = vmatpush3.bf16.msra.mxu0 %v11578_v33  ;;  %v8847_v14 = vcombine.low %v12864_v47, %v12868_v40  ;;  %v12915_v33 = vld [vmem:[%s12448_s10 + $0x150] sm:$0x11]  ;;  %v1519_v22 = vrot.slane %v1517_v0, 4  ;;  %v1531_v46 = vshrl.u32 %v12610_v56, 16  ;;  %v1540_v3 = vshll.u32 %v12938_v34, 16 }
 0x124   : > { %10487 = vmatpush3.bf16.msra.mxu1 %v11579_v31  ;;  %2165 = vmatprep.mubr.bf16.mxu0 %v8844_v60  ;;  %v12921_v60 = vsel %vm12750_vm2, %v1496_v41, %v1500_v37  ;;  %v12924_v31 = vld [vmem:[%s12448_s10 + $0x170] sm:$0x11]  ;;  %v1526_v11 = vshll.u32 %v12915_v33, 16  ;;  %v12935_v37 = vsel %vm12750_vm2, %v1482_v43, %v1486_v50  ;;  %v1510_v39 = vrot.slane %v1509_v48, 4 }
 0x125   : > { %2262 = vmatprep.mubr.bf16.mxu1 %v8846_v29  ;;  %10424 = vmatprep.subr.bf16.mxu0 %v11580_v13  ;;  %v8849_v29 = vcombine.low %v12872_v42, %v12891_v5  ;;  %v8852_v13 = vcombine.high %v12908_v36, %v12921_v60  ;;  %v1548_v50 = vshll.u32 %v12604_v52, 16  ;;  %v1554_v41 = vshll.u32 %v12924_v31, 16  ;;  %v11596_v52 = vld [vmem:[%s12450_s1 + $0x268] sm:$0xff]  }
 0x126   : > { %10488 = vmatprep.subr.bf16.mxu1 %v11581_v26  ;;  %v1528_v26 = vrot.slane %v1526_v11, 5  ;;  %v12952_v43 = vsel %vm12750_vm2, %v1510_v39, %v1514_v16  ;;  %v1523_v0 = vor.u32 %v1522_v35, %v1519_v22  ;;  %v1547_v48 = vrot.slane %v1545_v6, 4  ;;  %v11591_v6 = vld [vmem:[%s12450_s1 + $0x298] sm:$0xff]  }
 0x127   : > { %10425 = vmatpush3.bf16.msra.mxu0 %v11582_v18  ;;  %v1534_v18 = vshll.u32 %v12610_v56, 16  ;;  %v1550_v11 = vrot.slane %v1548_v50, 5  ;;  %v1556_v16 = vrot.slane %v1554_v41, 5  ;;  %v16514_v22 = vcombine.low %v12839_v12, %v12844_v55  ;;  %v12978_v41 = vld [vmem:[%s12448_s10 + $0x190] sm:$0x11] }
 0x128   : > { %10489 = vmatpush3.bf16.msra.mxu1 %v11583_v10  ;;  %10426 = vmatprep.subr.bf16.mxu0 %v11584_v54  ;;  %v16513_v10 = vcombine.low %v12827_v38, %v12832_v44  ;;  %v11589_v54 = vld [vmem:[%s12450_s1 + $0x2d8] sm:$0xff]   ;;  %v1524_v39 = vrot.slane %v1523_v0, 4  ;;  %v1533_v38 = vrot.slane %v1531_v46, 4  ;;  %v1542_v35 = vrot.slane %v1540_v3, 5  ;;  %v12984_v3 = vld [vmem:[%s12448_s10 + $0x1b0] sm:$0x11] }
 0x129   : > { %10490 = vmatprep.subr.bf16.mxu1 %v11585_v45  ;;  %v11590_v45 = vld [vmem:[%s12450_s1 + $0x218] sm:$0xff]   ;;  %v1536_v44 = vrot.slane %v1534_v18, 5  ;;  %v1559_v56 = vshrl.u32 %v12613_v57, 16  ;;  %v1562_v50 = vshll.u32 %v12613_v57, 16  ;;  %v1568_v12 = vshll.u32 %v12944_v2, 16 }
 0x12a   : > { %2166 = vmatmul.mubr.bf16.gmra.mrb[36].mxu0 %v16513_v10  ;;  %v1551_v10 = vor.u32 %v1550_v11, %v1547_v48  ;;  %v12973_v55 = vsel %vm12750_vm2, %v1524_v39, %v1528_v26  ;;  %v1573_v57 = vshrl.u32 %v12636_v20, 16  ;;  %v1576_v46 = vshll.u32 %v12636_v20, 16  ;;  %v11594_v48 = vld [vmem:[%s12450_s1 + $0x220] sm:$0xff]  }
 0x12b   : > { %2263 = vmatmul.mubr.bf16.gmra.mrb[36].mxu1 %v16514_v22  ;;  %2173 = vmatprep.mubr.bf16.mxu0 %v8848_v30  ;;  %v1537_v30 = vor.u32 %v1536_v44, %v1533_v38  ;;  %v1570_v0 = vrot.slane %v1568_v12, 5  ;;  %v11595_v11 = vld [vmem:[%s12450_s1 + $0x2a0] sm:$0xff]   ;;  %v1582_v38 = vshll.u32 %v12978_v41, 16  ;;  %v12989_v44 = vld [vmem:[%s12448_s10 + $0x198] sm:$0x11]  ;;  %v1587_v47 = vshrl.u32 %v12643_v24, 16 }
 0x12c   : > { %2270 = vmatprep.mubr.bf16.mxu1 %v8850_v27  ;;  %10427 = vmatpush3.bf16.msra.mxu0 %v11586_v1  ;;  %v11592_v27 = vld [vmem:[%s12450_s1 + $0x260] sm:$0xff]   ;;  %v1552_v18 = vrot.slane %v1551_v10, 4  ;;  %v1575_v22 = vrot.slane %v1573_v57, 4  ;;  %v1578_v39 = vrot.slane %v1576_v46, 5  ;;  %v1604_v10 = vshll.u32 %v12639_v21, 16 }
 0x12d   : > { %10491 = vmatpush3.bf16.msra.mxu1 %v11587_v51  ;;  %10428 = vmatprep.subr.bf16.mxu0 %v11588_v63  ;;  %v11593_v1 = vld [vmem:[%s12450_s1 + $0x2e0] sm:$0xff]   ;;  %v1561_v51 = vrot.slane %v1559_v56, 4  ;;  %v1564_v63 = vrot.slane %v1562_v50, 5  ;;  %v1538_v26 = vrot.slane %v1537_v30, 4  ;;  %v8853_v50 = vcombine.low %v12935_v37, %v12952_v43  ;;  %v11597_v30 = vld [vmem:[%s12450_s1 + $0x2e8] sm:$0xff]  }
 0x12e   : > { %10492 = vmatprep.subr.bf16.mxu1 %v11589_v54  ;;  %v12994_v20 = vsel %vm12750_vm2, %v1552_v18, %v1556_v16  ;;  %v1601_v54 = vshrl.u32 %v12639_v21, 16  ;;  %v1584_v16 = vrot.slane %v1582_v38, 5  ;;  %v1579_v21 = vor.u32 %v1578_v39, %v1575_v22  ;;  %v11599_v22 = vld [vmem:[%s12450_s1 + $0x2a8] sm:$0xff]  }
 0x12f   : > { %v1565_v56 = vor.u32 %v1564_v63, %v1561_v51  ;;  %v8856_v12 = vcombine.high %v12973_v55, %v12994_v20  ;;  %v1606_v18 = vrot.slane %v1604_v10, 5  ;;  %v11598_v51 = vld [vmem:[%s12450_s1 + $0x228] sm:$0xff]   ;;  %v1590_v40 = vshll.u32 %v12643_v24, 16  ;;  %v11601_v10 = vld [vmem:[%s12450_s1 + $0x2f0] sm:$0xff]  }
 0x130   : > { %10429 = vmatpush3.bf16.msra.mxu0 %v11590_v45  ;;  %v13004_v45 = vsel %vm12750_vm2, %v1538_v26, %v1542_v35  ;;  %v1603_v46 = vrot.slane %v1601_v54, 4  ;;  %v1610_v35 = vshll.u32 %v12984_v3, 16  ;;  %v1580_v5 = vrot.slane %v1579_v21, 4 }
 0x131   : > { %10493 = vmatpush3.bf16.msra.mxu1 %v11591_v6  ;;  %10430 = vmatprep.subr.bf16.mxu0 %v11592_v27  ;;  %v1566_v57 = vrot.slane %v1565_v56, 4  ;;  %v13011_v6 = vld [vmem:[%s12448_s10 + $0x1b8] sm:$0x11]  ;;  %v16515_v27 = vcombine.high %v12935_v37, %v12952_v43  ;;  %v1589_v26 = vrot.slane %v1587_v47, 4  ;;  %v1592_v56 = vrot.slane %v1590_v40, 5 }
 0x132   : > { %2174 = vmatmul.mubr.bf16.gmra.mrb[40].mxu0 %v8847_v14  ;;  %10494 = vmatprep.subr.bf16.mxu1 %v11593_v1  ;;  %v1596_v14 = vshll.u32 %v12989_v44, 16  ;;  %v8855_v1 = vcombine.low %v12973_v55, %v12994_v20  ;;  %v1612_v63 = vrot.slane %v1610_v35, 5  ;;  %v13043_v39 = vsel %vm12750_vm2, %v1580_v5, %v1584_v16  ;;  %v13054_v16 = vld [vmem:[%s12448_s10 + $0x1f0] sm:$0x11] }
 0x133   : > { %2271 = vmatmul.mubr.bf16.gmra.mrb[40].mxu1 %v8849_v29  ;;  %2181 = vmatprep.mubr.bf16.mxu0 %v8852_v13  ;;  %v13029_v42 = vsel %vm12750_vm2, %v1566_v57, %v1570_v0  ;;  %v1607_v29 = vor.u32 %v1606_v18, %v1603_v46  ;;  %v1615_v13 = vshrl.u32 %v12646_v25, 16  ;;  %v13038_v0 = vld [vmem:[%s12448_s10 + $0x1d0] sm:$0x11]  ;;  %v1629_v21 = vshrl.u32 %v12669_v53, 16 }
 0x134   : > { %2278 = vmatprep.mubr.bf16.mxu1 %v16515_v27  ;;  %10431 = vmatpush3.bf16.msra.mxu0 %v11594_v48  ;;  %v8858_v24 = vcombine.high %v13004_v45, %v13029_v42  ;;  %v11600_v48 = vld [vmem:[%s12450_s1 + $0x270] sm:$0xff]   ;;  %v1598_v54 = vrot.slane %v1596_v14, 5  ;;  %v1593_v18 = vor.u32 %v1592_v56, %v1589_v26  ;;  %v1632_v35 = vshll.u32 %v12669_v53, 16  ;;  %v13063_v27 = vld [vmem:[%s12448_s10 + $0x1d8] sm:$0x11] }
 0x135   : > { %10495 = vmatpush3.bf16.msra.mxu1 %v11595_v11  ;;  %10432 = vmatprep.subr.bf16.mxu0 %v11596_v52  ;;  %v1608_v38 = vrot.slane %v1607_v29, 4  ;;  %v1617_v57 = vrot.slane %v1615_v13, 4  ;;  %v1618_v11 = vshll.u32 %v12646_v25, 16  ;;  %v1624_v52 = vshll.u32 %v13011_v6, 16 }
 0x136   : > { %10496 = vmatprep.subr.bf16.mxu1 %v11597_v30  ;;  %v1638_v30 = vshll.u32 %v13038_v0, 16  ;;  %v8857_v47 = vcombine.low %v13004_v45, %v13029_v42  ;;  %v1594_v53 = vrot.slane %v1593_v18, 4  ;;  %v1631_v5 = vrot.slane %v1629_v21, 4 }
 0x137   : > { %v13051_v46 = vsel %vm12750_vm2, %v1608_v38, %v1612_v63  ;;  %v1620_v40 = vrot.slane %v1618_v11, 5  ;;  %v1626_v14 = vrot.slane %v1624_v52, 5  ;;  %v1634_v29 = vrot.slane %v1632_v35, 5 }
 0x138   : > { %10433 = vmatpush3.bf16.msra.mxu0 %v11598_v51  ;;  %v8860_v25 = vcombine.high %v13043_v39, %v13051_v46  ;;  %v16516_v51 = vcombine.low %v12908_v36, %v12921_v60  ;;  %v1640_v13 = vrot.slane %v1638_v30, 5  ;;  %v1657_v42 = vshrl.u32 %v12675_v15, 16  ;;  %v11602_v60 = vld [vmem:[%s12450_s1 + $0x230] sm:$0xff]  }
 0x139   : > { %10497 = vmatpush3.bf16.msra.mxu1 %v11599_v22  ;;  %10434 = vmatprep.subr.bf16.mxu0 %v11600_v48  ;;  %v1621_v45 = vor.u32 %v1620_v40, %v1617_v57  ;;  %v1660_v63 = vshll.u32 %v12675_v15, 16  ;;  %v1666_v36 = vshll.u32 %v13054_v16, 16  ;;  %v13080_v26 = vsel %vm12750_vm2, %v1594_v53, %v1598_v54  ;;  %v11603_v54 = vld [vmem:[%s12450_s1 + $0x2b0] sm:$0xff]  }
 0x13a   : > { %2182 = vmatmul.mubr.bf16.gmra.mrb[44].mxu0 %v16516_v51  ;;  %10498 = vmatprep.subr.bf16.mxu1 %v11601_v10  ;;  %v1635_v37 = vor.u32 %v1634_v29, %v1631_v5  ;;  %v1643_v43 = vshrl.u32 %v12678_v58, 16  ;;  %v1659_v22 = vrot.slane %v1657_v42, 4  ;;  %v1671_v52 = vshrl.u32 %v12688_v62, 16  ;;  %v13102_v40 = vld [vmem:[%s12448_s10 + $0x210] sm:$0x11] }
 0x13b   : > { %2279 = vmatmul.mubr.bf16.gmra.mrb[44].mxu1 %v8853_v50  ;;  %2189 = vmatprep.mubr.bf16.mxu0 %v8856_v12  ;;  %v1646_v50 = vshll.u32 %v12678_v58, 16  ;;  %v1622_v12 = vrot.slane %v1621_v45, 4  ;;  %v1662_v48 = vrot.slane %v1660_v63, 5  ;;  %v1668_v38 = vrot.slane %v1666_v36, 5  ;;  %v13091_v58 = vld [vmem:[%s12448_s10 + $0x1f8] sm:$0x11] }
 0x13c   : > { %2286 = vmatprep.mubr.bf16.mxu1 %v8858_v24  ;;  %10435 = vmatpush3.bf16.msra.mxu0 %v11602_v60  ;;  %v1636_v15 = vrot.slane %v1635_v37, 4  ;;  %v1645_v56 = vrot.slane %v1643_v43, 4  ;;  %v1652_v24 = vshll.u32 %v13063_v27, 16  ;;  %v1674_v21 = vshll.u32 %v12688_v62, 16  ;;  %v13105_v29 = vld [vmem:[%s12448_s10 + $0x230] sm:$0x11] }
 0x13d   : > { %v1648_v10 = vrot.slane %v1646_v50, 5  ;;  %v13088_v57 = vsel %vm12750_vm2, %v1622_v12, %v1626_v14  ;;  %v1663_v11 = vor.u32 %v1662_v48, %v1659_v22  ;;  %10499 = vmatpush3.bf16.msra.mxu1 %v11603_v54  ;;  %v1673_v53 = vrot.slane %v1671_v52, 4  ;;  %v1282_v62 = vld [vmem:[%s12448_s10 + $0x208] sm:$0xff]  ;;  %v13115_v36 = vld [vmem:[%s12448_s10 + $0x218] sm:$0x11] }
 0x13e   : > { %v8862_v18 = vcombine.high %v13080_v26, %v13088_v57  ;;  %v13099_v35 = vsel %vm12750_vm2, %v1636_v15, %v1640_v13  ;;  %v1654_v51 = vrot.slane %v1652_v24, 5  ;;  %v1676_v5 = vrot.slane %v1674_v21, 5  ;;  %v11605_v43 = vld [vmem:[%s12450_s1 + $0x2f8] sm:$0xff]  }
 0x13f   : > { %v1649_v30 = vor.u32 %v1648_v10, %v1645_v56  ;;  %v1664_v14 = vrot.slane %v1663_v11, 4  ;;  %v1680_v13 = vshll.u32 %v13091_v58, 16  ;;  %v1685_v42 = vshrl.u32 %v12725_v4, 16  ;;  %v11606_v12 = vld [vmem:[%s12450_s1 + $0x238] sm:$0xff]   ;;  %v1286_v56 = vld [vmem:[%s12448_s10 + $0x228] sm:$0xff]  ;;  %10500 = vmatprep.subr.bf16.mxu1 %v11605_v43 }
 0x140   : > { %v1688_v63 = vshll.u32 %v12725_v4, 16  ;;  %v1677_v37 = vor.u32 %v1676_v5, %v1673_v53  ;;  %v1694_v55 = vshll.u32 %v13102_v40, 16  ;;  %v1713_v20 = vshrl.u32 %v12728_v28, 16  ;;  %v13138_v10 = vld [vmem:[%s12448_s10 + $0x238] sm:$0x11] }
 0x141   : > { %v1650_v45 = vrot.slane %v1649_v30, 4  ;;  %v13119_v60 = vsel %vm12750_vm2, %v1664_v14, %v1668_v38  ;;  %v8859_v4 = vcombine.low %v13043_v39, %v13051_v46  ;;  %v1682_v50 = vrot.slane %v1680_v13, 5  ;;  %v11607_v21 = vld [vmem:[%s12450_s1 + $0x2b8] sm:$0xff]   ;;  %v2337_v43 = vld [vmem:[%s12448_s10 + $0x20] sm:$0xee] }
 0x142   : > { %2190 = vmatmul.mubr.bf16.gmra.mrb[48].mxu0 %v8855_v1  ;;  %v11604_v1 = vld [vmem:[%s12450_s1 + $0x278] sm:$0xff]   ;;  %v1678_v48 = vrot.slane %v1677_v37, 4  ;;  %v1687_v38 = vrot.slane %v1685_v42, 4  ;;  %v1690_v15 = vrot.slane %v1688_v63, 5  ;;  %v1715_v39 = vrot.slane %v1713_v20, 4  ;;  %10501 = vmatpush3.bf16.msra.mxu1 %v11607_v21  ;;  %v11609_v20 = vld [vmem:[%s12450_s1 + $0x3c0] sm:$0xff]  }
 0x143   : > { %2287 = vmatmul.mubr.bf16.gmra.mrb[48].mxu1 %v8857_v47  ;;  %2197 = vmatprep.mubr.bf16.mxu0 %v8860_v25  ;;  %v8861_v47 = vcombine.low %v13080_v26, %v13088_v57  ;;  %v8864_v25 = vcombine.high %v13099_v35, %v13119_v60  ;;  %v13134_v22 = vsel %vm12750_vm2, %v1650_v45, %v1654_v51  ;;  %v1716_v46 = vshll.u32 %v12728_v28, 16  ;;  %v2335_v37 = vld [vmem:[%s12448_s10] sm:$0xee] }
 0x144   : > { %2294 = vmatprep.mubr.bf16.mxu1 %v8862_v18  ;;  %10436 = vmatprep.subr.bf16.mxu0 %v11604_v1  ;;  %v1722_v26 = vshll.u32 %v13105_v29, 16  ;;  %v1699_v24 = vshrl.u32 %v1282_v62, 16  ;;  %v1683_v54 = vsel %vm12750_vm2, %v1678_v48, %v1682_v50  ;;  %v1691_v57 = vor.u32 %v1690_v15, %v1687_v38  ;;  %v11608_v18 = vld [vmem:[%s12450_s1 + $0x340] sm:$0xff]   ;;  %v2336_v38 = vld [vmem:[%s12448_s10 + $0x8] sm:$0xee] }
 0x145   : > { %10437 = vmatpush3.bf16.msra.mxu0 %v11606_v12  ;;  %v1702_v11 = vshll.u32 %v1282_v62, 16  ;;  %v1708_v52 = vshll.u32 %v13115_v36, 16  ;;  %v8866_v30 = vcombine.high %v13134_v22, %v1683_v54  ;;  %v1696_v14 = vrot.slane %v1694_v55, 5  ;;  %10614 = vmatprep.subr.bf16.mxu1 %v11609_v20  ;;  %v2343_v20 = vld [vmem:[%s12448_s10 + $0x80] sm:$0xee] }
 0x146   : > { %v1718_v51 = vrot.slane %v1716_v46, 5  ;;  %v1692_v28 = vrot.slane %v1691_v57, 4  ;;  %v1724_v53 = vrot.slane %v1722_v26, 5  ;;  %v1701_v5 = vrot.slane %v1699_v24, 4  ;;  %10550 = vmatprep.subr.bf16.mxu0 %v11608_v18 }
 0x147   : > { %v1704_v45 = vrot.slane %v1702_v11, 5  ;;  %v1727_v62 = vshrl.u32 %v1286_v56, 16  ;;  %v1730_v42 = vshll.u32 %v1286_v56, 16  ;;  %v1736_v63 = vshll.u32 %v13138_v10, 16  ;;  %v2338_v56 = vld [vmem:[%s12448_s10 + $0x28] sm:$0xee] }
 0x148   : > { %v1719_v13 = vor.u32 %v1718_v51, %v1715_v39  ;;  %v1710_v1 = vrot.slane %v1708_v52, 5  ;;  %v1697_v50 = vsel %vm12750_vm2, %v1692_v28, %v1696_v14  ;;  %v8865_v26 = vcombine.low %v13134_v22, %v1683_v54  ;;  %v2341_v28 = vld [vmem:[%s12448_s10 + $0x60] sm:$0xee] }
 0x149   : > { %v1705_v55 = vor.u32 %v1704_v45, %v1701_v5  ;;  %v1729_v12 = vrot.slane %v1727_v62, 4  ;;  %v1732_v48 = vrot.slane %v1730_v42, 5  ;;  %v1738_v46 = vrot.slane %v1736_v63, 5  ;;  %v2340_v45 = vld [vmem:[%s12448_s10 + $0x48] sm:$0xee] }
 0x14a   : > { %2198 = vmatmul.mubr.bf16.gmra.mrb[52].mxu0 %v8859_v4  ;;  %v1720_v4 = vrot.slane %v1719_v13, 4  ;;  %v8903_v57 = vrot.slane %v2335_v37, 9  ;;  %v2436_v11 = vrot.slane %v12713_v19, 5  ;;  %v8905_v18 = vrot.slane %v2337_v43, 9  ;;  %v2342_v62 = vld [vmem:[%s12448_s10 + $0x68] sm:$0xee] }
 0x14b   : > { %2295 = vmatmul.mubr.bf16.gmra.mrb[52].mxu1 %v8861_v47  ;;  %2205 = vmatprep.mubr.bf16.mxu0 %v8864_v25  ;;  %v1706_v15 = vrot.slane %v1705_v55, 4  ;;  %v8863_v47 = vcombine.low %v13099_v35, %v13119_v60  ;;  %v1733_v39 = vor.u32 %v1732_v48, %v1729_v12  ;;  %v2444_v35 = vrot.slane %v12717_v23, 5  ;;  %v2339_v60 = vld [vmem:[%s12448_s10 + $0x40] sm:$0xee]  ;;  %v2344_v48 = vld [vmem:[%s12448_s10 + $0x88] sm:$0xee] }
 0x14c   : > { %2302 = vmatprep.mubr.bf16.mxu1 %v8866_v30  ;;  %v1725_v25 = vsel %vm12750_vm2, %v1720_v4, %v1724_v53  ;;  %v16517_v30 = vmov 0  ;;  %v8904_v22 = vrot.slane %v2336_v38, 9  ;;  %v2440_v54 = vrot.slane %v12721_v17, 5  ;;  %v2345_v12 = vld [vmem:[%s12448_s10 + $0xa0] sm:$0xee] }
 0x14d   : > { %v8868_v24 = vcombine.high %v1697_v50, %v1725_v25  ;;  %v1711_v52 = vsel %vm12750_vm2, %v1706_v15, %v1710_v1  ;;  %v1734_v21 = vrot.slane %v1733_v39, 4  ;;  %v16518_v30 = vsel %vm13168_vm5, 4294967295, %v16517_v30 }
 0x14e   : > { %16519 = vst [vmem:[#allocation30_spill] sm:$0xff] %v16518_v30  ;;  %v8906_v14 = vrot.slane %v2338_v56, 9  ;;  %v2448_v19 = vrot.slane %v12732_v32, 5  ;;  %v8907_v23 = vrot.slane %v2339_v60, 9  ;;  %v2452_v53 = vrot.slane %v12761_v7, 5 }
 0x14f   : > { %v1739_v51 = vsel %vm12750_vm2, %v1734_v21, %v1738_v46  ;;  %v13181_v17 = vsel %vm13168_vm5, %v8903_v57, %v2436_v11  ;;  %v13185_v32 = vsel %vm13168_vm5, %v8905_v18, %v2444_v35  ;;  %v13189_v13 = vsel %vm13168_vm5, %v8904_v22, %v2440_v54  ;;  %v16521_v46 = vld [vmem:[#allocation24_spill] sm:$0xff]  ;;  %v16523_v21 = vld [vmem:[#allocation27_spill] sm:$0xff] }
 0x150   : > { %v8870_v5 = vcombine.high %v1711_v52, %v1739_v51  ;;  %v13193_v7 = vsel %vm13168_vm5, %v8906_v14, %v2448_v19  ;;  %v8867_v42 = vcombine.low %v1697_v50, %v1725_v25  ;;  %v8909_v63 = vrot.slane %v2341_v28, 9  ;;  %v2346_v50 = vld [vmem:[%s12448_s10 + $0xa8] sm:$0xee]  ;;  %v16524_v22 = vld [vmem:[#allocation28_spill] sm:$0xff]  ;;  %v16525_v14 = vld [vmem:[#allocation29_spill] sm:$0xff] }
 0x151   : > { %v2460_v37 = vrot.slane %v12764_v8, 5  ;;  %v8869_v55 = vcombine.low %v1711_v52, %v1739_v51  ;;  %v9000_v1 = vcombine.high %v13181_v17, %v13185_v32  ;;  %v8908_v43 = vrot.slane %v2340_v45, 9  ;;  %v16520_v25 = vld [vmem:[#allocation23_spill] sm:$0xff]  ;;  %v2349_v45 = vld [vmem:[%s12448_s10 + $0xe0] sm:$0xee] }
 0x152   : > { %2206 = vmatmul.mubr.bf16.gmra.mrb[56].mxu0 %v8863_v47  ;;  %v2456_v4 = vrot.slane %v12767_v9, 5  ;;  %v9002_v38 = vcombine.high %v13189_v13, %v13193_v7  ;;  %v8910_v15 = vrot.slane %v2342_v62, 9  ;;  %v2464_v56 = vrot.slane %v12774_v61, 5  ;;  %v16522_v61 = vld [vmem:[#allocation25_spill] sm:$0xff]  ;;  %v2348_v62 = vld [vmem:[%s12448_s10 + $0xc8] sm:$0xee] }
 0x153   : > { %2303 = vmatmul.mubr.bf16.gmra.mrb[56].mxu1 %v8865_v26  ;;  %2213 = vmatprep.mubr.bf16.mxu0 %v8868_v24  ;;  %v8911_v47 = vrot.slane %v2343_v20, 9  ;;  %v2468_v8 = vrot.slane %v16520_v25, 5  ;;  %v8913_v39 = vrot.slane %v2345_v12, 9  ;;  %v2476_v26 = vrot.slane %v16521_v46, 5  ;;  %v2350_v20 = vld [vmem:[%s12448_s10 + $0xe8] sm:$0xee] }
 0x154   : > { %2310 = vmatprep.mubr.bf16.mxu1 %v8870_v5  ;;  %v13211_v9 = vsel %vm13168_vm5, %v8907_v23, %v2452_v53  ;;  %v13215_v24 = vsel %vm13168_vm5, %v8909_v63, %v2460_v37  ;;  %v8912_v57 = vrot.slane %v2344_v48, 9  ;;  %v2472_v11 = vrot.slane %v16522_v61, 5  ;;  %v11610_v23 = vld [vmem:[%s12450_s1 + $0x300] sm:$0xff]   ;;  %v11613_v12 = vld [vmem:[%s12450_s1 + $0x3c8] sm:$0xff]   ;;  %v11616_v46 = vld [vmem:[%s12450_s1 + $0x350] sm:$0xff]  }
 0x155   : > { %v8914_v52 = vrot.slane %v2346_v50, 9  ;;  %v2484_v18 = vrot.slane %v16523_v21, 5  ;;  %v13221_v35 = vsel %vm13168_vm5, %v8908_v43, %v2456_v4  ;;  %v13225_v60 = vsel %vm13168_vm5, %v8910_v15, %v2464_v56  ;;  %v2347_v5 = vld [vmem:[%s12448_s10 + $0xc0] sm:$0xee]  ;;  %v11614_v56 = vld [vmem:[%s12450_s1 + $0x308] sm:$0xff]  }
 0x156   : > { %v2492_v54 = vrot.slane %v16524_v22, 5  ;;  %v2488_v19 = vrot.slane %v16525_v14, 5  ;;  %v8999_v51 = vcombine.low %v13181_v17, %v13185_v32  ;;  %v9001_v28 = vcombine.low %v13189_v13, %v13193_v7  ;;  %v11612_v32 = vld [vmem:[%s12450_s1 + $0x348] sm:$0xff]   ;;  %v2353_v14 = vld [vmem:[%s12448_s10 + $0x160] sm:$0xee] }
 0x157   : > { %v9004_v53 = vcombine.high %v13211_v9, %v13215_v24  ;;  %v8915_v63 = vrot.slane %v2347_v5, 9  ;;  %v8917_v37 = vrot.slane %v2349_v45, 9  ;;  %v9006_v17 = vcombine.high %v13221_v35, %v13225_v60  ;;  %v16526_v7 = vld [vmem:[#allocation26_spill] sm:$0xff] }
 0x158   : > { %v13247_v13 = vsel %vm13168_vm5, %v8911_v47, %v2468_v8  ;;  %v2480_v43 = vrot.slane %v16526_v7, 5  ;;  %v8918_v4 = vrot.slane %v2350_v20, 9  ;;  %v13253_v48 = vsel %vm13168_vm5, %v8913_v39, %v2476_v26  ;;  %v11615_v39 = vld [vmem:[%s12450_s1 + $0x388] sm:$0xff]  }
 0x159   : > { %v2500_v8 = vrot.slane %v12915_v33, 5  ;;  %v2508_v21 = vrot.slane %v12924_v31, 5  ;;  %v13287_v22 = vsel %vm13168_vm5, %v8912_v57, %v2472_v11  ;;  %v9003_v57 = vcombine.low %v13211_v9, %v13215_v24 }
 0x15a   : > { %2214 = vmatmul.mubr.bf16.gmra.mrb[60].mxu0 %v8867_v42  ;;  %v11611_v42 = vld [vmem:[%s12450_s1 + $0x380] sm:$0xff]   ;;  %v13291_v33 = vsel %vm13168_vm5, %v8914_v52, %v2480_v43  ;;  %v9005_v11 = vcombine.low %v13221_v35, %v13225_v60  ;;  %v9008_v52 = vcombine.high %v13247_v13, %v13253_v48  ;;  %v11619_v35 = vld [vmem:[%s12450_s1 + $0x390] sm:$0xff]   ;;  %v11620_v60 = vld [vmem:[%s12450_s1 + $0x358] sm:$0xff]   ;;  %v2516_v20 = vrot.slane %v12978_v41, 5 }
 0x15b   : > { %2311 = vmatmul.mubr.bf16.gmra.mrb[60].mxu1 %v8869_v55  ;;  %2979 = vmatprep.mubr.bf16.mxu0 %v9000_v1  ;;  %v8916_v55 = vrot.slane %v2348_v62, 9  ;;  %v2496_v1 = vrot.slane %v12886_v59, 5  ;;  %v13257_v59 = vsel %vm13168_vm5, %v8915_v63, %v2484_v18  ;;  %v2504_v18 = vrot.slane %v12938_v34, 5  ;;  %v2354_v34 = vld [vmem:[%s12448_s10 + $0x168] sm:$0xee] }
 0x15c   : > { %3076 = vmatprep.mubr.bf16.mxu1 %v9002_v38  ;;  %v13261_v38 = vsel %vm13168_vm5, %v8917_v37, %v2492_v54  ;;  %v2351_v54 = vld [vmem:[%s12448_s10 + $0x140] sm:$0xee]  ;;  %v8922_v5 = vrot.slane %v2354_v34, 9  ;;  %v9010_v45 = vcombine.high %v13287_v22, %v13291_v33  ;;  %v2520_v7 = vrot.slane %v12989_v44, 5  ;;  %v2356_v41 = vld [vmem:[%s12448_s10 + $0x188] sm:$0xee] }
 0x15d   : > { %v13265_v15 = vsel %vm13168_vm5, %v8916_v55, %v2488_v19  ;;  %v9012_v50 = vcombine.high %v13257_v59, %v13261_v38  ;;  %v13272_v47 = vsel %vm13168_vm5, %v8918_v4, %v2496_v1  ;;  %v9011_v25 = vcombine.low %v13257_v59, %v13261_v38  ;;  %v2352_v19 = vld [vmem:[%s12448_s10 + $0x148] sm:$0xee]  ;;  %v11621_v55 = vld [vmem:[%s12450_s1 + $0x3d8] sm:$0xff]   ;;  %v2355_v43 = vld [vmem:[%s12448_s10 + $0x180] sm:$0xee] }
 0x15e   : > { %v9014_v26 = vcombine.high %v13265_v15, %v13272_v47  ;;  %v9013_v61 = vcombine.low %v13265_v15, %v13272_v47  ;;  %v8919_v31 = vrot.slane %v2351_v54, 9  ;;  %v2357_v4 = vld [vmem:[%s12448_s10 + $0x1a0] sm:$0xee]  ;;  %v11623_v44 = vld [vmem:[%s12450_s1 + $0x398] sm:$0xff]   ;;  %v2532_v34 = vrot.slane %v13038_v0, 5 }
 0x15f   : > { %v11624_v54 = vld [vmem:[%s12450_s1 + $0x360] sm:$0xff]   ;;  %v11639_v59 = vld [vmem:[%s12450_s1 + $0x3b8] sm:$0xff]  }
 0x160   : > { %v13310_v62 = vsel %vm13168_vm5, %v8919_v31, %v2500_v8  ;;  %v8925_v8 = vrot.slane %v2357_v4, 9  ;;  %v2359_v0 = vld [vmem:[%s12448_s10 + $0x1c0] sm:$0xee]  ;;  %v11631_v4 = vld [vmem:[%s12450_s1 + $0x3a8] sm:$0xff]  }
 0x161   : > { %v11640_v38 = vld [vmem:[%s12450_s1 + $0x440] sm:$0xff]  }
 0x162   : > { %2980 = vmatmul.mubr.bf16.vlgmr.msra.gmra.mrb[64].mxu0 %v8999_v51  ;;  %v8921_v51 = vrot.slane %v2353_v14, 9  ;;  %v9063_v15 = vld [vmem:[%s12448_s10 + $0x20] sm:$0xff] }
 0x163   : > { %3077 = vmatmul.mubr.bf16.vlgmr.msra.gmra.mrb[64].mxu1 %v9001_v28  ;;  %10551 = vmatpush3.bf16.msra.mxu0 %v11610_v23  ;;  %v8920_v28 = vrot.slane %v2352_v19, 9  ;;  %v2512_v23 = vrot.slane %v12944_v2, 5  ;;  %v11618_v2 = vld [vmem:[%s12450_s1 + $0x310] sm:$0xff]   ;;  %v9065_v47 = vld [vmem:[%s12448_s10 + $0x40] sm:$0xff] }
 0x164   : > { %10615 = vmatpush3.bf16.msra.mxu1 %v11611_v42  ;;  %2987 = vmatprep.mubr.bf16.mxu0 %v9004_v53  ;;  %v11617_v53 = vld [vmem:[%s12450_s1 + $0x3d0] sm:$0xff]   ;;  %v13314_v9 = vsel %vm13168_vm5, %v8921_v51, %v2508_v21  ;;  %v2528_v21 = vrot.slane %v13011_v6, 5 }
 0x165   : > { %3084 = vmatprep.mubr.bf16.mxu1 %v9006_v17  ;;  %10552 = vmatprep.subr.bf16.mxu0 %v11612_v32  ;;  %v13318_v24 = vsel %vm13168_vm5, %v8920_v28, %v2504_v18  ;;  %v9016_v42 = vcombine.high %v13310_v62, %v13314_v9  ;;  %v13326_v63 = vsel %vm13168_vm5, %v8922_v5, %v2512_v23  ;;  %v2524_v32 = vrot.slane %v12984_v3, 5  ;;  %v11626_v28 = vld [vmem:[%s12450_s1 + $0x320] sm:$0xff]  }
 0x166   : > { %10616 = vmatprep.subr.bf16.mxu1 %v11613_v12  ;;  %v9015_v37 = vcombine.low %v13310_v62, %v13314_v9  ;;  %v9018_v1 = vcombine.high %v13318_v24, %v13326_v63  ;;  %v9017_v17 = vcombine.low %v13318_v24, %v13326_v63  ;;  %v11622_v12 = vld [vmem:[%s12450_s1 + $0x318] sm:$0xff]   ;;  %v9007_v3 = vcombine.low %v13247_v13, %v13253_v48  ;;  %v11625_v13 = vld [vmem:[%s12450_s1 + $0x3e0] sm:$0xff]   ;;  %v9066_v24 = vld [vmem:[%s12448_s10 + $0x48] sm:$0xff] }
 0x167   : > { %10553 = vmatpush3.bf16.msra.mxu0 %v11614_v56  ;;  %v8923_v56 = vrot.slane %v2355_v43, 9  ;;  %v13354_v19 = vsel %vm13168_vm5, %v8925_v8, %v2524_v32  ;;  %v11627_v5 = vld [vmem:[%s12450_s1 + $0x3a0] sm:$0xff]   ;;  %v11632_v8 = vld [vmem:[%s12450_s1 + $0x370] sm:$0xff]   ;;  %v3882_v62 = vshrl.u32 %v9063_v15, 16  ;;  %v3885_v9 = vshll.u32 %v9063_v15, 16 }
 0x168   : > { %10617 = vmatpush3.bf16.msra.mxu1 %v11615_v39  ;;  %10554 = vmatprep.subr.bf16.mxu0 %v11616_v46  ;;  %v2358_v39 = vld [vmem:[%s12448_s10 + $0x1a8] sm:$0xee]  ;;  %v8924_v46 = vrot.slane %v2356_v41, 9 }
 0x169   : > { %10618 = vmatprep.subr.bf16.mxu1 %v11617_v53  ;;  %v8926_v18 = vrot.slane %v2358_v39, 9  ;;  %v13350_v14 = vsel %vm13168_vm5, %v8923_v56, %v2516_v20  ;;  %v9009_v53 = vcombine.low %v13287_v22, %v13291_v33  ;;  %v11630_v22 = vld [vmem:[%s12450_s1 + $0x328] sm:$0xff]   ;;  %v2548_v39 = vrot.slane %v13102_v40, 5  ;;  %v2363_v40 = vld [vmem:[%s12448_s10 + $0x200] sm:$0xee] }
 0x16a   : > { %2988 = vmatmul.mubr.bf16.gmra.mrb[68].mxu0 %v9003_v57  ;;  %v13358_v6 = vsel %vm13168_vm5, %v8924_v46, %v2520_v7  ;;  %v9020_v48 = vcombine.high %v13350_v14, %v13354_v19  ;;  %v9019_v51 = vcombine.low %v13350_v14, %v13354_v19  ;;  %v13480_v14 = vld [vmem:[%s12448_s10 + $0x60] sm:$0xff] }
 0x16b   : > { %3085 = vmatmul.mubr.bf16.gmra.mrb[68].mxu1 %v9005_v11  ;;  %2995 = vmatprep.mubr.bf16.mxu0 %v9008_v52  ;;  %v13365_v31 = vsel %vm13168_vm5, %v8926_v18, %v2528_v21  ;;  %v2540_v11 = vrot.slane %v13054_v16, 5  ;;  %v2536_v52 = vrot.slane %v13063_v27, 5  ;;  %v2544_v16 = vrot.slane %v13091_v58, 5  ;;  %v11629_v27 = vld [vmem:[%s12450_s1 + $0x3e8] sm:$0xff]   ;;  %v11633_v21 = vld [vmem:[%s12450_s1 + $0x3f0] sm:$0xff]   ;;  %v13483_v19 = vld [vmem:[%s12448_s10 + $0x80] sm:$0xff] }
 0x16c   : > { %3092 = vmatprep.mubr.bf16.mxu1 %v9010_v45  ;;  %10555 = vmatpush3.bf16.msra.mxu0 %v11618_v2  ;;  %v9022_v23 = vcombine.high %v13358_v6, %v13365_v31  ;;  %v9021_v57 = vcombine.low %v13358_v6, %v13365_v31  ;;  %v11628_v45 = vld [vmem:[%s12450_s1 + $0x368] sm:$0xff]   ;;  %v2361_v2 = vld [vmem:[%s12448_s10 + $0x1e0] sm:$0xee] }
 0x16d   : > { %10619 = vmatpush3.bf16.msra.mxu1 %v11619_v35  ;;  %10556 = vmatprep.subr.bf16.mxu0 %v11620_v60  ;;  %v2360_v35 = vld [vmem:[%s12448_s10 + $0x1c8] sm:$0xee]  ;;  %v8927_v60 = vrot.slane %v2359_v0, 9  ;;  %v8929_v20 = vrot.slane %v2361_v2, 9  ;;  %v2365_v18 = vld [vmem:[%s12448_s10 + $0x220] sm:$0xee] }
 0x16e   : > { %10620 = vmatprep.subr.bf16.mxu1 %v11621_v55  ;;  %v2362_v55 = vld [vmem:[%s12448_s10 + $0x1e8] sm:$0xee]  ;;  %v8928_v32 = vrot.slane %v2360_v35, 9  ;;  %v11636_v35 = vld [vmem:[%s12450_s1 + $0x378] sm:$0xff]   ;;  %v11642_v31 = vld [vmem:[%s12450_s1 + $0x400] sm:$0xff]  }
 0x16f   : > { %v8930_v7 = vrot.slane %v2362_v55, 9  ;;  %v13390_v33 = vsel %vm13168_vm5, %v8927_v60, %v2532_v34  ;;  %v13394_v43 = vsel %vm13168_vm5, %v8929_v20, %v2540_v11  ;;  %v2366_v34 = vld [vmem:[%s12448_s10 + $0x228] sm:$0xee]  ;;  %v2560_v11 = vrot.slane %v13138_v10, 5  ;;  %v11637_v55 = vld [vmem:[%s12450_s1 + $0x3f8] sm:$0xff]  }
 0x170   : > { %10557 = vmatpush3.bf16.msra.mxu0 %v11622_v12  ;;  %v13398_v58 = vsel %vm13168_vm5, %v8928_v32, %v2536_v52  ;;  %v9024_v41 = vcombine.high %v13390_v33, %v13394_v43  ;;  %v9023_v56 = vcombine.low %v13390_v33, %v13394_v43  ;;  %v11634_v52 = vld [vmem:[%s12450_s1 + $0x330] sm:$0xff]   ;;  %v11638_v32 = vld [vmem:[%s12450_s1 + $0x338] sm:$0xff]   ;;  %v3927_v33 = vshll.u32 %v9066_v24, 16 }
 0x171   : > { %10621 = vmatpush3.bf16.msra.mxu1 %v11623_v44  ;;  %10558 = vmatprep.subr.bf16.mxu0 %v11624_v54  ;;  %v13408_v12 = vsel %vm13168_vm5, %v8930_v7, %v2544_v16  ;;  %v2552_v44 = vrot.slane %v13115_v36, 5  ;;  %v2364_v54 = vld [vmem:[%s12448_s10 + $0x208] sm:$0xee]  ;;  %v11643_v7 = vld [vmem:[%s12450_s1 + $0x480] sm:$0xff]  }
 0x172   : > { %2996 = vmatmul.mubr.bf16.gmra.mrb[72].mxu0 %v9007_v3  ;;  %10622 = vmatprep.subr.bf16.mxu1 %v11625_v13  ;;  %v9025_v46 = vcombine.low %v13398_v58, %v13408_v12  ;;  %v2556_v3 = vrot.slane %v13105_v29, 5  ;;  %v8933_v13 = vrot.slane %v2365_v18, 9  ;;  %v11635_v29 = vld [vmem:[%s12450_s1 + $0x3b0] sm:$0xff]   ;;  %v13515_v18 = vld [vmem:[%s12448_s10 + $0xc0] sm:$0xff] }
 0x173   : > { %3093 = vmatmul.mubr.bf16.gmra.mrb[72].mxu1 %v9009_v53  ;;  %3003 = vmatprep.mubr.bf16.mxu0 %v9012_v50  ;;  %v9026_v50 = vcombine.high %v13398_v58, %v13408_v12  ;;  %v8934_v53 = vrot.slane %v2366_v34, 9  ;;  %v11644_v58 = vld [vmem:[%s12450_s1 + $0x448] sm:$0xff]  }
 0x174   : > { %3100 = vmatprep.mubr.bf16.mxu1 %v9014_v26  ;;  %10559 = vmatpush3.bf16.msra.mxu0 %v11626_v28  ;;  %v8931_v26 = vrot.slane %v2363_v40, 9  ;;  %v8932_v28 = vrot.slane %v2364_v54, 9  ;;  %v13512_v40 = vld [vmem:[%s12448_s10 + $0xa0] sm:$0xff]  ;;  %v13518_v54 = vld [vmem:[%s12448_s10 + $0xa8] sm:$0xff] }
 0x175   : > { %10623 = vmatpush3.bf16.msra.mxu1 %v11627_v5  ;;  %10560 = vmatprep.subr.bf16.mxu0 %v11628_v45  ;;  %v2557_v5 = vsel %vm13168_vm5, %v8933_v13, %v2556_v3  ;;  %v2561_v10 = vsel %vm13168_vm5, %v8934_v53, %v2560_v11  ;;  %v3941_v3 = vshll.u32 %v13480_v14, 16  ;;  %v11648_v13 = vld [vmem:[%s12450_s1 + $0x450] sm:$0xff]   ;;  %v13528_v11 = vrot.slane %v3927_v33, 5  ;;  %v13574_v33 = vld [vmem:[%s12448_s10 + $0x108] sm:$0xff] }
 0x176   : > { %10624 = vmatprep.subr.bf16.mxu1 %v11629_v27  ;;  %v2549_v36 = vsel %vm13168_vm5, %v8931_v26, %v2548_v39  ;;  %v2553_v45 = vsel %vm13168_vm5, %v8932_v28, %v2552_v44  ;;  %v9159_v27 = vcombine.low %v9063_v15, %v9065_v47  ;;  %v11646_v39 = vld [vmem:[%s12450_s1 + $0x408] sm:$0xff]   ;;  %v3966_v53 = vshrl.u32 %v13483_v19, 16 }
 0x177   : > { %v9028_v0 = vcombine.high %v2549_v36, %v2557_v5  ;;  %v9027_v2 = vcombine.low %v2549_v36, %v2557_v5  ;;  %v9030_v60 = vcombine.high %v2553_v45, %v2561_v10  ;;  %v9029_v20 = vcombine.low %v2553_v45, %v2561_v10  ;;  %v11647_v44 = vld [vmem:[%s12450_s1 + $0x488] sm:$0xff]  }
 0x178   : > { %10561 = vmatpush3.bf16.msra.mxu0 %v11630_v22  ;;  %v3924_v22 = vshrl.u32 %v9066_v24, 16  ;;  %v13521_v26 = vld [vmem:[%s12448_s10 + $0xc8] sm:$0xff]  ;;  %v9163_v10 = vcombine.low %v13480_v14, %v13483_v19 }
 0x179   : > { %10625 = vmatpush3.bf16.msra.mxu1 %v11631_v4  ;;  %10562 = vmatprep.subr.bf16.mxu0 %v11632_v8 }
 0x17a   : > { %3004 = vmatmul.mubr.bf16.gmra.mrb[76].mxu0 %v9011_v25  ;;  %10626 = vmatprep.subr.bf16.mxu1 %v11633_v21  ;;  %v11641_v25 = vld [vmem:[%s12450_s1 + $0x4c0] sm:$0xff]   ;;  %v3938_v21 = vshrl.u32 %v13480_v14, 16  ;;  %v13526_v28 = vrot.slane %v3924_v22, 4 }
 0x17b   : > { %3101 = vmatmul.mubr.bf16.gmra.mrb[76].mxu1 %v9013_v61  ;;  %3011 = vmatprep.mubr.bf16.mxu0 %v9016_v42  ;;  %v9064_v61 = vld [vmem:[%s12448_s10 + $0x28] sm:$0xff]  ;;  %v9160_v42 = vcombine.high %v9063_v15, %v9065_v47  ;;  %v11652_v15 = vld [vmem:[%s12450_s1 + $0x458] sm:$0xff]  }
 0x17c   : > { %3108 = vmatprep.mubr.bf16.mxu1 %v9018_v1  ;;  %10563 = vmatpush3.bf16.msra.mxu0 %v11634_v52  ;;  %v9162_v63 = vcombine.high %v9064_v61, %v9066_v24  ;;  %v3887_v1 = vrot.slane %v3885_v9, 5  ;;  %v3899_v16 = vshll.u32 %v9064_v61, 16  ;;  %v9161_v43 = vcombine.low %v9064_v61, %v9066_v24  ;;  %v11649_v52 = vld [vmem:[%s12450_s1 + $0x4d0] sm:$0xff]  }
 0x17d   : > { %10627 = vmatpush3.bf16.msra.mxu1 %v11635_v29  ;;  %10564 = vmatprep.subr.bf16.mxu0 %v11636_v35  ;;  %v3969_v29 = vshll.u32 %v13483_v19, 16  ;;  %v3940_v45 = vrot.slane %v3938_v21, 4 }
 0x17e   : > { %10628 = vmatprep.subr.bf16.mxu1 %v11637_v55  ;;  %v13524_v34 = vrot.slane %v3899_v16, 5  ;;  %v9170_v55 = vcombine.high %v13518_v54, %v13521_v26 }
 0x180   : > { %10565 = vmatpush3.bf16.msra.mxu0 %v11638_v32  ;;  %v11650_v32 = vld [vmem:[%s12450_s1 + $0x410] sm:$0xff]  }
 0x181   : > { %10629 = vmatpush3.bf16.msra.mxu1 %v11639_v59  ;;  %10678 = vmatprep.subr.bf16.mxu0 %v11640_v38  ;;  %v3994_v59 = vshrl.u32 %v13512_v40, 16  ;;  %v3997_v38 = vshll.u32 %v13512_v40, 16 }
 0x182   : > { %3012 = vmatmul.mubr.bf16.gmra.mrb[80].mxu0 %v9015_v37  ;;  %10742 = vmatprep.subr.bf16.mxu1 %v11641_v25  ;;  %v3884_v37 = vrot.slane %v3882_v62, 4  ;;  %v11651_v25 = vld [vmem:[%s12450_s1 + $0x490] sm:$0xff]  }
 0x183   : > { %3109 = vmatmul.mubr.bf16.gmra.mrb[80].mxu1 %v9017_v17  ;;  %3019 = vmatprep.mubr.bf16.mxu0 %v9020_v48  ;;  %v3910_v17 = vshrl.u32 %v9065_v47, 16  ;;  %v3913_v48 = vshll.u32 %v9065_v47, 16  ;;  %v3968_v47 = vrot.slane %v3966_v53, 4  ;;  %v3999_v16 = vrot.slane %v3997_v38, 5 }
 0x184   : > { %3116 = vmatprep.mubr.bf16.mxu1 %v9022_v23  ;;  %v3888_v6 = vor.u32 %v3887_v1, %v3884_v37  ;;  %v13490_v23 = vld [vmem:[%s12448_s10 + $0x88] sm:$0xff]  ;;  %v4025_v37 = vshll.u32 %v13515_v18, 16  ;;  %v13557_v1 = vld [vmem:[%s12448_s10 + $0xe0] sm:$0xff] }
 0x185   : > { %v13494_v4 = vrot.slane %v3910_v17, 4  ;;  %v3980_v35 = vshrl.u32 %v13490_v23, 16  ;;  %v13560_v17 = vld [vmem:[%s12448_s10 + $0x100] sm:$0xff] }
 0x186   : > { %v13501_v8 = vrot.slane %v3888_v6, 4  ;;  %v3930_v6 = vor.u32 %v13528_v11, %v13526_v28  ;;  %v4011_v28 = vshll.u32 %v13518_v54, 16 }
 0x18a   : > { %3020 = vmatmul.mubr.bf16.gmra.mrb[84].mxu0 %v9019_v51  ;;  %v13487_v51 = vld [vmem:[%s12448_s10 + $0x68] sm:$0xff] }
 0x18b   : > { %3117 = vmatmul.mubr.bf16.gmra.mrb[84].mxu1 %v9021_v57  ;;  %3027 = vmatprep.mubr.bf16.mxu0 %v9024_v41  ;;  %v3896_v57 = vshrl.u32 %v9064_v61, 16  ;;  %v9164_v41 = vcombine.high %v13480_v14, %v13483_v19  ;;  %v9166_v12 = vcombine.high %v13487_v51, %v13490_v23  ;;  %v3952_v36 = vshrl.u32 %v13487_v51, 16  ;;  %v11653_v14 = vld [vmem:[%s12450_s1 + $0x4d8] sm:$0xff]  }
 0x18c   : > { %3124 = vmatprep.mubr.bf16.mxu1 %v9026_v50  ;;  %v13504_v50 = vrot.slane %v3913_v48, 5  ;;  %v3955_v5 = vshll.u32 %v13487_v51, 16  ;;  %v3971_v61 = vrot.slane %v3969_v29, 5  ;;  %v11654_v19 = vld [vmem:[%s12450_s1 + $0x418] sm:$0xff]   ;;  %v13599_v29 = vld [vmem:[%s12448_s10 + $0x160] sm:$0xff] }
 0x18d   : > { %v3954_v62 = vrot.slane %v3952_v36, 4  ;;  %v13602_v36 = vld [vmem:[%s12448_s10 + $0x180] sm:$0xff] }
 0x18e   : > { %v3957_v9 = vrot.slane %v3955_v5, 5  ;;  %v3916_v24 = vor.u32 %v13504_v50, %v13494_v4  ;;  %v3972_v22 = vor.u32 %v3971_v61, %v3968_v47  ;;  %v13605_v5 = vld [vmem:[%s12448_s10 + $0x168] sm:$0xff] }
 0x18f   : > { %v13632_v47 = vld [vmem:[%s12448_s10 + $0x1a8] sm:$0xff] }
 0x190   : > { %v13578_v4 = vrot.slane %v3916_v24, 4  ;;  %v13596_v53 = vrot.slane %v3972_v22, 4  ;;  %v13635_v61 = vld [vmem:[%s12448_s10 + $0x1c8] sm:$0xff]  ;;  %v9229_v24 = vld [vmem:[%s12448_s10 + $0x50] sm:$0x11] }
 0x191   : > { %v11666_v22 = vld [vmem:[%s12450_s1 + $0x430] sm:$0xff]  }
 0x192   : > { %3028 = vmatmul.mubr.bf16.gmra.mrb[88].mxu0 %v9023_v56  ;;  %v11645_v56 = vld [vmem:[%s12450_s1 + $0x4c8] sm:$0xff]  }
 0x193   : > { %3125 = vmatmul.mubr.bf16.gmra.mrb[88].mxu1 %v9025_v46  ;;  %3035 = vmatprep.mubr.bf16.mxu0 %v9028_v0  ;;  %v13506_v46 = vrot.slane %v3896_v57, 4  ;;  %v3943_v0 = vrot.slane %v3941_v3, 5  ;;  %v3996_v57 = vrot.slane %v3994_v59, 4 }
 0x194   : > { %3132 = vmatprep.mubr.bf16.mxu1 %v9030_v60  ;;  %v3983_v60 = vshll.u32 %v13490_v23, 16 }
 0x195   : > { %v3944_v48 = vor.u32 %v3943_v0, %v3940_v45  ;;  %v11661_v45 = vld [vmem:[%s12450_s1 + $0x4e8] sm:$0xff]  }
 0x197   : > { %v13585_v21 = vrot.slane %v3944_v48, 4 }
 0x19a   : > { %3036 = vmatmul.mubr.bf16.gmra.mrb[92].mxu0 %v9027_v2  ;;  %v9165_v2 = vcombine.low %v13487_v51, %v13490_v23  ;;  %v3985_v51 = vrot.slane %v3983_v60, 5  ;;  %v13567_v23 = vld [vmem:[%s12448_s10 + $0xe8] sm:$0xff]  ;;  %v13617_v60 = vld [vmem:[%s12448_s10 + $0x1a0] sm:$0xff] }
 0x19b   : > { %3133 = vmatmul.mubr.bf16.gmra.mrb[92].mxu1 %v9029_v20  ;;  %3639 = vmatprep.mubr.bf16.mxu0 %v9160_v42  ;;  %v9168_v20 = vcombine.high %v13512_v40, %v13515_v18  ;;  %v3902_v42 = vor.u32 %v13524_v34, %v13506_v46  ;;  %v13583_v46 = vrot.slane %v3930_v6, 4  ;;  %v4008_v34 = vshrl.u32 %v13518_v54, 16 }
 0x19c   : > { %3736 = vmatprep.mubr.bf16.mxu1 %v9162_v63  ;;  %v4022_v63 = vshrl.u32 %v13515_v18, 16  ;;  %v9174_v11 = vcombine.high %v13567_v23, %v13574_v33 }
 0x19d   : > { %v13581_v50 = vrot.slane %v3902_v42, 4  ;;  %v13626_v38 = vrot.slane %v4008_v34, 4  ;;  %v13641_v42 = vld [vmem:[%s12448_s10 + $0x38] sm:$0x11] }
 0x1a2   : > { %3640 = vmatmul.mubr.bf16.vlgmr.msra.gmra.mrb[96].mxu0 %v9159_v27  ;;  %v9167_v27 = vcombine.low %v13512_v40, %v13515_v18  ;;  %v11658_v40 = vld [vmem:[%s12450_s1 + $0x420] sm:$0xff]  }
 0x1a3   : > { %3737 = vmatmul.mubr.bf16.vlgmr.msra.gmra.mrb[96].mxu1 %v9161_v43  ;;  %10679 = vmatpush3.bf16.msra.mxu0 %v11642_v31  ;;  %v3982_v31 = vrot.slane %v3980_v35, 4  ;;  %v11655_v43 = vld [vmem:[%s12450_s1 + $0x498] sm:$0xff]   ;;  %v11659_v18 = vld [vmem:[%s12450_s1 + $0x4a0] sm:$0xff]  }
 0x1a4   : > { %10743 = vmatpush3.bf16.msra.mxu1 %v11643_v7  ;;  %3647 = vmatprep.mubr.bf16.mxu0 %v9164_v41  ;;  %v9169_v7 = vcombine.low %v13518_v54, %v13521_v26  ;;  %v3958_v41 = vor.u32 %v3957_v9, %v3954_v62  ;;  %v13608_v54 = vld [vmem:[%s12448_s10 + $0x188] sm:$0xff]  ;;  %v11665_v62 = vld [vmem:[%s12450_s1 + $0x4f0] sm:$0xff]  }
 0x1a5   : > { %3744 = vmatprep.mubr.bf16.mxu1 %v9166_v12  ;;  %10680 = vmatprep.subr.bf16.mxu0 %v11644_v58  ;;  %v11656_v58 = vld [vmem:[%s12450_s1 + $0x460] sm:$0xff]   ;;  %v4024_v12 = vrot.slane %v4022_v63, 4  ;;  %v3986_v3 = vor.u32 %v3985_v51, %v3982_v31  ;;  %v9225_v9 = vld [vmem:[%s12448_s10 + $0x30] sm:$0x11]  ;;  %v9171_v31 = vcombine.low %v13557_v1, %v13560_v17  ;;  %v9173_v51 = vcombine.low %v13567_v23, %v13574_v33 }
 0x1a6   : > { %10744 = vmatprep.subr.bf16.mxu1 %v11645_v56  ;;  %v4027_v56 = vrot.slane %v4025_v37, 5  ;;  %v13611_v0 = vrot.slane %v3958_v41, 4 }
 0x1a7   : > { %10681 = vmatpush3.bf16.msra.mxu0 %v11646_v39  ;;  %v11657_v39 = vld [vmem:[%s12450_s1 + $0x4e0] sm:$0xff]   ;;  %v13614_v35 = vrot.slane %v3986_v3, 4  ;;  %v11667_v3 = vld [vmem:[%s12450_s1 + $0x4b0] sm:$0xff]  }
 0x1a8   : > { %10745 = vmatpush3.bf16.msra.mxu1 %v11647_v44  ;;  %10682 = vmatprep.subr.bf16.mxu0 %v11648_v13  ;;  %v9172_v44 = vcombine.high %v13557_v1, %v13560_v17  ;;  %v4000_v13 = vor.u32 %v3999_v16, %v3996_v57  ;;  %v9176_v57 = vcombine.high %v13599_v29, %v13602_v36 }
 0x1a9   : > { %10746 = vmatprep.subr.bf16.mxu1 %v11649_v52  ;;  %v11660_v52 = vld [vmem:[%s12450_s1 + $0x468] sm:$0xff]   ;;  %v9178_v16 = vcombine.high %v13605_v5, %v13608_v54 }
 0x1aa   : > { %3648 = vmatmul.mubr.bf16.gmra.mrb[100].mxu0 %v9163_v10  ;;  %v4028_v10 = vor.u32 %v4027_v56, %v4024_v12  ;;  %v13624_v59 = vrot.slane %v4000_v13, 4  ;;  %v13664_v56 = vld [vmem:[%s12448_s10 + $0x1e8] sm:$0xff]  ;;  %v3905_v13 = vshll.u32 %v13641_v42, 16 }
 0x1ab   : > { %3745 = vmatmul.mubr.bf16.gmra.mrb[100].mxu1 %v9165_v2  ;;  %3655 = vmatprep.mubr.bf16.mxu0 %v9168_v20  ;;  %v11662_v2 = vld [vmem:[%s12450_s1 + $0x428] sm:$0xff]   ;;  %v13620_v20 = vld [vmem:[%s12448_s10 + $0x1c0] sm:$0xff] }
 0x1ac   : > { %3752 = vmatprep.mubr.bf16.mxu1 %v9170_v55  ;;  %10683 = vmatpush3.bf16.msra.mxu0 %v11650_v32  ;;  %v11663_v55 = vld [vmem:[%s12450_s1 + $0x4a8] sm:$0xff]   ;;  %v11664_v32 = vld [vmem:[%s12450_s1 + $0x470] sm:$0xff]   ;;  %v13643_v37 = vrot.slane %v4028_v10, 4 }
 0x1ad   : > { %10747 = vmatpush3.bf16.msra.mxu1 %v11651_v25  ;;  %10684 = vmatprep.subr.bf16.mxu0 %v11652_v15  ;;  %v13628_v25 = vrot.slane %v4011_v28, 5  ;;  %v4036_v15 = vshrl.u32 %v13521_v26, 16 }
 0x1ae   : > { %10748 = vmatprep.subr.bf16.mxu1 %v11653_v14  ;;  %v4039_v14 = vshll.u32 %v13521_v26, 16  ;;  %v9245_v26 = vld [vmem:[%s12448_s10 + $0xd0] sm:$0x11] }
 0x1b0   : > { %10685 = vmatpush3.bf16.msra.mxu0 %v11654_v19  ;;  %v13690_v19 = vld [vmem:[%s12448_s10 + $0x228] sm:$0xff]  ;;  %v4041_v30 = vrot.slane %v4039_v14, 5 }
 0x1b1   : > { %10749 = vmatpush3.bf16.msra.mxu1 %v11655_v43  ;;  %10686 = vmatprep.subr.bf16.mxu0 %v11656_v58  ;;  %v9230_v43 = vld [vmem:[%s12448_s10 + $0x58] sm:$0x11] }
 0x1b2   : > { %3656 = vmatmul.mubr.bf16.gmra.mrb[104].mxu0 %v9167_v27  ;;  %10750 = vmatprep.subr.bf16.mxu1 %v11657_v39  ;;  %v13656_v27 = vld [vmem:[%s12448_s10 + $0x1e0] sm:$0xff]  ;;  %v13667_v39 = vld [vmem:[%s12448_s10 + $0x208] sm:$0xff]  ;;  %v3933_v10 = vshll.u32 %v9230_v43, 16 }
 0x1b3   : > { %3753 = vmatmul.mubr.bf16.gmra.mrb[104].mxu1 %v9169_v7  ;;  %3663 = vmatprep.mubr.bf16.mxu0 %v9172_v44  ;;  %v13659_v7 = vld [vmem:[%s12448_s10 + $0x200] sm:$0xff]  ;;  %v11668_v44 = vld [vmem:[%s12450_s1 + $0x478] sm:$0xff]  }
 0x1b4   : > { %3760 = vmatprep.mubr.bf16.mxu1 %v9174_v11  ;;  %10687 = vmatpush3.bf16.msra.mxu0 %v11658_v40  ;;  %v3891_v40 = vshll.u32 %v9225_v9, 16  ;;  %v13682_v9 = vld [vmem:[%s12448_s10 + $0x240] sm:$0xff] }
 0x1b5   : > { %v10182_v63 = vpop.f32.mrb[0].mxu0  ;;  %10751 = vmatpush3.bf16.msra.mxu1 %v11659_v18  ;;  %10688 = vmatprep.subr.bf16.mxu0 %v11660_v52  ;;  %v3919_v18 = vshll.u32 %v9229_v24, 16  ;;  %v11669_v24 = vld [vmem:[%s12450_s1 + $0x4f8] sm:$0xff]   ;;  %v11673_v52 = vld [vmem:[%s12450_s1 + $0x5c0] sm:$0xff]  }
 0x1b6   : > { %v10246_v6 = vpop.f32.mrb[0].mxu1  ;;  %v10183_v48 = vpop.f32.mrb[1].mxu0  ;;  %10752 = vmatprep.subr.bf16.mxu1 %v11661_v45 }
 0x1b7   : > { %v10184_v58 = vadd.f32 %v10183_v48, %v10182_v63  ;;  %v10247_v41 = vpop.f32.mrb[1].mxu1  ;;  %v10185_v12 = vpop.f32.mrb[2].mxu0  ;;  %v13679_v63 = vld [vmem:[%s12448_s10 + $0x220] sm:$0xff]  ;;  %v11670_v48 = vld [vmem:[%s12450_s1 + $0x438] sm:$0xff]  }
 0x1b8   : > { %v10248_v34 = vadd.f32 %v10247_v41, %v10246_v6  ;;  %v10249_v28 = vpop.f32.mrb[2].mxu1  ;;  %v10186_v11 = vpop.f32.mrb[3].mxu0  ;;  %10689 = vmatpush3.bf16.msra.mxu0 %v11662_v2  ;;  %v13693_v2 = vld [vmem:[%s12448_s10 + $0x248] sm:$0xff] }
 0x1b9   : > { %v10187_v42 = vadd.f32 %v10186_v11, %v10185_v12  ;;  %v10250_v6 = vpop.f32.mrb[3].mxu1  ;;  %10753 = vmatpush3.bf16.msra.mxu1 %v11663_v55  ;;  %10690 = vmatprep.subr.bf16.mxu0 %v11664_v32  ;;  %v9233_v55 = vld [vmem:[%s12448_s10 + $0x70] sm:$0x11]  ;;  %v9238_v32 = vld [vmem:[%s12448_s10 + $0x98] sm:$0x11] }
 0x1ba   : > { %v13695_v45 = vadd.f32 %v10248_v34, %v10184_v58  ;;  %v10251_v12 = vadd.f32 %v10250_v6, %v10249_v28  ;;  %3664 = vmatmul.mubr.bf16.gmra.mrb[108].mxu0 %v9171_v31  ;;  %10754 = vmatprep.subr.bf16.mxu1 %v11665_v62  ;;  %v11671_v58 = vld [vmem:[%s12450_s1 + $0x4b8] sm:$0xff]   ;;  %v3893_v34 = vrot.slane %v3891_v40, 5  ;;  %v3921_v28 = vrot.slane %v3919_v18, 5  ;;  %v11672_v31 = vld [vmem:[%s12450_s1 + $0x540] sm:$0xff]   ;;  %v9237_v6 = vld [vmem:[%s12448_s10 + $0x90] sm:$0x11] }
 0x1bb   : > { %3761 = vmatmul.mubr.bf16.gmra.mrb[108].mxu1 %v9173_v51  ;;  %3671 = vmatprep.mubr.bf16.mxu0 %v9176_v57  ;;  %v9234_v57 = vld [vmem:[%s12448_s10 + $0x78] sm:$0x11]  ;;  %v3907_v18 = vrot.slane %v3905_v13, 5  ;;  %v3975_v51 = vshll.u32 %v9237_v6, 16  ;;  %v3989_v40 = vshll.u32 %v9238_v32, 16  ;;  %v9187_v6 = vcombine.low %v13679_v63, %v13682_v9 }
 0x1bc   : > { %v13708_v41 = vadd.f32 %v10251_v12, %v10187_v42  ;;  %3768 = vmatprep.mubr.bf16.mxu1 %v9178_v16  ;;  %10691 = vmatpush3.bf16.msra.mxu0 %v11666_v22  ;;  %v3935_v42 = vrot.slane %v3933_v10, 5  ;;  %v3947_v12 = vshll.u32 %v9233_v55, 16  ;;  %v4014_v22 = vor.u32 %v13628_v25, %v13626_v38 }
 0x1bd   : > { %v10188_v11 = vpop.f32.mrb[4].mxu0  ;;  %10755 = vmatpush3.bf16.msra.mxu1 %v11667_v3  ;;  %10692 = vmatprep.subr.bf16.mxu0 %v11668_v44  ;;  %v4038_v3 = vrot.slane %v4036_v15, 4  ;;  %v3961_v55 = vshll.u32 %v9234_v57, 16  ;;  %v13732_v38 = vsel %vm12750_vm2, %v13501_v8, %v3893_v34  ;;  %v13737_v25 = vsel %vm12750_vm2, %v13578_v4, %v3921_v28  ;;  %v9241_v15 = vld [vmem:[%s12448_s10 + $0xb0] sm:$0x11] }
 0x1be   : > { %16527 = vst [vmem:[#allocation23_spill] sm:$0xff] %v13708_v41  ;;  %v10252_v16 = vpop.f32.mrb[4].mxu1  ;;  %v10189_v43 = vpop.f32.mrb[5].mxu0  ;;  %10756 = vmatprep.subr.bf16.mxu1 %v11669_v24  ;;  %v13744_v32 = vsel %vm12750_vm2, %v13581_v50, %v3907_v18  ;;  %v13749_v8 = vsel %vm12750_vm2, %v13583_v46, %v3935_v42  ;;  %v4053_v50 = vshll.u32 %v13557_v1, 16  ;;  %v16529_v34 = vcombine.low %v13605_v5, %v13608_v54 }
 0x1bf   : > { %v10190_v44 = vadd.f32 %v10189_v43, %v10188_v11  ;;  %v10253_v13 = vpop.f32.mrb[5].mxu1  ;;  %v10191_v10 = vpop.f32.mrb[6].mxu0  ;;  %v16530_v46 = vcombine.high %v13617_v60, %v13620_v20  ;;  %v3963_v28 = vrot.slane %v3961_v55, 5  ;;  %v16531_v57 = vshrl.u32 %v13557_v1, 16  ;;  %v9263_v1 = vld [vmem:[%s12448_s10 + $0x1a0] sm:$0xff] }
 0x1c0   : > { %v10254_v62 = vadd.f32 %v10253_v13, %v10252_v16  ;;  %v10255_v24 = vpop.f32.mrb[6].mxu1  ;;  %v10192_v41 = vpop.f32.mrb[7].mxu0  ;;  %10693 = vmatpush3.bf16.msra.mxu0 %v11670_v48  ;;  %v3949_v48 = vrot.slane %v3947_v12, 5  ;;  %v3991_v54 = vrot.slane %v3989_v40, 5  ;;  %v4003_v42 = vshll.u32 %v9241_v15, 16 }
 0x1c1   : > { %v10193_v14 = vadd.f32 %v10192_v41, %v10191_v10  ;;  %v10256_v11 = vpop.f32.mrb[7].mxu1  ;;  %10757 = vmatpush3.bf16.msra.mxu1 %v11671_v58  ;;  %10806 = vmatprep.subr.bf16.mxu0 %v11672_v31  ;;  %v16528_v41 = vcombine.low %v13599_v29, %v13602_v36  ;;  %v3977_v58 = vrot.slane %v3975_v51, 5  ;;  %v13763_v31 = vrot.slane %v4014_v22, 4  ;;  %v9242_v12 = vld [vmem:[%s12448_s10 + $0xb8] sm:$0x11] }
 0x1c2   : > { %v13751_v43 = vadd.f32 %v10254_v62, %v10190_v44  ;;  %v10257_v4 = vadd.f32 %v10256_v11, %v10255_v24  ;;  %10870 = vmatprep.subr.bf16.mxu1 %v11673_v52  ;;  %v4042_v62 = vor.u32 %v4041_v30, %v4038_v3  ;;  %v4052_v18 = vrot.slane %v16531_v57, 4  ;;  %v9246_v44 = vld [vmem:[%s12448_s10 + $0xd8] sm:$0x11]  ;;  %v9249_v15 = vld [vmem:[%s12448_s10 + $0xf0] sm:$0x11] }
 0x1c3   : > { %3672 = vmatmul.mubr.bf16.gmra.mrb[112].mxu0 %v16528_v41  ;;  %3769 = vmatmul.mubr.bf16.gmra.mrb[112].mxu1 %v16529_v34  ;;  %v16532_v51 = vcombine.high %v13632_v47, %v13635_v61  ;;  %v4031_v3 = vshll.u32 %v9245_v26, 16  ;;  %v13787_v40 = vsel %vm12750_vm2, %v13585_v21, %v3949_v48  ;;  %v13792_v24 = vsel %vm12750_vm2, %v13596_v53, %v3977_v58 }
 0x1c4   : > { %3679 = vmatprep.mubr.bf16.mxu0 %v16530_v46  ;;  %v13767_v52 = vadd.f32 %v10257_v4, %v10193_v14  ;;  %v4055_v14 = vrot.slane %v4053_v50, 5  ;;  %v13798_v41 = vsel %vm12750_vm2, %v13611_v0, %v3963_v28  ;;  %v4017_v34 = vshll.u32 %v9242_v12, 16 }
 0x1c5   : > { %3776 = vmatprep.mubr.bf16.mxu1 %v16532_v51  ;;  %v10194_v16 = vpop.f32.mrb[8].mxu0  ;;  %v13800_v46 = vrot.slane %v4042_v62, 4  ;;  %v13805_v53 = vsel %vm12750_vm2, %v13614_v35, %v3991_v54  ;;  %v4005_v58 = vrot.slane %v4003_v42, 5  ;;  %v4045_v50 = vshll.u32 %v9246_v44, 16  ;;  %v9253_v51 = vld [vmem:[%s12448_s10 + $0x110] sm:$0x11] }
 0x1c6   : > { %v10258_v13 = vpop.f32.mrb[8].mxu1  ;;  %v10195_v10 = vpop.f32.mrb[9].mxu0  ;;  %v4033_v22 = vrot.slane %v4031_v3, 5  ;;  %v4059_v30 = vshll.u32 %v9249_v15, 16  ;;  %v4078_v0 = vshrl.u32 %v13560_v17, 16  ;;  %v16533_v12 = vcombine.low %v13617_v60, %v13620_v20 }
 0x1c7   : > { %v10196_v26 = vadd.f32 %v10195_v10, %v10194_v16  ;;  %v10259_v11 = vpop.f32.mrb[9].mxu1  ;;  %v10197_v4 = vpop.f32.mrb[10].mxu0  ;;  %v4081_v35 = vshll.u32 %v13560_v17, 16  ;;  %v16534_v54 = vcombine.low %v13632_v47, %v13635_v61  ;;  %v16535_v42 = vcombine.high %v13656_v27, %v13659_v7  ;;  %v9254_v47 = vld [vmem:[%s12448_s10 + $0x118] sm:$0x11] }
 0x1c8   : > { %v10260_v21 = vadd.f32 %v10259_v11, %v10258_v13  ;;  %v10261_v48 = vpop.f32.mrb[10].mxu1  ;;  %v10198_v57 = vpop.f32.mrb[11].mxu0  ;;  %v4056_v13 = vor.u32 %v4055_v14, %v4052_v18  ;;  %v4019_v60 = vrot.slane %v4017_v34, 5  ;;  %v4087_v20 = vshll.u32 %v9253_v51, 16 }
 0x1c9   : > { %v10199_v16 = vadd.f32 %v10198_v57, %v10197_v4  ;;  %v10262_v10 = vpop.f32.mrb[11].mxu1  ;;  %v16536_v17 = vcombine.high %v13664_v56, %v13667_v39  ;;  %v4047_v61 = vrot.slane %v4045_v50, 5  ;;  %v4064_v15 = vshrl.u32 %v13567_v23, 16 }
 0x1ca   : > { %v13809_v28 = vadd.f32 %v10260_v21, %v10196_v26  ;;  %v10263_v62 = vadd.f32 %v10262_v10, %v10261_v48  ;;  %v13838_v11 = vsel %vm12750_vm2, %v13624_v59, %v4005_v58  ;;  %v13843_v4 = vsel %vm12750_vm2, %v13643_v37, %v4033_v22  ;;  %v9250_v21 = vld [vmem:[%s12448_s10 + $0xf8] sm:$0x11]  ;;  %v551_v26 = vld [vmem:[#allocation2] sm:$0xff] }
 0x1cb   : > { %3680 = vmatmul.mubr.bf16.gmra.mrb[116].mxu0 %v16533_v12  ;;  %3777 = vmatmul.mubr.bf16.gmra.mrb[116].mxu1 %v16534_v54  ;;  %v13845_v34 = vrot.slane %v4059_v30, 5  ;;  %v13848_v50 = vrot.slane %v4056_v13, 4  ;;  %v4080_v51 = vrot.slane %v4078_v0, 4  ;;  %v4067_v10 = vshll.u32 %v13567_v23, 16 }
 0x1cc   : > { %3687 = vmatprep.mubr.bf16.mxu0 %v16535_v42  ;;  %v13825_v18 = vadd.f32 %v10263_v62, %v10199_v16  ;;  %3784 = vmatprep.mubr.bf16.mxu1 %v16536_v17  ;;  %v4083_v16 = vrot.slane %v4081_v35, 5  ;;  %v13851_v58 = vrot.slane %v4087_v20, 5  ;;  %v4092_v54 = vshrl.u32 %v13574_v33, 16 }
 0x1cd   : > { %v10200_v14 = vpop.f32.mrb[12].mxu0  ;;  %v4095_v37 = vshll.u32 %v13574_v33, 16  ;;  %v13855_v17 = vrot.slane %v4064_v15, 4  ;;  %v4106_v0 = vshrl.u32 %v13599_v29, 16  ;;  %v4109_v13 = vshll.u32 %v13599_v29, 16 }
 0x1ce   : > { %v10264_v48 = vpop.f32.mrb[12].mxu1  ;;  %v10201_v57 = vpop.f32.mrb[13].mxu0  ;;  %v4134_v20 = vshrl.u32 %v13602_v36, 16  ;;  %v16537_v15 = vcombine.low %v13656_v27, %v13659_v7  ;;  %v4069_v29 = vrot.slane %v4067_v10, 5  ;;  %v13881_v27 = vsel %vm12750_vm2, %v13800_v46, %v4047_v61 }
 0x1cf   : > { %v10202_v62 = vadd.f32 %v10201_v57, %v10200_v14  ;;  %v10265_v12 = vpop.f32.mrb[13].mxu1  ;;  %v10203_v59 = vpop.f32.mrb[14].mxu0  ;;  %v4073_v14 = vshll.u32 %v9250_v21, 16  ;;  %v4137_v57 = vshll.u32 %v13602_v36, 16  ;;  %v16538_v21 = vcombine.low %v13664_v56, %v13667_v39 }
 0x1d0   : > { %v10266_v30 = vadd.f32 %v10265_v12, %v10264_v48  ;;  %v10267_v22 = vpop.f32.mrb[14].mxu1  ;;  %v10204_v42 = vpop.f32.mrb[15].mxu0  ;;  %v4084_v12 = vor.u32 %v4083_v16, %v4080_v51  ;;  %v13876_v36 = vsel %vm12750_vm2, %v13763_v31, %v4019_v60  ;;  %v4094_v7 = vrot.slane %v4092_v54, 4  ;;  %v9257_v16 = vld [vmem:[%s12448_s10 + $0x170] sm:$0x11] }
 0x1d1   : > { %v10205_v23 = vadd.f32 %v10204_v42, %v10203_v59  ;;  %v10268_v35 = vpop.f32.mrb[15].mxu1  ;;  %v16539_v59 = vcombine.high %v13679_v63, %v13682_v9  ;;  %v4097_v51 = vrot.slane %v4095_v37, 5  ;;  %v16540_v39 = vcombine.high %v13690_v19, %v13693_v2  ;;  %v9261_v31 = vld [vmem:[%s12448_s10 + $0x190] sm:$0x11]  ;;  %v552_v63 = vld [vmem:[#allocation2 + $0x8] sm:$0xff] }
 0x1d2   : > { %v13861_v33 = vadd.f32 %v10266_v30, %v10202_v62  ;;  %v10269_v48 = vadd.f32 %v10268_v35, %v10267_v22  ;;  %v4108_v60 = vrot.slane %v4106_v0, 4  ;;  %v4111_v62 = vrot.slane %v4109_v13, 5  ;;  %v9256_v22 = vld [vmem:[%s12448_s10 + $0x168] sm:$0xff]  ;;  %v553_v9 = vld [vmem:[#allocation2 + $0x10] sm:$0xff] }
 0x1d3   : > { %3688 = vmatmul.mubr.bf16.gmra.mrb[120].mxu0 %v16537_v15  ;;  %3785 = vmatmul.mubr.bf16.gmra.mrb[120].mxu1 %v16538_v21  ;;  %v13893_v30 = vadd.f32 %v13695_v45, %v551_v26  ;;  %v4136_v54 = vrot.slane %v4134_v20, 4  ;;  %v4139_v37 = vrot.slane %v4137_v57, 5  ;;  %v13902_v0 = vrot.slane %v4073_v14, 5  ;;  %v9260_v45 = vld [vmem:[%s12448_s10 + $0x188] sm:$0xff] }
 0x1d4   : > { %3695 = vmatprep.mubr.bf16.mxu0 %v16539_v59  ;;  %v13884_v56 = vadd.f32 %v10269_v48, %v10205_v23  ;;  %3792 = vmatprep.mubr.bf16.mxu1 %v16540_v39  ;;  %v13900_v48 = vrot.slane %v4084_v12, 4  ;;  %v4101_v13 = vshll.u32 %v9254_v47, 16  ;;  %v4070_v57 = vor.u32 %v4069_v29, %v13855_v17  ;;  %v9258_v39 = vld [vmem:[%s12448_s10 + $0x178] sm:$0x11] }
 0x1d5   : > { %v10206_v46 = vpop.f32.mrb[16].mxu0  ;;  %v4098_v59 = vor.u32 %v4097_v51, %v4094_v7  ;;  %v4112_v12 = vor.u32 %v4111_v62, %v4108_v60  ;;  %v4115_v44 = vshll.u32 %v9257_v16, 16  ;;  %v4143_v14 = vshll.u32 %v9261_v31, 16 }
 0x1d6   : > { %v10270_v42 = vpop.f32.mrb[16].mxu1  ;;  %v10207_v23 = vpop.f32.mrb[17].mxu0  ;;  %v4123_v55 = vshll.u32 %v9256_v22, 16  ;;  %v4148_v17 = vshrl.u32 %v9260_v45, 16  ;;  %v4151_v29 = vshll.u32 %v9260_v45, 16  ;;  %v16542_v7 = vcombine.low %v13690_v19, %v13693_v2 }
 0x1d7   : > { %v10208_v26 = vadd.f32 %v10207_v23, %v10206_v46  ;;  %v10271_v15 = vpop.f32.mrb[17].mxu1  ;;  %v10209_v21 = vpop.f32.mrb[18].mxu0  ;;  %v4140_v46 = vor.u32 %v4139_v37, %v4136_v54  ;;  %v4120_v23 = vshrl.u32 %v9256_v22, 16  ;;  %v16543_v51 = vcombine.high %v13732_v38, %v13737_v25 }
 0x1d8   : > { %v10272_v61 = vadd.f32 %v10271_v15, %v10270_v42  ;;  %v10273_v10 = vpop.f32.mrb[18].mxu1  ;;  %v10210_v35 = vpop.f32.mrb[19].mxu0  ;;  %v4071_v16 = vrot.slane %v4070_v57, 4  ;;  %v13921_v31 = vrot.slane %v4098_v59, 4  ;;  %v13923_v60 = vrot.slane %v4101_v13, 5  ;;  %v11674_v42 = vld [vmem:[%s12450_s1 + $0x500] sm:$0xff]  }
 0x1d9   : > { %v10211_v3 = vadd.f32 %v10210_v35, %v10209_v21  ;;  %v10274_v47 = vpop.f32.mrb[19].mxu1  ;;  %v4129_v62 = vshll.u32 %v9258_v39, 16  ;;  %v16545_v19 = vcombine.high %v13744_v32, %v13749_v8  ;;  %v13931_v2 = vrot.slane %v4115_v44, 5  ;;  %v11675_v21 = vld [vmem:[%s12450_s1 + $0x580] sm:$0xff]  }
 0x1da   : > { %v13910_v5 = vadd.f32 %v10272_v61, %v10208_v26  ;;  %v10275_v20 = vadd.f32 %v10274_v47, %v10273_v10  ;;  %v9262_v10 = vld [vmem:[%s12448_s10 + $0x198] sm:$0x11]  ;;  %v4162_v54 = vshrl.u32 %v9263_v1, 16  ;;  %v4165_v37 = vshll.u32 %v9263_v1, 16  ;;  %v16546_v1 = vld [vmem:[#allocation23_spill] sm:$0xff] }
 0x1db   : > { %3696 = vmatmul.mubr.bf16.gmra.mrb[124].mxu0 %v9187_v6  ;;  %3793 = vmatmul.mubr.bf16.gmra.mrb[124].mxu1 %v16542_v7  ;;  %v554_v6 = vld [vmem:[#allocation2 + $0x18] sm:$0xff]  ;;  %v4113_v35 = vrot.slane %v4112_v12, 4  ;;  %v4145_v13 = vrot.slane %v4143_v14, 5  ;;  %v13934_v45 = vrot.slane %v4120_v23, 4  ;;  %v13936_v26 = vrot.slane %v4123_v55, 5  ;;  %v11676_v23 = vld [vmem:[%s12450_s1 + $0x548] sm:$0xff]  }
 0x1dc   : > { %16541 = vst [vmem:[#allocation24_spill] sm:$0xff] %v13910_v5  ;;  %4746 = vmatprep.mubr.bf16.mxu0 %v16543_v51  ;;  %v13926_v61 = vadd.f32 %v10275_v20, %v10211_v3  ;;  %4843 = vmatprep.mubr.bf16.mxu1 %v16545_v19  ;;  %v4141_v20 = vrot.slane %v4140_v46, 4  ;;  %v4150_v57 = vrot.slane %v4148_v17, 4  ;;  %v4153_v44 = vrot.slane %v4151_v29, 5  ;;  %v9265_v46 = vld [vmem:[%s12448_s10 + $0x1b0] sm:$0x11] }
 0x1dd   : > { %v10212_v22 = vpop.f32.mrb[20].mxu0  ;;  %v4157_v59 = vshll.u32 %v9262_v10, 16  ;;  %v13940_v39 = vadd.f32 %v16546_v1, %v552_v63  ;;  %v13947_v55 = vsel %vm12750_vm2, %v13848_v50, %v13845_v34  ;;  %v13949_v7 = vrot.slane %v4129_v62, 5  ;;  %v13953_v17 = vld [vmem:[%s12448_s10 + $0x1c0] sm:$0xff]  ;;  %v11677_v19 = vld [vmem:[%s12450_s1 + $0x5c8] sm:$0xff]  }
 0x1de   : > { %16544 = vst [vmem:[#allocation25_spill] sm:$0xff] %v13926_v61  ;;  %v10276_v3 = vpop.f32.mrb[20].mxu1  ;;  %v10213_v15 = vpop.f32.mrb[21].mxu0  ;;  %v13956_v29 = vadd.f32 %v13751_v43, %v553_v9  ;;  %v13960_v34 = vadd.f32 %v13767_v52, %v554_v6  ;;  %v11678_v1 = vld [vmem:[%s12450_s1 + $0x508] sm:$0xff]   ;;  %v13967_v43 = vsel %vm12750_vm2, %v13900_v48, %v13851_v58  ;;  %v4126_v9 = vor.u32 %v13936_v26, %v13934_v45 }
 0x1df   : > { %v10214_v47 = vadd.f32 %v10213_v15, %v10212_v22  ;;  %v10277_v12 = vpop.f32.mrb[21].mxu1  ;;  %v10215_v14 = vpop.f32.mrb[22].mxu0  ;;  %v4164_v22 = vrot.slane %v4162_v54, 4  ;;  %v4167_v15 = vrot.slane %v4165_v37, 5  ;;  %v16549_v52 = vcombine.low %v13732_v38, %v13737_v25  ;;  %v11679_v6 = vld [vmem:[%s12450_s1 + $0x588] sm:$0xff]  }
 0x1e0   : > { %v10278_v51 = vadd.f32 %v10277_v12, %v10276_v3  ;;  %v10279_v10 = vpop.f32.mrb[22].mxu1  ;;  %v10216_v63 = vpop.f32.mrb[23].mxu0  ;;  %16547 = vst [vmem:[#allocation27_spill] sm:$0xff] %v13960_v34  ;;  %v9269_v3 = vld [vmem:[%s12448_s10 + $0x1d0] sm:$0x11]  ;;  %v9264_v12 = vld [vmem:[%s12448_s10 + $0x1a8] sm:$0xff]  ;;  %v16550_v48 = vcombine.low %v13744_v32, %v13749_v8  ;;  %v13986_v45 = vsel %vm12750_vm2, %v4071_v16, %v13902_v0  ;;  %v16552_v32 = vcombine.high %v13787_v40, %v13792_v24 }
 0x1e1   : > { %v10217_v50 = vadd.f32 %v10216_v63, %v10215_v14  ;;  %v10280_v62 = vpop.f32.mrb[23].mxu1  ;;  %v11680_v14 = vld [vmem:[%s12450_s1 + $0x550] sm:$0xff]   ;;  %v4154_v63 = vor.u32 %v4153_v44, %v4150_v57  ;;  %v4171_v58 = vshll.u32 %v9265_v46, 16  ;;  %v13988_v26 = vrot.slane %v4157_v59, 5  ;;  %v9268_v57 = vld [vmem:[%s12448_s10 + $0x1c8] sm:$0xff]  ;;  %v14000_v59 = vld [vmem:[%s12448_s10 + $0x1e0] sm:$0xff] }
 0x1e2   : > { %v13973_v54 = vadd.f32 %v10278_v51, %v10214_v47  ;;  %v10281_v37 = vadd.f32 %v10280_v62, %v10279_v10  ;;  %v4190_v38 = vshrl.u32 %v13953_v17, 16  ;;  %v4193_v25 = vshll.u32 %v13953_v17, 16  ;;  %v11681_v8 = vld [vmem:[%s12450_s1 + $0x5d0] sm:$0xff]   ;;  %v14021_v10 = vld [vmem:[%s12448_s10 + $0x1b8] sm:$0x11]  ;;  %v9276_v61 = vld [vmem:[%s12448_s10 + $0x208] sm:$0xff] }
 0x1e3   : > { %4747 = vmatmul.mubr.bf16.vlgmr.msra.gmra.mrb[128].mxu0 %v16549_v52  ;;  %4844 = vmatmul.mubr.bf16.vlgmr.msra.gmra.mrb[128].mxu1 %v16550_v48  ;;  %v4199_v0 = vshll.u32 %v9269_v3, 16  ;;  %v4176_v16 = vshrl.u32 %v9264_v12, 16  ;;  %v16553_v46 = vcombine.high %v13798_v41, %v13805_v53  ;;  %v14014_v17 = vsel %vm12750_vm2, %v4113_v35, %v13931_v2 }
 0x1e4   : > { %16548 = vst [vmem:[#allocation28_spill] sm:$0xff] %v13973_v54  ;;  %10807 = vmatpush3.bf16.msra.mxu0 %v11674_v42  ;;  %v13993_v44 = vadd.f32 %v10281_v37, %v10217_v50  ;;  %10871 = vmatpush3.bf16.msra.mxu1 %v11675_v21  ;;  %v4168_v42 = vor.u32 %v4167_v15, %v4164_v22  ;;  %v4179_v22 = vshll.u32 %v9264_v12, 16  ;;  %v11682_v50 = vld [vmem:[%s12450_s1 + $0x510] sm:$0xff]   ;;  %v14024_v62 = vrot.slane %v4126_v9, 4  ;;  %v11692_v54 = vld [vmem:[%s12450_s1 + $0x568] sm:$0xff]  }
 0x1e5   : > { %4754 = vmatprep.mubr.bf16.mxu0 %v16552_v32  ;;  %v10218_v47 = vpop.f32.mrb[24].mxu0  ;;  %4851 = vmatprep.mubr.bf16.mxu1 %v16553_v46  ;;  %v14009_v21 = vsel %vm12750_vm2, %v13921_v31, %v13923_v60  ;;  %v14018_v51 = vsel %vm12750_vm2, %v4141_v20, %v4145_v13  ;;  %v14026_v31 = vrot.slane %v4154_v63, 4  ;;  %v14028_v60 = vrot.slane %v4171_v58, 5  ;;  %v11683_v13 = vld [vmem:[%s12450_s1 + $0x590] sm:$0xff]   ;;  %v9275_v32 = vld [vmem:[%s12448_s10 + $0x200] sm:$0xff] }
 0x1e6   : > { %16551 = vst [vmem:[#allocation29_spill] sm:$0xff] %v13993_v44  ;;  %10808 = vmatprep.subr.bf16.mxu0 %v11676_v23  ;;  %v10282_v23 = vpop.f32.mrb[24].mxu1  ;;  %v10219_v15 = vpop.f32.mrb[25].mxu0  ;;  %10872 = vmatprep.subr.bf16.mxu1 %v11677_v19  ;;  %v4204_v2 = vshrl.u32 %v9268_v57, 16  ;;  %v14031_v20 = vrot.slane %v4190_v38, 4  ;;  %v4207_v12 = vshll.u32 %v9268_v57, 16 }
 0x1e7   : > { %v10220_v35 = vadd.f32 %v10219_v15, %v10218_v47  ;;  %v10283_v3 = vpop.f32.mrb[25].mxu1  ;;  %v10221_v37 = vpop.f32.mrb[26].mxu0  ;;  %v4218_v19 = vshrl.u32 %v14000_v59, 16  ;;  %v14034_v58 = vrot.slane %v4168_v42, 4  ;;  %v14036_v48 = vrot.slane %v4193_v25, 5  ;;  %v11684_v57 = vld [vmem:[%s12450_s1 + $0x558] sm:$0xff]  }
 0x1e8   : > { %10809 = vmatpush3.bf16.msra.mxu0 %v11678_v1  ;;  %v10284_v52 = vadd.f32 %v10283_v3, %v10282_v23  ;;  %v10285_v9 = vpop.f32.mrb[26].mxu1  ;;  %v10222_v63 = vpop.f32.mrb[27].mxu0  ;;  %10873 = vmatpush3.bf16.msra.mxu1 %v11679_v6  ;;  %v14038_v1 = vrot.slane %v4199_v0, 5  ;;  %v14042_v46 = vrot.slane %v4176_v16, 4  ;;  %v14044_v6 = vrot.slane %v4179_v22, 5  ;;  %v9272_v42 = vld [vmem:[%s12448_s10 + $0x1e8] sm:$0xff] }
 0x1e9   : > { %10810 = vmatprep.subr.bf16.mxu0 %v11680_v14  ;;  %v10223_v38 = vadd.f32 %v10222_v63, %v10221_v37  ;;  %v10286_v47 = vpop.f32.mrb[27].mxu1  ;;  %10874 = vmatprep.subr.bf16.mxu1 %v11681_v8  ;;  %v4221_v14 = vshll.u32 %v14000_v59, 16  ;;  %v16555_v0 = vcombine.low %v13787_v40, %v13792_v24  ;;  %v11685_v15 = vld [vmem:[%s12450_s1 + $0x5d8] sm:$0xff]   ;;  %v14056_v16 = vrot.slane %v4204_v2, 4  ;;  %v11688_v37 = vld [vmem:[%s12450_s1 + $0x560] sm:$0xff]  }
 0x1ea   : > { %v14048_v23 = vadd.f32 %v10284_v52, %v10220_v35  ;;  %v10287_v25 = vadd.f32 %v10286_v47, %v10285_v9  ;;  %v11686_v3 = vld [vmem:[%s12450_s1 + $0x518] sm:$0xff]   ;;  %v16556_v22 = vcombine.low %v13798_v41, %v13805_v53  ;;  %v16557_v59 = vcombine.high %v13838_v11, %v13843_v4  ;;  %v11689_v47 = vld [vmem:[%s12450_s1 + $0x5e0] sm:$0xff]  }
 0x1eb   : > { %4755 = vmatmul.mubr.bf16.gmra.mrb[132].mxu0 %v16555_v0  ;;  %v11687_v35 = vld [vmem:[%s12450_s1 + $0x598] sm:$0xff]   ;;  %v14069_v24 = vrot.slane %v4207_v12, 5  ;;  %v14071_v52 = vrot.slane %v4218_v19, 4  ;;  %v4246_v9 = vshrl.u32 %v9275_v32, 16  ;;  %v4249_v63 = vshll.u32 %v9275_v32, 16 }
 0x1ec   : > { %16554 = vst [vmem:[#allocation26_spill] sm:$0xff] %v14048_v23  ;;  %4852 = vmatmul.mubr.bf16.gmra.mrb[132].mxu1 %v16556_v22  ;;  %4762 = vmatprep.mubr.bf16.mxu0 %v16557_v59  ;;  %v14067_v40 = vld [vmem:[%s12448_s10 + $0x1d8] sm:$0x11]  ;;  %v14073_v2 = vadd.f32 %v10287_v25, %v10223_v38  ;;  %v16559_v41 = vcombine.high %v13876_v36, %v13881_v27  ;;  %v14082_v0 = vld [vmem:[%s12448_s10 + $0x1f0] sm:$0x11]  ;;  %v4232_v12 = vshrl.u32 %v9272_v42, 16 }
 0x1ed   : > { %10811 = vmatpush3.bf16.msra.mxu0 %v11682_v50  ;;  %v9364_v53 = vcombine.high %v13947_v55, %v13967_v43  ;;  %v4235_v22 = vshll.u32 %v9272_v42, 16  ;;  %v10224_v19 = vpop.f32.mrb[28].mxu0  ;;  %10875 = vmatpush3.bf16.msra.mxu1 %v11683_v13  ;;  %v9366_v32 = vcombine.high %v13986_v45, %v14009_v21  ;;  %v14090_v25 = vrot.slane %v4221_v14, 5  ;;  %v11690_v38 = vld [vmem:[%s12450_s1 + $0x520] sm:$0xff]   ;;  %v9277_v50 = vld [vmem:[%s12448_s10 + $0x210] sm:$0x11] }
 0x1ee   : > { %16558 = vst [vmem:[#allocation23_spill] sm:$0xff] %v14073_v2  ;;  %4859 = vmatprep.mubr.bf16.mxu1 %v16559_v41  ;;  %10812 = vmatprep.subr.bf16.mxu0 %v11684_v57  ;;  %v10288_v59 = vpop.f32.mrb[28].mxu1  ;;  %v10225_v42 = vpop.f32.mrb[29].mxu0  ;;  %v14098_v41 = vsel %vm12750_vm2, %v14024_v62, %v13949_v7  ;;  %v4196_v57 = vor.u32 %v14036_v48, %v14031_v20  ;;  %v11691_v23 = vld [vmem:[%s12450_s1 + $0x5a0] sm:$0xff]   ;;  %v4213_v44 = vshll.u32 %v14067_v40, 16  ;;  %v14112_v7 = vrot.slane %v4246_v9, 4 }
 0x1ef   : > { %10876 = vmatprep.subr.bf16.mxu1 %v11685_v15  ;;  %v4182_v14 = vor.u32 %v14044_v6, %v14042_v46  ;;  %v14107_v15 = vld [vmem:[%s12448_s10 + $0x1f8] sm:$0x11]  ;;  %v10226_v8 = vadd.f32 %v10225_v42, %v10224_v19  ;;  %v10289_v2 = vpop.f32.mrb[29].mxu1  ;;  %v10227_v13 = vpop.f32.mrb[30].mxu0  ;;  %v4251_v62 = vrot.slane %v4249_v63, 5  ;;  %v4210_v46 = vor.u32 %v14069_v24, %v14056_v16  ;;  %v11693_v9 = vld [vmem:[%s12450_s1 + $0x5e8] sm:$0xff]  }
 0x1f0   : > { %v10290_v20 = vadd.f32 %v10289_v2, %v10288_v59  ;;  %v10291_v48 = vpop.f32.mrb[30].mxu1  ;;  %v10228_v5 = vpop.f32.mrb[31].mxu0  ;;  %v14118_v6 = vld [vmem:[%s12448_s10 + $0x218] sm:$0x11]  ;;  %v14120_v19 = vrot.slane %v4232_v12, 4  ;;  %v14122_v42 = vrot.slane %v4235_v22, 5  ;;  %v4224_v63 = vor.u32 %v14090_v25, %v14071_v52 }
 0x1f1   : > { %10813 = vmatpush3.bf16.msra.mxu0 %v11686_v3  ;;  %v10229_v40 = vadd.f32 %v10228_v5, %v10227_v13  ;;  %v10292_v34 = vpop.f32.mrb[31].mxu1  ;;  %10877 = vmatpush3.bf16.msra.mxu1 %v11687_v35  ;;  %v4227_v2 = vshll.u32 %v14082_v0, 16  ;;  %v4255_v3 = vshll.u32 %v9277_v50, 16  ;;  %v16560_v24 = vcombine.low %v13838_v11, %v13843_v4  ;;  %v11695_v0 = vld [vmem:[%s12450_s1 + $0x5a8] sm:$0xff]   ;;  %v11696_v12 = vld [vmem:[%s12450_s1 + $0x570] sm:$0xff]   ;;  %v14168_v13 = vld [vmem:[%s12448_s10 + $0x220] sm:$0xff] }
 0x1f2   : > { %10814 = vmatprep.subr.bf16.mxu0 %v11688_v37  ;;  %v14128_v59 = vadd.f32 %v10290_v20, %v10226_v8  ;;  %v10293_v16 = vadd.f32 %v10292_v34, %v10291_v48  ;;  %10878 = vmatprep.subr.bf16.mxu1 %v11689_v47  ;;  %v4260_v5 = vshrl.u32 %v9276_v61, 16  ;;  %v4263_v35 = vshll.u32 %v9276_v61, 16  ;;  %v11697_v25 = vld [vmem:[%s12450_s1 + $0x5f0] sm:$0xff]  }
 0x1f3   : > { %4763 = vmatmul.mubr.bf16.gmra.mrb[136].mxu0 %v16560_v24  ;;  %v16561_v37 = vcombine.low %v13876_v36, %v13881_v27  ;;  %v14136_v52 = vrot.slane %v4196_v57, 4  ;;  %v16562_v8 = vshll.u32 %v14021_v10, 16  ;;  %v4252_v11 = vor.u32 %v4251_v62, %v14112_v7  ;;  %v555_v36 = vld [vmem:[#allocation2 + $0x20] sm:$0xff] }
 0x1f4   : > { %4770 = vmatprep.mubr.bf16.mxu0 %v9364_v53  ;;  %v4241_v4 = vshll.u32 %v14107_v15, 16  ;;  %v14144_v47 = vadd.f32 %v10293_v16, %v10229_v40  ;;  %v14146_v27 = vrot.slane %v4182_v14, 4  ;;  %v14148_v61 = vrot.slane %v4213_v44, 5  ;;  %v11694_v53 = vld [vmem:[%s12450_s1 + $0x528] sm:$0xff]  }
 0x1f5   : > { %4860 = vmatmul.mubr.bf16.gmra.mrb[136].mxu1 %v16561_v37  ;;  %v14140_v34 = vrot.slane %v16562_v8, 5  ;;  %10815 = vmatpush3.bf16.msra.mxu0 %v11690_v38  ;;  %v4238_v10 = vor.u32 %v14122_v42, %v14120_v19  ;;  %v10310_v22 = vpop.f32.mrb[32].mxu0  ;;  %v14161_v38 = vrot.slane %v4210_v46, 4  ;;  %v14163_v44 = vrot.slane %v4227_v2, 5  ;;  %v556_v19 = vld [vmem:[#allocation2 + $0x28] sm:$0xff] }
 0x1f6   : > { %4867 = vmatprep.mubr.bf16.mxu1 %v9366_v32  ;;  %v14159_v32 = vsel %vm12750_vm2, %v14026_v31, %v13988_v26  ;;  %10879 = vmatpush3.bf16.msra.mxu1 %v11691_v23  ;;  %v4269_v50 = vshll.u32 %v14118_v6, 16  ;;  %v10374_v57 = vpop.f32.mrb[32].mxu1  ;;  %v10311_v14 = vpop.f32.mrb[33].mxu0  ;;  %v14170_v7 = vrot.slane %v4224_v63, 4  ;;  %v14172_v26 = vrot.slane %v4255_v3, 5  ;;  %v11698_v23 = vld [vmem:[%s12450_s1 + $0x530] sm:$0xff]  }
 0x1f7   : > { %10816 = vmatprep.subr.bf16.mxu0 %v11692_v54  ;;  %10880 = vmatprep.subr.bf16.mxu1 %v11693_v9  ;;  %v14174_v31 = vrot.slane %v4260_v5, 4  ;;  %v4265_v54 = vrot.slane %v4263_v35, 5  ;;  %v10312_v62 = vadd.f32 %v10311_v14, %v10310_v22  ;;  %v10375_v20 = vpop.f32.mrb[33].mxu1  ;;  %v10313_v48 = vpop.f32.mrb[34].mxu0  ;;  %v9367_v46 = vcombine.low %v14014_v17, %v14018_v51  ;;  %v11699_v9 = vld [vmem:[%s12450_s1 + $0x5b0] sm:$0xff]   ;;  %v9283_v63 = vld [vmem:[%s12448_s10 + $0x240] sm:$0xff] }
 0x1f8   : > { %v14179_v42 = vrot.slane %v4252_v11, 4  ;;  %v14181_v40 = vrot.slane %v4241_v4, 5  ;;  %v14186_v2 = vld [vmem:[%s12448_s10 + $0x228] sm:$0xff]  ;;  %v10376_v3 = vadd.f32 %v10375_v20, %v10374_v57  ;;  %v10377_v16 = vpop.f32.mrb[34].mxu1  ;;  %v10314_v24 = vpop.f32.mrb[35].mxu0  ;;  %v9370_v5 = vcombine.high %v14098_v41, %v14159_v32  ;;  %v11700_v11 = vld [vmem:[%s12450_s1 + $0x578] sm:$0xff]  }
 0x1f9   : > { %10817 = vmatpush3.bf16.msra.mxu0 %v11694_v53  ;;  %v14190_v35 = vrot.slane %v4238_v10, 4  ;;  %v4274_v37 = vshrl.u32 %v14168_v13, 16  ;;  %v14194_v8 = vld [vmem:[%s12448_s10 + $0x248] sm:$0xff]  ;;  %v10315_v4 = vadd.f32 %v10314_v24, %v10313_v48  ;;  %v10378_v22 = vpop.f32.mrb[35].mxu1  ;;  %v14198_v14 = vadd.f32 %v13809_v28, %v555_v36  ;;  %v11701_v24 = vld [vmem:[%s12450_s1 + $0x5f8] sm:$0xff]  }
 0x1fa   : > { %v14204_v57 = vsel %vm12750_vm2, %v14034_v58, %v14028_v60  ;;  %10881 = vmatpush3.bf16.msra.mxu1 %v11695_v0  ;;  %v14206_v53 = vrot.slane %v4269_v50, 5  ;;  %10818 = vmatprep.subr.bf16.mxu0 %v11696_v12  ;;  %v14208_v10 = vadd.f32 %v10376_v3, %v10312_v62  ;;  %v10379_v20 = vadd.f32 %v10378_v22, %v10377_v16  ;;  %v11702_v50 = vld [vmem:[%s12450_s1 + $0x538] sm:$0xff]   ;;  %v11704_v62 = vld [vmem:[%s12450_s1 + $0x640] sm:$0xff]  }
 0x1fb   : > { %v16563_v48 = vcombine.low %v13947_v55, %v13967_v43  ;;  %v4266_v28 = vor.u32 %v4265_v54, %v14174_v31  ;;  %10882 = vmatprep.subr.bf16.mxu1 %v11697_v25  ;;  %v4277_v36 = vshll.u32 %v14168_v13, 16  ;;  %v16564_v60 = vcombine.low %v13986_v45, %v14009_v21  ;;  %v14252_v54 = vld [vmem:[%s12448_s10 + $0x230] sm:$0x11] }
 0x1fc   : > { %v16565_v58 = vcombine.high %v14014_v17, %v14018_v51  ;;  %v14226_v55 = vsel %vm12750_vm2, %v14136_v52, %v14038_v1  ;;  %v4302_v43 = vshrl.u32 %v9283_v63, 16  ;;  %v4305_v0 = vshll.u32 %v9283_v63, 16 }
 0x1fd   : > { %4771 = vmatmul.mubr.bf16.gmra.mrb[140].mxu0 %v16563_v48  ;;  %4868 = vmatmul.mubr.bf16.gmra.mrb[140].mxu1 %v16564_v60  ;;  %v4288_v12 = vshrl.u32 %v14186_v2, 16  ;;  %v14230_v45 = vadd.f32 %v10379_v20, %v10315_v4  ;;  %v14233_v21 = vadd.f32 %v13825_v18, %v556_v19  ;;  %v4291_v25 = vshll.u32 %v14186_v2, 16  ;;  %v10316_v52 = vpop.f32.mrb[36].mxu0 }
 0x1fe   : > { %4778 = vmatprep.mubr.bf16.mxu0 %v16565_v58  ;;  %4875 = vmatprep.mubr.bf16.mxu1 %v9370_v5  ;;  %v4316_v1 = vshrl.u32 %v14194_v8, 16  ;;  %v9369_v13 = vcombine.low %v14098_v41, %v14159_v32  ;;  %v14243_v31 = vsel %vm12750_vm2, %v14146_v27, %v14140_v34  ;;  %v14249_v18 = vsel %vm12750_vm2, %v14161_v38, %v14148_v61  ;;  %v11703_v32 = vld [vmem:[%s12450_s1 + $0x5b8] sm:$0xff]   ;;  %v10380_v34 = vpop.f32.mrb[36].mxu1  ;;  %v10317_v27 = vpop.f32.mrb[37].mxu0 }
 0x1ff   : > { %10819 = vmatpush3.bf16.msra.mxu0 %v11698_v23  ;;  %10883 = vmatpush3.bf16.msra.mxu1 %v11699_v9  ;;  %v14255_v23 = vld [vmem:[%s12448_s10 + $0x250] sm:$0x11]  ;;  %v4319_v41 = vshll.u32 %v14194_v8, 16  ;;  %v9372_v19 = vcombine.high %v14204_v57, %v14226_v55  ;;  %v4267_v63 = vrot.slane %v4266_v28, 4  ;;  %v4276_v61 = vrot.slane %v4274_v37, 4  ;;  %v11705_v9 = vld [vmem:[%s12450_s1 + $0x6c0] sm:$0xff]  }
 0x200   : > { %10820 = vmatprep.subr.bf16.mxu0 %v11700_v11  ;;  %v4279_v38 = vrot.slane %v4277_v36, 5  ;;  %10884 = vmatprep.subr.bf16.mxu1 %v11701_v24  ;;  %v10318_v2 = vadd.f32 %v10317_v27, %v10316_v52  ;;  %v10381_v3 = vpop.f32.mrb[37].mxu1  ;;  %v10319_v16 = vpop.f32.mrb[38].mxu0  ;;  %v4304_v5 = vrot.slane %v4302_v43, 4  ;;  %v4307_v8 = vrot.slane %v4305_v0, 5 }
 0x201   : > { %v14264_v11 = vld [vmem:[%s12448_s10 + $0x238] sm:$0x11]  ;;  %v4290_v4 = vrot.slane %v4288_v12, 4  ;;  %v10382_v22 = vadd.f32 %v10381_v3, %v10380_v34  ;;  %v10383_v20 = vpop.f32.mrb[38].mxu1  ;;  %v10320_v48 = vpop.f32.mrb[39].mxu0  ;;  %v9374_v60 = vcombine.high %v14243_v31, %v14249_v18  ;;  %v4293_v37 = vrot.slane %v4291_v25, 5 }
 0x202   : > { %v14269_v28 = vld [vmem:[%s12448_s10 + $0x258] sm:$0x11]  ;;  %v4318_v36 = vrot.slane %v4316_v1, 4  ;;  %v10321_v24 = vadd.f32 %v10320_v48, %v10319_v16  ;;  %v10384_v58 = vpop.f32.mrb[39].mxu1  ;;  %v14275_v43 = vsel %vm12750_vm2, %v14170_v7, %v14163_v44  ;;  %v14281_v0 = vsel %vm12750_vm2, %v14179_v42, %v14172_v26 }
 0x203   : > { %10821 = vmatpush3.bf16.msra.mxu0 %v11702_v50  ;;  %v4321_v12 = vrot.slane %v4319_v41, 5  ;;  %10885 = vmatpush3.bf16.msra.mxu1 %v11703_v32  ;;  %v14283_v25 = vadd.f32 %v10382_v22, %v10318_v2  ;;  %v10385_v50 = vadd.f32 %v10384_v58, %v10383_v20  ;;  %v4283_v1 = vshll.u32 %v14252_v54, 16 }
 0x204   : > { %10934 = vmatprep.subr.bf16.mxu0 %v11704_v62  ;;  %v4311_v44 = vshll.u32 %v14255_v23, 16  ;;  %10998 = vmatprep.subr.bf16.mxu1 %v11705_v9  ;;  %v14294_v7 = vsel %vm12750_vm2, %v14190_v35, %v14181_v40  ;;  %v4280_v26 = vor.u32 %v4279_v38, %v4276_v61  ;;  %v4308_v42 = vor.u32 %v4307_v8, %v4304_v5  ;;  %v557_v40 = vld [vmem:[#allocation2 + $0x30] sm:$0xff]  ;;  %v558_v35 = vld [vmem:[#allocation2 + $0x38] sm:$0xff]  ;;  %v14318_v61 = vld [vmem:[%s12448_s10 + $0x20] sm:$0xee] }
 0x205   : > { %4779 = vmatmul.mubr.bf16.gmra.mrb[144].mxu0 %v9367_v46  ;;  %4876 = vmatmul.mubr.bf16.gmra.mrb[144].mxu1 %v9369_v13  ;;  %v14296_v52 = vadd.f32 %v10385_v50, %v10321_v24  ;;  %v14301_v17 = vsel %vm12750_vm2, %v4267_v63, %v14206_v53  ;;  %v4297_v51 = vshll.u32 %v14264_v11, 16  ;;  %v14306_v46 = vadd.f32 %v14208_v10, %v13893_v30  ;;  %v10322_v13 = vpop.f32.mrb[40].mxu0  ;;  %v14328_v8 = vld [vmem:[%s12448_s10 + $0x40] sm:$0xee] }
 0x206   : > { %4786 = vmatprep.mubr.bf16.mxu0 %v9372_v19  ;;  %4883 = vmatprep.mubr.bf16.mxu1 %v9374_v60  ;;  %v4294_v41 = vor.u32 %v4293_v37, %v4290_v4  ;;  %v4322_v32 = vor.u32 %v4321_v12, %v4318_v36  ;;  %v4325_v62 = vshll.u32 %v14269_v28, 16  ;;  %v14311_v34 = vadd.f32 %v14230_v45, %v13940_v39  ;;  %v10386_v53 = vpop.f32.mrb[40].mxu1  ;;  %v10323_v27 = vpop.f32.mrb[41].mxu0  ;;  %v14331_v37 = vld [vmem:[%s12448_s10 + $0x28] sm:$0xee] }
 0x207   : > { %v9371_v19 = vcombine.low %v14204_v57, %v14226_v55  ;;  %v9373_v30 = vcombine.low %v14243_v31, %v14249_v18  ;;  %v4285_v10 = vrot.slane %v4283_v1, 5  ;;  %v4313_v63 = vrot.slane %v4311_v44, 5  ;;  %v10387_v9 = vpop.f32.mrb[41].mxu1  ;;  %v10325_v2 = vpop.f32.mrb[42].mxu0  ;;  %v14339_v12 = vld [vmem:[%s12448_s10 + $0x48] sm:$0xee] }
 0x208   : > { %v10324_v38 = vadd.f32 %v10323_v27, %v10322_v13  ;;  %v9376_v39 = vcombine.high %v14275_v43, %v14281_v0  ;;  %v4281_v45 = vrot.slane %v4280_v26, 4  ;;  %v4309_v3 = vrot.slane %v4308_v42, 4  ;;  %v10389_v5 = vpop.f32.mrb[42].mxu1  ;;  %v10326_v57 = vpop.f32.mrb[43].mxu0  ;;  %v11808_v44 = vld [vmem:[%s12448_s10 + $0x30] sm:$0x11] }
 0x209   : > { %v10388_v16 = vadd.f32 %v10387_v9, %v10386_v53  ;;  %v14323_v55 = vadd.f32 %v13861_v33, %v557_v40  ;;  %v9378_v31 = vcombine.high %v14294_v7, %v14301_v17  ;;  %v4299_v18 = vrot.slane %v4297_v51, 5  ;;  %v10390_v22 = vpop.f32.mrb[43].mxu1  ;;  %v559_v40 = vld [vmem:[#allocation2 + $0x40] sm:$0xff]  ;;  %v16566_v53 = vld [vmem:[#allocation27_spill] sm:$0xff] }
 0x20a   : > { %v10327_v4 = vadd.f32 %v10326_v57, %v10325_v2  ;;  %v4295_v20 = vrot.slane %v4294_v41, 4  ;;  %v4323_v48 = vrot.slane %v4322_v32, 4  ;;  %v4327_v60 = vrot.slane %v4325_v62, 5  ;;  %v11809_v41 = vld [vmem:[%s12448_s10 + $0x50] sm:$0x11] }
 0x20b   : > { %v2273_v36 = vadd.f32 %v10388_v16, %v10324_v38  ;;  %v10391_v24 = vadd.f32 %v10390_v22, %v10389_v5  ;;  %v14334_v33 = vadd.f32 %v13884_v56, %v558_v35  ;;  %v9375_v58 = vcombine.low %v14275_v43, %v14281_v0  ;;  %v14369_v62 = vld [vmem:[%s12448_s10 + $0x60] sm:$0xee]  ;;  %v14390_v16 = vld [vmem:[%s12448_s10 + $0x68] sm:$0xee] }
 0x20c   : > { %v14343_v50 = vsel %vm12750_vm2, %v4281_v45, %v4285_v10  ;;  %v14347_v1 = vsel %vm12750_vm2, %v4309_v3, %v4313_v63  ;;  %v9447_v56 = vrot.slane %v14318_v61, 9  ;;  %v5022_v26 = vrot.slane %v11808_v44, 5  ;;  %v11810_v63 = vld [vmem:[%s12448_s10 + $0x38] sm:$0x11]  ;;  %v14383_v38 = vld [vmem:[%s12448_s10 + $0x80] sm:$0xee] }
 0x20d   : > { %4787 = vmatmul.mubr.bf16.gmra.mrb[148].mxu0 %v9371_v19  ;;  %4884 = vmatmul.mubr.bf16.gmra.mrb[148].mxu1 %v9373_v30  ;;  %v14352_v43 = vadd.f32 %v2273_v36, %v14198_v14  ;;  %v2276_v0 = vadd.f32 %v10391_v24, %v10327_v4  ;;  %v9449_v42 = vrot.slane %v14328_v8, 9  ;;  %v14357_v51 = vadd.f32 %v14283_v25, %v13956_v29  ;;  %v10328_v13 = vpop.f32.mrb[44].mxu0  ;;  %v11811_v45 = vld [vmem:[%s12448_s10 + $0x58] sm:$0x11]  ;;  %v14400_v4 = vld [vmem:[%s12448_s10 + $0x88] sm:$0xee] }
 0x20e   : > { %4794 = vmatprep.mubr.bf16.mxu0 %v9376_v39  ;;  %4891 = vmatprep.mubr.bf16.mxu1 %v9378_v31  ;;  %v14361_v35 = vsel %vm12750_vm2, %v4295_v20, %v4299_v18  ;;  %v14365_v14 = vsel %vm12750_vm2, %v4323_v48, %v4327_v60  ;;  %v5030_v32 = vrot.slane %v11809_v41, 5  ;;  %v14373_v29 = vadd.f32 %v14296_v52, %v16566_v53  ;;  %v10392_v27 = vpop.f32.mrb[44].mxu1  ;;  %v10329_v19 = vpop.f32.mrb[45].mxu0  ;;  %v14396_v18 = vld [vmem:[%s12448_s10 + $0x70] sm:$0x11]  ;;  %v560_v41 = vld [vmem:[#allocation2 + $0x48] sm:$0xff] }
 0x20f   : > { %v14376_v25 = vadd.f32 %v2276_v0, %v14233_v21  ;;  %v9377_v30 = vcombine.low %v14294_v7, %v14301_v17  ;;  %v9448_v10 = vrot.slane %v14331_v37, 9  ;;  %v5026_v61 = vrot.slane %v11810_v63, 5  ;;  %v10393_v52 = vpop.f32.mrb[45].mxu1  ;;  %v10331_v2 = vpop.f32.mrb[46].mxu0  ;;  %v16567_v48 = vld [vmem:[#allocation24_spill] sm:$0xff] }
 0x210   : > { %v10330_v9 = vadd.f32 %v10329_v19, %v10328_v13  ;;  %v9380_v21 = vcombine.high %v14343_v50, %v14347_v1  ;;  %v9450_v39 = vrot.slane %v14339_v12, 9  ;;  %v5034_v3 = vrot.slane %v11811_v45, 5  ;;  %v10395_v17 = vpop.f32.mrb[46].mxu1  ;;  %v10332_v5 = vpop.f32.mrb[47].mxu0  ;;  %v561_v53 = vld [vmem:[#allocation2 + $0x50] sm:$0xff]  ;;  %v562_v63 = vld [vmem:[#allocation2 + $0x58] sm:$0xff] }
 0x211   : > { %v10394_v7 = vadd.f32 %v10393_v52, %v10392_v27  ;;  %v9382_v57 = vcombine.high %v14361_v35, %v14365_v14  ;;  %v5038_v8 = vrot.slane %v14396_v18, 5  ;;  %v10333_v22 = vadd.f32 %v10332_v5, %v10331_v2  ;;  %v10396_v20 = vpop.f32.mrb[47].mxu1  ;;  %v11813_v19 = vld [vmem:[%s12448_s10 + $0x90] sm:$0x11]  ;;  %v11815_v2 = vld [vmem:[%s12448_s10 + $0x98] sm:$0x11] }
 0x212   : > { %v14403_v60 = vadd.f32 %v16567_v48, %v559_v40  ;;  %v9379_v37 = vcombine.low %v14343_v50, %v14347_v1  ;;  %v10397_v12 = vadd.f32 %v10396_v20, %v10395_v17  ;;  %v9381_v44 = vcombine.low %v14361_v35, %v14365_v14  ;;  %v14415_v40 = vld [vmem:[%s12448_s10 + $0xa0] sm:$0xee]  ;;  %v11817_v48 = vld [vmem:[%s12448_s10 + $0xd0] sm:$0x11] }
 0x213   : > { %v2281_v24 = vadd.f32 %v10394_v7, %v10330_v9  ;;  %v14412_v13 = vsel %vm13168_vm5, %v9447_v56, %v5022_v26  ;;  %v14419_v27 = vsel %vm13168_vm5, %v9449_v42, %v5030_v32  ;;  %v14427_v56 = vsel %vm13168_vm5, %v9450_v39, %v5034_v3  ;;  %v14430_v26 = vld [vmem:[%s12448_s10 + $0xc0] sm:$0xee]  ;;  %v15056_v0 = vld [vmem:[%s12448_s10 + $0x50] sm:$0x11] }
 0x214   : > { %v2284_v14 = vadd.f32 %v10397_v12, %v10333_v22  ;;  %v5046_v42 = vrot.slane %v11813_v19, 5  ;;  %v9452_v32 = vrot.slane %v14390_v16, 9  ;;  %v9454_v52 = vrot.slane %v14400_v4, 9  ;;  %v14457_v12 = vld [vmem:[%s12448_s10 + $0xb8] sm:$0x11] }
 0x215   : > { %4795 = vmatmul.mubr.bf16.gmra.mrb[152].mxu0 %v9375_v58  ;;  %4892 = vmatmul.mubr.bf16.gmra.mrb[152].mxu1 %v9377_v30  ;;  %v14423_v58 = vsel %vm13168_vm5, %v9448_v10, %v5026_v61  ;;  %v14433_v35 = vadd.f32 %v2281_v24, %v14323_v55  ;;  %v14438_v30 = vld [vmem:[%s12448_s10 + $0xa8] sm:$0xee]  ;;  %v10334_v10 = vpop.f32.mrb[48].mxu0  ;;  %v11814_v61 = vld [vmem:[%s12448_s10 + $0x78] sm:$0x11]  ;;  %v9544_v7 = vcombine.high %v14412_v13, %v14419_v27  ;;  %v9455_v17 = vrot.slane %v14415_v40, 9 }
 0x216   : > { %4802 = vmatprep.mubr.bf16.mxu0 %v9380_v21  ;;  %4899 = vmatprep.mubr.bf16.mxu1 %v9382_v57  ;;  %v5042_v9 = vrot.slane %v11814_v61, 5  ;;  %v5050_v21 = vrot.slane %v11815_v2, 5  ;;  %v11816_v55 = vld [vmem:[%s12448_s10 + $0xb0] sm:$0x11]  ;;  %v14445_v45 = vadd.f32 %v2284_v14, %v14334_v33  ;;  %v10398_v3 = vpop.f32.mrb[48].mxu1  ;;  %v10335_v16 = vpop.f32.mrb[49].mxu0 }
 0x217   : > { %v5054_v39 = vrot.slane %v11816_v55, 5  ;;  %v9457_v5 = vrot.slane %v14430_v26, 9  ;;  %v14452_v57 = vld [vmem:[%s12448_s10 + $0xc8] sm:$0xee]  ;;  %v10336_v4 = vadd.f32 %v10335_v16, %v10334_v10  ;;  %v10399_v22 = vpop.f32.mrb[49].mxu1  ;;  %v10337_v20 = vpop.f32.mrb[50].mxu0  ;;  %v9546_v10 = vcombine.high %v14423_v58, %v14427_v56 }
 0x218   : > { %v5062_v33 = vrot.slane %v11817_v48, 5  ;;  %v10400_v19 = vadd.f32 %v10399_v22, %v10398_v3  ;;  %v10401_v40 = vpop.f32.mrb[50].mxu1  ;;  %v10338_v61 = vpop.f32.mrb[51].mxu0  ;;  %v16569_v26 = vld [vmem:[#allocation25_spill] sm:$0xff]  ;;  %v16570_v55 = vld [vmem:[#allocation28_spill] sm:$0xff]  ;;  %v14500_v50 = vsel %vm13168_vm5, %v9452_v32, %v5042_v9  ;;  %v14504_v1 = vsel %vm13168_vm5, %v9454_v52, %v5050_v21 }
 0x219   : > { %v1218_v2 = vadd.f32 %v16569_v26, %v560_v41  ;;  %v14462_v36 = vadd.f32 %v16570_v55, %v561_v53  ;;  %v14467_v16 = vld [vmem:[%s12448_s10 + $0xe0] sm:$0xee]  ;;  %v14473_v24 = vld [vmem:[%s12448_s10 + $0xe8] sm:$0xee]  ;;  %v10339_v31 = vadd.f32 %v10338_v61, %v10337_v20  ;;  %v10402_v14 = vpop.f32.mrb[51].mxu1  ;;  %v9543_v41 = vcombine.low %v14412_v13, %v14419_v27  ;;  %v11712_v53 = vld [vmem:[%s12450_s1 + $0x650] sm:$0xff]  }
 0x21a   : > { %v14470_v48 = vld [vmem:[%s12448_s10 + $0x100] sm:$0xee]  ;;  %v2289_v26 = vadd.f32 %v10400_v19, %v10336_v4  ;;  %v10403_v55 = vadd.f32 %v10402_v14, %v10401_v40  ;;  %v16572_v20 = vrot.slane %v14369_v62, 9  ;;  %v16573_v13 = vrot.slane %v14383_v38, 9  ;;  %v14511_v38 = vld [vmem:[%s12448_s10 + $0x108] sm:$0xee] }
 0x21b   : > { %v16571_v3 = vld [vmem:[#allocation29_spill] sm:$0xff]  ;;  %v14508_v62 = vsel %vm13168_vm5, %v9455_v17, %v5054_v39  ;;  %v14518_v9 = vld [vmem:[%s12448_s10 + $0xf0] sm:$0x11]  ;;  %v16576_v4 = vld [vmem:[#allocation26_spill] sm:$0xff] }
 0x21c   : > { %v14476_v22 = vadd.f32 %v16571_v3, %v562_v63  ;;  %v14490_v63 = vsel %vm13168_vm5, %v16572_v20, %v5038_v8  ;;  %v14496_v27 = vsel %vm13168_vm5, %v16573_v13, %v5046_v42  ;;  %v14514_v18 = vadd.f32 %v2289_v26, %v14403_v60  ;;  %v11819_v42 = vld [vmem:[%s12448_s10 + $0xd8] sm:$0x11]  ;;  %v11706_v39 = vld [vmem:[%s12450_s1 + $0x600] sm:$0xff]   ;;  %v14525_v17 = vld [vmem:[%s12448_s10 + $0x110] sm:$0x11] }
 0x21d   : > { %4803 = vmatmul.mubr.bf16.gmra.mrb[156].mxu0 %v9379_v37  ;;  %4900 = vmatmul.mubr.bf16.gmra.mrb[156].mxu1 %v9381_v44  ;;  %v2292_v8 = vadd.f32 %v10403_v55, %v10339_v31  ;;  %v563_v37 = vld [vmem:[#allocation2 + $0x60] sm:$0xff]  ;;  %v564_v44 = vld [vmem:[#allocation2 + $0x68] sm:$0xff]  ;;  %v5066_v32 = vrot.slane %v11819_v42, 5  ;;  %v10340_v21 = vpop.f32.mrb[52].mxu0  ;;  %v14537_v3 = vld [vmem:[%s12448_s10 + $0xf8] sm:$0x11]  ;;  %v9545_v42 = vcombine.low %v14423_v58, %v14427_v56  ;;  %v9550_v58 = vcombine.high %v14500_v50, %v14504_v1 }
 0x21e   : > { %5565 = vmatprep.mubr.bf16.mxu0 %v9544_v7  ;;  %16574 = vst [vmem:[#allocation27_spill] sm:$0xff] %v14514_v18  ;;  %5662 = vmatprep.mubr.bf16.mxu1 %v9546_v10  ;;  %v10404_v19 = vpop.f32.mrb[52].mxu1  ;;  %v10341_v40 = vpop.f32.mrb[53].mxu0  ;;  %v11707_v61 = vld [vmem:[%s12450_s1 + $0x680] sm:$0xff]   ;;  %v14534_v10 = vsel %vm13168_vm5, %v9457_v5, %v5062_v33  ;;  %v14547_v60 = vadd.f32 %v16576_v4, %v563_v37  ;;  %v16577_v5 = vld [vmem:[#allocation23_spill] sm:$0xff] }
 0x21f   : > { %v14529_v14 = vadd.f32 %v2292_v8, %v1218_v2  ;;  %v14542_v20 = vld [vmem:[%s12448_s10 + $0x160] sm:$0xee]  ;;  %v10342_v13 = vadd.f32 %v10341_v40, %v10340_v21  ;;  %v10405_v2 = vpop.f32.mrb[53].mxu1  ;;  %v10343_v8 = vpop.f32.mrb[54].mxu0  ;;  %v14550_v33 = vadd.f32 %v16577_v5, %v564_v44  ;;  %v11708_v26 = vld [vmem:[%s12450_s1 + $0x648] sm:$0xff]   ;;  %v9548_v40 = vcombine.high %v14490_v63, %v14496_v27 }
 0x220   : > { %v14554_v31 = vld [vmem:[%s12448_s10 + $0x180] sm:$0xee]  ;;  %v10406_v55 = vadd.f32 %v10405_v2, %v10404_v19  ;;  %v10407_v7 = vpop.f32.mrb[54].mxu1  ;;  %v10344_v21 = vpop.f32.mrb[55].mxu0  ;;  %v11709_v37 = vld [vmem:[%s12450_s1 + $0x6c8] sm:$0xff]   ;;  %v16579_v19 = vrot.slane %v14438_v30, 9 }
 0x221   : > { %16575 = vst [vmem:[#allocation24_spill] sm:$0xff] %v14529_v14  ;;  %v10345_v44 = vadd.f32 %v10344_v21, %v10343_v8  ;;  %v10408_v4 = vpop.f32.mrb[55].mxu1  ;;  %v11710_v2 = vld [vmem:[%s12450_s1 + $0x608] sm:$0xff]   ;;  %v14569_v52 = vld [vmem:[%s12448_s10 + $0x118] sm:$0x11]  ;;  %v16578_v21 = vrot.slane %v14457_v12, 5 }
 0x222   : > { %v2297_v49 = vadd.f32 %v10406_v55, %v10342_v13  ;;  %v10409_v56 = vadd.f32 %v10408_v4, %v10407_v7  ;;  %v11711_v8 = vld [vmem:[%s12450_s1 + $0x688] sm:$0xff]   ;;  %v16580_v5 = vrot.slane %v14452_v57, 9  ;;  %v14591_v30 = vld [vmem:[%s12448_s10 + $0x170] sm:$0x11] }
 0x223   : > { %v14579_v14 = vsel %vm13168_vm5, %v16579_v19, %v16578_v21  ;;  %v14595_v55 = vld [vmem:[%s12448_s10 + $0x190] sm:$0x11]  ;;  %v14599_v13 = vld [vmem:[%s12448_s10 + $0x168] sm:$0xee]  ;;  %v11716_v19 = vld [vmem:[%s12450_s1 + $0x658] sm:$0xff]  }
 0x224   : > { %v14585_v18 = vsel %vm13168_vm5, %v16580_v5, %v5066_v32  ;;  %v14602_v32 = vld [vmem:[%s12448_s10 + $0x178] sm:$0x11]  ;;  %v2300_v4 = vadd.f32 %v10409_v56, %v10345_v44  ;;  %v9440_v57 = vld [vmem:[%s12448_s10 + $0x1e8] sm:$0xee] }
 0x225   : > { %5566 = vmatmul.mubr.bf16.vlgmr.msra.gmra.mrb[160].mxu0 %v9543_v41  ;;  %5663 = vmatmul.mubr.bf16.vlgmr.msra.gmra.mrb[160].mxu1 %v9545_v42  ;;  %v11713_v41 = vld [vmem:[%s12450_s1 + $0x6d0] sm:$0xff]   ;;  %v14606_v42 = vadd.f32 %v2297_v49, %v14462_v36  ;;  %v14610_v5 = vld [vmem:[%s12448_s10 + $0x198] sm:$0x11]  ;;  %v9442_v12 = vld [vmem:[%s12448_s10 + $0x208] sm:$0xee]  ;;  %v10346_v7 = vpop.f32.mrb[56].mxu0 }
 0x226   : > { %10935 = vmatpush3.bf16.msra.mxu0 %v11706_v39  ;;  %10999 = vmatpush3.bf16.msra.mxu1 %v11707_v61  ;;  %v14618_v49 = vld [vmem:[%s12448_s10 + $0x188] sm:$0xee]  ;;  %v9472_v36 = vrot.slane %v9440_v57, 9  ;;  %v5122_v61 = vrot.slane %v14107_v15, 5  ;;  %v14622_v56 = vadd.f32 %v2300_v4, %v14476_v22  ;;  %v10410_v44 = vpop.f32.mrb[56].mxu1  ;;  %v10347_v21 = vpop.f32.mrb[57].mxu0  ;;  %v9553_v22 = vcombine.low %v14579_v14, %v14585_v18 }
 0x227   : > { %16581 = vst [vmem:[#allocation25_spill] sm:$0xff] %v14606_v42  ;;  %5573 = vmatprep.mubr.bf16.mxu0 %v9548_v40  ;;  %5670 = vmatprep.mubr.bf16.mxu1 %v9550_v58  ;;  %v9474_v40 = vrot.slane %v9442_v12, 9  ;;  %v11714_v58 = vld [vmem:[%s12450_s1 + $0x610] sm:$0xff]   ;;  %v5130_v39 = vrot.slane %v14118_v6, 5  ;;  %v10348_v57 = vadd.f32 %v10347_v21, %v10346_v7  ;;  %v10411_v42 = vpop.f32.mrb[57].mxu1  ;;  %v10349_v15 = vpop.f32.mrb[58].mxu0 }
 0x228   : > { %10936 = vmatprep.subr.bf16.mxu0 %v11708_v26  ;;  %16582 = vst [vmem:[#allocation28_spill] sm:$0xff] %v14622_v56  ;;  %11000 = vmatprep.subr.bf16.mxu1 %v11709_v37  ;;  %v9554_v26 = vcombine.high %v14579_v14, %v14585_v18  ;;  %v11715_v12 = vld [vmem:[%s12450_s1 + $0x690] sm:$0xff]   ;;  %v16583_v4 = vrot.slane %v14518_v9, 5  ;;  %v16584_v37 = vrot.slane %v14467_v16, 9  ;;  %v14643_v6 = vsel %vm13168_vm5, %v9472_v36, %v5122_v61  ;;  %v10413_v21 = vpop.f32.mrb[58].mxu1  ;;  %v11727_v14 = vld [vmem:[%s12450_s1 + $0x6a8] sm:$0xff]  }
 0x229   : > { %v10412_v7 = vadd.f32 %v10411_v42, %v10410_v44  ;;  %v16585_v9 = vrot.slane %v14525_v17, 5  ;;  %v16586_v16 = vrot.slane %v14470_v48, 9  ;;  %v14656_v36 = vsel %vm13168_vm5, %v9474_v40, %v5130_v39  ;;  %v10414_v61 = vpop.f32.mrb[59].mxu1  ;;  %v11718_v40 = vld [vmem:[%s12450_s1 + $0x618] sm:$0xff]   ;;  %v9446_v17 = vld [vmem:[%s12448_s10 + $0x248] sm:$0xee] }
 0x22a   : > { %10937 = vmatpush3.bf16.msra.mxu0 %v11710_v2  ;;  %v14638_v56 = vsel %vm13168_vm5, %v16584_v37, %v16583_v4  ;;  %v10350_v2 = vpop.f32.mrb[59].mxu0  ;;  %11001 = vmatpush3.bf16.msra.mxu1 %v11711_v8  ;;  %v11717_v37 = vld [vmem:[%s12450_s1 + $0x6d8] sm:$0xff]   ;;  %v10415_v44 = vadd.f32 %v10414_v61, %v10413_v21  ;;  %v16587_v39 = vcombine.low %v14490_v63, %v14496_v27  ;;  %v16590_v63 = vrot.slane %v14537_v3, 5  ;;  %v11720_v61 = vld [vmem:[%s12450_s1 + $0x660] sm:$0xff]  }
 0x22b   : > { %10938 = vmatprep.subr.bf16.mxu0 %v11712_v53  ;;  %v14651_v4 = vsel %vm13168_vm5, %v16586_v16, %v16585_v9  ;;  %v10351_v42 = vadd.f32 %v10350_v2, %v10349_v15  ;;  %11002 = vmatprep.subr.bf16.mxu1 %v11713_v41  ;;  %v9466_v53 = vrot.slane %v14618_v49, 9  ;;  %v2305_v8 = vadd.f32 %v10412_v7, %v10348_v57  ;;  %v14668_v41 = vld [vmem:[%s12448_s10 + $0x1b0] sm:$0x11]  ;;  %v9443_v2 = vld [vmem:[%s12448_s10 + $0x220] sm:$0xee] }
 0x22c   : > { %v5102_v15 = vrot.slane %v14668_v41, 5  ;;  %v5134_v9 = vrot.slane %v14252_v54, 5  ;;  %v16588_v16 = vcombine.low %v14500_v50, %v14504_v1  ;;  %v16589_v57 = vcombine.high %v14508_v62, %v14534_v10  ;;  %v11719_v1 = vld [vmem:[%s12450_s1 + $0x698] sm:$0xff]  }
 0x22d   : > { %5574 = vmatmul.mubr.bf16.gmra.mrb[164].mxu0 %v16587_v39  ;;  %v16591_v27 = vrot.slane %v14473_v24, 9  ;;  %v16592_v54 = vrot.slane %v14569_v52, 5  ;;  %v16593_v21 = vrot.slane %v14511_v38, 9  ;;  %v9445_v39 = vld [vmem:[%s12448_s10 + $0x240] sm:$0xee]  ;;  %v5142_v3 = vrot.slane %v14255_v23, 5 }
 0x22e   : > { %5671 = vmatmul.mubr.bf16.gmra.mrb[164].mxu1 %v16588_v16  ;;  %5581 = vmatprep.mubr.bf16.mxu0 %v16589_v57  ;;  %v9475_v16 = vrot.slane %v9443_v2, 9  ;;  %v9444_v24 = vld [vmem:[%s12448_s10 + $0x228] sm:$0xee]  ;;  %v14701_v57 = vadd.f32 %v2305_v8, %v14547_v60  ;;  %v11721_v52 = vld [vmem:[%s12450_s1 + $0x6e0] sm:$0xff]   ;;  %v9477_v38 = vrot.slane %v9445_v39, 9  ;;  %v5138_v60 = vrot.slane %v14264_v11, 5 }
 0x22f   : > { %v14685_v7 = vsel %vm13168_vm5, %v16591_v27, %v16590_v63  ;;  %v14693_v50 = vsel %vm13168_vm5, %v16593_v21, %v16592_v54  ;;  %v2308_v63 = vadd.f32 %v10415_v44, %v10351_v42  ;;  %v565_v27 = vld [vmem:[#allocation2 + $0x70] sm:$0xff]  ;;  %5678 = vmatprep.mubr.bf16.mxu1 %v9554_v26  ;;  %10939 = vmatpush3.bf16.msra.mxu0 %v11714_v58  ;;  %v9476_v54 = vrot.slane %v9444_v24, 9  ;;  %v10352_v21 = vpop.f32.mrb[60].mxu0  ;;  %v10416_v8 = vpop.f32.mrb[60].mxu1  ;;  %v566_v39 = vld [vmem:[#allocation2 + $0x78] sm:$0xff] }
 0x230   : > { %11003 = vmatpush3.bf16.msra.mxu1 %v11715_v12  ;;  %10940 = vmatprep.subr.bf16.mxu0 %v11716_v19  ;;  %v14707_v23 = vsel %vm13168_vm5, %v9475_v16, %v5134_v9  ;;  %v9478_v42 = vrot.slane %v9446_v17, 9  ;;  %v5146_v26 = vrot.slane %v14269_v28, 5  ;;  %v10353_v44 = vpop.f32.mrb[61].mxu0  ;;  %v9556_v2 = vcombine.high %v14638_v56, %v14651_v4  ;;  %v11722_v12 = vld [vmem:[%s12450_s1 + $0x620] sm:$0xff]   ;;  %v11734_v41 = vld [vmem:[%s12450_s1 + $0x638] sm:$0xff]  }
 0x231   : > { %v14712_v58 = vadd.f32 %v2308_v63, %v14550_v33  ;;  %v9558_v19 = vcombine.high %v14685_v7, %v14693_v50  ;;  %11004 = vmatprep.subr.bf16.mxu1 %v11717_v37  ;;  %v14720_v9 = vld [vmem:[%s12448_s10 + $0x1a0] sm:$0xee]  ;;  %v14724_v11 = vsel %vm13168_vm5, %v9477_v38, %v5142_v3  ;;  %v10354_v28 = vadd.f32 %v10353_v44, %v10352_v21  ;;  %v10417_v33 = vpop.f32.mrb[61].mxu1  ;;  %v10355_v17 = vpop.f32.mrb[62].mxu0 }
 0x232   : > { %v11723_v16 = vld [vmem:[%s12450_s1 + $0x6a0] sm:$0xff]   ;;  %v14731_v37 = vsel %vm13168_vm5, %v9476_v54, %v5138_v60  ;;  %v14735_v63 = vsel %vm13168_vm5, %v9478_v42, %v5146_v26  ;;  %v10418_v48 = vadd.f32 %v10417_v33, %v10416_v8  ;;  %v10419_v3 = vpop.f32.mrb[62].mxu1  ;;  %v10356_v38 = vpop.f32.mrb[63].mxu0  ;;  %v1223_v42 = vadd.f32 %v14128_v59, %v565_v27  ;;  %v11724_v8 = vld [vmem:[%s12450_s1 + $0x668] sm:$0xff]   ;;  %v14752_v54 = vld [vmem:[%s12448_s10 + $0x1d0] sm:$0x11] }
 0x233   : > { %10941 = vmatpush3.bf16.msra.mxu0 %v11718_v40  ;;  %v14738_v21 = vld [vmem:[%s12448_s10 + $0x1c0] sm:$0xee]  ;;  %v10357_v26 = vadd.f32 %v10356_v38, %v10355_v17  ;;  %v10420_v40 = vpop.f32.mrb[63].mxu1  ;;  %v16594_v44 = vcombine.low %v14508_v62, %v14534_v10  ;;  %v5110_v60 = vrot.slane %v14752_v54, 5  ;;  %v14756_v59 = vld [vmem:[%s12448_s10 + $0x1a8] sm:$0xee] }
 0x234   : > { %11005 = vmatpush3.bf16.msra.mxu1 %v11719_v1  ;;  %10942 = vmatprep.subr.bf16.mxu0 %v11720_v61  ;;  %v2313_v33 = vadd.f32 %v10418_v48, %v10354_v28  ;;  %v10421_v24 = vadd.f32 %v10420_v40, %v10419_v3  ;;  %v14759_v27 = vld [vmem:[%s12448_s10 + $0x1c8] sm:$0xee]  ;;  %v14762_v17 = vld [vmem:[%s12448_s10 + $0x1b8] sm:$0x11]  ;;  %v16595_v62 = vrot.slane %v14591_v30, 5  ;;  %v16596_v10 = vrot.slane %v14542_v20, 9 }
 0x235   : > { %5582 = vmatmul.mubr.bf16.gmra.mrb[168].mxu0 %v16594_v44  ;;  %11006 = vmatprep.subr.bf16.mxu1 %v11721_v52  ;;  %v5106_v48 = vrot.slane %v14762_v17, 5  ;;  %v11725_v1 = vld [vmem:[%s12450_s1 + $0x6e8] sm:$0xff]   ;;  %v16597_v28 = vrot.slane %v14595_v55, 5  ;;  %v16598_v3 = vrot.slane %v14554_v31, 9  ;;  %v9467_v18 = vrot.slane %v14720_v9, 9  ;;  %v11728_v55 = vld [vmem:[%s12450_s1 + $0x670] sm:$0xff]  }
 0x236   : > { %v11726_v61 = vld [vmem:[%s12450_s1 + $0x628] sm:$0xff]   ;;  %5679 = vmatmul.mubr.bf16.gmra.mrb[168].mxu1 %v9553_v22  ;;  %5589 = vmatprep.mubr.bf16.mxu0 %v9556_v2  ;;  %v14776_v52 = vsel %vm13168_vm5, %v16596_v10, %v16595_v62  ;;  %v14788_v22 = vadd.f32 %v2313_v33, %v1223_v42  ;;  %v1224_v20 = vadd.f32 %v14144_v47, %v566_v39  ;;  %v9469_v2 = vrot.slane %v14738_v21, 9  ;;  %v10438_v44 = vpop.f32.mrb[64].mxu0  ;;  %v14824_v33 = vld [vmem:[%s12448_s10 + $0x1e0] sm:$0xee]  ;;  %v11731_v10 = vld [vmem:[%s12450_s1 + $0x6b0] sm:$0xff]  }
 0x237   : > { %v14784_v38 = vsel %vm13168_vm5, %v16598_v3, %v16597_v28  ;;  %v2316_v30 = vadd.f32 %v10421_v24, %v10357_v26  ;;  %5686 = vmatprep.mubr.bf16.mxu1 %v9558_v19  ;;  %10943 = vmatpush3.bf16.msra.mxu0 %v11722_v12  ;;  %v16599_v31 = vrot.slane %v14602_v32, 5  ;;  %v16600_v40 = vrot.slane %v14599_v13, 9  ;;  %v11729_v19 = vld [vmem:[%s12450_s1 + $0x6f0] sm:$0xff]   ;;  %v10502_v32 = vpop.f32.mrb[64].mxu1  ;;  %v10439_v13 = vpop.f32.mrb[65].mxu0 }
 0x238   : > { %v16601_v9 = vrot.slane %v14610_v5, 5  ;;  %11007 = vmatpush3.bf16.msra.mxu1 %v11723_v16  ;;  %10944 = vmatprep.subr.bf16.mxu0 %v11724_v8  ;;  %v9555_v39 = vcombine.low %v14638_v56, %v14651_v4  ;;  %v9557_v5 = vcombine.low %v14685_v7, %v14693_v50  ;;  %v9560_v49 = vcombine.high %v14776_v52, %v14784_v38  ;;  %v10503_v16 = vpop.f32.mrb[65].mxu1  ;;  %v10441_v24 = vpop.f32.mrb[66].mxu0  ;;  %v11831_v26 = vld [vmem:[%s12448_s10 + $0x1d8] sm:$0x11] }
 0x239   : > { %v14799_v62 = vsel %vm13168_vm5, %v16600_v40, %v16599_v31  ;;  %v14810_v12 = vadd.f32 %v2316_v30, %v1224_v20  ;;  %11008 = vmatprep.subr.bf16.mxu1 %v11725_v1  ;;  %v9468_v21 = vrot.slane %v14756_v59, 9  ;;  %v9470_v42 = vrot.slane %v14759_v27, 9  ;;  %v10505_v8 = vpop.f32.mrb[66].mxu1  ;;  %v10442_v7 = vpop.f32.mrb[67].mxu0  ;;  %v11730_v1 = vld [vmem:[%s12450_s1 + $0x630] sm:$0xff]   ;;  %v11732_v59 = vld [vmem:[%s12450_s1 + $0x678] sm:$0xff]  }
 0x23a   : > { %v14807_v47 = vsel %vm13168_vm5, %v9466_v53, %v16601_v9  ;;  %v10440_v53 = vadd.f32 %v10439_v13, %v10438_v44  ;;  %v5114_v56 = vrot.slane %v11831_v26, 5  ;;  %v10504_v4 = vadd.f32 %v10503_v16, %v10502_v32  ;;  %v10506_v3 = vpop.f32.mrb[67].mxu1  ;;  %v11733_v30 = vld [vmem:[%s12450_s1 + $0x6f8] sm:$0xff]   ;;  %v9441_v31 = vld [vmem:[%s12448_s10 + $0x200] sm:$0xee] }
 0x23b   : > { %v9562_v50 = vcombine.high %v14799_v62, %v14807_v47  ;;  %10945 = vmatpush3.bf16.msra.mxu0 %v11726_v61  ;;  %v10443_v28 = vadd.f32 %v10442_v7, %v10441_v24  ;;  %v10507_v20 = vadd.f32 %v10506_v3, %v10505_v8  ;;  %v14834_v61 = vsel %vm13168_vm5, %v9467_v18, %v5102_v15  ;;  %v11832_v54 = vld [vmem:[%s12448_s10 + $0x1f0] sm:$0x11] }
 0x23c   : > { %11009 = vmatpush3.bf16.msra.mxu1 %v11727_v14  ;;  %10946 = vmatprep.subr.bf16.mxu0 %v11728_v55  ;;  %v3079_v27 = vadd.f32 %v10504_v4, %v10440_v53  ;;  %v14843_v44 = vsel %vm13168_vm5, %v9469_v2, %v5110_v60  ;;  %v5115_v15 = vsel %vm13168_vm5, %v9470_v42, %v5114_v56  ;;  %v9471_v18 = vrot.slane %v14824_v33, 9  ;;  %v11735_v60 = vld [vmem:[%s12450_s1 + $0x6b8] sm:$0xff]   ;;  %v11736_v2 = vld [vmem:[%s12450_s1 + $0x740] sm:$0xff]  }
 0x23d   : > { %5590 = vmatmul.mubr.bf16.gmra.mrb[172].mxu0 %v9555_v39  ;;  %11010 = vmatprep.subr.bf16.mxu1 %v11729_v19  ;;  %v3082_v55 = vadd.f32 %v10507_v20, %v10443_v28  ;;  %v10444_v40 = vpop.f32.mrb[68].mxu0  ;;  %v5118_v9 = vrot.slane %v11832_v54, 5  ;;  %v11737_v19 = vld [vmem:[%s12450_s1 + $0x7c0] sm:$0xff]   ;;  %v9561_v39 = vcombine.low %v14799_v62, %v14807_v47  ;;  %v9564_v16 = vcombine.high %v14834_v61, %v14843_v44 }
 0x23e   : > { %5687 = vmatmul.mubr.bf16.gmra.mrb[172].mxu1 %v9557_v5  ;;  %5597 = vmatprep.mubr.bf16.mxu0 %v9560_v49  ;;  %v14837_v14 = vadd.f32 %v3079_v27, %v14306_v46  ;;  %v14851_v46 = vsel %vm13168_vm5, %v9468_v21, %v5106_v48  ;;  %v10508_v17 = vpop.f32.mrb[68].mxu1  ;;  %v10445_v13 = vpop.f32.mrb[69].mxu0  ;;  %v9559_v48 = vcombine.low %v14776_v52, %v14784_v38  ;;  %v9473_v24 = vrot.slane %v9441_v31, 9  ;;  %v11833_v21 = vld [vmem:[%s12448_s10 + $0x210] sm:$0x11] }
 0x23f   : > { %5694 = vmatprep.mubr.bf16.mxu1 %v9562_v50  ;;  %10947 = vmatpush3.bf16.msra.mxu0 %v11730_v1  ;;  %v14861_v32 = vadd.f32 %v3082_v55, %v14311_v34  ;;  %v10446_v5 = vadd.f32 %v10445_v13, %v10444_v40  ;;  %v10509_v49 = vpop.f32.mrb[69].mxu1  ;;  %v10447_v53 = vpop.f32.mrb[70].mxu0  ;;  %v5126_v42 = vrot.slane %v11833_v21, 5  ;;  %v9566_v4 = vcombine.high %v14851_v46, %v5115_v15 }
 0x240   : > { %11011 = vmatpush3.bf16.msra.mxu1 %v11731_v10  ;;  %10948 = vmatprep.subr.bf16.mxu0 %v11732_v59  ;;  %v10510_v34 = vadd.f32 %v10509_v49, %v10508_v17  ;;  %v10511_v26 = vpop.f32.mrb[70].mxu1  ;;  %v10448_v56 = vpop.f32.mrb[71].mxu0  ;;  %v5119_v50 = vsel %vm13168_vm5, %v9471_v18, %v5118_v9  ;;  %v9563_v59 = vcombine.low %v14834_v61, %v14843_v44  ;;  %v14885_v9 = vld [vmem:[%s12448_s10 + $0x40] sm:$0xff] }
 0x241   : > { %11012 = vmatprep.subr.bf16.mxu1 %v11733_v30  ;;  %v10449_v52 = vadd.f32 %v10448_v56, %v10447_v53  ;;  %v10512_v38 = vpop.f32.mrb[71].mxu1  ;;  %v5127_v33 = vsel %vm13168_vm5, %v9473_v24, %v5126_v42  ;;  %v9565_v30 = vcombine.low %v14851_v46, %v5115_v15  ;;  %v14889_v61 = vld [vmem:[%s12448_s10 + $0x60] sm:$0xff]  ;;  %v16602_v15 = vcombine.high %v14643_v6, %v14656_v36 }
 0x242   : > { %v3087_v62 = vadd.f32 %v10510_v34, %v10446_v5  ;;  %v10513_v47 = vadd.f32 %v10512_v38, %v10511_v26  ;;  %v9568_v55 = vcombine.high %v5119_v50, %v5127_v33  ;;  %v6496_v17 = vshrl.u32 %v14889_v61, 16 }
 0x243   : > { %10949 = vmatpush3.bf16.msra.mxu0 %v11734_v41  ;;  %v9567_v53 = vcombine.low %v5119_v50, %v5127_v33  ;;  %v16605_v50 = vcombine.high %v14707_v23, %v14724_v11 }
 0x244   : > { %11013 = vmatpush3.bf16.msra.mxu1 %v11735_v60  ;;  %11062 = vmatprep.subr.bf16.mxu0 %v11736_v2  ;;  %v14872_v8 = vadd.f32 %v3087_v62, %v14357_v51  ;;  %v3090_v7 = vadd.f32 %v10513_v47, %v10449_v52  ;;  %v6468_v2 = vshrl.u32 %v14885_v9, 16 }
 0x245   : > { %5598 = vmatmul.mubr.bf16.gmra.mrb[176].mxu0 %v9559_v48  ;;  %11126 = vmatprep.subr.bf16.mxu1 %v11737_v19  ;;  %v10450_v1 = vpop.f32.mrb[72].mxu0  ;;  %v6471_v19 = vshll.u32 %v14885_v9, 16  ;;  %v6499_v48 = vshll.u32 %v14889_v61, 16 }
 0x246   : > { %5695 = vmatmul.mubr.bf16.gmra.mrb[176].mxu1 %v9561_v39  ;;  %5605 = vmatprep.mubr.bf16.mxu0 %v9564_v16  ;;  %v14879_v10 = vadd.f32 %v3090_v7, %v14373_v29  ;;  %v10514_v28 = vpop.f32.mrb[72].mxu1  ;;  %v10451_v3 = vpop.f32.mrb[73].mxu0  ;;  %v16604_v7 = vcombine.low %v14643_v6, %v14656_v36 }
 0x247   : > { %5702 = vmatprep.mubr.bf16.mxu1 %v9566_v4  ;;  %v10452_v51 = vadd.f32 %v10451_v3, %v10450_v1  ;;  %v10515_v27 = vpop.f32.mrb[73].mxu1  ;;  %v10453_v20 = vpop.f32.mrb[74].mxu0  ;;  %v6473_v56 = vrot.slane %v6471_v19, 5  ;;  %v6498_v4 = vrot.slane %v6496_v17, 4  ;;  %v6501_v62 = vrot.slane %v6499_v48, 5  ;;  %v14916_v3 = vld [vmem:[%s12448_s10 + $0x48] sm:$0xff] }
 0x248   : > { %v10516_v31 = vadd.f32 %v10515_v27, %v10514_v28  ;;  %v10517_v41 = vpop.f32.mrb[74].mxu1  ;;  %v10454_v40 = vpop.f32.mrb[75].mxu0  ;;  %v16607_v28 = vcombine.high %v14731_v37, %v14735_v63  ;;  %v14941_v19 = vld [vmem:[%s12448_s10 + $0xa8] sm:$0xff]  ;;  %v14944_v17 = vld [vmem:[%s12448_s10 + $0xc0] sm:$0xff] }
 0x249   : > { %v10455_v18 = vadd.f32 %v10454_v40, %v10453_v20  ;;  %v10518_v54 = vpop.f32.mrb[75].mxu1 }
 0x24a   : > { %v3095_v29 = vadd.f32 %v10516_v31, %v10452_v51  ;;  %v10519_v60 = vadd.f32 %v10518_v54, %v10517_v41  ;;  %v14919_v51 = vld [vmem:[%s12448_s10 + $0x68] sm:$0xff]  ;;  %v6482_v31 = vshrl.u32 %v14916_v3, 16 }
 0x24c   : > { %v14892_v44 = vadd.f32 %v3095_v29, %v14352_v43  ;;  %v3098_v46 = vadd.f32 %v10519_v60, %v10455_v18  ;;  %v6470_v43 = vrot.slane %v6468_v2, 4  ;;  %v15053_v2 = vld [vmem:[%s12448_s10 + $0x1e8] sm:$0xff] }
 0x24d   : > { %5606 = vmatmul.mubr.bf16.gmra.mrb[180].mxu0 %v9563_v59  ;;  %v10456_v13 = vpop.f32.mrb[76].mxu0 }
 0x24e   : > { %5703 = vmatmul.mubr.bf16.gmra.mrb[180].mxu1 %v9565_v30  ;;  %5613 = vmatprep.mubr.bf16.mxu0 %v9568_v55  ;;  %v14901_v39 = vadd.f32 %v3098_v46, %v14376_v25  ;;  %v10520_v5 = vpop.f32.mrb[76].mxu1  ;;  %v10457_v49 = vpop.f32.mrb[77].mxu0  ;;  %v6474_v27 = vor.u32 %v6473_v56, %v6470_v43  ;;  %v14928_v30 = vld [vmem:[%s12448_s10 + $0xa0] sm:$0xff]  ;;  %v6502_v55 = vor.u32 %v6501_v62, %v6498_v4  ;;  %v14955_v43 = vld [vmem:[%s12448_s10 + $0xe8] sm:$0xff] }
 0x24f   : > { %5710 = vmatprep.mubr.bf16.mxu1 %v16602_v15  ;;  %v10458_v16 = vadd.f32 %v10457_v49, %v10456_v13  ;;  %v10521_v24 = vpop.f32.mrb[77].mxu1  ;;  %v10459_v21 = vpop.f32.mrb[78].mxu0  ;;  %v9706_v46 = vcombine.high %v14916_v3, %v14919_v51  ;;  %v14938_v15 = vld [vmem:[%s12448_s10 + $0x88] sm:$0xff]  ;;  %v14949_v49 = vld [vmem:[%s12448_s10 + $0xe0] sm:$0xff] }
 0x250   : > { %16603 = vst [vmem:[#allocation29_spill] sm:$0xff] %v14901_v39  ;;  %v10522_v42 = vadd.f32 %v10521_v24, %v10520_v5  ;;  %v10523_v34 = vpop.f32.mrb[78].mxu1  ;;  %v10460_v26 = vpop.f32.mrb[79].mxu0  ;;  %v6485_v24 = vshll.u32 %v14916_v3, 16  ;;  %v14967_v56 = vld [vmem:[%s12448_s10 + $0x120] sm:$0xff]  ;;  %v14969_v4 = vrot.slane %v6502_v55, 4  ;;  %v16628_v39 = vcombine.high %v14944_v17, %v14949_v49 }
 0x251   : > { %v10461_v52 = vadd.f32 %v10460_v26, %v10459_v21  ;;  %v10524_v38 = vpop.f32.mrb[79].mxu1  ;;  %v14964_v26 = vld [vmem:[%s12448_s10 + $0x100] sm:$0xff]  ;;  %v11742_v62 = vld [vmem:[%s12450_s1 + $0x708] sm:$0xff]   ;;  %v11744_v55 = vld [vmem:[%s12450_s1 + $0x750] sm:$0xff]  }
 0x252   : > { %v3103_v25 = vadd.f32 %v10522_v42, %v10458_v16  ;;  %v10525_v47 = vadd.f32 %v10524_v38, %v10523_v34  ;;  %v14957_v16 = vrot.slane %v6474_v27, 4  ;;  %v16609_v34 = vcombine.low %v14707_v23, %v14724_v11  ;;  %v14981_v11 = vld [vmem:[%s12448_s10 + $0x108] sm:$0xff]  ;;  %v11738_v27 = vld [vmem:[%s12450_s1 + $0x700] sm:$0xff]  }
 0x253   : > { %v16610_v38 = vcombine.low %v14731_v37, %v14735_v63  ;;  %v15041_v23 = vld [vmem:[%s12448_s10 + $0x1c8] sm:$0xff] }
 0x254   : > { %v14910_v33 = vadd.f32 %v3103_v25, %v14433_v35  ;;  %v3106_v1 = vadd.f32 %v10525_v47, %v10461_v52  ;;  %v14925_v35 = vld [vmem:[%s12448_s10 + $0x80] sm:$0xff]  ;;  %v14971_v52 = vrot.slane %v6482_v31, 4  ;;  %v14984_v25 = vld [vmem:[%s12448_s10 + $0x128] sm:$0xff]  ;;  %v6510_v47 = vshrl.u32 %v14919_v51, 16 }
 0x255   : > { %5614 = vmatmul.mubr.bf16.gmra.mrb[184].mxu0 %v9567_v53  ;;  %v10462_v59 = vpop.f32.mrb[80].mxu0  ;;  %v14952_v53 = vld [vmem:[%s12448_s10 + $0xc8] sm:$0xff]  ;;  %v6524_v63 = vshrl.u32 %v14925_v35, 16  ;;  %v15000_v31 = vrot.slane %v6485_v24, 5 }
 0x256   : > { %5711 = vmatmul.mubr.bf16.gmra.mrb[184].mxu1 %v16604_v7  ;;  %5621 = vmatprep.mubr.bf16.mxu0 %v16605_v50  ;;  %16606 = vst [vmem:[#allocation26_spill] sm:$0xff] %v14910_v33  ;;  %v14922_v6 = vadd.f32 %v3106_v1, %v14445_v45  ;;  %v10526_v36 = vpop.f32.mrb[80].mxu1  ;;  %v10463_v20 = vpop.f32.mrb[81].mxu0  ;;  %v9704_v45 = vcombine.high %v14885_v9, %v14889_v61  ;;  %v6513_v7 = vshll.u32 %v14919_v51, 16  ;;  %v16611_v50 = vld [vmem:[#allocation27_spill] sm:$0xff] }
 0x257   : > { %5718 = vmatprep.mubr.bf16.mxu1 %v16607_v28  ;;  %v10464_v41 = vadd.f32 %v10463_v20, %v10462_v59  ;;  %v10527_v40 = vpop.f32.mrb[81].mxu1  ;;  %v10465_v18 = vpop.f32.mrb[82].mxu0  ;;  %v6527_v28 = vshll.u32 %v14925_v35, 16  ;;  %v15035_v20 = vld [vmem:[%s12448_s10 + $0x1c0] sm:$0xff]  ;;  %v16616_v33 = vcombine.low %v14916_v3, %v14919_v51  ;;  %v16619_v51 = vcombine.high %v14925_v35, %v14928_v30 }
 0x258   : > { %16608 = vst [vmem:[#allocation23_spill] sm:$0xff] %v14922_v6  ;;  %v10528_v54 = vadd.f32 %v10527_v40, %v10526_v36  ;;  %v10529_v29 = vpop.f32.mrb[82].mxu1  ;;  %v10466_v60 = vpop.f32.mrb[83].mxu0  ;;  %v9710_v36 = vcombine.high %v14938_v15, %v14941_v19  ;;  %v15070_v6 = vld [vmem:[%s12448_s10 + $0x70] sm:$0x11] }
 0x259   : > { %v10467_v13 = vadd.f32 %v10466_v60, %v10465_v18  ;;  %v10530_v48 = vpop.f32.mrb[83].mxu1 }
 0x25a   : > { %v3111_v21 = vadd.f32 %v10528_v54, %v10464_v41  ;;  %v10531_v42 = vadd.f32 %v10530_v48, %v10529_v29  ;;  %v16613_v41 = vld [vmem:[#allocation24_spill] sm:$0xff]  ;;  %v11739_v54 = vld [vmem:[%s12450_s1 + $0x780] sm:$0xff]   ;;  %v11741_v29 = vld [vmem:[%s12450_s1 + $0x7c8] sm:$0xff]  }
 0x25b   : > { %v15016_v48 = vld [vmem:[%s12448_s10 + $0x1a0] sm:$0xff] }
 0x25c   : > { %v14989_v1 = vadd.f32 %v3111_v21, %v16611_v50  ;;  %v3114_v37 = vadd.f32 %v10531_v42, %v10467_v13  ;;  %v15013_v13 = vld [vmem:[%s12448_s10 + $0x180] sm:$0xff]  ;;  %v15022_v50 = vld [vmem:[%s12448_s10 + $0x188] sm:$0xff] }
 0x25d   : > { %5622 = vmatmul.mubr.bf16.gmra.mrb[188].mxu0 %v16609_v34  ;;  %v10468_v59 = vpop.f32.mrb[84].mxu0  ;;  %v11740_v34 = vld [vmem:[%s12450_s1 + $0x748] sm:$0xff]  }
 0x25e   : > { %5719 = vmatmul.mubr.bf16.gmra.mrb[188].mxu1 %v16610_v38  ;;  %6225 = vmatprep.mubr.bf16.mxu0 %v9704_v45  ;;  %16612 = vst [vmem:[#allocation27_spill] sm:$0xff] %v14989_v1  ;;  %v15003_v40 = vadd.f32 %v3114_v37, %v16613_v41  ;;  %v10532_v18 = vpop.f32.mrb[84].mxu1  ;;  %v10469_v45 = vpop.f32.mrb[85].mxu0  ;;  %v15025_v37 = vld [vmem:[%s12448_s10 + $0x1a8] sm:$0xff]  ;;  %v15027_v41 = vrot.slane %v6510_v47, 4  ;;  %v15038_v38 = vld [vmem:[%s12448_s10 + $0x1e0] sm:$0xff] }
 0x25f   : > { %6322 = vmatprep.mubr.bf16.mxu1 %v9706_v46  ;;  %v10470_v24 = vadd.f32 %v10469_v45, %v10468_v59  ;;  %v10533_v21 = vpop.f32.mrb[85].mxu1  ;;  %v10471_v42 = vpop.f32.mrb[86].mxu0  ;;  %v15029_v46 = vrot.slane %v6513_v7, 5  ;;  %v15043_v47 = vrot.slane %v6524_v63, 4  ;;  %v15045_v7 = vrot.slane %v6527_v28, 5 }
 0x260   : > { %16614 = vst [vmem:[#allocation24_spill] sm:$0xff] %v15003_v40  ;;  %v10534_v60 = vadd.f32 %v10533_v21, %v10532_v18  ;;  %v10535_v59 = vpop.f32.mrb[86].mxu1  ;;  %v10472_v45 = vpop.f32.mrb[87].mxu0  ;;  %v6488_v63 = vor.u32 %v15000_v31, %v14971_v52  ;;  %v11743_v40 = vld [vmem:[%s12450_s1 + $0x788] sm:$0xff]   ;;  %v11745_v52 = vld [vmem:[%s12450_s1 + $0x7d0] sm:$0xff]  }
 0x261   : > { %v10473_v18 = vadd.f32 %v10472_v45, %v10471_v42  ;;  %v10536_v21 = vpop.f32.mrb[87].mxu1  ;;  %v16615_v45 = vcombine.low %v14885_v9, %v14889_v61  ;;  %v15081_v31 = vld [vmem:[%s12448_s10 + $0x58] sm:$0x11] }
 0x262   : > { %v3119_v28 = vadd.f32 %v10534_v60, %v10470_v24  ;;  %v10537_v42 = vadd.f32 %v10536_v21, %v10535_v59  ;;  %v15084_v60 = vld [vmem:[%s12448_s10 + $0x78] sm:$0x11]  ;;  %v6516_v24 = vor.u32 %v15029_v46, %v15027_v41  ;;  %v6477_v41 = vshll.u32 %v15056_v0, 16 }
 0x263   : > { %v16617_v59 = vld [vmem:[#allocation25_spill] sm:$0xff]  ;;  %v6491_v1 = vshll.u32 %v15081_v31, 16  ;;  %v6519_v9 = vshll.u32 %v15084_v60, 16 }
 0x264   : > { %v15089_v3 = vadd.f32 %v3119_v28, %v16617_v59  ;;  %v15106_v28 = vld [vmem:[%s12448_s10 + $0x220] sm:$0xff]  ;;  %v15127_v59 = vrot.slane %v6516_v24, 4 }
 0x265   : > { %6226 = vmatmul.mubr.bf16.vlgmr.msra.gmra.mrb[192].mxu0 %v16615_v45  ;;  %v10474_v21 = vpop.f32.mrb[88].mxu0  ;;  %v11746_v45 = vld [vmem:[%s12450_s1 + $0x710] sm:$0xff]   ;;  %v15136_v31 = vld [vmem:[%s12448_s10 + $0x240] sm:$0xff] }
 0x266   : > { %6323 = vmatmul.mubr.bf16.vlgmr.msra.gmra.mrb[192].mxu1 %v16616_v33  ;;  %11063 = vmatpush3.bf16.msra.mxu0 %v11738_v27  ;;  %16618 = vst [vmem:[#allocation25_spill] sm:$0xff] %v15089_v3  ;;  %v3122_v33 = vadd.f32 %v10537_v42, %v10473_v18  ;;  %v6530_v27 = vor.u32 %v15045_v7, %v15043_v47  ;;  %v15103_v18 = vld [vmem:[%s12448_s10 + $0x200] sm:$0xff]  ;;  %v15108_v47 = vrot.slane %v6488_v63, 4  ;;  %v16620_v7 = vld [vmem:[#allocation28_spill] sm:$0xff]  ;;  %v10475_v42 = vpop.f32.mrb[89].mxu0  ;;  %v6505_v63 = vshll.u32 %v15070_v6, 16 }
 0x267   : > { %11127 = vmatpush3.bf16.msra.mxu1 %v11739_v54  ;;  %6233 = vmatprep.mubr.bf16.mxu0 %v16619_v51  ;;  %v15117_v51 = vld [vmem:[%s12448_s10 + $0x208] sm:$0xff]  ;;  %v10476_v46 = vadd.f32 %v10475_v42, %v10474_v21  ;;  %v11749_v6 = vld [vmem:[%s12450_s1 + $0x7d8] sm:$0xff]   ;;  %v15139_v24 = vld [vmem:[%s12448_s10 + $0x260] sm:$0xff]  ;;  %v6552_v21 = vshrl.u32 %v14928_v30, 16 }
 0x268   : > { %6330 = vmatprep.mubr.bf16.mxu1 %v9710_v36  ;;  %11064 = vmatprep.subr.bf16.mxu0 %v11740_v34  ;;  %v15111_v36 = vadd.f32 %v3122_v33, %v16620_v7  ;;  %v10538_v34 = vpop.f32.mrb[88].mxu1  ;;  %16622 = vst [vmem:[#allocation31_spill] sm:$0xff] %v15117_v51  ;;  %v15120_v54 = vld [vmem:[%s12448_s10 + $0x228] sm:$0xff]  ;;  %v10477_v33 = vpop.f32.mrb[90].mxu0  ;;  %v11748_v7 = vld [vmem:[%s12450_s1 + $0x758] sm:$0xff]   ;;  %v15141_v60 = vrot.slane %v6530_v27, 4 }
 0x269   : > { %11128 = vmatprep.subr.bf16.mxu1 %v11741_v29  ;;  %16623 = vst [vmem:[#allocation32_spill] sm:$0xff] %v15120_v54  ;;  %v10539_v61 = vpop.f32.mrb[89].mxu1  ;;  %v11747_v29 = vld [vmem:[%s12450_s1 + $0x790] sm:$0xff]   ;;  %v15148_v42 = vld [vmem:[%s12448_s10 + $0x248] sm:$0xff]  ;;  %v11751_v54 = vld [vmem:[%s12450_s1 + $0x798] sm:$0xff]  }
 0x26a   : > { %16621 = vst [vmem:[#allocation28_spill] sm:$0xff] %v15111_v36  ;;  %11065 = vmatpush3.bf16.msra.mxu0 %v11742_v62  ;;  %v10540_v5 = vadd.f32 %v10539_v61, %v10538_v34  ;;  %v10541_v0 = vpop.f32.mrb[90].mxu1  ;;  %v10478_v36 = vpop.f32.mrb[91].mxu0  ;;  %16624 = vst [vmem:[#allocation33_spill] sm:$0xff] %v15148_v42  ;;  %v15151_v62 = vld [vmem:[%s12448_s10 + $0x268] sm:$0xff]  ;;  %v11764_v42 = vld [vmem:[%s12450_s1 + $0x778] sm:$0xff]  }
 0x26b   : > { %11129 = vmatpush3.bf16.msra.mxu1 %v11743_v40  ;;  %11066 = vmatprep.subr.bf16.mxu0 %v11744_v55  ;;  %v10479_v61 = vadd.f32 %v10478_v36, %v10477_v33  ;;  %v10542_v34 = vpop.f32.mrb[91].mxu1  ;;  %16625 = vst [vmem:[#allocation34_spill] sm:$0xff] %v15151_v62  ;;  %v16626_v36 = vcombine.low %v14925_v35, %v14928_v30  ;;  %v6479_v33 = vrot.slane %v6477_v41, 5  ;;  %v6507_v55 = vrot.slane %v6505_v63, 5  ;;  %v15179_v51 = vld [vmem:[%s12448_s10 + $0x90] sm:$0x11] }
 0x26c   : > { %11130 = vmatprep.subr.bf16.mxu1 %v11745_v52  ;;  %v3127_v3 = vadd.f32 %v10540_v5, %v10476_v46  ;;  %v10543_v27 = vadd.f32 %v10542_v34, %v10541_v0  ;;  %v11750_v52 = vld [vmem:[%s12450_s1 + $0x718] sm:$0xff]   ;;  %v16627_v40 = vcombine.low %v14938_v15, %v14941_v19  ;;  %v11752_v5 = vld [vmem:[%s12450_s1 + $0x760] sm:$0xff]   ;;  %v6493_v35 = vrot.slane %v6491_v1, 5 }
 0x26d   : > { %6234 = vmatmul.mubr.bf16.gmra.mrb[196].mxu0 %v16626_v36  ;;  %v6521_v0 = vrot.slane %v6519_v9, 5  ;;  %v6555_v34 = vshll.u32 %v14928_v30, 16  ;;  %v11753_v36 = vld [vmem:[%s12450_s1 + $0x7e0] sm:$0xff]   ;;  %v10480_v1 = vpop.f32.mrb[92].mxu0  ;;  %v15183_v30 = vrot.slane %v6552_v21, 4  ;;  %v6538_v9 = vshrl.u32 %v14938_v15, 16 }
 0x26e   : > { %6331 = vmatmul.mubr.bf16.gmra.mrb[196].mxu1 %v16627_v40  ;;  %6241 = vmatprep.mubr.bf16.mxu0 %v16628_v39  ;;  %v15170_v41 = vadd.f32 %v3127_v3, %v14701_v57  ;;  %v3130_v63 = vadd.f32 %v10543_v27, %v10479_v61  ;;  %v16630_v40 = vcombine.high %v14952_v53, %v14955_v43  ;;  %v6541_v3 = vshll.u32 %v14938_v15, 16  ;;  %v10544_v61 = vpop.f32.mrb[92].mxu1  ;;  %v10481_v27 = vpop.f32.mrb[93].mxu0 }
 0x26f   : > { %11067 = vmatpush3.bf16.msra.mxu0 %v11746_v45  ;;  %11131 = vmatpush3.bf16.msra.mxu1 %v11747_v29  ;;  %v15195_v21 = vsel %vm12750_vm2, %v14957_v16, %v6479_v33  ;;  %v15200_v15 = vsel %vm12750_vm2, %v14969_v4, %v6507_v55  ;;  %v10483_v39 = vpop.f32.mrb[94].mxu0  ;;  %v6566_v29 = vshrl.u32 %v14941_v19, 16  ;;  %v6569_v57 = vshll.u32 %v14941_v19, 16  ;;  %v11755_v4 = vld [vmem:[%s12450_s1 + $0x7a0] sm:$0xff]  }
 0x270   : > { %16629 = vst [vmem:[#allocation35_spill] sm:$0xff] %v15170_v41  ;;  %6338 = vmatprep.mubr.bf16.mxu1 %v16630_v40  ;;  %11068 = vmatprep.subr.bf16.mxu0 %v11748_v7  ;;  %v15188_v45 = vadd.f32 %v3130_v63, %v14712_v58  ;;  %16633 = vst [vmem:[#allocation22_spill] sm:$0xff] %v15195_v21  ;;  %v15203_v58 = vld [vmem:[%s12448_s10 + $0xb0] sm:$0x11]  ;;  %v10482_v63 = vadd.f32 %v10481_v27, %v10480_v1  ;;  %v10545_v40 = vpop.f32.mrb[93].mxu1  ;;  %v10484_v46 = vpop.f32.mrb[95].mxu0 }
 0x271   : > { %11132 = vmatprep.subr.bf16.mxu1 %v11749_v6  ;;  %16634 = vst [vmem:[#allocation37_spill] sm:$0xff] %v15200_v15  ;;  %v15205_v6 = vrot.slane %v6555_v34, 5  ;;  %v10546_v16 = vadd.f32 %v10545_v40, %v10544_v61  ;;  %v10547_v33 = vpop.f32.mrb[94].mxu1  ;;  %v15214_v55 = vsel %vm12750_vm2, %v15108_v47, %v6493_v35  ;;  %v15219_v34 = vsel %vm12750_vm2, %v15127_v59, %v6521_v0  ;;  %v11757_v27 = vld [vmem:[%s12450_s1 + $0x7e8] sm:$0xff]  }
 0x272   : > { %16631 = vst [vmem:[#allocation36_spill] sm:$0xff] %v15188_v45  ;;  %v11754_v45 = vld [vmem:[%s12450_s1 + $0x720] sm:$0xff]   ;;  %v6533_v19 = vshll.u32 %v15179_v51, 16  ;;  %v10485_v1 = vadd.f32 %v10484_v46, %v10483_v39  ;;  %v10548_v61 = vpop.f32.mrb[95].mxu1  ;;  %v15225_v35 = vrot.slane %v6538_v9, 4  ;;  %v15227_v40 = vrot.slane %v6541_v3, 5 }
 0x273   : > { %11069 = vmatpush3.bf16.msra.mxu0 %v11750_v52  ;;  %11133 = vmatpush3.bf16.msra.mxu1 %v11751_v54  ;;  %v11756_v52 = vld [vmem:[%s12450_s1 + $0x768] sm:$0xff]   ;;  %v3135_v59 = vadd.f32 %v10546_v16, %v10482_v63  ;;  %v10549_v0 = vadd.f32 %v10548_v61, %v10547_v33  ;;  %v16635_v51 = vcombine.low %v14944_v17, %v14949_v49  ;;  %v6580_v46 = vshrl.u32 %v14944_v17, 16  ;;  %v11760_v16 = vld [vmem:[%s12450_s1 + $0x770] sm:$0xff]   ;;  %v15251_v61 = vld [vmem:[%s12448_s10 + $0xb8] sm:$0x11] }
 0x274   : > { %11070 = vmatprep.subr.bf16.mxu0 %v11752_v5  ;;  %11134 = vmatprep.subr.bf16.mxu1 %v11753_v36  ;;  %v11758_v54 = vld [vmem:[%s12450_s1 + $0x728] sm:$0xff]   ;;  %v15234_v5 = vld [vmem:[%s12448_s10 + $0x98] sm:$0x11]  ;;  %v6583_v39 = vshll.u32 %v14944_v17, 16  ;;  %v16636_v9 = vcombine.low %v14952_v53, %v14955_v43  ;;  %v16637_v3 = vcombine.high %v14964_v26, %v14967_v56  ;;  %v6558_v33 = vor.u32 %v15205_v6, %v15183_v30  ;;  %v11761_v36 = vld [vmem:[%s12450_s1 + $0x7f0] sm:$0xff]  }
 0x275   : > { %6242 = vmatmul.mubr.bf16.gmra.mrb[200].mxu0 %v16635_v51  ;;  %v11759_v63 = vld [vmem:[%s12450_s1 + $0x7a8] sm:$0xff]   ;;  %v15253_v17 = vrot.slane %v6566_v29, 4  ;;  %v15255_v51 = vrot.slane %v6569_v57, 5  ;;  %v15261_v47 = vadd.f32 %v3135_v59, %v14788_v22  ;;  %v16639_v41 = vcombine.high %v14981_v11, %v14984_v25  ;;  %v15270_v29 = vld [vmem:[%s12448_s10 + $0xf0] sm:$0x11]  ;;  %v10566_v57 = vpop.f32.mrb[96].mxu0 }
 0x276   : > { %6339 = vmatmul.mubr.bf16.gmra.mrb[200].mxu1 %v16636_v9  ;;  %6249 = vmatprep.mubr.bf16.mxu0 %v16637_v3  ;;  %v15258_v9 = vld [vmem:[%s12448_s10 + $0xd0] sm:$0x11]  ;;  %v3138_v3 = vadd.f32 %v10549_v0, %v10485_v1  ;;  %v6535_v6 = vrot.slane %v6533_v19, 5  ;;  %v6608_v1 = vshrl.u32 %v14949_v49, 16  ;;  %v6611_v59 = vshll.u32 %v14949_v49, 16  ;;  %v10567_v0 = vpop.f32.mrb[97].mxu0 }
 0x277   : > { %16638 = vst [vmem:[#allocation38_spill] sm:$0xff] %v15261_v47  ;;  %6346 = vmatprep.mubr.bf16.mxu1 %v16639_v41  ;;  %11071 = vmatpush3.bf16.msra.mxu0 %v11754_v45  ;;  %v10630_v45 = vpop.f32.mrb[96].mxu1  ;;  %v11762_v30 = vld [vmem:[%s12450_s1 + $0x730] sm:$0xff]   ;;  %v6585_v47 = vrot.slane %v6583_v39, 5  ;;  %v10568_v22 = vadd.f32 %v10567_v0, %v10566_v57  ;;  %v10569_v15 = vpop.f32.mrb[98].mxu0  ;;  %v6559_v21 = vrot.slane %v6558_v33, 4  ;;  %v6544_v49 = vor.u32 %v15227_v40, %v15225_v35 }
 0x278   : > { %11135 = vmatpush3.bf16.msra.mxu1 %v11755_v4  ;;  %11072 = vmatprep.subr.bf16.mxu0 %v11756_v52  ;;  %v15277_v41 = vadd.f32 %v3138_v3, %v14810_v12  ;;  %v9898_v4 = vcombine.high %v15214_v55, %v15219_v34  ;;  %v6582_v52 = vrot.slane %v6580_v46, 4  ;;  %v10631_v19 = vpop.f32.mrb[97].mxu1  ;;  %v6547_v12 = vshll.u32 %v15234_v5, 16  ;;  %v10570_v62 = vpop.f32.mrb[99].mxu0 }
 0x279   : > { %11136 = vmatprep.subr.bf16.mxu1 %v11757_v27  ;;  %v10632_v3 = vadd.f32 %v10631_v19, %v10630_v45  ;;  %v11763_v27 = vld [vmem:[%s12450_s1 + $0x7b0] sm:$0xff]   ;;  %v6572_v46 = vor.u32 %v15255_v51, %v15253_v17  ;;  %v6575_v39 = vshll.u32 %v15251_v61, 16  ;;  %v6589_v57 = vshll.u32 %v15258_v9, 16  ;;  %v11765_v61 = vld [vmem:[%s12450_s1 + $0x7f8] sm:$0xff]  }
 0x27a   : > { %16640 = vst [vmem:[#allocation39_spill] sm:$0xff] %v15277_v41  ;;  %v10633_v41 = vpop.f32.mrb[98].mxu1  ;;  %v10571_v33 = vadd.f32 %v10570_v62, %v10569_v15  ;;  %v6610_v35 = vrot.slane %v6608_v1, 4  ;;  %v6613_v40 = vrot.slane %v6611_v59, 5  ;;  %v16641_v17 = vcombine.low %v14964_v26, %v14967_v56  ;;  %v11767_v9 = vld [vmem:[%s12450_s1 + $0x7b8] sm:$0xff]  }
 0x27b   : > { %11073 = vmatpush3.bf16.msra.mxu0 %v11758_v54  ;;  %v10634_v0 = vpop.f32.mrb[99].mxu1  ;;  %v6617_v54 = vshll.u32 %v15270_v29, 16  ;;  %v3739_v5 = vadd.f32 %v10632_v3, %v10568_v22  ;;  %v6586_v51 = vor.u32 %v6585_v47, %v6582_v52  ;;  %v6594_v62 = vshrl.u32 %v14952_v53, 16  ;;  %v11768_v29 = vld [vmem:[%s12450_s1 + $0x840] sm:$0xff]  }
 0x27c   : > { %11137 = vmatpush3.bf16.msra.mxu1 %v11759_v63  ;;  %11074 = vmatprep.subr.bf16.mxu0 %v11760_v16  ;;  %v10635_v45 = vadd.f32 %v10634_v0, %v10633_v41  ;;  %v16642_v15 = vcombine.low %v14981_v11, %v14984_v25  ;;  %v16643_v63 = vcombine.high %v15013_v13, %v15016_v48  ;;  %v11766_v16 = vld [vmem:[%s12450_s1 + $0x738] sm:$0xff]   ;;  %v16644_v47 = vshll.u32 %v15203_v58, 16 }
 0x27d   : > { %6250 = vmatmul.mubr.bf16.gmra.mrb[204].mxu0 %v16641_v17  ;;  %11138 = vmatprep.subr.bf16.mxu1 %v11761_v36  ;;  %v15309_v36 = vsel %vm12750_vm2, %v15141_v60, %v6535_v6  ;;  %v6549_v1 = vrot.slane %v6547_v12, 5  ;;  %v6597_v59 = vshll.u32 %v14952_v53, 16  ;;  %v15315_v41 = vadd.f32 %v3739_v5, %v14837_v14  ;;  %v15321_v6 = vld [vmem:[%s12448_s10 + $0xd8] sm:$0x11]  ;;  %v10572_v58 = vpop.f32.mrb[100].mxu0 }
 0x27e   : > { %6347 = vmatmul.mubr.bf16.gmra.mrb[204].mxu1 %v16642_v15  ;;  %6257 = vmatprep.mubr.bf16.mxu0 %v16643_v63  ;;  %v6563_v22 = vrot.slane %v16644_v47, 5  ;;  %v3742_v52 = vadd.f32 %v10635_v45, %v10571_v33  ;;  %v16645_v19 = vcombine.high %v15022_v50, %v15025_v37  ;;  %v6545_v3 = vrot.slane %v6544_v49, 4  ;;  %v10636_v5 = vpop.f32.mrb[100].mxu1  ;;  %v10573_v45 = vpop.f32.mrb[101].mxu0  ;;  %v9790_v17 = vld [vmem:[%s12448_s10 + $0xf8] sm:$0x11] }
 0x27f   : > { %11075 = vmatpush3.bf16.msra.mxu0 %v11762_v30  ;;  %v6577_v60 = vrot.slane %v6575_v39, 5  ;;  %v6573_v12 = vrot.slane %v6572_v46, 4  ;;  %v6591_v53 = vrot.slane %v6589_v57, 5  ;;  %v6614_v0 = vor.u32 %v6613_v40, %v6610_v35  ;;  %v11769_v30 = vld [vmem:[%s12450_s1 + $0x8c0] sm:$0xff]  }
 0x280   : > { %6354 = vmatprep.mubr.bf16.mxu1 %v16645_v19  ;;  %11139 = vmatpush3.bf16.msra.mxu1 %v11763_v27  ;;  %v15323_v14 = vrot.slane %v6617_v54, 5  ;;  %v15326_v33 = vadd.f32 %v3742_v52, %v14861_v32  ;;  %v6587_v49 = vrot.slane %v6586_v51, 4  ;;  %v6596_v39 = vrot.slane %v6594_v62, 4  ;;  %v10637_v27 = vpop.f32.mrb[101].mxu1 }
 0x281   : > { %11076 = vmatprep.subr.bf16.mxu0 %v11764_v42  ;;  %11140 = vmatprep.subr.bf16.mxu1 %v11765_v61  ;;  %v6622_v15 = vshrl.u32 %v14955_v43, 16  ;;  %v10574_v63 = vadd.f32 %v10573_v45, %v10572_v58  ;;  %v10575_v42 = vpop.f32.mrb[102].mxu0  ;;  %v15333_v46 = vsel %vm12750_vm2, %v6559_v21, %v6563_v22  ;;  %v6599_v57 = vrot.slane %v6597_v59, 5  ;;  %v10639_v40 = vpop.f32.mrb[102].mxu1 }
 0x282   : > { %v6625_v32 = vshll.u32 %v14955_v43, 16  ;;  %v10638_v35 = vadd.f32 %v10637_v27, %v10636_v5  ;;  %v10576_v54 = vpop.f32.mrb[103].mxu0  ;;  %v6603_v61 = vshll.u32 %v15321_v6, 16  ;;  %v6636_v51 = vshrl.u32 %v14964_v26, 16  ;;  %v10640_v52 = vpop.f32.mrb[103].mxu1 }
 0x283   : > { %11077 = vmatpush3.bf16.msra.mxu0 %v11766_v16  ;;  %v6639_v62 = vshll.u32 %v14964_v26, 16  ;;  %v10577_v47 = vadd.f32 %v10576_v54, %v10575_v42  ;;  %v6615_v21 = vrot.slane %v6614_v0, 4  ;;  %v6664_v22 = vshrl.u32 %v14967_v56, 16  ;;  %v9793_v26 = vld [vmem:[%s12448_s10 + $0x110] sm:$0x11] }
 0x284   : > { %11141 = vmatpush3.bf16.msra.mxu1 %v11767_v9  ;;  %11190 = vmatprep.subr.bf16.mxu0 %v11768_v29  ;;  %v6667_v43 = vshll.u32 %v14967_v56, 16  ;;  %v3747_v59 = vadd.f32 %v10638_v35, %v10574_v63  ;;  %v10641_v19 = vadd.f32 %v10640_v52, %v10639_v40  ;;  %v16646_v16 = vcombine.low %v15013_v13, %v15016_v48 }
 0x285   : > { %11254 = vmatprep.subr.bf16.mxu1 %v11769_v30  ;;  %v15346_v6 = vsel %vm12750_vm2, %v6545_v3, %v6549_v1  ;;  %v16647_v9 = vcombine.low %v15022_v50, %v15025_v37  ;;  %v16648_v29 = vcombine.high %v15035_v20, %v15038_v38  ;;  %v6600_v56 = vor.u32 %v6599_v57, %v6596_v39  ;;  %v10578_v37 = vpop.f32.mrb[104].mxu0  ;;  %v9797_v57 = vld [vmem:[%s12448_s10 + $0x130] sm:$0x11] }
 0x286   : > { %6258 = vmatmul.mubr.bf16.gmra.mrb[208].mxu0 %v16646_v16  ;;  %v6624_v58 = vrot.slane %v6622_v15, 4  ;;  %v6627_v0 = vrot.slane %v6625_v32, 5  ;;  %v6631_v48 = vshll.u32 %v9790_v17, 16  ;;  %v15356_v5 = vadd.f32 %v3747_v59, %v14872_v8  ;;  %v10642_v8 = vpop.f32.mrb[104].mxu1  ;;  %v10579_v27 = vpop.f32.mrb[105].mxu0 }
 0x287   : > { %6355 = vmatmul.mubr.bf16.gmra.mrb[208].mxu1 %v16647_v9  ;;  %6265 = vmatprep.mubr.bf16.mxu0 %v16648_v29  ;;  %v3750_v45 = vadd.f32 %v10641_v19, %v10577_v47  ;;  %v16649_v1 = vcombine.high %v15041_v23, %v15053_v2  ;;  %v6638_v3 = vrot.slane %v6636_v51, 4  ;;  %v6641_v50 = vrot.slane %v6639_v62, 5  ;;  %v10581_v40 = vpop.f32.mrb[106].mxu0 }
 0x288   : > { %v15363_v30 = vsel %vm12750_vm2, %v6573_v12, %v6577_v60  ;;  %v6645_v39 = vshll.u32 %v9793_v26, 16  ;;  %v6666_v15 = vrot.slane %v6664_v22, 4  ;;  %v6669_v63 = vrot.slane %v6667_v43, 5  ;;  %v10643_v12 = vpop.f32.mrb[105].mxu1  ;;  %v9794_v43 = vld [vmem:[%s12448_s10 + $0x118] sm:$0x11] }
 0x289   : > { %6362 = vmatprep.mubr.bf16.mxu1 %v16649_v1  ;;  %v15366_v17 = vadd.f32 %v3750_v45, %v14879_v10  ;;  %v15370_v42 = vsel %vm12750_vm2, %v6587_v49, %v6591_v53  ;;  %v6650_v32 = vshrl.u32 %v14981_v11, 16  ;;  %v6653_v35 = vshll.u32 %v14981_v11, 16  ;;  %v10645_v47 = vpop.f32.mrb[106].mxu1  ;;  %v10582_v53 = vpop.f32.mrb[107].mxu0  ;;  %v16654_v1 = vld [vmem:[#allocation32_spill] sm:$0xff] }
 0x28a   : > { %v10580_v60 = vadd.f32 %v10579_v27, %v10578_v37  ;;  %v15378_v10 = vsel %vm12750_vm2, %v6615_v21, %v15323_v14  ;;  %v6605_v54 = vrot.slane %v6603_v61, 5  ;;  %v6633_v51 = vrot.slane %v6631_v48, 5  ;;  %v10646_v19 = vpop.f32.mrb[107].mxu1 }
 0x28b   : > { %v10644_v62 = vadd.f32 %v10643_v12, %v10642_v8  ;;  %v6601_v49 = vrot.slane %v6600_v56, 4  ;;  %v6628_v52 = vor.u32 %v6627_v0, %v6624_v58  ;;  %v6642_v22 = vor.u32 %v6641_v50, %v6638_v3  ;;  %v16656_v8 = vld [vmem:[#allocation29_spill] sm:$0xff]  ;;  %v15522_v58 = vld [vmem:[%s12448_s10 + $0x1f0] sm:$0x11] }
 0x28c   : > { %v10583_v59 = vadd.f32 %v10582_v53, %v10581_v40  ;;  %v6647_v11 = vrot.slane %v6645_v39, 5  ;;  %v6670_v16 = vor.u32 %v6669_v63, %v6666_v15  ;;  %v6673_v26 = vshll.u32 %v9797_v57, 16  ;;  %v15414_v40 = vld [vmem:[%s12448_s10 + $0x138] sm:$0x11] }
 0x28d   : > { %v3755_v9 = vadd.f32 %v10644_v62, %v10580_v60  ;;  %v10647_v29 = vadd.f32 %v10646_v19, %v10645_v47  ;;  %v16650_v14 = vcombine.low %v15035_v20, %v15038_v38  ;;  %v6652_v61 = vrot.slane %v6650_v32, 4  ;;  %v10584_v39 = vpop.f32.mrb[108].mxu0 }
 0x28e   : > { %v6655_v21 = vrot.slane %v6653_v35, 5  ;;  %v16651_v48 = vcombine.low %v15041_v23, %v15053_v2  ;;  %v16652_v56 = vcombine.high %v15103_v18, %v15106_v28  ;;  %v6678_v45 = vshrl.u32 %v14984_v25, 16  ;;  %v16653_v23 = vld [vmem:[#allocation31_spill] sm:$0xff]  ;;  %v10648_v57 = vpop.f32.mrb[108].mxu1  ;;  %v10585_v32 = vpop.f32.mrb[109].mxu0 }
 0x28f   : > { %6266 = vmatmul.mubr.bf16.gmra.mrb[212].mxu0 %v16650_v14  ;;  %v6681_v20 = vshll.u32 %v14984_v25, 16  ;;  %v15397_v38 = vadd.f32 %v3755_v9, %v14892_v44  ;;  %v3758_v2 = vadd.f32 %v10647_v29, %v10583_v59  ;;  %v16655_v3 = vcombine.high %v16653_v23, %v16654_v1  ;;  %v10649_v47 = vpop.f32.mrb[109].mxu1  ;;  %v10587_v53 = vpop.f32.mrb[110].mxu0  ;;  %v9803_v59 = vld [vmem:[%s12448_s10 + $0x1a0] sm:$0xff]  ;;  %v11773_v44 = vld [vmem:[%s12450_s1 + $0x8c8] sm:$0xff]  }
 0x290   : > { %6363 = vmatmul.mubr.bf16.gmra.mrb[212].mxu1 %v16651_v48  ;;  %6273 = vmatprep.mubr.bf16.mxu0 %v16652_v56  ;;  %v6629_v50 = vrot.slane %v6628_v52, 4  ;;  %v6643_v37 = vrot.slane %v6642_v22, 4  ;;  %v6659_v25 = vshll.u32 %v9794_v43, 16  ;;  %v6671_v60 = vrot.slane %v6670_v16, 4  ;;  %v10651_v9 = vpop.f32.mrb[110].mxu1  ;;  %v10588_v29 = vpop.f32.mrb[111].mxu0 }
 0x291   : > { %6370 = vmatprep.mubr.bf16.mxu1 %v16655_v3  ;;  %v15409_v27 = vadd.f32 %v3758_v2, %v16656_v8  ;;  %v6675_v12 = vrot.slane %v6673_v26, 5  ;;  %v10586_v62 = vadd.f32 %v10585_v32, %v10584_v39  ;;  %v6656_v52 = vor.u32 %v6655_v21, %v6652_v61  ;;  %v9801_v48 = vld [vmem:[%s12448_s10 + $0x190] sm:$0x11]  ;;  %v9800_v61 = vld [vmem:[%s12448_s10 + $0x188] sm:$0xff]  ;;  %v10652_v56 = vpop.f32.mrb[111].mxu1 }
 0x292   : > { %v6680_v22 = vrot.slane %v6678_v45, 4  ;;  %v6683_v43 = vrot.slane %v6681_v20, 5  ;;  %v10650_v19 = vadd.f32 %v10649_v47, %v10648_v57  ;;  %v15419_v14 = vsel %vm12750_vm2, %v6601_v49, %v6605_v54  ;;  %v9805_v20 = vld [vmem:[%s12448_s10 + $0x1b0] sm:$0x11]  ;;  %v16661_v47 = vld [vmem:[#allocation33_spill] sm:$0xff] }
 0x293   : > { %v15423_v16 = vsel %vm12750_vm2, %v6629_v50, %v6633_v51  ;;  %v15427_v26 = vsel %vm12750_vm2, %v6643_v37, %v6647_v11  ;;  %v10589_v21 = vadd.f32 %v10588_v29, %v10587_v53  ;;  %v6661_v45 = vrot.slane %v6659_v25, 5 }
 0x294   : > { %v6692_v2 = vshrl.u32 %v15013_v13, 16  ;;  %v6695_v54 = vshll.u32 %v15013_v13, 16  ;;  %v3763_v49 = vadd.f32 %v10650_v19, %v10586_v62  ;;  %v10653_v3 = vadd.f32 %v10652_v56, %v10651_v9 }
 0x295   : > { %v16657_v51 = vcombine.low %v15103_v18, %v15106_v28  ;;  %v6720_v50 = vshrl.u32 %v9803_v59, 16  ;;  %v6723_v11 = vshll.u32 %v9803_v59, 16  ;;  %v16658_v37 = vcombine.low %v16653_v23, %v16654_v1  ;;  %v9804_v18 = vld [vmem:[%s12448_s10 + $0x1a8] sm:$0xff] }
 0x296   : > { %v16659_v39 = vcombine.high %v15136_v31, %v15139_v24  ;;  %v15445_v25 = vsel %vm12750_vm2, %v6671_v60, %v6675_v12  ;;  %v6657_v13 = vrot.slane %v6656_v52, 4  ;;  %v6684_v8 = vor.u32 %v6683_v43, %v6680_v22  ;;  %v16660_v28 = vld [vmem:[#allocation26_spill] sm:$0xff]  ;;  %v10590_v19 = vpop.f32.mrb[112].mxu0  ;;  %v16664_v22 = vld [vmem:[#allocation23_spill] sm:$0xff]  ;;  %v10654_v43 = vpop.f32.mrb[112].mxu1 }
 0x297   : > { %6274 = vmatmul.mubr.bf16.gmra.mrb[216].mxu0 %v16657_v51  ;;  %v6687_v57 = vshll.u32 %v15414_v40, 16  ;;  %v15450_v32 = vadd.f32 %v3763_v49, %v16660_v28  ;;  %v3766_v62 = vadd.f32 %v10653_v3, %v10589_v21  ;;  %v16662_v23 = vld [vmem:[#allocation34_spill] sm:$0xff]  ;;  %v6706_v53 = vshrl.u32 %v9800_v61, 16  ;;  %v10591_v29 = vpop.f32.mrb[113].mxu0  ;;  %v10655_v51 = vpop.f32.mrb[113].mxu1 }
 0x298   : > { %6371 = vmatmul.mubr.bf16.gmra.mrb[216].mxu1 %v16658_v37  ;;  %6281 = vmatprep.mubr.bf16.mxu0 %v16659_v39  ;;  %v16663_v1 = vcombine.high %v16661_v47, %v16662_v23  ;;  %v6709_v59 = vshll.u32 %v9800_v61, 16  ;;  %v15455_v9 = vrot.slane %v6692_v2, 4  ;;  %v15457_v60 = vrot.slane %v6695_v54, 5  ;;  %v10593_v61 = vpop.f32.mrb[114].mxu0  ;;  %v10657_v37 = vpop.f32.mrb[114].mxu1  ;;  %v15516_v28 = vld [vmem:[%s12448_s10 + $0x1e8] sm:$0xff] }
 0x299   : > { %v6701_v12 = vshll.u32 %v9801_v48, 16  ;;  %v6729_v52 = vshll.u32 %v9805_v20, 16  ;;  %v15460_v40 = vadd.f32 %v3766_v62, %v16664_v22  ;;  %v6722_v56 = vrot.slane %v6720_v50, 4  ;;  %v10594_v39 = vpop.f32.mrb[115].mxu0 }
 0x29a   : > { %6378 = vmatprep.mubr.bf16.mxu1 %v16663_v1  ;;  %v6725_v49 = vrot.slane %v6723_v11, 5  ;;  %v10592_v3 = vadd.f32 %v10591_v29, %v10590_v19  ;;  %v6734_v54 = vshrl.u32 %v9804_v18, 16  ;;  %v6737_v48 = vshll.u32 %v9804_v18, 16  ;;  %v10658_v1 = vpop.f32.mrb[115].mxu1  ;;  %v9802_v18 = vld [vmem:[%s12448_s10 + $0x198] sm:$0x11] }
 0x29b   : > { %v10656_v20 = vadd.f32 %v10655_v51, %v10654_v43  ;;  %v6708_v62 = vrot.slane %v6706_v53, 4  ;;  %v6711_v50 = vrot.slane %v6709_v59, 5  ;;  %v10595_v11 = vadd.f32 %v10594_v39, %v10593_v61  ;;  %v9806_v61 = vld [vmem:[%s12448_s10 + $0x1b8] sm:$0x11]  ;;  %v9807_v39 = vld [vmem:[%s12448_s10 + $0x1c0] sm:$0xff] }
 0x29c   : > { %v15470_v19 = vsel %vm12750_vm2, %v6657_v13, %v6661_v45  ;;  %v6685_v22 = vrot.slane %v6684_v8, 4  ;;  %v6689_v29 = vrot.slane %v6687_v57, 5  ;;  %v10659_v51 = vadd.f32 %v10658_v1, %v10657_v37  ;;  %v16667_v13 = vld [vmem:[#allocation22_spill] sm:$0xff]  ;;  %v16668_v8 = vld [vmem:[#allocation37_spill] sm:$0xff]  ;;  %v16671_v1 = vld [vmem:[#allocation24_spill] sm:$0xff] }
 0x29d   : > { %v3771_v43 = vadd.f32 %v10656_v20, %v10592_v3  ;;  %v16665_v2 = vcombine.low %v15136_v31, %v15139_v24  ;;  %v6698_v53 = vor.u32 %v15457_v60, %v15455_v9  ;;  %v15478_v59 = vrot.slane %v6701_v12, 5  ;;  %v9811_v9 = vld [vmem:[%s12448_s10 + $0x1e0] sm:$0xff]  ;;  %v16670_v60 = vld [vmem:[#allocation27_spill] sm:$0xff] }
 0x29e   : > { %v16666_v45 = vcombine.low %v16661_v47, %v16662_v23  ;;  %v16669_v57 = vcombine.high %v16667_v13, %v16668_v8  ;;  %v6726_v3 = vor.u32 %v6725_v49, %v6722_v56  ;;  %v15488_v20 = vrot.slane %v6729_v52, 5  ;;  %v10596_v37 = vpop.f32.mrb[116].mxu0  ;;  %v11770_v56 = vld [vmem:[%s12450_s1 + $0x800] sm:$0xff]  }
 0x29f   : > { %6282 = vmatmul.mubr.bf16.gmra.mrb[220].mxu0 %v16665_v2  ;;  %v6736_v31 = vrot.slane %v6734_v54, 4  ;;  %v6739_v24 = vrot.slane %v6737_v48, 5  ;;  %v15492_v12 = vadd.f32 %v3771_v43, %v16670_v60  ;;  %v3774_v2 = vadd.f32 %v10659_v51, %v10595_v11  ;;  %v10660_v11 = vpop.f32.mrb[116].mxu1  ;;  %v10597_v51 = vpop.f32.mrb[117].mxu0 }
 0x2a0   : > { %6379 = vmatmul.mubr.bf16.gmra.mrb[220].mxu1 %v16666_v45  ;;  %7332 = vmatprep.mubr.bf16.mxu0 %v16669_v57  ;;  %v6712_v47 = vor.u32 %v6711_v50, %v6708_v62  ;;  %v6715_v23 = vshll.u32 %v9802_v18, 16  ;;  %v15500_v52 = vsel %vm12750_vm2, %v6685_v22, %v6689_v29  ;;  %v6743_v49 = vshll.u32 %v9806_v61, 16  ;;  %v15509_v50 = vld [vmem:[%s12448_s10 + $0x1d0] sm:$0x11]  ;;  %v15512_v29 = vld [vmem:[%s12448_s10 + $0x1c8] sm:$0xff]  ;;  %v10661_v45 = vpop.f32.mrb[117].mxu1 }
 0x2a1   : > { %7429 = vmatprep.mubr.bf16.mxu1 %v9898_v4  ;;  %v6748_v54 = vshrl.u32 %v9807_v39, 16  ;;  %v6751_v48 = vshll.u32 %v9807_v39, 16  ;;  %v15503_v43 = vadd.f32 %v3774_v2, %v16671_v1  ;;  %v11771_v4 = vld [vmem:[%s12450_s1 + $0x880] sm:$0xff]   ;;  %v6776_v18 = vshrl.u32 %v9811_v9, 16  ;;  %v10599_v39 = vpop.f32.mrb[118].mxu0  ;;  %v11772_v57 = vld [vmem:[%s12450_s1 + $0x848] sm:$0xff]  }
 0x2a2   : > { %v6779_v22 = vshll.u32 %v9811_v9, 16  ;;  %v10598_v61 = vadd.f32 %v10597_v51, %v10596_v37  ;;  %v6699_v60 = vrot.slane %v6698_v53, 4  ;;  %v6727_v2 = vrot.slane %v6726_v3, 4  ;;  %v10663_v21 = vpop.f32.mrb[118].mxu1  ;;  %v10600_v62 = vpop.f32.mrb[119].mxu0 }
 0x2a3   : > { %v6740_v1 = vor.u32 %v6739_v24, %v6736_v31  ;;  %v10662_v35 = vadd.f32 %v10661_v45, %v10660_v11  ;;  %v9910_v63 = vcombine.high %v15470_v19, %v15500_v52  ;;  %v6713_v9 = vrot.slane %v6712_v47, 4  ;;  %v10664_v51 = vpop.f32.mrb[119].mxu1 }
 0x2a4   : > { %v6717_v0 = vrot.slane %v6715_v23, 5  ;;  %v10601_v37 = vadd.f32 %v10600_v62, %v10599_v39  ;;  %v6745_v15 = vrot.slane %v6743_v49, 5  ;;  %v15524_v53 = vrot.slane %v6748_v54, 4  ;;  %v11774_v49 = vld [vmem:[%s12450_s1 + $0x808] sm:$0xff]  }
 0x2a5   : > { %v6753_v3 = vrot.slane %v6751_v48, 5  ;;  %v3779_v31 = vadd.f32 %v10662_v35, %v10598_v61  ;;  %v10665_v24 = vadd.f32 %v10664_v51, %v10663_v21  ;;  %v16672_v11 = vcombine.low %v16667_v13, %v16668_v8  ;;  %v16674_v8 = vld [vmem:[#allocation25_spill] sm:$0xff] }
 0x2a6   : > { %v15529_v45 = vrot.slane %v6776_v18, 4  ;;  %v15531_v47 = vrot.slane %v6779_v22, 5  ;;  %v16673_v23 = vcombine.low %v15214_v55, %v15219_v34  ;;  %v6741_v54 = vrot.slane %v6740_v1, 4  ;;  %v11775_v55 = vld [vmem:[%s12450_s1 + $0x888] sm:$0xff]   ;;  %v11776_v34 = vld [vmem:[%s12450_s1 + $0x850] sm:$0xff]   ;;  %v10602_v22 = vpop.f32.mrb[120].mxu0 }
 0x2a7   : > { %7333 = vmatmul.mubr.bf16.vlgmr.msra.gmra.mrb[224].mxu0 %v16672_v11  ;;  %v6757_v35 = vshll.u32 %v15509_v50, 16  ;;  %v6762_v21 = vshrl.u32 %v15512_v29, 16  ;;  %v6765_v13 = vshll.u32 %v15512_v29, 16  ;;  %v15541_v48 = vadd.f32 %v3779_v31, %v16674_v8  ;;  %v10666_v31 = vpop.f32.mrb[120].mxu1  ;;  %v11779_v8 = vld [vmem:[%s12450_s1 + $0x890] sm:$0xff]  }
 0x2a8   : > { %7430 = vmatmul.mubr.bf16.vlgmr.msra.gmra.mrb[224].mxu1 %v16673_v23  ;;  %11191 = vmatpush3.bf16.msra.mxu0 %v11770_v56  ;;  %v3782_v62 = vadd.f32 %v10665_v24, %v10601_v37  ;;  %v16675_v18 = vcombine.high %v15309_v36, %v15333_v46  ;;  %v6790_v56 = vshrl.u32 %v15516_v28, 16  ;;  %v6793_v50 = vshll.u32 %v15516_v28, 16  ;;  %v16677_v37 = vld [vmem:[#allocation28_spill] sm:$0xff] }
 0x2a9   : > { %11255 = vmatpush3.bf16.msra.mxu1 %v11771_v4  ;;  %v16676_v29 = vcombine.high %v15346_v6, %v15363_v30  ;;  %11192 = vmatprep.subr.bf16.mxu0 %v11772_v57  ;;  %v11777_v4 = vld [vmem:[%s12450_s1 + $0x8d0] sm:$0xff]   ;;  %v15559_v39 = vsel %vm12750_vm2, %v6699_v60, %v15478_v59  ;;  %v6754_v1 = vor.u32 %v6753_v3, %v15524_v53  ;;  %v6785_v28 = vshll.u32 %v15522_v58, 16  ;;  %v10603_v57 = vpop.f32.mrb[121].mxu0  ;;  %v15579_v60 = vld [vmem:[%s12448_s10 + $0x1d8] sm:$0x11]  ;;  %v10667_v3 = vpop.f32.mrb[121].mxu1 }
 0x2aa   : > { %7340 = vmatprep.mubr.bf16.mxu0 %v16675_v18  ;;  %v15564_v51 = vadd.f32 %v3782_v62, %v16677_v37  ;;  %11256 = vmatprep.subr.bf16.mxu1 %v11773_v44  ;;  %v11778_v24 = vld [vmem:[%s12450_s1 + $0x810] sm:$0xff]   ;;  %v15570_v11 = vsel %vm12750_vm2, %v6727_v2, %v15488_v20  ;;  %v15574_v59 = vsel %vm12750_vm2, %v6713_v9, %v6717_v0  ;;  %v15582_v53 = vld [vmem:[%s12448_s10 + $0x1f8] sm:$0x11]  ;;  %v10605_v23 = vpop.f32.mrb[122].mxu0  ;;  %v6764_v0 = vrot.slane %v6762_v21, 4  ;;  %v15591_v62 = vld [vmem:[%s12448_s10 + $0x200] sm:$0xff] }
 0x2ab   : > { %7437 = vmatprep.mubr.bf16.mxu1 %v16676_v29  ;;  %v6782_v58 = vor.u32 %v15531_v47, %v15529_v45  ;;  %v10604_v44 = vadd.f32 %v10603_v57, %v10602_v22  ;;  %v11780_v20 = vld [vmem:[%s12450_s1 + $0x858] sm:$0xff]   ;;  %v15588_v2 = vsel %vm12750_vm2, %v6741_v54, %v6745_v15  ;;  %v6767_v9 = vrot.slane %v6765_v13, 5  ;;  %v10669_v47 = vpop.f32.mrb[122].mxu1  ;;  %v10606_v18 = vpop.f32.mrb[123].mxu0  ;;  %v15595_v57 = vld [vmem:[%s12448_s10 + $0x220] sm:$0xff] }
 0x2ac   : > { %11193 = vmatpush3.bf16.msra.mxu0 %v11774_v49  ;;  %v10668_v45 = vadd.f32 %v10667_v3, %v10666_v31  ;;  %v11781_v22 = vld [vmem:[%s12450_s1 + $0x8d8] sm:$0xff]   ;;  %v6759_v29 = vrot.slane %v6757_v35, 5  ;;  %v6792_v49 = vrot.slane %v6790_v56, 4  ;;  %v6795_v37 = vrot.slane %v6793_v50, 5  ;;  %v10670_v15 = vpop.f32.mrb[123].mxu1 }
 0x2ad   : > { %11257 = vmatpush3.bf16.msra.mxu1 %v11775_v55  ;;  %11194 = vmatprep.subr.bf16.mxu0 %v11776_v34  ;;  %v10607_v61 = vadd.f32 %v10606_v18, %v10605_v23  ;;  %v6755_v54 = vrot.slane %v6754_v1, 4  ;;  %v6787_v21 = vrot.slane %v6785_v28, 5  ;;  %v6771_v13 = vshll.u32 %v15579_v60, 16  ;;  %v11782_v35 = vld [vmem:[%s12450_s1 + $0x818] sm:$0xff]   ;;  %v16681_v23 = vld [vmem:[#allocation35_spill] sm:$0xff]  ;;  %v11786_v28 = vld [vmem:[%s12450_s1 + $0x820] sm:$0xff]  }
 0x2ae   : > { %11258 = vmatprep.subr.bf16.mxu1 %v11777_v4  ;;  %v3787_v31 = vadd.f32 %v10668_v45, %v10604_v44  ;;  %v10671_v3 = vadd.f32 %v10670_v15, %v10669_v47  ;;  %v16678_v55 = vcombine.low %v15309_v36, %v15333_v46  ;;  %v6783_v34 = vrot.slane %v6782_v58, 4  ;;  %v11783_v1 = vld [vmem:[%s12450_s1 + $0x898] sm:$0xff]   ;;  %v15613_v36 = vld [vmem:[%s12448_s10 + $0x210] sm:$0x11]  ;;  %v11784_v47 = vld [vmem:[%s12450_s1 + $0x860] sm:$0xff]  }
 0x2af   : > { %v6799_v56 = vshll.u32 %v15582_v53, 16  ;;  %v16679_v50 = vcombine.low %v15346_v6, %v15363_v30  ;;  %v16680_v4 = vcombine.high %v15370_v42, %v15378_v10  ;;  %v6768_v44 = vor.u32 %v6767_v9, %v6764_v0  ;;  %v10608_v9 = vpop.f32.mrb[124].mxu0 }
 0x2b0   : > { %7341 = vmatmul.mubr.bf16.gmra.mrb[228].mxu0 %v16678_v55  ;;  %v6804_v46 = vshrl.u32 %v15591_v62, 16  ;;  %v6807_v58 = vshll.u32 %v15591_v62, 16  ;;  %v15618_v6 = vadd.f32 %v3787_v31, %v16681_v23  ;;  %v3790_v30 = vadd.f32 %v10671_v3, %v10607_v61  ;;  %v11785_v31 = vld [vmem:[%s12450_s1 + $0x8e0] sm:$0xff]  }
 0x2b1   : > { %7438 = vmatmul.mubr.bf16.gmra.mrb[228].mxu1 %v16679_v50  ;;  %7348 = vmatprep.mubr.bf16.mxu0 %v16680_v4  ;;  %v16683_v45 = vcombine.high %v15419_v14, %v15423_v16  ;;  %v6796_v18 = vor.u32 %v6795_v37, %v6792_v49  ;;  %v6832_v0 = vshrl.u32 %v15595_v57, 16  ;;  %v15632_v61 = vsel %vm12750_vm2, %v6755_v54, %v6759_v29  ;;  %v15636_v49 = vld [vmem:[%s12448_s10 + $0x208] sm:$0xff]  ;;  %v16684_v37 = vld [vmem:[#allocation36_spill] sm:$0xff] }
 0x2b2   : > { %16682 = vst [vmem:[#allocation31_spill] sm:$0xff] %v15618_v6  ;;  %11195 = vmatpush3.bf16.msra.mxu0 %v11778_v24  ;;  %11259 = vmatpush3.bf16.msra.mxu1 %v11779_v8  ;;  %v6835_v24 = vshll.u32 %v15595_v57, 16  ;;  %v15639_v3 = vadd.f32 %v3790_v30, %v16684_v37  ;;  %v10672_v8 = vpop.f32.mrb[124].mxu1  ;;  %v15643_v55 = vsel %vm12750_vm2, %v6783_v34, %v6787_v21  ;;  %v6773_v50 = vrot.slane %v6771_v13, 5  ;;  %v9820_v37 = vld [vmem:[%s12448_s10 + $0x228] sm:$0xff] }
 0x2b3   : > { %7445 = vmatprep.mubr.bf16.mxu1 %v16683_v45  ;;  %11196 = vmatprep.subr.bf16.mxu0 %v11780_v20  ;;  %v10609_v20 = vpop.f32.mrb[125].mxu0  ;;  %v6801_v4 = vrot.slane %v6799_v56, 5  ;;  %v10673_v54 = vpop.f32.mrb[125].mxu1  ;;  %v6769_v45 = vrot.slane %v6768_v44, 4  ;;  %v15645_v57 = vrot.slane %v6804_v46, 4  ;;  %v6813_v30 = vshll.u32 %v15613_v36, 16 }
 0x2b4   : > { %16685 = vst [vmem:[#allocation32_spill] sm:$0xff] %v15639_v3  ;;  %11260 = vmatprep.subr.bf16.mxu1 %v11781_v22  ;;  %v10610_v29 = vadd.f32 %v10609_v20, %v10608_v9  ;;  %v10611_v23 = vpop.f32.mrb[126].mxu0  ;;  %v10674_v15 = vadd.f32 %v10673_v54, %v10672_v8  ;;  %v10675_v62 = vpop.f32.mrb[126].mxu1  ;;  %v6797_v21 = vrot.slane %v6796_v18, 4  ;;  %v15650_v13 = vrot.slane %v6807_v58, 5  ;;  %v11787_v46 = vld [vmem:[%s12450_s1 + $0x8a0] sm:$0xff]  }
 0x2b5   : > { %v10612_v22 = vpop.f32.mrb[127].mxu0  ;;  %v15652_v34 = vrot.slane %v6832_v0, 4  ;;  %v10676_v44 = vpop.f32.mrb[127].mxu1  ;;  %v11788_v9 = vld [vmem:[%s12450_s1 + $0x868] sm:$0xff]   ;;  %v15656_v20 = vrot.slane %v6835_v24, 5  ;;  %v6818_v8 = vshrl.u32 %v15636_v49, 16  ;;  %v16686_v58 = vcombine.low %v15370_v42, %v15378_v10 }
 0x2b6   : > { %11197 = vmatpush3.bf16.msra.mxu0 %v11782_v35  ;;  %v10613_v56 = vadd.f32 %v10612_v22, %v10611_v23  ;;  %11261 = vmatpush3.bf16.msra.mxu1 %v11783_v1  ;;  %v6821_v35 = vshll.u32 %v15636_v49, 16  ;;  %v3795_v18 = vadd.f32 %v10674_v15, %v10610_v29  ;;  %v10677_v54 = vadd.f32 %v10676_v44, %v10675_v62  ;;  %v11789_v0 = vld [vmem:[%s12450_s1 + $0x8e8] sm:$0xff]   ;;  %v15665_v1 = vld [vmem:[%s12448_s10 + $0x230] sm:$0x11]  ;;  %v15693_v22 = vld [vmem:[%s12448_s10 + $0x218] sm:$0x11] }
 0x2b7   : > { %11198 = vmatprep.subr.bf16.mxu0 %v11784_v47  ;;  %11262 = vmatprep.subr.bf16.mxu1 %v11785_v31  ;;  %v6846_v47 = vshrl.u32 %v9820_v37, 16  ;;  %v6849_v24 = vshll.u32 %v9820_v37, 16  ;;  %v16687_v23 = vcombine.low %v15419_v14, %v15423_v16  ;;  %v16688_v62 = vcombine.high %v15427_v26, %v15445_v25  ;;  %v11790_v31 = vld [vmem:[%s12450_s1 + $0x828] sm:$0xff]   ;;  %v10694_v44 = vpop.f32.mrb[128].mxu0 }
 0x2b8   : > { %7349 = vmatmul.mubr.bf16.gmra.mrb[232].mxu0 %v16686_v58  ;;  %v15679_v15 = vsel %vm12750_vm2, %v6769_v45, %v6773_v50  ;;  %v16689_v49 = vld [vmem:[#allocation38_spill] sm:$0xff]  ;;  %v3798_v16 = vadd.f32 %v10677_v54, %v10613_v56  ;;  %v6810_v29 = vor.u32 %v15650_v13, %v15645_v57  ;;  %v15690_v37 = vrot.slane %v6813_v30, 5  ;;  %v11792_v13 = vld [vmem:[%s12450_s1 + $0x870] sm:$0xff]  }
 0x2b9   : > { %7446 = vmatmul.mubr.bf16.gmra.mrb[232].mxu1 %v16687_v23  ;;  %7356 = vmatprep.mubr.bf16.mxu0 %v16688_v62  ;;  %v15683_v14 = vadd.f32 %v3795_v18, %v16689_v49  ;;  %v9823_v50 = vld [vmem:[%s12448_s10 + $0x240] sm:$0xff]  ;;  %v15701_v56 = vsel %vm12750_vm2, %v6797_v21, %v6801_v4  ;;  %v15706_v18 = vld [vmem:[%s12448_s10 + $0x238] sm:$0x11]  ;;  %v15708_v57 = vrot.slane %v6818_v8, 4  ;;  %v15710_v30 = vrot.slane %v6821_v35, 5  ;;  %v16691_v54 = vld [vmem:[#allocation39_spill] sm:$0xff] }
 0x2ba   : > { %7453 = vmatprep.mubr.bf16.mxu1 %v9910_v63  ;;  %11199 = vmatpush3.bf16.msra.mxu0 %v11786_v28  ;;  %v15697_v45 = vld [vmem:[%s12448_s10 + $0x260] sm:$0xff]  ;;  %v11791_v63 = vld [vmem:[%s12450_s1 + $0x8a8] sm:$0xff]   ;;  %v6841_v28 = vshll.u32 %v15665_v1, 16  ;;  %v15714_v58 = vadd.f32 %v3798_v16, %v16691_v54  ;;  %v10695_v23 = vpop.f32.mrb[129].mxu0  ;;  %v6838_v4 = vor.u32 %v15656_v20, %v15652_v34  ;;  %v6848_v21 = vrot.slane %v6846_v47, 4  ;;  %v11793_v62 = vld [vmem:[%s12450_s1 + $0x8f0] sm:$0xff]  }
 0x2bb   : > { %16690 = vst [vmem:[#allocation29_spill] sm:$0xff] %v15683_v14  ;;  %11263 = vmatpush3.bf16.msra.mxu1 %v11787_v46  ;;  %11200 = vmatprep.subr.bf16.mxu0 %v11788_v9  ;;  %v10758_v46 = vpop.f32.mrb[128].mxu1  ;;  %v6851_v9 = vrot.slane %v6849_v24, 5  ;;  %v10696_v49 = vadd.f32 %v10695_v23, %v10694_v44  ;;  %v10697_v8 = vpop.f32.mrb[130].mxu0  ;;  %v6860_v42 = vshrl.u32 %v9823_v50, 16  ;;  %v6863_v35 = vshll.u32 %v9823_v50, 16 }
 0x2bc   : > { %16692 = vst [vmem:[#allocation26_spill] sm:$0xff] %v15714_v58  ;;  %11264 = vmatprep.subr.bf16.mxu1 %v11789_v0  ;;  %v10759_v10 = vpop.f32.mrb[129].mxu1  ;;  %v6888_v14 = vshrl.u32 %v15697_v45, 16  ;;  %v10698_v0 = vpop.f32.mrb[131].mxu0  ;;  %v6811_v20 = vrot.slane %v6810_v29, 4  ;;  %v11794_v47 = vld [vmem:[%s12450_s1 + $0x830] sm:$0xff]  }
 0x2bd   : > { %v10760_v16 = vadd.f32 %v10759_v10, %v10758_v46  ;;  %v10761_v54 = vpop.f32.mrb[130].mxu1  ;;  %v6891_v24 = vshll.u32 %v15697_v45, 16  ;;  %v10699_v44 = vadd.f32 %v10698_v0, %v10697_v8  ;;  %v15724_v50 = vrot.slane %v6841_v28, 5  ;;  %v11795_v34 = vld [vmem:[%s12450_s1 + $0x8b0] sm:$0xff]   ;;  %v11796_v29 = vld [vmem:[%s12450_s1 + $0x878] sm:$0xff]   ;;  %v9828_v28 = vld [vmem:[%s12448_s10 + $0x268] sm:$0xff] }
 0x2be   : > { %11201 = vmatpush3.bf16.msra.mxu0 %v11790_v31  ;;  %v10762_v23 = vpop.f32.mrb[131].mxu1  ;;  %v6824_v10 = vor.u32 %v15710_v30, %v15708_v57  ;;  %v6827_v46 = vshll.u32 %v15693_v22, 16  ;;  %v9824_v31 = vld [vmem:[%s12448_s10 + $0x248] sm:$0xff]  ;;  %v16693_v45 = vcombine.low %v15427_v26, %v15445_v25  ;;  %v6852_v8 = vor.u32 %v6851_v9, %v6848_v21  ;;  %v11797_v57 = vld [vmem:[%s12450_s1 + $0x8f8] sm:$0xff]  }
 0x2bf   : > { %11265 = vmatpush3.bf16.msra.mxu1 %v11791_v63  ;;  %11202 = vmatprep.subr.bf16.mxu0 %v11792_v13  ;;  %v4846_v58 = vadd.f32 %v10760_v16, %v10696_v49  ;;  %v10763_v3 = vadd.f32 %v10762_v23, %v10761_v54  ;;  %v6855_v63 = vshll.u32 %v15706_v18, 16  ;;  %v16694_v30 = vcombine.low %v15470_v19, %v15500_v52  ;;  %v15745_v16 = vld [vmem:[%s12448_s10 + $0x250] sm:$0x11]  ;;  %v10700_v23 = vpop.f32.mrb[132].mxu0 }
 0x2c0   : > { %7357 = vmatmul.mubr.bf16.gmra.mrb[236].mxu0 %v16693_v45  ;;  %11266 = vmatprep.subr.bf16.mxu1 %v11793_v62  ;;  %v16695_v13 = vcombine.high %v15559_v39, %v15570_v11  ;;  %v6839_v49 = vrot.slane %v6838_v4, 4  ;;  %v6862_v26 = vrot.slane %v6860_v42, 4  ;;  %v6865_v25 = vrot.slane %v6863_v35, 5  ;;  %v15754_v19 = vld [vmem:[%s12448_s10 + $0x270] sm:$0x11]  ;;  %v11798_v4 = vld [vmem:[%s12450_s1 + $0x838] sm:$0xff]  }
 0x2c1   : > { %7454 = vmatmul.mubr.bf16.gmra.mrb[236].mxu1 %v16694_v30  ;;  %v6890_v21 = vrot.slane %v6888_v14, 4  ;;  %v15748_v9 = vadd.f32 %v4846_v58, %v15315_v41  ;;  %v4849_v62 = vadd.f32 %v10763_v3, %v10699_v44  ;;  %v16697_v54 = vcombine.high %v15574_v59, %v15588_v2  ;;  %v11799_v41 = vld [vmem:[%s12450_s1 + $0x8b8] sm:$0xff]   ;;  %v10764_v58 = vpop.f32.mrb[132].mxu1  ;;  %v10701_v44 = vpop.f32.mrb[133].mxu0 }
 0x2c2   : > { %7364 = vmatprep.mubr.bf16.mxu0 %v16695_v13  ;;  %11203 = vmatpush3.bf16.msra.mxu0 %v11794_v47  ;;  %v6893_v52 = vrot.slane %v6891_v24, 5  ;;  %v6874_v0 = vshrl.u32 %v9824_v31, 16  ;;  %v6829_v45 = vrot.slane %v6827_v46, 5  ;;  %v6877_v42 = vshll.u32 %v9824_v31, 16 }
 0x2c3   : > { %16696 = vst [vmem:[#allocation33_spill] sm:$0xff] %v15748_v9  ;;  %7461 = vmatprep.mubr.bf16.mxu1 %v16697_v54  ;;  %11267 = vmatpush3.bf16.msra.mxu1 %v11795_v34  ;;  %v6902_v14 = vshrl.u32 %v9828_v28, 16  ;;  %v6905_v35 = vshll.u32 %v9828_v28, 16  ;;  %v15759_v3 = vadd.f32 %v4849_v62, %v15326_v33  ;;  %v6825_v30 = vrot.slane %v6824_v10, 4  ;;  %v10765_v54 = vpop.f32.mrb[133].mxu1  ;;  %v10703_v9 = vpop.f32.mrb[134].mxu0 }
 0x2c4   : > { %11204 = vmatprep.subr.bf16.mxu0 %v11796_v29  ;;  %v6853_v47 = vrot.slane %v6852_v8, 4  ;;  %v6857_v13 = vrot.slane %v6855_v63, 5  ;;  %11268 = vmatprep.subr.bf16.mxu1 %v11797_v57  ;;  %v10702_v24 = vadd.f32 %v10701_v44, %v10700_v23  ;;  %v6866_v46 = vor.u32 %v6865_v25, %v6862_v26  ;;  %v10767_v28 = vpop.f32.mrb[134].mxu1  ;;  %v10704_v6 = vpop.f32.mrb[135].mxu0  ;;  %v15769_v62 = vld [vmem:[%s12448_s10 + $0x258] sm:$0x11] }
 0x2c5   : > { %v6869_v34 = vshll.u32 %v15745_v16, 16  ;;  %v6897_v31 = vshll.u32 %v15754_v19, 16  ;;  %v10766_v29 = vadd.f32 %v10765_v54, %v10764_v58  ;;  %v15766_v33 = vsel %vm12750_vm2, %v6811_v20, %v15690_v37  ;;  %v10768_v57 = vpop.f32.mrb[135].mxu1  ;;  %v15784_v20 = vld [vmem:[%s12448_s10 + $0x278] sm:$0x11] }
 0x2c6   : > { %v6894_v10 = vor.u32 %v6893_v52, %v6890_v21  ;;  %v6876_v8 = vrot.slane %v6874_v0, 4  ;;  %11205 = vmatpush3.bf16.msra.mxu0 %v11798_v4  ;;  %v10705_v63 = vadd.f32 %v10704_v6, %v10703_v9  ;;  %v6879_v26 = vrot.slane %v6877_v42, 5 }
 0x2c7   : > { %v6904_v25 = vrot.slane %v6902_v14, 4  ;;  %v6907_v23 = vrot.slane %v6905_v35, 5  ;;  %11269 = vmatpush3.bf16.msra.mxu1 %v11799_v41  ;;  %v4854_v58 = vadd.f32 %v10766_v29, %v10702_v24  ;;  %v10769_v44 = vadd.f32 %v10768_v57, %v10767_v28  ;;  %v9959_v41 = vld [vmem:[%s12448_s10 + $0x40] sm:$0xee] }
 0x2c8   : > { %v16698_v54 = vcombine.low %v15559_v39, %v15570_v11  ;;  %v15777_v37 = vsel %vm12750_vm2, %v6839_v49, %v15724_v50  ;;  %v15781_v6 = vsel %vm12750_vm2, %v6825_v30, %v6829_v45  ;;  %v16699_v21 = vcombine.low %v15574_v59, %v15588_v2  ;;  %v10706_v45 = vpop.f32.mrb[136].mxu0 }
 0x2c9   : > { %v16700_v39 = vcombine.high %v15632_v61, %v15643_v55  ;;  %v15794_v11 = vsel %vm12750_vm2, %v6853_v47, %v6857_v13  ;;  %v6867_v50 = vrot.slane %v6866_v46, 4  ;;  %v6871_v49 = vrot.slane %v6869_v34, 5  ;;  %v10707_v47 = vpop.f32.mrb[137].mxu0  ;;  %v9961_v46 = vld [vmem:[%s12448_s10 + $0x60] sm:$0xee] }
 0x2ca   : > { %7365 = vmatmul.mubr.bf16.gmra.mrb[240].mxu0 %v16698_v54  ;;  %7462 = vmatmul.mubr.bf16.gmra.mrb[240].mxu1 %v16699_v21  ;;  %v6899_v9 = vrot.slane %v6897_v31, 5  ;;  %v15797_v52 = vadd.f32 %v4854_v58, %v15356_v5  ;;  %v4857_v0 = vadd.f32 %v10769_v44, %v10705_v63  ;;  %v16701_v59 = vcombine.high %v15679_v15, %v15701_v56  ;;  %v10770_v5 = vpop.f32.mrb[136].mxu1  ;;  %v10709_v29 = vpop.f32.mrb[138].mxu0 }
 0x2cb   : > { %7372 = vmatprep.mubr.bf16.mxu0 %v16700_v39  ;;  %v6895_v2 = vrot.slane %v6894_v10, 4  ;;  %v6883_v4 = vshll.u32 %v15769_v62, 16  ;;  %v6880_v42 = vor.u32 %v6879_v26, %v6876_v8  ;;  %v6908_v14 = vor.u32 %v6907_v23, %v6904_v25  ;;  %v10771_v31 = vpop.f32.mrb[137].mxu1  ;;  %v9960_v8 = vld [vmem:[%s12448_s10 + $0x48] sm:$0xee] }
 0x2cc   : > { %7469 = vmatprep.mubr.bf16.mxu1 %v16701_v59  ;;  %v6911_v35 = vshll.u32 %v15784_v20, 16  ;;  %v15806_v30 = vadd.f32 %v4857_v0, %v15366_v17  ;;  %v9915_v13 = vcombine.low %v15632_v61, %v15643_v55  ;;  %v9917_v24 = vcombine.low %v15679_v15, %v15701_v56  ;;  %v15823_v61 = vld [vmem:[%s12448_s10 + $0x68] sm:$0xee]  ;;  %v10773_v15 = vpop.f32.mrb[138].mxu1  ;;  %v10710_v56 = vpop.f32.mrb[139].mxu0 }
 0x2cd   : > { %v10708_v34 = vadd.f32 %v10707_v47, %v10706_v45  ;;  %v9920_v28 = vcombine.high %v15766_v33, %v15777_v37  ;;  %v9922_v10 = vcombine.high %v15781_v6, %v15794_v11  ;;  %v15819_v17 = vsel %vm12750_vm2, %v6867_v50, %v6871_v49  ;;  %v10774_v23 = vpop.f32.mrb[139].mxu1  ;;  %v11834_v50 = vld [vmem:[%s12448_s10 + $0x50] sm:$0x11]  ;;  %v15831_v59 = vld [vmem:[%s12448_s10 + $0x80] sm:$0xee] }
 0x2ce   : > { %v10772_v55 = vadd.f32 %v10771_v31, %v10770_v5  ;;  %v15827_v63 = vsel %vm12750_vm2, %v6895_v2, %v6899_v9  ;;  %v6885_v57 = vrot.slane %v6883_v4, 5  ;;  %v9991_v26 = vrot.slane %v9959_v41, 9  ;;  %v11835_v9 = vld [vmem:[%s12448_s10 + $0x70] sm:$0x11]  ;;  %v11836_v45 = vld [vmem:[%s12448_s10 + $0x58] sm:$0x11] }
 0x2cf   : > { %v10711_v25 = vadd.f32 %v10710_v56, %v10709_v29  ;;  %v6881_v58 = vrot.slane %v6880_v42, 4  ;;  %v6909_v44 = vrot.slane %v6908_v14, 4  ;;  %v6913_v54 = vrot.slane %v6911_v35, 5  ;;  %v15837_v35 = vld [vmem:[%s12448_s10 + $0xa0] sm:$0xee] }
 0x2d0   : > { %v4862_v21 = vadd.f32 %v10772_v55, %v10708_v34  ;;  %v10775_v39 = vadd.f32 %v10774_v23, %v10773_v15  ;;  %v7608_v49 = vrot.slane %v11834_v50, 5  ;;  %v9993_v0 = vrot.slane %v9961_v46, 9  ;;  %v15856_v29 = vld [vmem:[%s12448_s10 + $0x88] sm:$0xee] }
 0x2d1   : > { %v7616_v2 = vrot.slane %v11835_v9, 5  ;;  %v9992_v4 = vrot.slane %v9960_v8, 9  ;;  %v7612_v42 = vrot.slane %v11836_v45, 5  ;;  %v9994_v14 = vrot.slane %v15823_v61, 9  ;;  %v15870_v8 = vld [vmem:[%s12448_s10 + $0xa8] sm:$0xee] }
 0x2d2   : > { %7373 = vmatmul.mubr.bf16.gmra.mrb[244].mxu0 %v9915_v13  ;;  %7470 = vmatmul.mubr.bf16.gmra.mrb[244].mxu1 %v9917_v24  ;;  %v15840_v41 = vadd.f32 %v4862_v21, %v15397_v38  ;;  %v4865_v5 = vadd.f32 %v10775_v39, %v10711_v25  ;;  %v9919_v47 = vcombine.low %v15766_v33, %v15777_v37  ;;  %v10712_v13 = vpop.f32.mrb[140].mxu0  ;;  %v11837_v38 = vld [vmem:[%s12448_s10 + $0x78] sm:$0x11]  ;;  %v10776_v33 = vpop.f32.mrb[140].mxu1  ;;  %v15873_v61 = vld [vmem:[%s12448_s10 + $0xc0] sm:$0xee] }
 0x2d3   : > { %7380 = vmatprep.mubr.bf16.mxu0 %v9920_v28  ;;  %7477 = vmatprep.mubr.bf16.mxu1 %v9922_v10  ;;  %v9921_v24 = vcombine.low %v15781_v6, %v15794_v11  ;;  %v15848_v46 = vsel %vm12750_vm2, %v6881_v58, %v6885_v57  ;;  %v15852_v34 = vsel %vm12750_vm2, %v6909_v44, %v6913_v54  ;;  %v7620_v31 = vrot.slane %v11837_v38, 5  ;;  %v10713_v37 = vpop.f32.mrb[141].mxu0  ;;  %v10777_v55 = vpop.f32.mrb[141].mxu1  ;;  %v15885_v25 = vld [vmem:[%s12448_s10 + $0xe0] sm:$0xee] }
 0x2d4   : > { %v15859_v28 = vadd.f32 %v4865_v5, %v15409_v27  ;;  %v9924_v6 = vcombine.high %v15819_v17, %v15827_v63  ;;  %v9923_v11 = vcombine.low %v15819_v17, %v15827_v63  ;;  %v15867_v10 = vsel %vm13168_vm5, %v9991_v26, %v7608_v49  ;;  %v10715_v15 = vpop.f32.mrb[142].mxu0  ;;  %v10779_v58 = vpop.f32.mrb[142].mxu1  ;;  %v11838_v21 = vld [vmem:[%s12448_s10 + $0x90] sm:$0x11]  ;;  %v9968_v49 = vld [vmem:[%s12448_s10 + $0xc8] sm:$0xee] }
 0x2d5   : > { %v10714_v27 = vadd.f32 %v10713_v37, %v10712_v13  ;;  %v15877_v56 = vsel %vm13168_vm5, %v9993_v0, %v7616_v2  ;;  %v15881_v57 = vsel %vm13168_vm5, %v9992_v4, %v7612_v42  ;;  %v9995_v26 = vrot.slane %v15831_v59, 9  ;;  %v10716_v44 = vpop.f32.mrb[143].mxu0  ;;  %v9970_v0 = vld [vmem:[%s12448_s10 + $0xe8] sm:$0xee]  ;;  %v10780_v2 = vpop.f32.mrb[143].mxu1 }
 0x2d6   : > { %v10778_v23 = vadd.f32 %v10777_v55, %v10776_v33  ;;  %v9926_v54 = vcombine.high %v15848_v46, %v15852_v34  ;;  %v7624_v39 = vrot.slane %v11838_v21, 5  ;;  %v9997_v50 = vrot.slane %v15837_v35, 9  ;;  %v11839_v45 = vld [vmem:[%s12448_s10 + $0xb0] sm:$0x11]  ;;  %v11840_v38 = vld [vmem:[%s12448_s10 + $0x98] sm:$0x11] }
 0x2d7   : > { %v10717_v9 = vadd.f32 %v10716_v44, %v10715_v15  ;;  %v9925_v59 = vcombine.low %v15848_v46, %v15852_v34  ;;  %v15897_v4 = vsel %vm13168_vm5, %v9994_v14, %v7620_v31  ;;  %v7632_v42 = vrot.slane %v11839_v45, 5  ;;  %v11841_v34 = vld [vmem:[%s12448_s10 + $0xb8] sm:$0x11]  ;;  %v11842_v31 = vld [vmem:[%s12448_s10 + $0xd0] sm:$0x11] }
 0x2d8   : > { %v4870_v5 = vadd.f32 %v10778_v23, %v10714_v27  ;;  %v10781_v13 = vadd.f32 %v10780_v2, %v10779_v58  ;;  %v9996_v35 = vrot.slane %v15856_v29, 9  ;;  %v7628_v33 = vrot.slane %v11840_v38, 5  ;;  %v11843_v15 = vld [vmem:[%s12448_s10 + $0xf0] sm:$0x11]  ;;  %v10718_v23 = vpop.f32.mrb[144].mxu0 }
 0x2d9   : > { %v9998_v46 = vrot.slane %v15870_v8, 9  ;;  %v7636_v37 = vrot.slane %v11841_v34, 5  ;;  %v9999_v14 = vrot.slane %v15873_v61, 9  ;;  %v7640_v27 = vrot.slane %v11842_v31, 5  ;;  %v11844_v58 = vld [vmem:[%s12448_s10 + $0xd8] sm:$0x11] }
 0x2da   : > { %7381 = vmatmul.mubr.bf16.gmra.mrb[248].mxu0 %v9919_v47  ;;  %7478 = vmatmul.mubr.bf16.gmra.mrb[248].mxu1 %v9921_v24  ;;  %v15907_v47 = vadd.f32 %v4870_v5, %v15450_v32  ;;  %v4873_v55 = vadd.f32 %v10781_v13, %v10717_v9  ;;  %v10001_v29 = vrot.slane %v15885_v25, 9  ;;  %v7648_v24 = vrot.slane %v11843_v15, 5  ;;  %v11845_v61 = vld [vmem:[%s12448_s10 + $0xf8] sm:$0x11]  ;;  %v10782_v32 = vpop.f32.mrb[144].mxu1  ;;  %v10719_v9 = vpop.f32.mrb[145].mxu0 }
 0x2db   : > { %7388 = vmatprep.mubr.bf16.mxu0 %v9924_v6  ;;  %7485 = vmatprep.mubr.bf16.mxu1 %v9926_v54  ;;  %v15912_v6 = vld [vmem:[%s12448_s10 + $0x100] sm:$0xee]  ;;  %v10000_v8 = vrot.slane %v9968_v49, 9  ;;  %v7644_v44 = vrot.slane %v11844_v58, 5  ;;  %v10002_v21 = vrot.slane %v9970_v0, 9  ;;  %v7652_v2 = vrot.slane %v11845_v61, 5 }
 0x2dc   : > { %v15917_v45 = vadd.f32 %v4873_v55, %v15460_v40  ;;  %v10088_v25 = vcombine.high %v15867_v10, %v15877_v56  ;;  %v10090_v54 = vcombine.high %v15881_v57, %v15897_v4  ;;  %v15925_v49 = vsel %vm13168_vm5, %v9995_v26, %v7624_v39  ;;  %v10783_v13 = vpop.f32.mrb[145].mxu1  ;;  %v10721_v0 = vpop.f32.mrb[146].mxu0  ;;  %v9973_v31 = vld [vmem:[%s12448_s10 + $0x120] sm:$0xee] }
 0x2dd   : > { %v10720_v5 = vadd.f32 %v10719_v9, %v10718_v23  ;;  %v15929_v40 = vsel %vm13168_vm5, %v9997_v50, %v7632_v42  ;;  %v15933_v38 = vsel %vm13168_vm5, %v9996_v35, %v7628_v33  ;;  %v15937_v34 = vsel %vm13168_vm5, %v9998_v46, %v7636_v37  ;;  %v10785_v26 = vpop.f32.mrb[146].mxu1  ;;  %v10722_v39 = vpop.f32.mrb[147].mxu0  ;;  %v11846_v23 = vld [vmem:[%s12448_s10 + $0x110] sm:$0x11]  ;;  %v9983_v9 = vld [vmem:[%s12448_s10 + $0x200] sm:$0xee] }
 0x2de   : > { %v10784_v55 = vadd.f32 %v10783_v13, %v10782_v32  ;;  %v15942_v15 = vsel %vm13168_vm5, %v9999_v14, %v7640_v27  ;;  %v15946_v50 = vsel %vm13168_vm5, %v10001_v29, %v7648_v24  ;;  %v10003_v42 = vrot.slane %v15912_v6, 9  ;;  %v10786_v33 = vpop.f32.mrb[147].mxu1  ;;  %v11847_v24 = vld [vmem:[%s12448_s10 + $0x130] sm:$0x11]  ;;  %v15987_v32 = vld [vmem:[%s12448_s10 + $0x128] sm:$0xee] }
 0x2df   : > { %v10723_v35 = vadd.f32 %v10722_v39, %v10721_v0  ;;  %v15951_v46 = vsel %vm13168_vm5, %v10000_v8, %v7644_v44  ;;  %v15955_v37 = vsel %vm13168_vm5, %v10002_v21, %v7652_v2  ;;  %v7656_v14 = vrot.slane %v11846_v23, 5  ;;  %v15967_v21 = vld [vmem:[%s12448_s10 + $0x108] sm:$0xee] }
 0x2e0   : > { %v4878_v27 = vadd.f32 %v10784_v55, %v10720_v5  ;;  %v10787_v58 = vadd.f32 %v10786_v33, %v10785_v26  ;;  %v10005_v29 = vrot.slane %v9973_v31, 9  ;;  %v7664_v6 = vrot.slane %v11847_v24, 5  ;;  %v9985_v55 = vld [vmem:[%s12448_s10 + $0x220] sm:$0xee] }
 0x2e1   : > { %v10087_v8 = vcombine.low %v15867_v10, %v15877_v56  ;;  %v10089_v44 = vcombine.low %v15881_v57, %v15897_v4  ;;  %v10091_v63 = vcombine.low %v15925_v49, %v15929_v40  ;;  %v9980_v10 = vld [vmem:[%s12448_s10 + $0x1c8] sm:$0xee]  ;;  %v10093_v57 = vcombine.low %v15933_v38, %v15937_v34 }
 0x2e2   : > { %7389 = vmatmul.mubr.bf16.gmra.mrb[252].mxu0 %v9923_v11  ;;  %7486 = vmatmul.mubr.bf16.gmra.mrb[252].mxu1 %v9925_v59  ;;  %v15970_v61 = vadd.f32 %v4878_v27, %v15492_v12  ;;  %v4881_v17 = vadd.f32 %v10787_v58, %v10723_v35  ;;  %v10092_v11 = vcombine.high %v15925_v49, %v15929_v40  ;;  %v9982_v56 = vld [vmem:[%s12448_s10 + $0x1e8] sm:$0xee]  ;;  %v10724_v59 = vpop.f32.mrb[148].mxu0  ;;  %v10004_v31 = vrot.slane %v15967_v21, 9 }
 0x2e3   : > { %8151 = vmatprep.mubr.bf16.mxu0 %v10088_v25  ;;  %8248 = vmatprep.mubr.bf16.mxu1 %v10090_v54  ;;  %v10094_v4 = vcombine.high %v15933_v38, %v15937_v34  ;;  %v10096_v12 = vcombine.high %v15942_v15, %v15946_v50  ;;  %v10788_v54 = vpop.f32.mrb[148].mxu1  ;;  %v10725_v5 = vpop.f32.mrb[149].mxu0  ;;  %v15995_v13 = vsel %vm13168_vm5, %v10003_v42, %v7656_v14  ;;  %v7692_v33 = vrot.slane %v15579_v60, 5  ;;  %v16005_v14 = vld [vmem:[%s12448_s10 + $0x118] sm:$0x11]  ;;  %v16703_v38 = vld [vmem:[#allocation31_spill] sm:$0xff] }
 0x2e4   : > { %v15991_v25 = vadd.f32 %v4881_v17, %v15503_v43  ;;  %v15999_v0 = vsel %vm13168_vm5, %v10005_v29, %v7664_v6  ;;  %v10726_v26 = vadd.f32 %v10725_v5, %v10724_v59  ;;  %v10789_v39 = vpop.f32.mrb[149].mxu1  ;;  %v10727_v35 = vpop.f32.mrb[150].mxu0  ;;  %v10012_v43 = vrot.slane %v9980_v10, 9  ;;  %v16011_v10 = vld [vmem:[%s12448_s10 + $0x138] sm:$0x11] }
 0x2e5   : > { %v10014_v23 = vrot.slane %v9982_v56, 9  ;;  %v10790_v27 = vadd.f32 %v10789_v39, %v10788_v54  ;;  %v10791_v58 = vpop.f32.mrb[150].mxu1  ;;  %v10728_v42 = vpop.f32.mrb[151].mxu0  ;;  %v7660_v29 = vrot.slane %v16005_v14, 5  ;;  %v7700_v24 = vrot.slane %v15582_v53, 5 }
 0x2e6   : > { %v10015_v6 = vrot.slane %v9983_v9, 9  ;;  %v10729_v17 = vadd.f32 %v10728_v42, %v10727_v35  ;;  %v10792_v59 = vpop.f32.mrb[151].mxu1  ;;  %v10006_v5 = vrot.slane %v15987_v32, 9  ;;  %v7668_v60 = vrot.slane %v16011_v10, 5  ;;  %v9984_v54 = vld [vmem:[%s12448_s10 + $0x208] sm:$0xee] }
 0x2e7   : > { %v16016_v56 = vsel %vm13168_vm5, %v10012_v43, %v7692_v33  ;;  %v4886_v39 = vadd.f32 %v10790_v27, %v10726_v26  ;;  %v10793_v2 = vadd.f32 %v10792_v59, %v10791_v58  ;;  %v16021_v53 = vsel %vm13168_vm5, %v10014_v23, %v7700_v24  ;;  %v9986_v35 = vld [vmem:[%s12448_s10 + $0x228] sm:$0xee]  ;;  %v9989_v24 = vld [vmem:[%s12448_s10 + $0x260] sm:$0xee] }
 0x2e8   : > { %v7704_v9 = vrot.slane %v15613_v36, 5  ;;  %v10109_v42 = vcombine.low %v16016_v56, %v16021_v53  ;;  %v10110_v43 = vcombine.high %v16016_v56, %v16021_v53  ;;  %v10017_v33 = vrot.slane %v9985_v55, 9 }
 0x2e9   : > { %v7712_v26 = vrot.slane %v15665_v1, 5  ;;  %v16032_v27 = vadd.f32 %v4886_v39, %v15541_v48  ;;  %v4889_v23 = vadd.f32 %v10793_v2, %v10729_v17  ;;  %v7708_v55 = vrot.slane %v15693_v22, 5 }
 0x2ea   : > { %8152 = vmatmul.mubr.bf16.vlgmr.msra.gmra.mrb[0].mxu0 %v10087_v8  ;;  %8249 = vmatmul.mubr.bf16.vlgmr.msra.gmra.mrb[0].mxu1 %v10089_v44  ;;  %v9987_v8 = vld [vmem:[%s12448_s10 + $0x240] sm:$0xee]  ;;  %v16036_v36 = vsel %vm13168_vm5, %v10015_v6, %v7704_v9  ;;  %v10016_v44 = vrot.slane %v9984_v54, 9  ;;  %v10018_v1 = vrot.slane %v9986_v35, 9  ;;  %v7716_v48 = vrot.slane %v15706_v18, 5 }
 0x2eb   : > { %8159 = vmatprep.mubr.bf16.mxu0 %v10092_v11  ;;  %8256 = vmatprep.mubr.bf16.mxu1 %v10094_v4  ;;  %v10730_v11 = vpop.f32.mrb[152].mxu0  ;;  %v16040_v58 = vsel %vm13168_vm5, %v10017_v33, %v7712_v26  ;;  %v16046_v2 = vadd.f32 %v4889_v23, %v15564_v51  ;;  %v10794_v4 = vpop.f32.mrb[152].mxu1  ;;  %v10019_v10 = vrot.slane %v9987_v8, 9  ;;  %v9988_v54 = vld [vmem:[%s12448_s10 + $0x248] sm:$0xee]  ;;  %v7720_v35 = vrot.slane %v15745_v16, 5 }
 0x2ec   : > { %v10731_v17 = vpop.f32.mrb[153].mxu0  ;;  %v10795_v22 = vpop.f32.mrb[153].mxu1  ;;  %v16055_v18 = vsel %vm13168_vm5, %v10016_v44, %v7708_v55  ;;  %v16059_v51 = vsel %vm13168_vm5, %v10018_v1, %v7716_v48  ;;  %v9990_v33 = vld [vmem:[%s12448_s10 + $0x268] sm:$0xee]  ;;  %v7728_v1 = vrot.slane %v15754_v19, 5  ;;  %v10020_v16 = vrot.slane %v9988_v54, 9 }
 0x2ed   : > { %v10732_v39 = vadd.f32 %v10731_v17, %v10730_v11  ;;  %v10733_v9 = vpop.f32.mrb[154].mxu0  ;;  %v10796_v26 = vadd.f32 %v10795_v22, %v10794_v4  ;;  %v10797_v23 = vpop.f32.mrb[154].mxu1  ;;  %v10114_v11 = vcombine.high %v16055_v18, %v16059_v51  ;;  %v10021_v17 = vrot.slane %v9989_v24, 9 }
 0x2ee   : > { %v10734_v6 = vpop.f32.mrb[155].mxu0  ;;  %v10798_v44 = vpop.f32.mrb[155].mxu1  ;;  %v16069_v55 = vsel %vm13168_vm5, %v10019_v10, %v7720_v35  ;;  %v7724_v22 = vrot.slane %v15769_v62, 5  ;;  %v10022_v8 = vrot.slane %v9990_v33, 9  ;;  %v16088_v19 = vsel %vm13168_vm5, %v10004_v31, %v7660_v29  ;;  %v9977_v29 = vld [vmem:[%s12448_s10 + $0x1a0] sm:$0xee] }
 0x2ef   : > { %v10735_v59 = vadd.f32 %v10734_v6, %v10733_v9  ;;  %v4894_v48 = vadd.f32 %v10796_v26, %v10732_v39  ;;  %v10799_v4 = vadd.f32 %v10798_v44, %v10797_v23  ;;  %v16094_v62 = vsel %vm13168_vm5, %v10006_v5, %v7668_v60  ;;  %v9976_v5 = vld [vmem:[%s12448_s10 + $0x188] sm:$0xee]  ;;  %v16705_v6 = vld [vmem:[#allocation32_spill] sm:$0xff] }
 0x2f0   : > { %v16098_v49 = vsel %vm13168_vm5, %v10021_v17, %v7728_v1  ;;  %v7732_v40 = vrot.slane %v15784_v20, 5  ;;  %v10736_v31 = vpop.f32.mrb[156].mxu0  ;;  %v10095_v20 = vcombine.low %v15942_v15, %v15946_v50  ;;  %v10097_v14 = vcombine.low %v15951_v46, %v15955_v37  ;;  %v10800_v10 = vpop.f32.mrb[156].mxu1  ;;  %v9978_v50 = vld [vmem:[%s12448_s10 + $0x1a8] sm:$0xee] }
 0x2f1   : > { %v16102_v34 = vadd.f32 %v4894_v48, %v16703_v38  ;;  %v4897_v21 = vadd.f32 %v10799_v4, %v10735_v59  ;;  %v10116_v32 = vcombine.high %v16069_v55, %v16098_v49  ;;  %v16120_v60 = vsel %vm13168_vm5, %v10020_v16, %v7724_v22  ;;  %v10737_v54 = vpop.f32.mrb[157].mxu0  ;;  %v10801_v9 = vpop.f32.mrb[157].mxu1  ;;  %v11850_v23 = vld [vmem:[%s12448_s10 + $0x190] sm:$0x11] }
 0x2f2   : > { %8160 = vmatmul.mubr.bf16.gmra.mrb[4].mxu0 %v10091_v63  ;;  %8257 = vmatmul.mubr.bf16.gmra.mrb[4].mxu1 %v10093_v57  ;;  %v16704_v63 = vcombine.high %v15951_v46, %v15955_v37  ;;  %v9975_v57 = vld [vmem:[%s12448_s10 + $0x180] sm:$0xee]  ;;  %v16124_v24 = vsel %vm13168_vm5, %v10022_v8, %v7732_v40  ;;  %v10100_v15 = vcombine.high %v15995_v13, %v15999_v0  ;;  %v10739_v35 = vpop.f32.mrb[158].mxu0  ;;  %v7672_v8 = vrot.slane %v11850_v23, 5  ;;  %v10803_v44 = vpop.f32.mrb[158].mxu1 }
 0x2f3   : > { %8167 = vmatprep.mubr.bf16.mxu0 %v10096_v12  ;;  %v10115_v12 = vcombine.low %v16069_v55, %v16098_v49  ;;  %v16127_v59 = vadd.f32 %v4897_v21, %v16705_v6  ;;  %v10118_v37 = vcombine.high %v16120_v60, %v16124_v24  ;;  %v10738_v39 = vadd.f32 %v10737_v54, %v10736_v31  ;;  %v10740_v1 = vpop.f32.mrb[159].mxu0  ;;  %v11851_v48 = vld [vmem:[%s12448_s10 + $0x1b0] sm:$0x11]  ;;  %v10804_v38 = vpop.f32.mrb[159].mxu1  ;;  %v11852_v21 = vld [vmem:[%s12448_s10 + $0x198] sm:$0x11] }
 0x2f4   : > { %8264 = vmatprep.mubr.bf16.mxu1 %v16704_v63  ;;  %v10102_v33 = vcombine.high %v16088_v19, %v16094_v62  ;;  %v10007_v26 = vrot.slane %v9975_v57, 9  ;;  %v10802_v17 = vadd.f32 %v10801_v9, %v10800_v10  ;;  %v10009_v16 = vrot.slane %v9977_v29, 9  ;;  %v11853_v6 = vld [vmem:[%s12448_s10 + $0x1b8] sm:$0x11] }
 0x2f5   : > { %v7680_v4 = vrot.slane %v11851_v48, 5  ;;  %v10008_v22 = vrot.slane %v9976_v5, 9  ;;  %v10741_v40 = vadd.f32 %v10740_v1, %v10739_v35  ;;  %v7676_v63 = vrot.slane %v11852_v21, 5  ;;  %v16706_v10 = vld [vmem:[#allocation29_spill] sm:$0xff] }
 0x2f6   : > { %v10010_v31 = vrot.slane %v9978_v50, 9  ;;  %v7684_v54 = vrot.slane %v11853_v6, 5  ;;  %v4902_v46 = vadd.f32 %v10802_v17, %v10738_v39  ;;  %v10805_v57 = vadd.f32 %v10804_v38, %v10803_v44  ;;  %v9979_v50 = vld [vmem:[%s12448_s10 + $0x1c0] sm:$0xee] }
 0x2f7   : > { %v7673_v5 = vsel %vm13168_vm5, %v10007_v26, %v7672_v8  ;;  %v7681_v35 = vsel %vm13168_vm5, %v10009_v16, %v7680_v4  ;;  %v7677_v39 = vsel %vm13168_vm5, %v10008_v22, %v7676_v63  ;;  %v10099_v26 = vcombine.low %v15995_v13, %v15999_v0  ;;  %v11854_v22 = vld [vmem:[%s12448_s10 + $0x1d0] sm:$0x11] }
 0x2f8   : > { %v16143_v9 = vadd.f32 %v4902_v46, %v16706_v10  ;;  %v4905_v29 = vadd.f32 %v10805_v57, %v10741_v40  ;;  %v10822_v23 = vpop.f32.mrb[160].mxu0  ;;  %v10101_v8 = vcombine.low %v16088_v19, %v16094_v62  ;;  %v10104_v48 = vcombine.high %v7673_v5, %v7681_v35  ;;  %v16708_v19 = vld [vmem:[#allocation33_spill] sm:$0xff] }
 0x2f9   : > { %v10823_v17 = vpop.f32.mrb[161].mxu0  ;;  %v10011_v4 = vrot.slane %v9979_v50, 9  ;;  %v7688_v40 = vrot.slane %v11854_v22, 5 }
 0x2fa   : > { %8168 = vmatmul.mubr.bf16.gmra.mrb[8].mxu0 %v10095_v20  ;;  %8265 = vmatmul.mubr.bf16.gmra.mrb[8].mxu1 %v10097_v14  ;;  %v7685_v20 = vsel %vm13168_vm5, %v10010_v31, %v7684_v54  ;;  %v9981_v14 = vld [vmem:[%s12448_s10 + $0x1e0] sm:$0xee]  ;;  %v10824_v44 = vadd.f32 %v10823_v17, %v10822_v23  ;;  %v10825_v16 = vpop.f32.mrb[162].mxu0  ;;  %v11855_v54 = vld [vmem:[%s12448_s10 + $0x1f0] sm:$0x11] }
 0x2fb   : > { %8175 = vmatprep.mubr.bf16.mxu0 %v10100_v15  ;;  %8272 = vmatprep.mubr.bf16.mxu1 %v10102_v33  ;;  %v16707_v15 = vld [vmem:[#allocation26_spill] sm:$0xff]  ;;  %v10886_v33 = vpop.f32.mrb[160].mxu1  ;;  %v10826_v63 = vpop.f32.mrb[163].mxu0  ;;  %v10106_v31 = vcombine.high %v7677_v39, %v7685_v20  ;;  %v10013_v6 = vrot.slane %v9981_v14, 9  ;;  %v7696_v57 = vrot.slane %v11855_v54, 5  ;;  %v7689_v23 = vsel %vm13168_vm5, %v10011_v4, %v7688_v40 }
 0x2fc   : > { %v16156_v46 = vadd.f32 %v4905_v29, %v16707_v15  ;;  %v10887_v1 = vpop.f32.mrb[161].mxu1  ;;  %v10827_v10 = vadd.f32 %v10826_v63, %v10825_v16 }
 0x2fd   : > { %v10888_v38 = vadd.f32 %v10887_v1, %v10886_v33  ;;  %v10889_v21 = vpop.f32.mrb[162].mxu1  ;;  %v7697_v14 = vsel %vm13168_vm5, %v10013_v6, %v7696_v57 }
 0x2fe   : > { %v10890_v29 = vpop.f32.mrb[163].mxu1  ;;  %v10108_v22 = vcombine.high %v7689_v23, %v7697_v14  ;;  %v10107_v54 = vcombine.low %v7689_v23, %v7697_v14 }
 0x2ff   : > { %v5665_v13 = vadd.f32 %v10888_v38, %v10824_v44  ;;  %v10891_v0 = vadd.f32 %v10890_v29, %v10889_v21 }
 0x300   : > { %v10828_v15 = vpop.f32.mrb[164].mxu0 }
 0x301   : > { %v16165_v62 = vadd.f32 %v5665_v13, %v16708_v19  ;;  %v5668_v50 = vadd.f32 %v10891_v0, %v10827_v10  ;;  %v10892_v17 = vpop.f32.mrb[164].mxu1  ;;  %v10829_v44 = vpop.f32.mrb[165].mxu0 }
 0x302   : > { %8176 = vmatmul.mubr.bf16.gmra.mrb[12].mxu0 %v10099_v26  ;;  %8273 = vmatmul.mubr.bf16.gmra.mrb[12].mxu1 %v10101_v8  ;;  %v10103_v26 = vcombine.low %v7673_v5, %v7681_v35  ;;  %v10830_v8 = vadd.f32 %v10829_v44, %v10828_v15  ;;  %v10893_v1 = vpop.f32.mrb[165].mxu1  ;;  %v10831_v16 = vpop.f32.mrb[166].mxu0 }
 0x303   : > { %8183 = vmatprep.mubr.bf16.mxu0 %v10104_v48  ;;  %8280 = vmatprep.mubr.bf16.mxu1 %v10106_v31  ;;  %v16172_v33 = vadd.f32 %v5668_v50, %v15759_v3  ;;  %v10105_v48 = vcombine.low %v7677_v39, %v7685_v20  ;;  %v10894_v38 = vadd.f32 %v10893_v1, %v10892_v17  ;;  %v10895_v21 = vpop.f32.mrb[166].mxu1  ;;  %v10832_v63 = vpop.f32.mrb[167].mxu0 }
 0x304   : > { %v10833_v31 = vadd.f32 %v10832_v63, %v10831_v16  ;;  %v10896_v4 = vpop.f32.mrb[167].mxu1  ;;  %v16710_v63 = vcombine.low %v16036_v36, %v16040_v58 }
 0x305   : > { %v5673_v40 = vadd.f32 %v10894_v38, %v10830_v8  ;;  %v10897_v7 = vadd.f32 %v10896_v4, %v10895_v21 }
 0x307   : > { %v16175_v3 = vadd.f32 %v5673_v40, %v15797_v52  ;;  %v5676_v6 = vadd.f32 %v10897_v7, %v10833_v31 }
 0x308   : > { %v10834_v5 = vpop.f32.mrb[168].mxu0 }
 0x309   : > { %v16181_v35 = vadd.f32 %v5676_v6, %v15806_v30  ;;  %v10898_v39 = vpop.f32.mrb[168].mxu1  ;;  %v10835_v20 = vpop.f32.mrb[169].mxu0  ;;  %v16709_v30 = vcombine.high %v16036_v36, %v16040_v58 }
 0x30a   : > { %8184 = vmatmul.mubr.bf16.gmra.mrb[16].mxu0 %v10103_v26  ;;  %8281 = vmatmul.mubr.bf16.gmra.mrb[16].mxu1 %v10105_v48  ;;  %v10836_v57 = vadd.f32 %v10835_v20, %v10834_v5  ;;  %v10899_v10 = vpop.f32.mrb[169].mxu1  ;;  %v10837_v29 = vpop.f32.mrb[170].mxu0 }
 0x30b   : > { %8191 = vmatprep.mubr.bf16.mxu0 %v10108_v22  ;;  %8288 = vmatprep.mubr.bf16.mxu1 %v10110_v43  ;;  %v10900_v13 = vadd.f32 %v10899_v10, %v10898_v39  ;;  %v10901_v0 = vpop.f32.mrb[170].mxu1  ;;  %v10838_v19 = vpop.f32.mrb[171].mxu0 }
 0x30c   : > { %v10839_v52 = vadd.f32 %v10838_v19, %v10837_v29  ;;  %v10902_v50 = vpop.f32.mrb[171].mxu1 }
 0x30d   : > { %v5681_v15 = vadd.f32 %v10900_v13, %v10836_v57  ;;  %v10903_v17 = vadd.f32 %v10902_v50, %v10901_v0 }
 0x30f   : > { %v16190_v43 = vadd.f32 %v5681_v15, %v15840_v41  ;;  %v5684_v23 = vadd.f32 %v10903_v17, %v10839_v52 }
 0x310   : > { %v10840_v14 = vpop.f32.mrb[172].mxu0 }
 0x311   : > { %v16196_v44 = vadd.f32 %v5684_v23, %v15859_v28  ;;  %v10904_v26 = vpop.f32.mrb[172].mxu1  ;;  %v10841_v8 = vpop.f32.mrb[173].mxu0  ;;  %v16711_v28 = vcombine.low %v16055_v18, %v16059_v51 }
 0x312   : > { %8192 = vmatmul.mubr.bf16.gmra.mrb[20].mxu0 %v10107_v54  ;;  %8289 = vmatmul.mubr.bf16.gmra.mrb[20].mxu1 %v10109_v42  ;;  %v10842_v56 = vadd.f32 %v10841_v8, %v10840_v14  ;;  %v10905_v53 = vpop.f32.mrb[173].mxu1  ;;  %v10843_v42 = vpop.f32.mrb[174].mxu0 }
 0x313   : > { %8199 = vmatprep.mubr.bf16.mxu0 %v16709_v30  ;;  %8296 = vmatprep.mubr.bf16.mxu1 %v10114_v11  ;;  %v10906_v1 = vadd.f32 %v10905_v53, %v10904_v26  ;;  %v10907_v16 = vpop.f32.mrb[174].mxu1  ;;  %v10844_v48 = vpop.f32.mrb[175].mxu0 }
 0x314   : > { %v10845_v22 = vadd.f32 %v10844_v48, %v10843_v42  ;;  %v10908_v41 = vpop.f32.mrb[175].mxu1 }
 0x315   : > { %v5689_v38 = vadd.f32 %v10906_v1, %v10842_v56  ;;  %v10909_v21 = vadd.f32 %v10908_v41, %v10907_v16 }
 0x317   : > { %v16208_v11 = vadd.f32 %v5689_v38, %v15907_v47  ;;  %v5692_v31 = vadd.f32 %v10909_v21, %v10845_v22 }
 0x318   : > { %v10846_v4 = vpop.f32.mrb[176].mxu0 }
 0x319   : > { %v16214_v36 = vadd.f32 %v5692_v31, %v15917_v45  ;;  %v10910_v58 = vpop.f32.mrb[176].mxu1  ;;  %v10847_v40 = vpop.f32.mrb[177].mxu0  ;;  %v16712_v45 = vcombine.low %v16120_v60, %v16124_v24 }
 0x31a   : > { %8200 = vmatmul.mubr.bf16.gmra.mrb[24].mxu0 %v16710_v63  ;;  %8297 = vmatmul.mubr.bf16.gmra.mrb[24].mxu1 %v16711_v28  ;;  %v10848_v18 = vadd.f32 %v10847_v40, %v10846_v4  ;;  %v10911_v51 = vpop.f32.mrb[177].mxu1  ;;  %v10849_v7 = vpop.f32.mrb[178].mxu0  ;;  %v11800_v4 = vld [vmem:[%s12472_s25] sm:$0xff]  }
 0x31b   : > { %8207 = vmatprep.mubr.bf16.mxu0 %v10116_v32  ;;  %8304 = vmatprep.mubr.bf16.mxu1 %v10118_v37  ;;  %v10912_v6 = vadd.f32 %v10911_v51, %v10910_v58  ;;  %v10913_v5 = vpop.f32.mrb[178].mxu1  ;;  %v10850_v32 = vpop.f32.mrb[179].mxu0 }
 0x31c   : > { %v10851_v39 = vadd.f32 %v10850_v32, %v10849_v7  ;;  %v10914_v47 = vpop.f32.mrb[179].mxu1  ;;  %11334 = vmatprep.subr.bf16.mxu0 %v11800_v4  ;;  %11366 = vmatprep.subr.bf16.mxu1 %v11800_v4 }
 0x31d   : > { %v5697_v20 = vadd.f32 %v10912_v6, %v10848_v18  ;;  %v10915_v54 = vadd.f32 %v10914_v47, %v10913_v5  ;;  %11335 = vmatpush3.bf16.msra.mxu0 %v11800_v4  ;;  %11374 = vmatpush3.bf16.msra.mxu1 %v11800_v4 }
 0x31f   : > { %v16223_v37 = vadd.f32 %v5697_v20, %v15970_v61  ;;  %v5700_v57 = vadd.f32 %v10915_v54, %v10851_v39  ;;  %v11801_v20 = vld [vmem:[%s12472_s25 + $0x8] sm:$0xff]  }
 0x320   : > { %v10852_v10 = vpop.f32.mrb[180].mxu0  ;;  %11336 = vmatprep.subr.bf16.mxu0 %v11801_v20  ;;  %11367 = vmatprep.subr.bf16.mxu1 %v11801_v20 }
 0x321   : > { %v16226_v29 = vadd.f32 %v5700_v57, %v15991_v25  ;;  %v10916_v13 = vpop.f32.mrb[180].mxu1  ;;  %v10853_v0 = vpop.f32.mrb[181].mxu0  ;;  %11337 = vmatpush3.bf16.msra.mxu0 %v11801_v20  ;;  %11375 = vmatpush3.bf16.msra.mxu1 %v11801_v20 }
 0x322   : > { %8208 = vmatmul.mubr.bf16.gmra.mrb[28].mxu0 %v10115_v12  ;;  %8305 = vmatmul.mubr.bf16.gmra.mrb[28].mxu1 %v16712_v45  ;;  %v10854_v19 = vadd.f32 %v10853_v0, %v10852_v10  ;;  %v10917_v52 = vpop.f32.mrb[181].mxu1  ;;  %v10855_v50 = vpop.f32.mrb[182].mxu0 }
 0x323   : > { %v10918_v15 = vadd.f32 %v10917_v52, %v10916_v13  ;;  %v10919_v55 = vpop.f32.mrb[182].mxu1  ;;  %v10856_v49 = vpop.f32.mrb[183].mxu0  ;;  %v11802_v13 = vld [vmem:[%s12472_s25 + $0x10] sm:$0xff]  }
 0x324   : > { %v10857_v12 = vadd.f32 %v10856_v49, %v10855_v50  ;;  %v10920_v17 = vpop.f32.mrb[183].mxu1  ;;  %11338 = vmatprep.subr.bf16.mxu0 %v11802_v13  ;;  %11368 = vmatprep.subr.bf16.mxu1 %v11802_v13 }
 0x325   : > { %v5705_v60 = vadd.f32 %v10918_v15, %v10854_v19  ;;  %v10921_v24 = vadd.f32 %v10920_v17, %v10919_v55  ;;  %11339 = vmatpush3.bf16.msra.mxu0 %v11802_v13  ;;  %11376 = vmatpush3.bf16.msra.mxu1 %v11802_v13 }
 0x327   : > { %v16229_v61 = vadd.f32 %v5705_v60, %v16032_v27  ;;  %v5708_v30 = vadd.f32 %v10921_v24, %v10857_v12 }
 0x328   : > { %v10858_v23 = vpop.f32.mrb[184].mxu0 }
 0x329   : > { %v16232_v25 = vadd.f32 %v5708_v30, %v16046_v2  ;;  %v10922_v14 = vpop.f32.mrb[184].mxu1  ;;  %v10859_v26 = vpop.f32.mrb[185].mxu0 }
 0x32a   : > { %v10860_v8 = vadd.f32 %v10859_v26, %v10858_v23  ;;  %v10923_v56 = vpop.f32.mrb[185].mxu1  ;;  %v10861_v53 = vpop.f32.mrb[186].mxu0  ;;  %v11803_v26 = vld [vmem:[%s12472_s25 + $0x18] sm:$0xff]  }
 0x32b   : > { %v10924_v42 = vadd.f32 %v10923_v56, %v10922_v14  ;;  %v10925_v1 = vpop.f32.mrb[186].mxu1  ;;  %v10862_v16 = vpop.f32.mrb[187].mxu0  ;;  %11340 = vmatprep.subr.bf16.mxu0 %v11803_v26  ;;  %11369 = vmatprep.subr.bf16.mxu1 %v11803_v26 }
 0x32c   : > { %v10863_v48 = vadd.f32 %v10862_v16, %v10861_v53  ;;  %v10926_v22 = vpop.f32.mrb[187].mxu1  ;;  %11341 = vmatpush3.bf16.msra.mxu0 %v11803_v26  ;;  %11377 = vmatpush3.bf16.msra.mxu1 %v11803_v26 }
 0x32d   : > { %v5713_v41 = vadd.f32 %v10924_v42, %v10860_v8  ;;  %v10927_v38 = vadd.f32 %v10926_v22, %v10925_v1 }
 0x32f   : > { %v16235_v27 = vadd.f32 %v5713_v41, %v16102_v34  ;;  %v5716_v21 = vadd.f32 %v10927_v38, %v10863_v48  ;;  %v11804_v48 = vld [vmem:[%s12472_s25 + $0x20] sm:$0xff]  }
 0x330   : > { %v10864_v63 = vpop.f32.mrb[188].mxu0  ;;  %11342 = vmatprep.subr.bf16.mxu0 %v11804_v48  ;;  %11370 = vmatprep.subr.bf16.mxu1 %v11804_v48 }
 0x331   : > { %v16238_v2 = vadd.f32 %v5716_v21, %v16127_v59  ;;  %v10928_v28 = vpop.f32.mrb[188].mxu1  ;;  %v10865_v31 = vpop.f32.mrb[189].mxu0  ;;  %11343 = vmatpush3.bf16.msra.mxu0 %v11804_v48  ;;  %11378 = vmatpush3.bf16.msra.mxu1 %v11804_v48 }
 0x332   : > { %v10866_v58 = vadd.f32 %v10865_v31, %v10864_v63  ;;  %v10929_v40 = vpop.f32.mrb[189].mxu1  ;;  %v10867_v18 = vpop.f32.mrb[190].mxu0 }
 0x333   : > { %v10930_v51 = vadd.f32 %v10929_v40, %v10928_v28  ;;  %v10931_v7 = vpop.f32.mrb[190].mxu1  ;;  %v10868_v6 = vpop.f32.mrb[191].mxu0 }
 0x334   : > { %v10869_v34 = vadd.f32 %v10868_v6, %v10867_v18  ;;  %v10932_v5 = vpop.f32.mrb[191].mxu1 }
 0x335   : > { %v5721_v32 = vadd.f32 %v10930_v51, %v10866_v58  ;;  %v10933_v59 = vadd.f32 %v10932_v5, %v10931_v7  ;;  %v11805_v58 = vld [vmem:[%s12472_s25 + $0x28] sm:$0xff]  }
 0x336   : > { %11344 = vmatprep.subr.bf16.mxu0 %v11805_v58  ;;  %11371 = vmatprep.subr.bf16.mxu1 %v11805_v58 }
 0x337   : > { %v16242_v39 = vadd.f32 %v5721_v32, %v16143_v9  ;;  %v5724_v47 = vadd.f32 %v10933_v59, %v10869_v34  ;;  %11345 = vmatpush3.bf16.msra.mxu0 %v11805_v58  ;;  %11379 = vmatpush3.bf16.msra.mxu1 %v11805_v58  ;;  %v11806_v59 = vld [vmem:[%s12472_s25 + $0x30] sm:$0xff]  }
 0x338   : > { %v10950_v54 = vpop.f32.mrb[192].mxu0  ;;  %11346 = vmatprep.subr.bf16.mxu0 %v11806_v59  ;;  %11372 = vmatprep.subr.bf16.mxu1 %v11806_v59 }
 0x339   : > { %v16246_v45 = vadd.f32 %v5724_v47, %v16156_v46  ;;  %v11014_v57 = vpop.f32.mrb[192].mxu1  ;;  %v10951_v10 = vpop.f32.mrb[193].mxu0 }
 0x33a   : > { %v10952_v0 = vadd.f32 %v10951_v10, %v10950_v54  ;;  %v11015_v19 = vpop.f32.mrb[193].mxu1  ;;  %v10953_v52 = vpop.f32.mrb[194].mxu0 }
 0x33b   : > { %v11016_v50 = vadd.f32 %v11015_v19, %v11014_v57  ;;  %v11017_v15 = vpop.f32.mrb[194].mxu1  ;;  %v10954_v9 = vpop.f32.mrb[195].mxu0  ;;  %11347 = vmatpush3.bf16.msra.mxu0 %v11806_v59  ;;  %11380 = vmatpush3.bf16.msra.mxu1 %v11806_v59 }
 0x33c   : > { %v10955_v55 = vadd.f32 %v10954_v9, %v10953_v52  ;;  %v11018_v49 = vpop.f32.mrb[195].mxu1 }
 0x33d   : > { %v6325_v46 = vadd.f32 %v11016_v50, %v10952_v0  ;;  %v11019_v12 = vadd.f32 %v11018_v49, %v11017_v15  ;;  %v11807_v0 = vld [vmem:[%s12472_s25 + $0x38] sm:$0xff]  }
 0x33e   : > { %11348 = vmatprep.subr.bf16.mxu0 %v11807_v0  ;;  %11373 = vmatprep.subr.bf16.mxu1 %v11807_v0 }
 0x33f   : > { %v16250_v17 = vadd.f32 %v6325_v46, %v16165_v62  ;;  %v6328_v60 = vadd.f32 %v11019_v12, %v10955_v55  ;;  %11349 = vmatpush3.bf16.msra.mxu0 %v11807_v0  ;;  %11381 = vmatpush3.bf16.msra.mxu1 %v11807_v0 }
 0x340   : > { %v10956_v24 = vpop.f32.mrb[196].mxu0 }
 0x341   : > { %v16253_v30 = vadd.f32 %v6328_v60, %v16172_v33  ;;  %v11020_v23 = vpop.f32.mrb[196].mxu1  ;;  %v10957_v14 = vpop.f32.mrb[197].mxu0 }
 0x342   : > { %v10958_v8 = vadd.f32 %v10957_v14, %v10956_v24  ;;  %v11021_v56 = vpop.f32.mrb[197].mxu1  ;;  %v10959_v53 = vpop.f32.mrb[198].mxu0 }
 0x343   : > { %v11022_v42 = vadd.f32 %v11021_v56, %v11020_v23  ;;  %v11023_v1 = vpop.f32.mrb[198].mxu1  ;;  %v10960_v16 = vpop.f32.mrb[199].mxu0 }
 0x344   : > { %v10961_v22 = vadd.f32 %v10960_v16, %v10959_v53  ;;  %v11024_v62 = vpop.f32.mrb[199].mxu1 }
 0x345   : > { %v6333_v41 = vadd.f32 %v11022_v42, %v10958_v8  ;;  %v11025_v33 = vadd.f32 %v11024_v62, %v11023_v1 }
 0x347   : > { %v16258_v38 = vadd.f32 %v6333_v41, %v16175_v3  ;;  %v6336_v21 = vadd.f32 %v11025_v33, %v10961_v22 }
 0x348   : > { %v10962_v63 = vpop.f32.mrb[200].mxu0 }
 0x349   : > { %v16261_v28 = vadd.f32 %v6336_v21, %v16181_v35  ;;  %v11026_v31 = vpop.f32.mrb[200].mxu1  ;;  %v10963_v4 = vpop.f32.mrb[201].mxu0 }
 0x34a   : > { %v10964_v40 = vadd.f32 %v10963_v4, %v10962_v63  ;;  %v11027_v18 = vpop.f32.mrb[201].mxu1  ;;  %v10965_v51 = vpop.f32.mrb[202].mxu0 }
 0x34b   : > { %v11028_v7 = vadd.f32 %v11027_v18, %v11026_v31  ;;  %v11029_v6 = vpop.f32.mrb[202].mxu1  ;;  %v10966_v34 = vpop.f32.mrb[203].mxu0 }
 0x34c   : > { %v10967_v3 = vadd.f32 %v10966_v34, %v10965_v51  ;;  %v11030_v5 = vpop.f32.mrb[203].mxu1 }
 0x34d   : > { %v6341_v32 = vadd.f32 %v11028_v7, %v10964_v40  ;;  %v11031_v35 = vadd.f32 %v11030_v5, %v11029_v6 }
 0x34f   : > { %v16266_v47 = vadd.f32 %v6341_v32, %v16190_v43  ;;  %v6344_v20 = vadd.f32 %v11031_v35, %v10967_v3 }
 0x350   : > { %v10968_v54 = vpop.f32.mrb[204].mxu0 }
 0x351   : > { %v16269_v57 = vadd.f32 %v6344_v20, %v16196_v44  ;;  %v11032_v10 = vpop.f32.mrb[204].mxu1  ;;  %v10969_v13 = vpop.f32.mrb[205].mxu0 }
 0x352   : > { %v10970_v19 = vadd.f32 %v10969_v13, %v10968_v54  ;;  %v11033_v52 = vpop.f32.mrb[205].mxu1  ;;  %v10971_v50 = vpop.f32.mrb[206].mxu0 }
 0x353   : > { %v11034_v15 = vadd.f32 %v11033_v52, %v11032_v10  ;;  %v11035_v9 = vpop.f32.mrb[206].mxu1  ;;  %v10972_v55 = vpop.f32.mrb[207].mxu0 }
 0x354   : > { %v10973_v43 = vadd.f32 %v10972_v55, %v10971_v50  ;;  %v11036_v49 = vpop.f32.mrb[207].mxu1 }
 0x355   : > { %v6349_v46 = vadd.f32 %v11034_v15, %v10970_v19  ;;  %v11037_v12 = vadd.f32 %v11036_v49, %v11035_v9 }
 0x357   : > { %v16273_v44 = vadd.f32 %v6349_v46, %v16208_v11  ;;  %v6352_v60 = vadd.f32 %v11037_v12, %v10973_v43 }
 0x359   : > { %v10974_v24 = vpop.f32.mrb[208].mxu0  ;;  %v16276_v23 = vadd.f32 %v6352_v60, %v16214_v36 }
 0x35a   : > { %v11038_v14 = vpop.f32.mrb[208].mxu1  ;;  %v10975_v26 = vpop.f32.mrb[209].mxu0 }
 0x35b   : > { %v10976_v8 = vadd.f32 %v10975_v26, %v10974_v24  ;;  %v11039_v56 = vpop.f32.mrb[209].mxu1  ;;  %v10977_v53 = vpop.f32.mrb[210].mxu0 }
 0x35c   : > { %v11040_v42 = vadd.f32 %v11039_v56, %v11038_v14  ;;  %v11041_v1 = vpop.f32.mrb[210].mxu1  ;;  %v10978_v16 = vpop.f32.mrb[211].mxu0 }
 0x35d   : > { %v10979_v48 = vadd.f32 %v10978_v16, %v10977_v53  ;;  %v11042_v22 = vpop.f32.mrb[211].mxu1 }
 0x35e   : > { %v6357_v62 = vadd.f32 %v11040_v42, %v10976_v8  ;;  %v11043_v41 = vadd.f32 %v11042_v22, %v11041_v1 }
 0x360   : > { %v16279_v11 = vadd.f32 %v6357_v62, %v16223_v37  ;;  %v6360_v33 = vadd.f32 %v11043_v41, %v10979_v48 }
 0x362   : > { %v10980_v21 = vpop.f32.mrb[212].mxu0  ;;  %v16282_v36 = vadd.f32 %v6360_v33, %v16226_v29 }
 0x363   : > { %v11044_v63 = vpop.f32.mrb[212].mxu1  ;;  %v10981_v31 = vpop.f32.mrb[213].mxu0 }
 0x364   : > { %v10982_v4 = vadd.f32 %v10981_v31, %v10980_v21  ;;  %v11045_v58 = vpop.f32.mrb[213].mxu1  ;;  %v10983_v40 = vpop.f32.mrb[214].mxu0 }
 0x365   : > { %v11046_v18 = vadd.f32 %v11045_v58, %v11044_v63  ;;  %v11047_v51 = vpop.f32.mrb[214].mxu1  ;;  %v10984_v7 = vpop.f32.mrb[215].mxu0 }
 0x366   : > { %v10985_v6 = vadd.f32 %v10984_v7, %v10983_v40  ;;  %v11048_v34 = vpop.f32.mrb[215].mxu1 }
 0x367   : > { %v6365_v3 = vadd.f32 %v11046_v18, %v10982_v4  ;;  %v11049_v5 = vadd.f32 %v11048_v34, %v11047_v51 }
 0x369   : > { %v16285_v37 = vadd.f32 %v6365_v3, %v16229_v61  ;;  %v6368_v32 = vadd.f32 %v11049_v5, %v10985_v6 }
 0x36a   : > { %v10986_v35 = vpop.f32.mrb[216].mxu0 }
 0x36b   : > { %v16288_v29 = vadd.f32 %v6368_v32, %v16232_v25  ;;  %v11050_v59 = vpop.f32.mrb[216].mxu1  ;;  %v10987_v20 = vpop.f32.mrb[217].mxu0 }
 0x36c   : > { %v10988_v54 = vadd.f32 %v10987_v20, %v10986_v35  ;;  %v11051_v10 = vpop.f32.mrb[217].mxu1  ;;  %v10989_v13 = vpop.f32.mrb[218].mxu0 }
 0x36d   : > { %v11052_v0 = vadd.f32 %v11051_v10, %v11050_v59  ;;  %v11053_v19 = vpop.f32.mrb[218].mxu1  ;;  %v10990_v52 = vpop.f32.mrb[219].mxu0 }
 0x36e   : > { %v10991_v50 = vadd.f32 %v10990_v52, %v10989_v13  ;;  %v11054_v15 = vpop.f32.mrb[219].mxu1 }
 0x36f   : > { %v6373_v9 = vadd.f32 %v11052_v0, %v10988_v54  ;;  %v11055_v55 = vadd.f32 %v11054_v15, %v11053_v19 }
 0x371   : > { %v16291_v61 = vadd.f32 %v6373_v9, %v16235_v27  ;;  %v6376_v43 = vadd.f32 %v11055_v55, %v10991_v50 }
 0x372   : > { %v10992_v49 = vpop.f32.mrb[220].mxu0 }
 0x373   : > { %v16294_v25 = vadd.f32 %v6376_v43, %v16238_v2  ;;  %v11056_v46 = vpop.f32.mrb[220].mxu1  ;;  %v10993_v12 = vpop.f32.mrb[221].mxu0 }
 0x374   : > { %v10994_v60 = vadd.f32 %v10993_v12, %v10992_v49  ;;  %v11057_v24 = vpop.f32.mrb[221].mxu1  ;;  %v10995_v14 = vpop.f32.mrb[222].mxu0 }
 0x375   : > { %v11058_v26 = vadd.f32 %v11057_v24, %v11056_v46  ;;  %v11059_v8 = vpop.f32.mrb[222].mxu1  ;;  %v10996_v56 = vpop.f32.mrb[223].mxu0 }
 0x376   : > { %v10997_v53 = vadd.f32 %v10996_v56, %v10995_v14  ;;  %v11060_v42 = vpop.f32.mrb[223].mxu1 }
 0x377   : > { %v6381_v1 = vadd.f32 %v11058_v26, %v10994_v60  ;;  %v11061_v16 = vadd.f32 %v11060_v42, %v11059_v8 }
 0x379   : > { %v16297_v27 = vadd.f32 %v6381_v1, %v16242_v39  ;;  %v6384_v48 = vadd.f32 %v11061_v16, %v10997_v53 }
 0x37a   : > { %v11078_v22 = vpop.f32.mrb[224].mxu0 }
 0x37b   : > { %v16300_v2 = vadd.f32 %v6384_v48, %v16246_v45  ;;  %v11142_v62 = vpop.f32.mrb[224].mxu1  ;;  %v11079_v41 = vpop.f32.mrb[225].mxu0 }
 0x37c   : > { %v11080_v33 = vadd.f32 %v11079_v41, %v11078_v22  ;;  %v11143_v21 = vpop.f32.mrb[225].mxu1  ;;  %v11081_v63 = vpop.f32.mrb[226].mxu0 }
 0x37d   : > { %v11144_v31 = vadd.f32 %v11143_v21, %v11142_v62  ;;  %v11145_v4 = vpop.f32.mrb[226].mxu1  ;;  %v11082_v58 = vpop.f32.mrb[227].mxu0 }
 0x37e   : > { %v11083_v40 = vadd.f32 %v11082_v58, %v11081_v63  ;;  %v11146_v18 = vpop.f32.mrb[227].mxu1 }
 0x37f   : > { %v7432_v51 = vadd.f32 %v11144_v31, %v11080_v33  ;;  %v11147_v7 = vadd.f32 %v11146_v18, %v11145_v4 }
 0x381   : > { %v16303_v39 = vadd.f32 %v7432_v51, %v16250_v17  ;;  %v7435_v6 = vadd.f32 %v11147_v7, %v11083_v40 }
 0x383   : > { %v11084_v34 = vpop.f32.mrb[228].mxu0  ;;  %v16306_v45 = vadd.f32 %v7435_v6, %v16253_v30 }
 0x384   : > { %v11148_v3 = vpop.f32.mrb[228].mxu1  ;;  %v11085_v5 = vpop.f32.mrb[229].mxu0 }
 0x385   : > { %v11086_v32 = vadd.f32 %v11085_v5, %v11084_v34  ;;  %v11149_v35 = vpop.f32.mrb[229].mxu1  ;;  %v11087_v59 = vpop.f32.mrb[230].mxu0 }
 0x386   : > { %v11150_v20 = vadd.f32 %v11149_v35, %v11148_v3  ;;  %v11151_v54 = vpop.f32.mrb[230].mxu1  ;;  %v11088_v10 = vpop.f32.mrb[231].mxu0 }
 0x387   : > { %v11089_v13 = vadd.f32 %v11088_v10, %v11087_v59  ;;  %v11152_v0 = vpop.f32.mrb[231].mxu1 }
 0x388   : > { %v7440_v19 = vadd.f32 %v11150_v20, %v11086_v32  ;;  %v11153_v52 = vadd.f32 %v11152_v0, %v11151_v54 }
 0x38a   : > { %v16309_v17 = vadd.f32 %v7440_v19, %v16258_v38  ;;  %v7443_v50 = vadd.f32 %v11153_v52, %v11089_v13 }
 0x38b   : > { %v11090_v15 = vpop.f32.mrb[232].mxu0 }
 0x38c   : > { %v16312_v30 = vadd.f32 %v7443_v50, %v16261_v28  ;;  %v11154_v9 = vpop.f32.mrb[232].mxu1  ;;  %v11091_v55 = vpop.f32.mrb[233].mxu0 }
 0x38d   : > { %v11092_v43 = vadd.f32 %v11091_v55, %v11090_v15  ;;  %v11155_v49 = vpop.f32.mrb[233].mxu1  ;;  %v11093_v46 = vpop.f32.mrb[234].mxu0 }
 0x38e   : > { %v11156_v12 = vadd.f32 %v11155_v49, %v11154_v9  ;;  %v11157_v60 = vpop.f32.mrb[234].mxu1  ;;  %v11094_v24 = vpop.f32.mrb[235].mxu0 }
 0x38f   : > { %v11095_v14 = vadd.f32 %v11094_v24, %v11093_v46  ;;  %v11158_v26 = vpop.f32.mrb[235].mxu1 }
 0x390   : > { %v7448_v8 = vadd.f32 %v11156_v12, %v11092_v43  ;;  %v11159_v56 = vadd.f32 %v11158_v26, %v11157_v60 }
 0x392   : > { %v16315_v38 = vadd.f32 %v7448_v8, %v16266_v47  ;;  %v7451_v53 = vadd.f32 %v11159_v56, %v11095_v14 }
 0x393   : > { %v11096_v42 = vpop.f32.mrb[236].mxu0 }
 0x394   : > { %v16318_v28 = vadd.f32 %v7451_v53, %v16269_v57  ;;  %v11160_v1 = vpop.f32.mrb[236].mxu1  ;;  %v11097_v16 = vpop.f32.mrb[237].mxu0 }
 0x395   : > { %v11098_v48 = vadd.f32 %v11097_v16, %v11096_v42  ;;  %v11161_v22 = vpop.f32.mrb[237].mxu1  ;;  %v11099_v62 = vpop.f32.mrb[238].mxu0 }
 0x396   : > { %v11162_v41 = vadd.f32 %v11161_v22, %v11160_v1  ;;  %v11163_v33 = vpop.f32.mrb[238].mxu1  ;;  %v11100_v21 = vpop.f32.mrb[239].mxu0 }
 0x397   : > { %v11101_v63 = vadd.f32 %v11100_v21, %v11099_v62  ;;  %v11164_v31 = vpop.f32.mrb[239].mxu1 }
 0x398   : > { %v7456_v4 = vadd.f32 %v11162_v41, %v11098_v48  ;;  %v11165_v58 = vadd.f32 %v11164_v31, %v11163_v33 }
 0x39a   : > { %v16321_v47 = vadd.f32 %v7456_v4, %v16273_v44  ;;  %v7459_v40 = vadd.f32 %v11165_v58, %v11101_v63 }
 0x39c   : > { %v16324_v57 = vadd.f32 %v7459_v40, %v16276_v23 }
 0x39d   : > { %v11102_v18 = vpop.f32.mrb[240].mxu0  ;;  %v11166_v51 = vpop.f32.mrb[240].mxu1 }
 0x39e   : > { %v11103_v7 = vpop.f32.mrb[241].mxu0  ;;  %v11167_v34 = vpop.f32.mrb[241].mxu1 }
 0x39f   : > { %v11104_v6 = vadd.f32 %v11103_v7, %v11102_v18  ;;  %v11105_v3 = vpop.f32.mrb[242].mxu0  ;;  %v11168_v5 = vadd.f32 %v11167_v34, %v11166_v51  ;;  %v11169_v32 = vpop.f32.mrb[242].mxu1 }
 0x3a0   : > { %v11106_v35 = vpop.f32.mrb[243].mxu0  ;;  %v11170_v20 = vpop.f32.mrb[243].mxu1 }
 0x3a1   : > { %v11107_v59 = vadd.f32 %v11106_v35, %v11105_v3  ;;  %v7464_v54 = vadd.f32 %v11168_v5, %v11104_v6  ;;  %v11171_v10 = vadd.f32 %v11170_v20, %v11169_v32 }
 0x3a3   : > { %v16327_v44 = vadd.f32 %v7464_v54, %v16279_v11  ;;  %v7467_v13 = vadd.f32 %v11171_v10, %v11107_v59 }
 0x3a5   : > { %v11108_v0 = vpop.f32.mrb[244].mxu0  ;;  %v16330_v23 = vadd.f32 %v7467_v13, %v16282_v36  ;;  %v11172_v19 = vpop.f32.mrb[244].mxu1 }
 0x3a6   : > { %v11109_v52 = vpop.f32.mrb[245].mxu0  ;;  %v11173_v15 = vpop.f32.mrb[245].mxu1 }
 0x3a7   : > { %v11110_v50 = vadd.f32 %v11109_v52, %v11108_v0  ;;  %v11111_v9 = vpop.f32.mrb[246].mxu0  ;;  %v11174_v55 = vadd.f32 %v11173_v15, %v11172_v19  ;;  %v11175_v43 = vpop.f32.mrb[246].mxu1 }
 0x3a8   : > { %v11112_v49 = vpop.f32.mrb[247].mxu0  ;;  %v11176_v12 = vpop.f32.mrb[247].mxu1 }
 0x3a9   : > { %v11113_v46 = vadd.f32 %v11112_v49, %v11111_v9  ;;  %v7472_v60 = vadd.f32 %v11174_v55, %v11110_v50  ;;  %v11177_v24 = vadd.f32 %v11176_v12, %v11175_v43 }
 0x3ab   : > { %v16333_v11 = vadd.f32 %v7472_v60, %v16285_v37  ;;  %v7475_v14 = vadd.f32 %v11177_v24, %v11113_v46  ;;  %v16352_v60 = vld [vmem:[%s12459_s0] ss:$0 sm:$0xff] }
 0x3ad   : > { %v11114_v26 = vpop.f32.mrb[248].mxu0  ;;  %v16336_v36 = vadd.f32 %v7475_v14, %v16288_v29  ;;  %v11178_v8 = vpop.f32.mrb[248].mxu1 }
 0x3ae   : > { %v11115_v56 = vpop.f32.mrb[249].mxu0  ;;  %v11179_v42 = vpop.f32.mrb[249].mxu1 }
 0x3af   : > { %v11116_v53 = vadd.f32 %v11115_v56, %v11114_v26  ;;  %v11117_v1 = vpop.f32.mrb[250].mxu0  ;;  %v11180_v16 = vadd.f32 %v11179_v42, %v11178_v8  ;;  %v11181_v48 = vpop.f32.mrb[250].mxu1 }
 0x3b0   : > { %v11118_v22 = vpop.f32.mrb[251].mxu0  ;;  %v11182_v41 = vpop.f32.mrb[251].mxu1 }
 0x3b1   : > { %v11119_v62 = vadd.f32 %v11118_v22, %v11117_v1  ;;  %v7480_v33 = vadd.f32 %v11180_v16, %v11116_v53  ;;  %v11183_v21 = vadd.f32 %v11182_v41, %v11181_v48 }
 0x3b3   : > { %v16339_v37 = vadd.f32 %v7480_v33, %v16291_v61  ;;  %v7483_v63 = vadd.f32 %v11183_v21, %v11119_v62 }
 0x3b5   : > { %v11120_v31 = vpop.f32.mrb[252].mxu0  ;;  %v16342_v29 = vadd.f32 %v7483_v63, %v16294_v25  ;;  %v11184_v4 = vpop.f32.mrb[252].mxu1 }
 0x3b6   : > { %v11121_v58 = vpop.f32.mrb[253].mxu0  ;;  %v11185_v18 = vpop.f32.mrb[253].mxu1 }
 0x3b7   : > { %v11122_v40 = vadd.f32 %v11121_v58, %v11120_v31  ;;  %v11123_v51 = vpop.f32.mrb[254].mxu0  ;;  %v11186_v7 = vadd.f32 %v11185_v18, %v11184_v4  ;;  %v11187_v6 = vpop.f32.mrb[254].mxu1 }
 0x3b8   : > { %v11124_v34 = vpop.f32.mrb[255].mxu0  ;;  %v11188_v5 = vpop.f32.mrb[255].mxu1 }
 0x3b9   : > { %v11125_v3 = vadd.f32 %v11124_v34, %v11123_v51  ;;  %v7488_v32 = vadd.f32 %v11186_v7, %v11122_v40  ;;  %v11189_v35 = vadd.f32 %v11188_v5, %v11187_v6 }
 0x3bb   : > { %v16345_v61 = vadd.f32 %v7488_v32, %v16297_v27  ;;  %v7491_v59 = vadd.f32 %v11189_v35, %v11125_v3 }
 0x3bd   : > { %v11206_v20 = vpop.f32.mrb[0].mxu0  ;;  %v16348_v25 = vadd.f32 %v7491_v59, %v16300_v2  ;;  %v11270_v54 = vpop.f32.mrb[0].mxu1 }
 0x3be   : > { %v11207_v10 = vpop.f32.mrb[1].mxu0  ;;  %v11271_v0 = vpop.f32.mrb[1].mxu1 }
 0x3bf   : > { %v11208_v13 = vadd.f32 %v11207_v10, %v11206_v20  ;;  %v11209_v19 = vpop.f32.mrb[2].mxu0  ;;  %v11272_v52 = vadd.f32 %v11271_v0, %v11270_v54  ;;  %v11273_v50 = vpop.f32.mrb[2].mxu1 }
 0x3c0   : > { %v11210_v15 = vpop.f32.mrb[3].mxu0  ;;  %v11274_v55 = vpop.f32.mrb[3].mxu1 }
 0x3c1   : > { %v11211_v9 = vadd.f32 %v11210_v15, %v11209_v19  ;;  %v8251_v43 = vadd.f32 %v11272_v52, %v11208_v13  ;;  %v11275_v49 = vadd.f32 %v11274_v55, %v11273_v50 }
 0x3c3   : > { %v8313_v27 = vadd.f32 %v8251_v43, %v16303_v39  ;;  %v8254_v46 = vadd.f32 %v11275_v49, %v11211_v9 }
 0x3c5   : > { %v11212_v12 = vpop.f32.mrb[4].mxu0  ;;  %8329 = vst [vmem:[#allocation2] sm:$0xff] %v8313_v27  ;;  %v8314_v2 = vadd.f32 %v8254_v46, %v16306_v45  ;;  %v11276_v24 = vpop.f32.mrb[4].mxu1  ;;  %v8352_v16 = vadd.f32 %v16352_v60, %v8313_v27 }
 0x3c6   : > { %v11213_v14 = vpop.f32.mrb[5].mxu0  ;;  %v11277_v8 = vpop.f32.mrb[5].mxu1 }
 0x3c7   : > { %v11214_v26 = vadd.f32 %v11213_v14, %v11212_v12  ;;  %v11215_v56 = vpop.f32.mrb[6].mxu0  ;;  %8330 = vst [vmem:[#allocation2 + $0x8] sm:$0xff] %v8314_v2  ;;  %v11278_v53 = vadd.f32 %v11277_v8, %v11276_v24  ;;  %v11279_v42 = vpop.f32.mrb[6].mxu1  ;;  %v8353_v39 = vadd.f32 %v16352_v60, %v8314_v2 }
 0x3c8   : > { %v11216_v1 = vpop.f32.mrb[7].mxu0  ;;  %v11280_v22 = vpop.f32.mrb[7].mxu1 }
 0x3c9   : > { %v11217_v48 = vadd.f32 %v11216_v1, %v11215_v56  ;;  %v8259_v62 = vadd.f32 %v11278_v53, %v11214_v26  ;;  %v11281_v41 = vadd.f32 %v11280_v22, %v11279_v42  ;;  %v8368_v33 = vpack.c.bf16 %v8353_v39, %v8352_v16 }
 0x3cb   : > { %v8315_v45 = vadd.f32 %v8259_v62, %v16309_v17  ;;  %v8262_v21 = vadd.f32 %v11281_v41, %v11217_v48  ;;  %11350 = vmatprep.mubr.bf16.mxu0 %v8368_v33 }
 0x3cd   : > { %v11218_v63 = vpop.f32.mrb[8].mxu0  ;;  %8331 = vst [vmem:[#allocation2 + $0x10] sm:$0xff] %v8315_v45  ;;  %v8316_v31 = vadd.f32 %v8262_v21, %v16312_v30  ;;  %v11282_v4 = vpop.f32.mrb[8].mxu1  ;;  %v8354_v7 = vadd.f32 %v16352_v60, %v8315_v45 }
 0x3ce   : > { %v11219_v58 = vpop.f32.mrb[9].mxu0  ;;  %v11283_v18 = vpop.f32.mrb[9].mxu1 }
 0x3cf   : > { %v11220_v40 = vadd.f32 %v11219_v58, %v11218_v63  ;;  %v11221_v51 = vpop.f32.mrb[10].mxu0  ;;  %8332 = vst [vmem:[#allocation2 + $0x18] sm:$0xff] %v8316_v31  ;;  %v8355_v6 = vadd.f32 %v16352_v60, %v8316_v31  ;;  %v11284_v34 = vadd.f32 %v11283_v18, %v11282_v4  ;;  %v11285_v3 = vpop.f32.mrb[10].mxu1 }
 0x3d0   : > { %v11222_v5 = vpop.f32.mrb[11].mxu0  ;;  %v11286_v32 = vpop.f32.mrb[11].mxu1 }
 0x3d1   : > { %v11223_v17 = vadd.f32 %v11222_v5, %v11221_v51  ;;  %v8369_v35 = vpack.c.bf16 %v8355_v6, %v8354_v7  ;;  %v8267_v59 = vadd.f32 %v11284_v34, %v11220_v40  ;;  %v11287_v20 = vadd.f32 %v11286_v32, %v11285_v3 }
 0x3d3   : > { %v8317_v30 = vadd.f32 %v8267_v59, %v16315_v38  ;;  %v8270_v54 = vadd.f32 %v11287_v20, %v11223_v17  ;;  %11351 = vmatmul.mubr.bf16.vlgmr.msra.gmra.mrb[32].mxu0 %v8369_v35 }
 0x3d5   : > { %v11224_v10 = vpop.f32.mrb[12].mxu0  ;;  %8333 = vst [vmem:[#allocation2 + $0x20] sm:$0xff] %v8317_v30  ;;  %v8318_v13 = vadd.f32 %v8270_v54, %v16318_v28  ;;  %v11288_v0 = vpop.f32.mrb[12].mxu1  ;;  %v8356_v49 = vadd.f32 %v16352_v60, %v8317_v30 }
 0x3d6   : > { %v11225_v19 = vpop.f32.mrb[13].mxu0  ;;  %v11289_v50 = vpop.f32.mrb[13].mxu1 }
 0x3d7   : > { %v11226_v52 = vadd.f32 %v11225_v19, %v11224_v10  ;;  %v11227_v15 = vpop.f32.mrb[14].mxu0  ;;  %8334 = vst [vmem:[#allocation2 + $0x28] sm:$0xff] %v8318_v13  ;;  %v11290_v9 = vadd.f32 %v11289_v50, %v11288_v0  ;;  %v11291_v55 = vpop.f32.mrb[14].mxu1  ;;  %v8357_v27 = vadd.f32 %v16352_v60, %v8318_v13 }
 0x3d8   : > { %v11228_v43 = vpop.f32.mrb[15].mxu0  ;;  %v11292_v46 = vpop.f32.mrb[15].mxu1 }
 0x3d9   : > { %v11229_v38 = vadd.f32 %v11228_v43, %v11227_v15  ;;  %v8275_v12 = vadd.f32 %v11290_v9, %v11226_v52  ;;  %v11293_v2 = vadd.f32 %v11292_v46, %v11291_v55  ;;  %v8370_v24 = vpack.c.bf16 %v8357_v27, %v8356_v49 }
 0x3db   : > { %v8319_v28 = vadd.f32 %v8275_v12, %v16321_v47  ;;  %v8278_v14 = vadd.f32 %v11293_v2, %v11229_v38  ;;  %11354 = vmatprep.mubr.bf16.mxu0 %v8370_v24 }
 0x3dd   : > { %v11230_v26 = vpop.f32.mrb[16].mxu0  ;;  %8335 = vst [vmem:[#allocation2 + $0x30] sm:$0xff] %v8319_v28  ;;  %v8320_v8 = vadd.f32 %v8278_v14, %v16324_v57  ;;  %v11294_v56 = vpop.f32.mrb[16].mxu1  ;;  %v8358_v39 = vadd.f32 %v16352_v60, %v8319_v28 }
 0x3de   : > { %v11231_v53 = vpop.f32.mrb[17].mxu0  ;;  %v11295_v1 = vpop.f32.mrb[17].mxu1 }
 0x3df   : > { %v11232_v42 = vadd.f32 %v11231_v53, %v11230_v26  ;;  %v11233_v16 = vpop.f32.mrb[18].mxu0  ;;  %8336 = vst [vmem:[#allocation2 + $0x38] sm:$0xff] %v8320_v8  ;;  %v8359_v48 = vadd.f32 %v16352_v60, %v8320_v8  ;;  %v11296_v22 = vadd.f32 %v11295_v1, %v11294_v56  ;;  %v11297_v62 = vpop.f32.mrb[18].mxu1 }
 0x3e0   : > { %v11234_v41 = vpop.f32.mrb[19].mxu0  ;;  %v11298_v33 = vpop.f32.mrb[19].mxu1 }
 0x3e1   : > { %v11235_v47 = vadd.f32 %v11234_v41, %v11233_v16  ;;  %v8371_v45 = vpack.c.bf16 %v8359_v48, %v8358_v39  ;;  %v8283_v21 = vadd.f32 %v11296_v22, %v11232_v42  ;;  %v11299_v63 = vadd.f32 %v11298_v33, %v11297_v62 }
 0x3e3   : > { %v8321_v57 = vadd.f32 %v8283_v21, %v16327_v44  ;;  %v8286_v31 = vadd.f32 %v11299_v63, %v11235_v47  ;;  %11355 = vmatmul.mubr.bf16.gmra.mrb[36].mxu0 %v8371_v45 }
 0x3e5   : > { %v11236_v4 = vpop.f32.mrb[20].mxu0  ;;  %8337 = vst [vmem:[#allocation2 + $0x40] sm:$0xff] %v8321_v57  ;;  %v8322_v58 = vadd.f32 %v8286_v31, %v16330_v23  ;;  %v11300_v40 = vpop.f32.mrb[20].mxu1  ;;  %v8360_v17 = vadd.f32 %v16352_v60, %v8321_v57 }
 0x3e6   : > { %v11237_v18 = vpop.f32.mrb[21].mxu0  ;;  %v11301_v7 = vpop.f32.mrb[21].mxu1 }
 0x3e7   : > { %v11238_v51 = vadd.f32 %v11237_v18, %v11236_v4  ;;  %v11239_v6 = vpop.f32.mrb[22].mxu0  ;;  %8338 = vst [vmem:[#allocation2 + $0x48] sm:$0xff] %v8322_v58  ;;  %v11302_v34 = vadd.f32 %v11301_v7, %v11300_v40  ;;  %v11303_v3 = vpop.f32.mrb[22].mxu1  ;;  %v8361_v32 = vadd.f32 %v16352_v60, %v8322_v58 }
 0x3e8   : > { %v11240_v5 = vpop.f32.mrb[23].mxu0  ;;  %v11304_v35 = vpop.f32.mrb[23].mxu1 }
 0x3e9   : > { %v11241_v44 = vadd.f32 %v11240_v5, %v11239_v6  ;;  %v8291_v59 = vadd.f32 %v11302_v34, %v11238_v51  ;;  %v11305_v20 = vadd.f32 %v11304_v35, %v11303_v3  ;;  %v8372_v30 = vpack.c.bf16 %v8361_v32, %v8360_v17 }
 0x3eb   : > { %v8323_v23 = vadd.f32 %v8291_v59, %v16333_v11  ;;  %v8294_v54 = vadd.f32 %v11305_v20, %v11241_v44  ;;  %11358 = vmatprep.mubr.bf16.mxu1 %v8372_v30 }
 0x3ed   : > { %v11242_v10 = vpop.f32.mrb[24].mxu0  ;;  %8339 = vst [vmem:[#allocation2 + $0x50] sm:$0xff] %v8323_v23  ;;  %v8324_v13 = vadd.f32 %v8294_v54, %v16336_v36  ;;  %v11306_v0 = vpop.f32.mrb[24].mxu1  ;;  %v8362_v9 = vadd.f32 %v16352_v60, %v8323_v23 }
 0x3ee   : > { %v11243_v19 = vpop.f32.mrb[25].mxu0  ;;  %v11307_v50 = vpop.f32.mrb[25].mxu1 }
 0x3ef   : > { %v11244_v52 = vadd.f32 %v11243_v19, %v11242_v10  ;;  %v11245_v15 = vpop.f32.mrb[26].mxu0  ;;  %8340 = vst [vmem:[#allocation2 + $0x58] sm:$0xff] %v8324_v13  ;;  %v8363_v55 = vadd.f32 %v16352_v60, %v8324_v13  ;;  %v11308_v43 = vadd.f32 %v11307_v50, %v11306_v0  ;;  %v11309_v49 = vpop.f32.mrb[26].mxu1 }
 0x3f0   : > { %v11246_v27 = vpop.f32.mrb[27].mxu0  ;;  %v11310_v38 = vpop.f32.mrb[27].mxu1 }
 0x3f1   : > { %v11247_v11 = vadd.f32 %v11246_v27, %v11245_v15  ;;  %v8373_v46 = vpack.c.bf16 %v8363_v55, %v8362_v9  ;;  %v8299_v12 = vadd.f32 %v11308_v43, %v11244_v52  ;;  %v11311_v2 = vadd.f32 %v11310_v38, %v11309_v49 }
 0x3f3   : > { %v8325_v36 = vadd.f32 %v8299_v12, %v16339_v37  ;;  %v8302_v24 = vadd.f32 %v11311_v2, %v11247_v11  ;;  %11359 = vmatmul.mubr.bf16.vlgmr.msra.gmra.mrb[32].mxu1 %v8373_v46 }
 0x3f5   : > { %v11248_v28 = vpop.f32.mrb[28].mxu0  ;;  %8341 = vst [vmem:[#allocation2 + $0x60] sm:$0xff] %v8325_v36  ;;  %v8326_v14 = vadd.f32 %v8302_v24, %v16342_v29  ;;  %v11312_v26 = vpop.f32.mrb[28].mxu1  ;;  %v8364_v48 = vadd.f32 %v16352_v60, %v8325_v36 }
 0x3f6   : > { %v11249_v8 = vpop.f32.mrb[29].mxu0  ;;  %v11313_v53 = vpop.f32.mrb[29].mxu1 }
 0x3f7   : > { %v11250_v56 = vadd.f32 %v11249_v8, %v11248_v28  ;;  %v11251_v42 = vpop.f32.mrb[30].mxu0  ;;  %8342 = vst [vmem:[#allocation2 + $0x68] sm:$0xff] %v8326_v14  ;;  %v11314_v1 = vadd.f32 %v11313_v53, %v11312_v26  ;;  %v11315_v16 = vpop.f32.mrb[30].mxu1  ;;  %v8365_v22 = vadd.f32 %v16352_v60, %v8326_v14 }
 0x3f8   : > { %v11252_v39 = vpop.f32.mrb[31].mxu0  ;;  %v11316_v62 = vpop.f32.mrb[31].mxu1 }
 0x3f9   : > { %v11253_v37 = vadd.f32 %v11252_v39, %v11251_v42  ;;  %v8307_v41 = vadd.f32 %v11314_v1, %v11250_v56  ;;  %v11317_v47 = vadd.f32 %v11316_v62, %v11315_v16  ;;  %v8374_v29 = vpack.c.bf16 %v8365_v22, %v8364_v48 }
 0x3fb   : > { %v8327_v33 = vadd.f32 %v8307_v41, %v16345_v61  ;;  %v8310_v45 = vadd.f32 %v11317_v47, %v11253_v37  ;;  %11362 = vmatprep.mubr.bf16.mxu1 %v8374_v29 }
 0x3fd   : > { %8343 = vst [vmem:[#allocation2 + $0x70] sm:$0xff] %v8327_v33  ;;  %v8328_v21 = vadd.f32 %v8310_v45, %v16348_v25  ;;  %v8366_v63 = vadd.f32 %v16352_v60, %v8327_v33 }
 0x3ff   : > { %8344 = vst [vmem:[#allocation2 + $0x78] sm:$0xff] %v8328_v21  ;;  %v8367_v57 = vadd.f32 %v16352_v60, %v8328_v21 }
 0x401   : > { %v8375_v31 = vpack.c.bf16 %v8367_v57, %v8366_v63 }
 0x403   : > { %11363 = vmatmul.mubr.bf16.gmra.mrb[36].mxu1 %v8375_v31 }
 0x4a6   : > { %v11352_v4 = vpop.f32.mrb[32].mxu0 }
 0x4a7   : > { %8539 = vst [vmem:[%s12470_s15 + $0x10] sm:$0xff] %v11352_v4  ;;  %v8474_v61 = vpop.f32.mrb[33].mxu0 }
 0x4a8   : > { %8537 = vst [vmem:[%s12470_s15] sm:$0xff] %v8474_v61  ;;  %v11353_v58 = vpop.f32.mrb[34].mxu0 }
 0x4a9   : > { %8540 = vst [vmem:[%s12470_s15 + $0x18] sm:$0xff] %v11353_v58  ;;  %v8477_v25 = vpop.f32.mrb[35].mxu0 }
 0x4aa   : > { %8538 = vst [vmem:[%s12470_s15 + $0x8] sm:$0xff] %v8477_v25 }
 0x4b6   : > { %v11356_v40 = vpop.f32.mrb[36].mxu0 }
 0x4b7   : > { %8543 = vst [vmem:[%s12470_s15 + $0x30] sm:$0xff] %v11356_v40  ;;  %v8490_v60 = vpop.f32.mrb[37].mxu0 }
 0x4b8   : > { %8541 = vst [vmem:[%s12470_s15 + $0x20] sm:$0xff] %v8490_v60  ;;  %v11357_v18 = vpop.f32.mrb[38].mxu0 }
 0x4b9   : > { %8544 = vst [vmem:[%s12470_s15 + $0x38] sm:$0xff] %v11357_v18  ;;  %v8493_v51 = vpop.f32.mrb[39].mxu0 }
 0x4ba   : > { %8542 = vst [vmem:[%s12470_s15 + $0x28] sm:$0xff] %v8493_v51 }
 0x4c6   : > { %v11360_v7 = vpop.f32.mrb[32].mxu1 }
 0x4c7   : > { %8547 = vst [vmem:[%s12470_s15 + $0x50] sm:$0xff] %v11360_v7  ;;  %v8506_v6 = vpop.f32.mrb[33].mxu1 }
 0x4c8   : > { %8545 = vst [vmem:[%s12470_s15 + $0x40] sm:$0xff] %v8506_v6  ;;  %v11361_v34 = vpop.f32.mrb[34].mxu1 }
 0x4c9   : > { %8548 = vst [vmem:[%s12470_s15 + $0x58] sm:$0xff] %v11361_v34  ;;  %v8509_v3 = vpop.f32.mrb[35].mxu1 }
 0x4ca   : > { %8546 = vst [vmem:[%s12470_s15 + $0x48] sm:$0xff] %v8509_v3 }
 0x4d6   : > { %v11364_v5 = vpop.f32.mrb[36].mxu1 }
 0x4d7   : > { %8551 = vst [vmem:[%s12470_s15 + $0x70] sm:$0xff] %v11364_v5  ;;  %v8522_v17 = vpop.f32.mrb[37].mxu1 }
 0x4d8   : > { %8549 = vst [vmem:[%s12470_s15 + $0x60] sm:$0xff] %v8522_v17  ;;  %v11365_v32 = vpop.f32.mrb[38].mxu1 }
 0x4d9   : > { %8552 = vst [vmem:[%s12470_s15 + $0x78] sm:$0xff] %v11365_v32  ;;  %v8525_v44 = vpop.f32.mrb[39].mxu1 }
 0x4da   : > { %8550 = vst [vmem:[%s12470_s15 + $0x68] sm:$0xff] %v8525_v44 }
 0x4db PF: > { %s20_s27 = sadd.s32 1, %s12022_s27   ;;  %s16714_s24 = sld [smem:[#allocation21_spill]] }
 0x4dc   : > { %p16402_p4 = scmp.ge.s32.totalorder %s20_s27, 10   ;;  %s16715_s6 = sld [smem:[#allocation14_spill]] }
 0x4dd   : > { %s16716_s20 = sld [smem:[#allocation20_spill]]  ;;  %s16717_s21 = sld [smem:[#allocation15_spill]] }
 0x4de   : > { %s16718_s22 = sld [smem:[#allocation19_spill]]  ;;  %s16719_s7 = sld [smem:[#allocation16_spill]] }
 0x4df   : > { %s16720_s25 = sld [smem:[#allocation17_spill]]  ;;  %s16721_s11 = sld [smem:[#allocation18_spill]] }
 0x4e0   : > { %s16723_s15 = smov %s11978_s16  ;;  %s16724_s16 = smov %s11982_s17 }
 0x4e1   : > { %s16725_s17 = smov %s16714_s24  ;;  %s16726_s18 = smov %s11990_s19 }
 0x4e2   : > { %s16727_s19 = smov %s16715_s6  ;;  %s16729_s24 = smov %s12018_s26 }
 0x4e3   :  { %19 = sbr.rel (!%p16402_p4) target bundleno = 13 (0xd), region = 150 }
 0x4e4   : > { %s16728_s23 = smov %s16719_s7 }
 0x4e5   : > { %s16730_s26 = smov %s16721_s11 }
 0x4ea   :  { %8574 = vsyncpa [#allocation5], 1 }
 0x4eb   :  { %8576 = vsyncpa [#allocation5 + $0x1], 1 }
 0x4ec   :  { %8577 = vsyncpa [#allocation7], 1 }
 0x4ed   :  { %8579 = vsyncpa [#allocation7 + $0x1], 1 }

</bundles_post_ra>
